<compile_context>
chip_gen: v7x
topology: tpu7x:2x2x1
jax: 0.10.0
libtpu: 0.0.40
codegen_flags: <defaults>
</compile_context>

<pallas_src>
import math
import functools

import jax
import jax.numpy as jnp
from jax.experimental import pallas as pl
from jax.experimental.pallas import tpu as pltpu


# ---------------------------------------------------------------------------
# Fused Pallas kernel: one grid step == TB batch elements, all in VMEM
# ---------------------------------------------------------------------------

def _stn_fused_kernel(x_ref,                              # (TB, R, D) f32
                      a_blk_ref,                          # (TR, TR) bf16 block-diag adjacency
                      mask_ref,                           # (TR, TR) f32 additive attention mask
                      cbias_ref,                          # (TR, D)  f32 hoisted conv bias slab
                      wx_ref,                             # (D, D)   bf16
                      gw1_ref, gb1_ref, gw2_ref, gb2_ref,     # GCN
                      wqkv_ref, bqkv_ref, wo_ref, bo_ref,     # attention
                      fw1_ref, fb1_ref, fw2_ref, fb2_ref,     # feed-forward
                      lng_ref, lnb_ref,                       # LayerNorm
                      fsw_ref, fgw_ref, fsgb_ref,             # gate
                      o_ref,                              # (TB, R, D)
                      *, n_heads, d_k, d_v, eps=1e-5):
    f32 = jnp.float32
    bf16 = jnp.bfloat16
    TB, R, D = x_ref.shape
    TR = TB * R

    x = x_ref[...].reshape(TR, D)
    a_blk = a_blk_ref[...]                # bf16, reused by both GCN mixes
    mask_bias = mask_ref[...]             # f32, loaded once, reused by every head

    # ---- 1x1 conv over cat([x, D_S, D_T]): only the x-part is data-dependent;
    #      the D_S/D_T/b contributions were hoisted to the wrapper.
    h = (jnp.dot(x.astype(bf16), wx_ref[...], preferred_element_type=f32)
         + cbias_ref[...])                                                   # (TR, D)
    h16 = h.astype(bf16)

    # ---- GCN branch: A @ relu(A @ X @ W1 + b1) @ W2 + b2, A block-diagonal ----
    # TODO(synk): GCN submodule definition not provided; standard 2-layer
    # graph convolution (d_model -> 4*d_model -> d_model) assumed.
    xw1 = jnp.dot(h16, gw1_ref[...], preferred_element_type=f32)             # (TR, H)
    axw1 = jnp.dot(a_blk, xw1.astype(bf16), preferred_element_type=f32)
    t1 = jnp.maximum(axw1 + gb1_ref[...], 0.0)
    at1 = jnp.dot(a_blk, t1.astype(bf16), preferred_element_type=f32)
    xg = (jnp.dot(at1.astype(bf16), gw2_ref[...], preferred_element_type=f32)
          + gb2_ref[...])                                                    # (TR, D)

    # ---- Graph multi-head attention (fused per-head-contiguous QKV) ----------
    # TODO(synk): GraphMultiHeadAttention definition not provided;
    # adjacency-masked scaled-dot-product multi-head attention assumed.
    qkv = (jnp.dot(h16, wqkv_ref[...], preferred_element_type=f32)
           + bqkv_ref[...])                                                  # (TR, nh*(2dk+dv))
    wo = wo_ref[...]                                                         # (Hv, D) bf16
    per_head = 2 * d_k + d_v
    y = jnp.zeros((TR, D), f32)
    for hh in range(n_heads):                       # n_heads is small; unrolled
        off = hh * per_head
        q = qkv[:, off:off + d_k].astype(bf16)              # scale folded into Wq
        k = qkv[:, off + d_k:off + 2 * d_k].astype(bf16)
        v = qkv[:, off + 2 * d_k:off + 2 * d_k + d_v].astype(bf16)
        s = jnp.dot(q, k.T, preferred_element_type=f32) + mask_bias          # (TR, TR)
        s = s - jnp.max(s, axis=-1, keepdims=True)
        p = jnp.exp(s)
        # NOTE: approx reciprocal (EUP slot); fully-masked rows (no adj>0)
        # would give uniform weights rather than zeros — not hit by this adj.
        p = p * pl.reciprocal(jnp.sum(p, axis=-1, keepdims=True), approx=True)
        ctx = jnp.dot(p.astype(bf16), v, preferred_element_type=f32)         # (TR, d_v)
        # accumulate output projection per head (== concat(heads) @ Wo)
        y = y + jnp.dot(ctx.astype(bf16), wo[hh * d_v:(hh + 1) * d_v, :],
                        preferred_element_type=f32)
    y = y + bo_ref[...]                                                      # (TR, D)

    # ---- feed-forward + residual + LayerNorm (f32) ---------------------------
    ff = jnp.maximum(jnp.dot(y.astype(bf16), fw1_ref[...],
                             preferred_element_type=f32) + fb1_ref[...], 0.0)
    ff = (jnp.dot(ff.astype(bf16), fw2_ref[...], preferred_element_type=f32)
          + fb2_ref[...])
    vres = ff + y
    mu = jnp.mean(vres, axis=-1, keepdims=True)
    var = jnp.mean((vres - mu) ** 2, axis=-1, keepdims=True)
    y_ln = (vres - mu) * jax.lax.rsqrt(var + eps) * lng_ref[...] + lnb_ref[...]

    # ---- gated fusion: VPU multiply + lane reduction (no width-1 matmul) -----
    gs = jnp.sum(y_ln * fsw_ref[...], axis=-1, keepdims=True)
    gg = jnp.sum(xg * fgw_ref[...], axis=-1, keepdims=True)
    g = jax.nn.sigmoid(gs + gg + fsgb_ref[...])
    out = g * y_ln + (1.0 - g) * xg
    o_ref[...] = out.reshape(TB, R, D).astype(o_ref.dtype)


# ---------------------------------------------------------------------------
# Forward pass wrapper
# ---------------------------------------------------------------------------

def _default_grid_steps(batch):
    """v7x has 2 TensorCores/chip -> keep 2 parallel grid steps; v5e/v6e have a
    single TC -> fold the whole batch into one step (per-step overhead ~0.35us
    rivals this kernel's compute)."""
    try:
        kind = jax.devices()[0].device_kind.lower()
    except Exception:
        kind = ""
    if ("v7" in kind or "tpu7" in kind) and batch >= 2 and batch % 2 == 0:
        return 2
    return 1


@functools.partial(jax.jit,
                   static_argnames=("n_heads", "d_k", "d_v", "grid_steps"))
def _stn_forward_impl(x, adj, params, *, n_heads, d_k, d_v, grid_steps):
    B, M, N, D = x.shape
    R = M * N
    assert B % grid_steps == 0
    TB = B // grid_steps
    TR = TB * R
    H = params["gcn_w1"].shape[1]
    Hv = n_heads * d_v
    QKV = n_heads * (2 * d_k + d_v)
    f32, bf16 = jnp.float32, jnp.bfloat16

    # ---- batch/grid-invariant prep hoisted out of the kernel (runs once) -----
    conv_w = params["conv_w"]                               # (D + N + M, D)
    wx, wds, wdt = conv_w[:D], conv_w[D:D + N], conv_w[D + N:]
    cbias = (jnp.dot(params["D_S"].astype(f32), wds)[None, :, :]
             + jnp.dot(params["D_T"].astype(f32), wdt)[:, None, :]
             + params["conv_b"][None, None, :]).reshape(R, D)
    cbias = jnp.tile(cbias, (TB, 1))                        # (TR, D)

    # block-diagonal adjacency over the TB*M node groups handled per grid step
    adj_f = adj.astype(f32)
    a_blk = jnp.kron(jnp.eye(TB * M, dtype=f32), adj_f)     # (TR, TR)
    mask_bias = jnp.where(a_blk > 0, 0.0, -1e9).astype(f32)

    # fused per-head-contiguous QKV projection; fold 1/sqrt(d_k) into Wq/bq
    scale = 1.0 / math.sqrt(d_k)
    wq, bq = params["wq"] * scale, params["bq"] * scale
    wk, bk = params["wk"], params["bk"]
    wv, bv = params["wv"], params["bv"]
    w_cols, b_cols = [], []
    for hh in range(n_heads):
        w_cols += [wq[:, hh * d_k:(hh + 1) * d_k],
                   wk[:, hh * d_k:(hh + 1) * d_k],
                   wv[:, hh * d_v:(hh + 1) * d_v]]
        b_cols += [bq[hh * d_k:(hh + 1) * d_k],
                   bk[hh * d_k:(hh + 1) * d_k],
                   bv[hh * d_v:(hh + 1) * d_v]]
    wqkv = jnp.concatenate(w_cols, axis=1)                  # (D, QKV)
    bqkv = jnp.concatenate(b_cols, axis=0)                  # (QKV,)

    x_flat = x.reshape(B, R, D)

    def rep(shape):
        return pl.BlockSpec(shape, lambda g, _nd=len(shape): (0,) * _nd)

    kernel = functools.partial(_stn_fused_kernel,
                               n_heads=n_heads, d_k=d_k, d_v=d_v)

    out = pl.pallas_call(
        kernel,
        out_shape=jax.ShapeDtypeStruct((B, R, D), x.dtype),
        grid=(grid_steps,),
        in_specs=[
            pl.BlockSpec((TB, R, D), lambda g: (g, 0, 0)),        # x (TB / step)
            rep((TR, TR)), rep((TR, TR)), rep((TR, D)),           # A_blk, mask, conv bias
            rep((D, D)),                                          # Wx
            rep((D, H)), rep((1, H)), rep((H, D)), rep((1, D)),       # GCN
            rep((D, QKV)), rep((1, QKV)), rep((Hv, D)), rep((1, D)),  # attention
            rep((D, H)), rep((1, H)), rep((H, D)), rep((1, D)),       # FFN
            rep((1, D)), rep((1, D)),                                 # LayerNorm
            rep((1, D)), rep((1, D)), rep((1, 1)),                    # gate
        ],
        out_specs=pl.BlockSpec((TB, R, D), lambda g: (g, 0, 0)),
        compiler_params=pltpu.CompilerParams(
            dimension_semantics=("parallel",)),
    )(x_flat,
      a_blk.astype(bf16), mask_bias, cbias,
      wx.astype(bf16),
      params["gcn_w1"].astype(bf16), params["gcn_b1"].reshape(1, H),
      params["gcn_w2"].astype(bf16), params["gcn_b2"].reshape(1, D),
      wqkv.astype(bf16), bqkv.reshape(1, QKV),
      params["wo"].astype(bf16), params["bo"].reshape(1, D),
      params["ff_w1"].astype(bf16), params["ff_b1"].reshape(1, H),
      params["ff_w2"].astype(bf16), params["ff_b2"].reshape(1, D),
      params["ln_g"].reshape(1, D), params["ln_b"].reshape(1, D),
      params["fs_w"].reshape(1, D), params["fg_w"].reshape(1, D),
      (params["fs_b"] + params["fg_b"]).reshape(1, 1))

    return out.reshape(B, M, N, D)


def spatial_transformer_forward(x, adj, params, *, n_heads, d_k, d_v,
                                grid_steps=None):
    if grid_steps is None:
        grid_steps = _default_grid_steps(x.shape[0])
    return _stn_forward_impl(x, adj, params, n_heads=n_heads, d_k=d_k,
                             d_v=d_v, grid_steps=grid_steps)


# ---------------------------------------------------------------------------
# Deterministic parameter construction + demo
# ---------------------------------------------------------------------------

def make_params(key, *, d_model, len_his, n_nodes, n_heads, d_k, d_v, adj):
    D, M, N = d_model, len_his, n_nodes
    C_in = M + N + D
    H = 4 * D
    ks = jax.random.split(key, 16)

    def init(k, shape, fan_in):
        return jax.random.normal(k, shape, jnp.float32) / math.sqrt(fan_in)

    return {
        "D_S": adj.astype(jnp.float32),                # nn.Parameter(adj)
        "D_T": jnp.eye(M, dtype=jnp.float32),          # nn.Parameter(eye)
        "conv_w": init(ks[0], (C_in, D), C_in),
        "conv_b": jnp.zeros((D,), jnp.float32),
        "gcn_w1": init(ks[1], (D, H), D),
        "gcn_b1": jnp.zeros((H,), jnp.float32),
        "gcn_w2": init(ks[2], (H, D), H),
        "gcn_b2": jnp.zeros((D,), jnp.float32),
        "wq": init(ks[3], (D, n_heads * d_k), D),
        "bq": jnp.zeros((n_heads * d_k,), jnp.float32),
        "wk": init(ks[4], (D, n_heads * d_k), D),
        "bk": jnp.zeros((n_heads * d_k,), jnp.float32),
        "wv": init(ks[5], (D, n_heads * d_v), D),
        "bv": jnp.zeros((n_heads * d_v,), jnp.float32),
        "wo": init(ks[6], (n_heads * d_v, D), n_heads * d_v),
        "bo": jnp.zeros((D,), jnp.float32),
        "ff_w1": init(ks[7], (D, H), D),
        "ff_b1": jnp.zeros((H,), jnp.float32),
        "ff_w2": init(ks[8], (H, D), H),
        "ff_b2": jnp.zeros((D,), jnp.float32),
        "fs_w": init(ks[9], (D, 1), D),
        "fs_b": jnp.zeros((1,), jnp.float32),
        "fg_w": init(ks[10], (D, 1), D),
        "fg_b": jnp.zeros((1,), jnp.float32),
        "ln_g": jnp.ones((D,), jnp.float32),
        "ln_b": jnp.zeros((D,), jnp.float32),
    }


if __name__ == "__main__":
    B, M, N, D = 2, 8, 16, 32          # batch, len_his, n_nodes, d_model
    n_heads, d_k, d_v = 2, 16, 16

    key = jax.random.PRNGKey(0)
    kx, ka, kp = jax.random.split(key, 3)

    # deterministic dense row-normalized adjacency
    a = jnp.abs(jax.random.normal(ka, (N, N), jnp.float32)) + 0.1
    adj = a / jnp.sum(a, axis=-1, keepdims=True)

    x = jax.random.normal(kx, (B, M, N, D), jnp.float32)
    params = make_params(kp, d_model=D, len_his=M, n_nodes=N,
                         n_heads=n_heads, d_k=d_k, d_v=d_v, adj=adj)

    out = spatial_transformer_forward(x, adj, params,
                                      n_heads=n_heads, d_k=d_k, d_v=d_v)
    out = jax.block_until_ready(out)
    assert out.shape == (B, M, N, D) and bool(jnp.all(jnp.isfinite(out)))
    print("KERNEL_OK")
</pallas_src>

<mosaic_0001>
module attributes {stable_mosaic.version = 11 : i64} {
  func.func @_stn_fused_kernel(%arg0: i32, %arg1: memref<2x128x32xf32, #tpu.memory_space<vmem>>, %arg2: memref<256x256xbf16, #tpu.memory_space<vmem>>, %arg3: memref<256x256xf32, #tpu.memory_space<vmem>>, %arg4: memref<256x32xf32, #tpu.memory_space<vmem>>, %arg5: memref<32x32xbf16, #tpu.memory_space<vmem>>, %arg6: memref<32x128xbf16, #tpu.memory_space<vmem>>, %arg7: memref<1x128xf32, #tpu.memory_space<vmem>>, %arg8: memref<128x32xbf16, #tpu.memory_space<vmem>>, %arg9: memref<1x32xf32, #tpu.memory_space<vmem>>, %arg10: memref<32x96xbf16, #tpu.memory_space<vmem>>, %arg11: memref<1x96xf32, #tpu.memory_space<vmem>>, %arg12: memref<32x32xbf16, #tpu.memory_space<vmem>>, %arg13: memref<1x32xf32, #tpu.memory_space<vmem>>, %arg14: memref<32x128xbf16, #tpu.memory_space<vmem>>, %arg15: memref<1x128xf32, #tpu.memory_space<vmem>>, %arg16: memref<128x32xbf16, #tpu.memory_space<vmem>>, %arg17: memref<1x32xf32, #tpu.memory_space<vmem>>, %arg18: memref<1x32xf32, #tpu.memory_space<vmem>>, %arg19: memref<1x32xf32, #tpu.memory_space<vmem>>, %arg20: memref<1x32xf32, #tpu.memory_space<vmem>>, %arg21: memref<1x32xf32, #tpu.memory_space<vmem>>, %arg22: memref<1x1xf32, #tpu.memory_space<vmem>>, %arg23: memref<2x128x32xf32, #tpu.memory_space<vmem>>) attributes {dimension_semantics = [#tpu.dimension_semantics<parallel>], iteration_bounds = array<i64: 1>, scalar_prefetch = 0 : i64, scratch_operands = 0 : i64, tpu.core_type = #tpu.core_type<tc>, window_params = [{transform_indices = @transform_0, window_bounds = array<i64: 2, 128, 32>}, {pipeline_mode = #tpu.pipeline_mode<synchronous>, transform_indices = @transform_1, window_bounds = array<i64: 256, 256>}, {pipeline_mode = #tpu.pipeline_mode<synchronous>, transform_indices = @transform_2, window_bounds = array<i64: 256, 256>}, {pipeline_mode = #tpu.pipeline_mode<synchronous>, transform_indices = @transform_3, window_bounds = array<i64: 256, 32>}, {pipeline_mode = #tpu.pipeline_mode<synchronous>, transform_indices = @transform_4, window_bounds = array<i64: 32, 32>}, {pipeline_mode = #tpu.pipeline_mode<synchronous>, transform_indices = @transform_5, window_bounds = array<i64: 32, 128>}, {pipeline_mode = #tpu.pipeline_mode<synchronous>, transform_indices = @transform_6, window_bounds = array<i64: 1, 128>}, {pipeline_mode = #tpu.pipeline_mode<synchronous>, transform_indices = @transform_7, window_bounds = array<i64: 128, 32>}, {pipeline_mode = #tpu.pipeline_mode<synchronous>, transform_indices = @transform_8, window_bounds = array<i64: 1, 32>}, {pipeline_mode = #tpu.pipeline_mode<synchronous>, transform_indices = @transform_9, window_bounds = array<i64: 32, 96>}, {pipeline_mode = #tpu.pipeline_mode<synchronous>, transform_indices = @transform_10, window_bounds = array<i64: 1, 96>}, {pipeline_mode = #tpu.pipeline_mode<synchronous>, transform_indices = @transform_11, window_bounds = array<i64: 32, 32>}, {pipeline_mode = #tpu.pipeline_mode<synchronous>, transform_indices = @transform_12, window_bounds = array<i64: 1, 32>}, {pipeline_mode = #tpu.pipeline_mode<synchronous>, transform_indices = @transform_13, window_bounds = array<i64: 32, 128>}, {pipeline_mode = #tpu.pipeline_mode<synchronous>, transform_indices = @transform_14, window_bounds = array<i64: 1, 128>}, {pipeline_mode = #tpu.pipeline_mode<synchronous>, transform_indices = @transform_15, window_bounds = array<i64: 128, 32>}, {pipeline_mode = #tpu.pipeline_mode<synchronous>, transform_indices = @transform_16, window_bounds = array<i64: 1, 32>}, {pipeline_mode = #tpu.pipeline_mode<synchronous>, transform_indices = @transform_17, window_bounds = array<i64: 1, 32>}, {pipeline_mode = #tpu.pipeline_mode<synchronous>, transform_indices = @transform_18, window_bounds = array<i64: 1, 32>}, {pipeline_mode = #tpu.pipeline_mode<synchronous>, transform_indices = @transform_19, window_bounds = array<i64: 1, 32>}, {pipeline_mode = #tpu.pipeline_mode<synchronous>, transform_indices = @transform_20, window_bounds = array<i64: 1, 32>}, {pipeline_mode = #tpu.pipeline_mode<synchronous>, transform_indices = @transform_21, window_bounds = array<i64: 1, 1>}, {transform_indices = @transform_22, window_bounds = array<i64: 2, 128, 32>}]} {
    %c0 = arith.constant 0 : index
    %c0_0 = arith.constant 0 : index
    %c0_1 = arith.constant 0 : index
    %0 = vector.load %arg1[%c0, %c0_0, %c0_1] : memref<2x128x32xf32, #tpu.memory_space<vmem>>, vector<2x128x32xf32>
    %1 = vector.shape_cast %0 : vector<2x128x32xf32> to vector<256x32xf32>
    %c0_2 = arith.constant 0 : index
    %c0_3 = arith.constant 0 : index
    %2 = vector.load %arg2[%c0_2, %c0_3] : memref<256x256xbf16, #tpu.memory_space<vmem>>, vector<256x256xbf16>
    %c0_4 = arith.constant 0 : index
    %c0_5 = arith.constant 0 : index
    %3 = vector.load %arg3[%c0_4, %c0_5] : memref<256x256xf32, #tpu.memory_space<vmem>>, vector<256x256xf32>
    %4 = arith.truncf %1 : vector<256x32xf32> to vector<256x32xbf16>
    %c0_6 = arith.constant 0 : index
    %c0_7 = arith.constant 0 : index
    %5 = vector.load %arg5[%c0_6, %c0_7] : memref<32x32xbf16, #tpu.memory_space<vmem>>, vector<32x32xbf16>
    %cst = arith.constant dense<0.000000e+00> : vector<256x32xf32>
    %6 = tpu.matmul %4, %5, %cst {dimension_numbers = #tpu.dot_dimension_numbers<[1], [0], [0], [1], [0, 0, 1, 1], [], []>} : vector<256x32xbf16>, vector<32x32xbf16>, vector<256x32xf32> -> vector<256x32xf32>
    %c0_8 = arith.constant 0 : index
    %c0_9 = arith.constant 0 : index
    %7 = vector.load %arg4[%c0_8, %c0_9] : memref<256x32xf32, #tpu.memory_space<vmem>>, vector<256x32xf32>
    %8 = arith.addf %6, %7 : vector<256x32xf32>
    %9 = arith.truncf %8 : vector<256x32xf32> to vector<256x32xbf16>
    %c0_10 = arith.constant 0 : index
    %c0_11 = arith.constant 0 : index
    %10 = vector.load %arg6[%c0_10, %c0_11] : memref<32x128xbf16, #tpu.memory_space<vmem>>, vector<32x128xbf16>
    %cst_12 = arith.constant dense<0.000000e+00> : vector<256x128xf32>
    %11 = tpu.matmul %9, %10, %cst_12 {dimension_numbers = #tpu.dot_dimension_numbers<[1], [0], [0], [1], [0, 0, 1, 1], [], []>} : vector<256x32xbf16>, vector<32x128xbf16>, vector<256x128xf32> -> vector<256x128xf32>
    %12 = arith.truncf %11 : vector<256x128xf32> to vector<256x128xbf16>
    %cst_13 = arith.constant dense<0.000000e+00> : vector<256x128xf32>
    %13 = tpu.matmul %2, %12, %cst_13 {dimension_numbers = #tpu.dot_dimension_numbers<[1], [0], [0], [1], [0, 0, 1, 1], [], []>} : vector<256x256xbf16>, vector<256x128xbf16>, vector<256x128xf32> -> vector<256x128xf32>
    %c0_14 = arith.constant 0 : index
    %c0_15 = arith.constant 0 : index
    %14 = vector.load %arg7[%c0_14, %c0_15] : memref<1x128xf32, #tpu.memory_space<vmem>>, vector<1x128xf32>
    %15 = vector.broadcast %14 : vector<1x128xf32> to vector<256x128xf32>
    %16 = arith.addf %13, %15 : vector<256x128xf32>
    %cst_16 = arith.constant 0.000000e+00 : f32
    %17 = vector.broadcast %cst_16 : f32 to vector<256x128xf32>
    %18 = arith.maximumf %16, %17 : vector<256x128xf32>
    %19 = arith.truncf %18 : vector<256x128xf32> to vector<256x128xbf16>
    %cst_17 = arith.constant dense<0.000000e+00> : vector<256x128xf32>
    %20 = tpu.matmul %2, %19, %cst_17 {dimension_numbers = #tpu.dot_dimension_numbers<[1], [0], [0], [1], [0, 0, 1, 1], [], []>} : vector<256x256xbf16>, vector<256x128xbf16>, vector<256x128xf32> -> vector<256x128xf32>
    %21 = arith.truncf %20 : vector<256x128xf32> to vector<256x128xbf16>
    %c0_18 = arith.constant 0 : index
    %c0_19 = arith.constant 0 : index
    %22 = vector.load %arg8[%c0_18, %c0_19] : memref<128x32xbf16, #tpu.memory_space<vmem>>, vector<128x32xbf16>
    %cst_20 = arith.constant dense<0.000000e+00> : vector<256x32xf32>
    %23 = tpu.matmul %21, %22, %cst_20 {dimension_numbers = #tpu.dot_dimension_numbers<[1], [0], [0], [1], [0, 0, 1, 1], [], []>} : vector<256x128xbf16>, vector<128x32xbf16>, vector<256x32xf32> -> vector<256x32xf32>
    %c0_21 = arith.constant 0 : index
    %c0_22 = arith.constant 0 : index
    %24 = vector.load %arg9[%c0_21, %c0_22] : memref<1x32xf32, #tpu.memory_space<vmem>>, vector<1x32xf32>
    %25 = vector.broadcast %24 : vector<1x32xf32> to vector<256x32xf32>
    %26 = arith.addf %23, %25 : vector<256x32xf32>
    %c0_23 = arith.constant 0 : index
    %c0_24 = arith.constant 0 : index
    %27 = vector.load %arg10[%c0_23, %c0_24] : memref<32x96xbf16, #tpu.memory_space<vmem>>, vector<32x96xbf16>
    %cst_25 = arith.constant dense<0.000000e+00> : vector<256x96xf32>
    %28 = tpu.matmul %9, %27, %cst_25 {dimension_numbers = #tpu.dot_dimension_numbers<[1], [0], [0], [1], [0, 0, 1, 1], [], []>} : vector<256x32xbf16>, vector<32x96xbf16>, vector<256x96xf32> -> vector<256x96xf32>
    %c0_26 = arith.constant 0 : index
    %c0_27 = arith.constant 0 : index
    %29 = vector.load %arg11[%c0_26, %c0_27] : memref<1x96xf32, #tpu.memory_space<vmem>>, vector<1x96xf32>
    %30 = vector.broadcast %29 : vector<1x96xf32> to vector<256x96xf32>
    %31 = arith.addf %28, %30 : vector<256x96xf32>
    %c0_28 = arith.constant 0 : index
    %c0_29 = arith.constant 0 : index
    %32 = vector.load %arg12[%c0_28, %c0_29] : memref<32x32xbf16, #tpu.memory_space<vmem>>, vector<32x32xbf16>
    %cst_30 = arith.constant 0.000000e+00 : f32
    %33 = vector.broadcast %cst_30 : f32 to vector<256x32xf32>
    %34 = vector.extract_strided_slice %31 {offsets = [0, 0], sizes = [256, 16], strides = [1, 1]} : vector<256x96xf32> to vector<256x16xf32>
    %35 = arith.truncf %34 : vector<256x16xf32> to vector<256x16xbf16>
    %36 = vector.extract_strided_slice %31 {offsets = [0, 16], sizes = [256, 16], strides = [1, 1]} : vector<256x96xf32> to vector<256x16xf32>
    %37 = arith.truncf %36 : vector<256x16xf32> to vector<256x16xbf16>
    %38 = vector.extract_strided_slice %31 {offsets = [0, 32], sizes = [256, 16], strides = [1, 1]} : vector<256x96xf32> to vector<256x16xf32>
    %39 = arith.truncf %38 : vector<256x16xf32> to vector<256x16xbf16>
    %40 = tpu.transpose %37, [1, 0] : vector<256x16xbf16> -> vector<16x256xbf16>
    %cst_31 = arith.constant dense<0.000000e+00> : vector<256x256xf32>
    %41 = tpu.matmul %35, %40, %cst_31 {dimension_numbers = #tpu.dot_dimension_numbers<[1], [0], [0], [1], [0, 0, 1, 1], [], []>} : vector<256x16xbf16>, vector<16x256xbf16>, vector<256x256xf32> -> vector<256x256xf32>
    %42 = arith.addf %41, %3 : vector<256x256xf32>
    %cst_32 = arith.constant dense<0xFF800000> : vector<256xf32>
    %43 = vector.multi_reduction <maximumf>, %42, %cst_32 [1] : vector<256x256xf32> to vector<256xf32>
    %44 = vector.shape_cast %43 : vector<256xf32> to vector<256x1xf32>
    %45 = vector.broadcast %44 : vector<256x1xf32> to vector<256x256xf32>
    %46 = arith.subf %42, %45 : vector<256x256xf32>
    %47 = math.exp %46 : vector<256x256xf32>
    %cst_33 = arith.constant dense<0.000000e+00> : vector<256xf32>
    %48 = vector.multi_reduction <add>, %47, %cst_33 [1] : vector<256x256xf32> to vector<256xf32>
    %49 = vector.shape_cast %48 : vector<256xf32> to vector<256x1xf32>
    %50 = tpu.reciprocal %49 {approx = true} : vector<256x1xf32> -> vector<256x1xf32>
    %51 = vector.broadcast %50 : vector<256x1xf32> to vector<256x256xf32>
    %52 = arith.mulf %47, %51 : vector<256x256xf32>
    %53 = arith.truncf %52 : vector<256x256xf32> to vector<256x256xbf16>
    %cst_34 = arith.constant dense<0.000000e+00> : vector<256x16xf32>
    %54 = tpu.matmul %53, %39, %cst_34 {dimension_numbers = #tpu.dot_dimension_numbers<[1], [0], [0], [1], [0, 0, 1, 1], [], []>} : vector<256x256xbf16>, vector<256x16xbf16>, vector<256x16xf32> -> vector<256x16xf32>
    %55 = arith.truncf %54 : vector<256x16xf32> to vector<256x16xbf16>
    %56 = vector.extract_strided_slice %32 {offsets = [0, 0], sizes = [16, 32], strides = [1, 1]} : vector<32x32xbf16> to vector<16x32xbf16>
    %cst_35 = arith.constant dense<0.000000e+00> : vector<256x32xf32>
    %57 = tpu.matmul %55, %56, %cst_35 {dimension_numbers = #tpu.dot_dimension_numbers<[1], [0], [0], [1], [0, 0, 1, 1], [], []>} : vector<256x16xbf16>, vector<16x32xbf16>, vector<256x32xf32> -> vector<256x32xf32>
    %58 = arith.addf %33, %57 : vector<256x32xf32>
    %59 = vector.extract_strided_slice %31 {offsets = [0, 48], sizes = [256, 16], strides = [1, 1]} : vector<256x96xf32> to vector<256x16xf32>
    %60 = arith.truncf %59 : vector<256x16xf32> to vector<256x16xbf16>
    %61 = vector.extract_strided_slice %31 {offsets = [0, 64], sizes = [256, 16], strides = [1, 1]} : vector<256x96xf32> to vector<256x16xf32>
    %62 = arith.truncf %61 : vector<256x16xf32> to vector<256x16xbf16>
    %63 = vector.extract_strided_slice %31 {offsets = [0, 80], sizes = [256, 16], strides = [1, 1]} : vector<256x96xf32> to vector<256x16xf32>
    %64 = arith.truncf %63 : vector<256x16xf32> to vector<256x16xbf16>
    %65 = tpu.transpose %62, [1, 0] : vector<256x16xbf16> -> vector<16x256xbf16>
    %cst_36 = arith.constant dense<0.000000e+00> : vector<256x256xf32>
    %66 = tpu.matmul %60, %65, %cst_36 {dimension_numbers = #tpu.dot_dimension_numbers<[1], [0], [0], [1], [0, 0, 1, 1], [], []>} : vector<256x16xbf16>, vector<16x256xbf16>, vector<256x256xf32> -> vector<256x256xf32>
    %67 = arith.addf %66, %3 : vector<256x256xf32>
    %cst_37 = arith.constant dense<0xFF800000> : vector<256xf32>
    %68 = vector.multi_reduction <maximumf>, %67, %cst_37 [1] : vector<256x256xf32> to vector<256xf32>
    %69 = vector.shape_cast %68 : vector<256xf32> to vector<256x1xf32>
    %70 = vector.broadcast %69 : vector<256x1xf32> to vector<256x256xf32>
    %71 = arith.subf %67, %70 : vector<256x256xf32>
    %72 = math.exp %71 : vector<256x256xf32>
    %cst_38 = arith.constant dense<0.000000e+00> : vector<256xf32>
    %73 = vector.multi_reduction <add>, %72, %cst_38 [1] : vector<256x256xf32> to vector<256xf32>
    %74 = vector.shape_cast %73 : vector<256xf32> to vector<256x1xf32>
    %75 = tpu.reciprocal %74 {approx = true} : vector<256x1xf32> -> vector<256x1xf32>
    %76 = vector.broadcast %75 : vector<256x1xf32> to vector<256x256xf32>
    %77 = arith.mulf %72, %76 : vector<256x256xf32>
    %78 = arith.truncf %77 : vector<256x256xf32> to vector<256x256xbf16>
    %cst_39 = arith.constant dense<0.000000e+00> : vector<256x16xf32>
    %79 = tpu.matmul %78, %64, %cst_39 {dimension_numbers = #tpu.dot_dimension_numbers<[1], [0], [0], [1], [0, 0, 1, 1], [], []>} : vector<256x256xbf16>, vector<256x16xbf16>, vector<256x16xf32> -> vector<256x16xf32>
    %80 = arith.truncf %79 : vector<256x16xf32> to vector<256x16xbf16>
    %81 = vector.extract_strided_slice %32 {offsets = [16, 0], sizes = [16, 32], strides = [1, 1]} : vector<32x32xbf16> to vector<16x32xbf16>
    %cst_40 = arith.constant dense<0.000000e+00> : vector<256x32xf32>
    %82 = tpu.matmul %80, %81, %cst_40 {dimension_numbers = #tpu.dot_dimension_numbers<[1], [0], [0], [1], [0, 0, 1, 1], [], []>} : vector<256x16xbf16>, vector<16x32xbf16>, vector<256x32xf32> -> vector<256x32xf32>
    %83 = arith.addf %58, %82 : vector<256x32xf32>
    %c0_41 = arith.constant 0 : index
    %c0_42 = arith.constant 0 : index
    %84 = vector.load %arg13[%c0_41, %c0_42] : memref<1x32xf32, #tpu.memory_space<vmem>>, vector<1x32xf32>
    %85 = vector.broadcast %84 : vector<1x32xf32> to vector<256x32xf32>
    %86 = arith.addf %83, %85 : vector<256x32xf32>
    %87 = arith.truncf %86 : vector<256x32xf32> to vector<256x32xbf16>
    %c0_43 = arith.constant 0 : index
    %c0_44 = arith.constant 0 : index
    %88 = vector.load %arg14[%c0_43, %c0_44] : memref<32x128xbf16, #tpu.memory_space<vmem>>, vector<32x128xbf16>
    %cst_45 = arith.constant dense<0.000000e+00> : vector<256x128xf32>
    %89 = tpu.matmul %87, %88, %cst_45 {dimension_numbers = #tpu.dot_dimension_numbers<[1], [0], [0], [1], [0, 0, 1, 1], [], []>} : vector<256x32xbf16>, vector<32x128xbf16>, vector<256x128xf32> -> vector<256x128xf32>
    %c0_46 = arith.constant 0 : index
    %c0_47 = arith.constant 0 : index
    %90 = vector.load %arg15[%c0_46, %c0_47] : memref<1x128xf32, #tpu.memory_space<vmem>>, vector<1x128xf32>
    %91 = vector.broadcast %90 : vector<1x128xf32> to vector<256x128xf32>
    %92 = arith.addf %89, %91 : vector<256x128xf32>
    %cst_48 = arith.constant 0.000000e+00 : f32
    %93 = vector.broadcast %cst_48 : f32 to vector<256x128xf32>
    %94 = arith.maximumf %92, %93 : vector<256x128xf32>
    %95 = arith.truncf %94 : vector<256x128xf32> to vector<256x128xbf16>
    %c0_49 = arith.constant 0 : index
    %c0_50 = arith.constant 0 : index
    %96 = vector.load %arg16[%c0_49, %c0_50] : memref<128x32xbf16, #tpu.memory_space<vmem>>, vector<128x32xbf16>
    %cst_51 = arith.constant dense<0.000000e+00> : vector<256x32xf32>
    %97 = tpu.matmul %95, %96, %cst_51 {dimension_numbers = #tpu.dot_dimension_numbers<[1], [0], [0], [1], [0, 0, 1, 1], [], []>} : vector<256x128xbf16>, vector<128x32xbf16>, vector<256x32xf32> -> vector<256x32xf32>
    %c0_52 = arith.constant 0 : index
    %c0_53 = arith.constant 0 : index
    %98 = vector.load %arg17[%c0_52, %c0_53] : memref<1x32xf32, #tpu.memory_space<vmem>>, vector<1x32xf32>
    %99 = vector.broadcast %98 : vector<1x32xf32> to vector<256x32xf32>
    %100 = arith.addf %97, %99 : vector<256x32xf32>
    %101 = arith.addf %100, %86 : vector<256x32xf32>
    %cst_54 = arith.constant dense<0.000000e+00> : vector<256xf32>
    %102 = vector.multi_reduction <add>, %101, %cst_54 [1] : vector<256x32xf32> to vector<256xf32>
    %103 = vector.shape_cast %102 : vector<256xf32> to vector<256x1xf32>
    %cst_55 = arith.constant 3.200000e+01 : f32
    %104 = vector.broadcast %cst_55 : f32 to vector<256x1xf32>
    %105 = arith.divf %103, %104 : vector<256x1xf32>
    %106 = vector.broadcast %105 : vector<256x1xf32> to vector<256x32xf32>
    %107 = arith.subf %101, %106 : vector<256x32xf32>
    %108 = arith.mulf %107, %107 : vector<256x32xf32>
    %cst_56 = arith.constant dense<0.000000e+00> : vector<256xf32>
    %109 = vector.multi_reduction <add>, %108, %cst_56 [1] : vector<256x32xf32> to vector<256xf32>
    %110 = vector.shape_cast %109 : vector<256xf32> to vector<256x1xf32>
    %cst_57 = arith.constant 3.200000e+01 : f32
    %111 = vector.broadcast %cst_57 : f32 to vector<256x1xf32>
    %112 = arith.divf %110, %111 : vector<256x1xf32>
    %113 = vector.broadcast %105 : vector<256x1xf32> to vector<256x32xf32>
    %114 = arith.subf %101, %113 : vector<256x32xf32>
    %cst_58 = arith.constant 9.99999974E-6 : f32
    %115 = vector.broadcast %cst_58 : f32 to vector<256x1xf32>
    %116 = arith.addf %112, %115 : vector<256x1xf32>
    %117 = math.rsqrt %116 : vector<256x1xf32>
    %118 = vector.broadcast %117 : vector<256x1xf32> to vector<256x32xf32>
    %119 = arith.mulf %114, %118 : vector<256x32xf32>
    %c0_59 = arith.constant 0 : index
    %c0_60 = arith.constant 0 : index
    %120 = vector.load %arg18[%c0_59, %c0_60] : memref<1x32xf32, #tpu.memory_space<vmem>>, vector<1x32xf32>
    %121 = vector.broadcast %120 : vector<1x32xf32> to vector<256x32xf32>
    %122 = arith.mulf %119, %121 : vector<256x32xf32>
    %c0_61 = arith.constant 0 : index
    %c0_62 = arith.constant 0 : index
    %123 = vector.load %arg19[%c0_61, %c0_62] : memref<1x32xf32, #tpu.memory_space<vmem>>, vector<1x32xf32>
    %124 = vector.broadcast %123 : vector<1x32xf32> to vector<256x32xf32>
    %125 = arith.addf %122, %124 : vector<256x32xf32>
    %c0_63 = arith.constant 0 : index
    %c0_64 = arith.constant 0 : index
    %126 = vector.load %arg20[%c0_63, %c0_64] : memref<1x32xf32, #tpu.memory_space<vmem>>, vector<1x32xf32>
    %127 = vector.broadcast %126 : vector<1x32xf32> to vector<256x32xf32>
    %128 = arith.mulf %125, %127 : vector<256x32xf32>
    %cst_65 = arith.constant dense<0.000000e+00> : vector<256xf32>
    %129 = vector.multi_reduction <add>, %128, %cst_65 [1] : vector<256x32xf32> to vector<256xf32>
    %130 = vector.shape_cast %129 : vector<256xf32> to vector<256x1xf32>
    %c0_66 = arith.constant 0 : index
    %c0_67 = arith.constant 0 : index
    %131 = vector.load %arg21[%c0_66, %c0_67] : memref<1x32xf32, #tpu.memory_space<vmem>>, vector<1x32xf32>
    %132 = vector.broadcast %131 : vector<1x32xf32> to vector<256x32xf32>
    %133 = arith.mulf %26, %132 : vector<256x32xf32>
    %cst_68 = arith.constant dense<0.000000e+00> : vector<256xf32>
    %134 = vector.multi_reduction <add>, %133, %cst_68 [1] : vector<256x32xf32> to vector<256xf32>
    %135 = vector.shape_cast %134 : vector<256xf32> to vector<256x1xf32>
    %136 = arith.addf %130, %135 : vector<256x1xf32>
    %c0_69 = arith.constant 0 : index
    %c0_70 = arith.constant 0 : index
    %137 = vector.load %arg22[%c0_69, %c0_70] : memref<1x1xf32, #tpu.memory_space<vmem>>, vector<1x1xf32>
    %138 = vector.broadcast %137 : vector<1x1xf32> to vector<256x1xf32>
    %139 = arith.addf %136, %138 : vector<256x1xf32>
    %140 = arith.negf %139 : vector<256x1xf32>
    %141 = math.exp %140 : vector<256x1xf32>
    %cst_71 = arith.constant 1.000000e+00 : f32
    %142 = vector.broadcast %cst_71 : f32 to vector<256x1xf32>
    %143 = arith.addf %142, %141 : vector<256x1xf32>
    %144 = arith.divf %142, %143 : vector<256x1xf32>
    %145 = vector.broadcast %144 : vector<256x1xf32> to vector<256x32xf32>
    %146 = arith.mulf %145, %125 : vector<256x32xf32>
    %cst_72 = arith.constant 1.000000e+00 : f32
    %147 = vector.broadcast %cst_72 : f32 to vector<256x1xf32>
    %148 = arith.subf %147, %144 : vector<256x1xf32>
    %149 = vector.broadcast %148 : vector<256x1xf32> to vector<256x32xf32>
    %150 = arith.mulf %149, %26 : vector<256x32xf32>
    %151 = arith.addf %146, %150 : vector<256x32xf32>
    %152 = vector.shape_cast %151 : vector<256x32xf32> to vector<2x128x32xf32>
    %c0_73 = arith.constant 0 : index
    %c0_74 = arith.constant 0 : index
    %c0_75 = arith.constant 0 : index
    %153 = vector.load %arg23[%c0_73, %c0_74, %c0_75] : memref<2x128x32xf32, #tpu.memory_space<vmem>>, vector<2x128x32xf32>
    tpu.vector_store %arg23[%c0_73, %c0_74, %c0_75], %152 {strides = array<i32>} : memref<2x128x32xf32, #tpu.memory_space<vmem>>, vector<2x128x32xf32>,
    return
  }
  func.func @transform_0(%arg0: i32) -> (i32, i32, i32) {
    %c0_i32 = arith.constant 0 : i32
    %c0_i32_0 = arith.constant 0 : i32
    %c0_i32_1 = arith.constant 0 : i32
    return %arg0, %c0_i32, %c0_i32_0 : i32, i32, i32
  }
  func.func @transform_1(%arg0: i32) -> (i32, i32) {
    %c0_i32 = arith.constant 0 : i32
    %c0_i32_0 = arith.constant 0 : i32
    %c0_i32_1 = arith.constant 0 : i32
    return %c0_i32, %c0_i32_0 : i32, i32
  }
  func.func @transform_2(%arg0: i32) -> (i32, i32) {
    %c0_i32 = arith.constant 0 : i32
    %c0_i32_0 = arith.constant 0 : i32
    %c0_i32_1 = arith.constant 0 : i32
    return %c0_i32, %c0_i32_0 : i32, i32
  }
  func.func @transform_3(%arg0: i32) -> (i32, i32) {
    %c0_i32 = arith.constant 0 : i32
    %c0_i32_0 = arith.constant 0 : i32
    %c0_i32_1 = arith.constant 0 : i32
    return %c0_i32, %c0_i32_0 : i32, i32
  }
  func.func @transform_4(%arg0: i32) -> (i32, i32) {
    %c0_i32 = arith.constant 0 : i32
    %c0_i32_0 = arith.constant 0 : i32
    %c0_i32_1 = arith.constant 0 : i32
    return %c0_i32, %c0_i32_0 : i32, i32
  }
  func.func @transform_5(%arg0: i32) -> (i32, i32) {
    %c0_i32 = arith.constant 0 : i32
    %c0_i32_0 = arith.constant 0 : i32
    %c0_i32_1 = arith.constant 0 : i32
    return %c0_i32, %c0_i32_0 : i32, i32
  }
  func.func @transform_6(%arg0: i32) -> (i32, i32) {
    %c0_i32 = arith.constant 0 : i32
    %c0_i32_0 = arith.constant 0 : i32
    %c0_i32_1 = arith.constant 0 : i32
    return %c0_i32, %c0_i32_0 : i32, i32
  }
  func.func @transform_7(%arg0: i32) -> (i32, i32) {
    %c0_i32 = arith.constant 0 : i32
    %c0_i32_0 = arith.constant 0 : i32
    %c0_i32_1 = arith.constant 0 : i32
    return %c0_i32, %c0_i32_0 : i32, i32
  }
  func.func @transform_8(%arg0: i32) -> (i32, i32) {
    %c0_i32 = arith.constant 0 : i32
    %c0_i32_0 = arith.constant 0 : i32
    %c0_i32_1 = arith.constant 0 : i32
    return %c0_i32, %c0_i32_0 : i32, i32
  }
  func.func @transform_9(%arg0: i32) -> (i32, i32) {
    %c0_i32 = arith.constant 0 : i32
    %c0_i32_0 = arith.constant 0 : i32
    %c0_i32_1 = arith.constant 0 : i32
    return %c0_i32, %c0_i32_0 : i32, i32
  }
  func.func @transform_10(%arg0: i32) -> (i32, i32) {
    %c0_i32 = arith.constant 0 : i32
    %c0_i32_0 = arith.constant 0 : i32
    %c0_i32_1 = arith.constant 0 : i32
    return %c0_i32, %c0_i32_0 : i32, i32
  }
  func.func @transform_11(%arg0: i32) -> (i32, i32) {
    %c0_i32 = arith.constant 0 : i32
    %c0_i32_0 = arith.constant 0 : i32
    %c0_i32_1 = arith.constant 0 : i32
    return %c0_i32, %c0_i32_0 : i32, i32
  }
  func.func @transform_12(%arg0: i32) -> (i32, i32) {
    %c0_i32 = arith.constant 0 : i32
    %c0_i32_0 = arith.constant 0 : i32
    %c0_i32_1 = arith.constant 0 : i32
    return %c0_i32, %c0_i32_0 : i32, i32
  }
  func.func @transform_13(%arg0: i32) -> (i32, i32) {
    %c0_i32 = arith.constant 0 : i32
    %c0_i32_0 = arith.constant 0 : i32
    %c0_i32_1 = arith.constant 0 : i32
    return %c0_i32, %c0_i32_0 : i32, i32
  }
  func.func @transform_14(%arg0: i32) -> (i32, i32) {
    %c0_i32 = arith.constant 0 : i32
    %c0_i32_0 = arith.constant 0 : i32
    %c0_i32_1 = arith.constant 0 : i32
    return %c0_i32, %c0_i32_0 : i32, i32
  }
  func.func @transform_15(%arg0: i32) -> (i32, i32) {
    %c0_i32 = arith.constant 0 : i32
    %c0_i32_0 = arith.constant 0 : i32
    %c0_i32_1 = arith.constant 0 : i32
    return %c0_i32, %c0_i32_0 : i32, i32
  }
  func.func @transform_16(%arg0: i32) -> (i32, i32) {
    %c0_i32 = arith.constant 0 : i32
    %c0_i32_0 = arith.constant 0 : i32
    %c0_i32_1 = arith.constant 0 : i32
    return %c0_i32, %c0_i32_0 : i32, i32
  }
  func.func @transform_17(%arg0: i32) -> (i32, i32) {
    %c0_i32 = arith.constant 0 : i32
    %c0_i32_0 = arith.constant 0 : i32
    %c0_i32_1 = arith.constant 0 : i32
    return %c0_i32, %c0_i32_0 : i32, i32
  }
  func.func @transform_18(%arg0: i32) -> (i32, i32) {
    %c0_i32 = arith.constant 0 : i32
    %c0_i32_0 = arith.constant 0 : i32
    %c0_i32_1 = arith.constant 0 : i32
    return %c0_i32, %c0_i32_0 : i32, i32
  }
  func.func @transform_19(%arg0: i32) -> (i32, i32) {
    %c0_i32 = arith.constant 0 : i32
    %c0_i32_0 = arith.constant 0 : i32
    %c0_i32_1 = arith.constant 0 : i32
    return %c0_i32, %c0_i32_0 : i32, i32
  }
  func.func @transform_20(%arg0: i32) -> (i32, i32) {
    %c0_i32 = arith.constant 0 : i32
    %c0_i32_0 = arith.constant 0 : i32
    %c0_i32_1 = arith.constant 0 : i32
    return %c0_i32, %c0_i32_0 : i32, i32
  }
  func.func @transform_21(%arg0: i32) -> (i32, i32) {
    %c0_i32 = arith.constant 0 : i32
    %c0_i32_0 = arith.constant 0 : i32
    %c0_i32_1 = arith.constant 0 : i32
    return %c0_i32, %c0_i32_0 : i32, i32
  }
  func.func @transform_22(%arg0: i32) -> (i32, i32, i32) {
    %c0_i32 = arith.constant 0 : i32
    %c0_i32_0 = arith.constant 0 : i32
    %c0_i32_1 = arith.constant 0 : i32
    return %arg0, %c0_i32, %c0_i32_0 : i32, i32, i32
  }
}

</mosaic_0001>

<bundles_post_ra>
// kernel: _stn_forward_impl.1
= control target key start
LH: loop header
LB: loop body
LE: loop exit
PB: predicated region body
PF: predicated region fallthrough
CT: control target
= control target key end

     0   :  { %s12855_s0 = inlined_call_operand.vmem [shape: f32[2,128,32], index: 0, kind: input, shape index: {}]   ;;  %s12856_s1 = inlined_call_operand.vmem [shape: bf16[256,256], index: 1, kind: input, shape index: {}]   ;;  %s12857_s2 = inlined_call_operand.vmem [shape: f32[256,256], index: 2, kind: input, shape index: {}]   ;;  %s12858_s3 = inlined_call_operand.vmem [shape: f32[256,32], index: 3, kind: input, shape index: {}]   ;;  %s12859_s4 = inlined_call_operand.vmem [shape: bf16[32,32], index: 4, kind: input, shape index: {}]   ;;  %s12860_s5 = inlined_call_operand.vmem [shape: bf16[32,128], index: 5, kind: input, shape index: {}]   ;;  %s12861_s6 = inlined_call_operand.vmem [shape: f32[1,128], index: 6, kind: input, shape index: {}]   ;;  %s12862_s7 = inlined_call_operand.vmem [shape: bf16[128,32], index: 7, kind: input, shape index: {}]   ;;  %s12863_s8 = inlined_call_operand.vmem [shape: f32[1,32], index: 8, kind: input, shape index: {}]   ;;  %s12864_s9 = inlined_call_operand.vmem [shape: bf16[32,96], index: 9, kind: input, shape index: {}]   ;;  %s12865_s10 = inlined_call_operand.vmem [shape: f32[1,96], index: 10, kind: input, shape index: {}]   ;;  %s12866_s11 = inlined_call_operand.vmem [shape: bf16[32,32], index: 11, kind: input, shape index: {}]   ;;  %s12867_s12 = inlined_call_operand.vmem [shape: f32[1,32], index: 12, kind: input, shape index: {}]   ;;  %s12868_s13 = inlined_call_operand.vmem [shape: bf16[32,128], index: 13, kind: input, shape index: {}]   ;;  %s12869_s14 = inlined_call_operand.vmem [shape: f32[1,128], index: 14, kind: input, shape index: {}]   ;;  %s12870_s15 = inlined_call_operand.vmem [shape: bf16[128,32], index: 15, kind: input, shape index: {}]   ;;  %s12871_s16 = inlined_call_operand.vmem [shape: f32[1,32], index: 16, kind: input, shape index: {}]   ;;  %s12872_s17 = inlined_call_operand.vmem [shape: f32[1,32], index: 17, kind: input, shape index: {}]   ;;  %s12873_s18 = inlined_call_operand.vmem [shape: f32[1,32], index: 18, kind: input, shape index: {}]   ;;  %s12874_s19 = inlined_call_operand.vmem [shape: f32[1,32], index: 19, kind: input, shape index: {}]   ;;  %s12875_s20 = inlined_call_operand.vmem [shape: f32[1,32], index: 20, kind: input, shape index: {}]   ;;  %s12876_s21 = inlined_call_operand.<no memory space> [shape: f32[1,1], index: 21, kind: input, shape index: {}]   ;;  %s12877_s22 = inlined_call_operand.hbm [shape: f32[2,128,32], index: 22, kind: output, shape index: {}]  }
   0x1   :  { %13112 = sst [smem:[#allocation145_spill]] %s12855_s0  ;;  %v27_v0 = vstv %s12876_s21 }
   0x2   :  { %13113 = sst [smem:[#allocation146_spill]] %s12856_s1  ;;  %28 = vst [vmem:[#allocation2] sm:$0x1] %v27_v0 }
   0x3   :  { %13114 = sst [smem:[#allocation147_spill]] %s12857_s2 }
   0x4   :  { %13115 = sst [smem:[#allocation148_spill]] %s12858_s3 }
   0x5   :  { %13116 = sst [smem:[#allocation149_spill]] %s12859_s4 }
   0x6   :  { %13117 = sst [smem:[#allocation150_spill]] %s12860_s5 }
   0x7   :  { %13118 = sst [smem:[#allocation151_spill]] %s12861_s6 }
   0x8   :  { %s13119_s4 = sld [smem:[#allocation149_spill]]  ;;  %s13120_s24 = sld [smem:[#allocation145_spill]]  ;;  %vm267_vm0 = vcmask 261120  }
   0xe   :  { %v7735_v1 = vld [vmem:[%s13119_s4] sm:$0xff]   ;;  %v7736_v2 = vld [vmem:[%s13119_s4 + $0x8] sm:$0xff]   ;;  %v77_v6 = vld [vmem:[%s13120_s24 + $0x10] sm:$0xff] }
   0xf   :  { %7368 = vmatprep.subr.bf16.mxu0 %v7735_v1  ;;  %v75_v3 = vld [vmem:[%s13120_s24] sm:$0xff]  ;;  %v76_v4 = vld [vmem:[%s13120_s24 + $0x8] sm:$0xff]  ;;  %v78_v7 = vld [vmem:[%s13120_s24 + $0x18] sm:$0xff] }
  0x10   :  { %7369 = vmatpush3.bf16.msra.mxu0 %v7735_v1  ;;  %v203_v5 = vpack.c.bf16 %v76_v4, %v75_v3  ;;  %v79_v8 = vld [vmem:[%s13120_s24 + $0x20] sm:$0xff]  ;;  %v80_v9 = vld [vmem:[%s13120_s24 + $0x28] sm:$0xff]  ;;  %v204_v10 = vpack.c.bf16 %v78_v7, %v77_v6  ;;  %v81_v12 = vld [vmem:[%s13120_s24 + $0x30] sm:$0xff] }
  0x11   :  { %7370 = vmatprep.subr.bf16.mxu0 %v7736_v2  ;;  %v205_v11 = vpack.c.bf16 %v80_v9, %v79_v8  ;;  %v82_v13 = vld [vmem:[%s13120_s24 + $0x38] sm:$0xff]  ;;  %v83_v14 = vld [vmem:[%s13120_s24 + $0x40] sm:$0xff]  ;;  %v84_v15 = vld [vmem:[%s13120_s24 + $0x48] sm:$0xff] }
  0x12   :  { %7372 = vmatprep.mubr.msk.bf16.mxu0 %vm267_vm0, %v203_v5  ;;  %v206_v16 = vpack.c.bf16 %v82_v13, %v81_v12  ;;  %v207_v17 = vpack.c.bf16 %v84_v15, %v83_v14  ;;  %v85_v18 = vld [vmem:[%s13120_s24 + $0x50] sm:$0xff]  ;;  %v86_v19 = vld [vmem:[%s13120_s24 + $0x58] sm:$0xff]  ;;  %v87_v20 = vld [vmem:[%s13120_s24 + $0x60] sm:$0xff] }
  0x13   :  { %v88_v21 = vld [vmem:[%s13120_s24 + $0x68] sm:$0xff]  ;;  %v208_v22 = vpack.c.bf16 %v86_v19, %v85_v18  ;;  %v89_v24 = vld [vmem:[%s13120_s24 + $0x70] sm:$0xff]  ;;  %v90_v25 = vld [vmem:[%s13120_s24 + $0x78] sm:$0xff] }
  0x14   :  { %7371 = vmatpush3.bf16.msra.mxu0 %v7736_v2  ;;  %v209_v23 = vpack.c.bf16 %v88_v21, %v87_v20  ;;  %v91_v26 = vld [vmem:[%s13120_s24 + $0x80] sm:$0xff]  ;;  %v92_v27 = vld [vmem:[%s13120_s24 + $0x88] sm:$0xff]  ;;  %v210_v28 = vpack.c.bf16 %v90_v25, %v89_v24  ;;  %v93_v30 = vld [vmem:[%s13120_s24 + $0x90] sm:$0xff] }
  0x15   :  { %v211_v29 = vpack.c.bf16 %v92_v27, %v91_v26  ;;  %v94_v31 = vld [vmem:[%s13120_s24 + $0x98] sm:$0xff]  ;;  %v95_v32 = vld [vmem:[%s13120_s24 + $0xa0] sm:$0xff]  ;;  %v96_v33 = vld [vmem:[%s13120_s24 + $0xa8] sm:$0xff] }
  0x16   :  { %v212_v34 = vpack.c.bf16 %v94_v31, %v93_v30  ;;  %v213_v35 = vpack.c.bf16 %v96_v33, %v95_v32 }
  0x17   :  { %7373 = vmatmul.mubr.msk.bf16.vlgmr.msra.gmra.mrb[0].mxu0 %vm267_vm0, %v204_v10 }
  0x18   :  { %7376 = vmatprep.mubr.msk.bf16.mxu0 %vm267_vm0, %v205_v11 }
  0x1f   :  { %7377 = vmatmul.mubr.msk.bf16.gmra.mrb[4].mxu0 %vm267_vm0, %v206_v16 }
  0x20   :  { %7380 = vmatprep.mubr.msk.bf16.mxu0 %vm267_vm0, %v207_v17 }
  0x27   :  { %7381 = vmatmul.mubr.msk.bf16.gmra.mrb[8].mxu0 %vm267_vm0, %v208_v22 }
  0x28   :  { %7384 = vmatprep.mubr.msk.bf16.mxu0 %vm267_vm0, %v209_v23 }
  0x2f   :  { %7385 = vmatmul.mubr.msk.bf16.gmra.mrb[12].mxu0 %vm267_vm0, %v210_v28 }
  0x30   :  { %7388 = vmatprep.mubr.msk.bf16.mxu0 %vm267_vm0, %v211_v29 }
  0x31   :  { %29 = vsyncpa [#allocation4], 0  ;;  %v97_v36 = vld [vmem:[%s13120_s24 + $0xb0] sm:$0xff]  ;;  %v98_v37 = vld [vmem:[%s13120_s24 + $0xb8] sm:$0xff]  ;;  %s13121_s2 = sld [smem:[#allocation150_spill]]  ;;  %s13122_s30 = sld [smem:[#allocation148_spill]] }
  0x32   :  { %v99_v38 = vld [vmem:[%s13120_s24 + $0xc0] sm:$0xff]  ;;  %v100_v39 = vld [vmem:[%s13120_s24 + $0xc8] sm:$0xff]  ;;  %v214_v40 = vpack.c.bf16 %v98_v37, %v97_v36  ;;  %v101_v42 = vld [vmem:[%s13120_s24 + $0xd0] sm:$0xff]  ;;  %s13134_s1 = sld [smem:[#allocation146_spill]]  ;;  %s13135_s21 = sld [smem:[#allocation151_spill]]  ;;  %vm1771_vm1 = vcmask 130048  }
  0x33   :  { %v215_v41 = vpack.c.bf16 %v100_v39, %v99_v38  ;;  %v102_v43 = vld [vmem:[%s13120_s24 + $0xd8] sm:$0xff]  ;;  %v103_v44 = vld [vmem:[%s13120_s24 + $0xe0] sm:$0xff]  ;;  %v104_v45 = vld [vmem:[%s13120_s24 + $0xe8] sm:$0xff]  ;;  %s8421_s3 = smov 80   ;;  %s8422_s28 = smov 96  }
  0x34   :  { %v216_v46 = vpack.c.bf16 %v102_v43, %v101_v42  ;;  %v217_v47 = vpack.c.bf16 %v104_v45, %v103_v44  ;;  %v105_v48 = vld [vmem:[%s13120_s24 + $0xf0] sm:$0xff]  ;;  %v106_v49 = vld [vmem:[%s13120_s24 + $0xf8] sm:$0xff]  ;;  %s8423_s29 = smov 48   ;;  %s13189_s0 = sld [smem:[#allocation147_spill]] }
  0x35   :  { %v218_v50 = vpack.c.bf16 %v106_v49, %v105_v48 }
  0x37   :  { %7389 = vmatmul.mubr.msk.bf16.gmra.mrb[16].mxu0 %vm267_vm0, %v212_v34  ;;  %v7737_v51 = vld [vmem:[%s13121_s2] sm:$0xff]   ;;  %v7738_v52 = vld [vmem:[%s13121_s2 + $0x8] sm:$0xff]   ;;  %v225_v53 = vld [vmem:[%s13122_s30 + $0x10] sm:$0xff] }
  0x38   :  { %7392 = vmatprep.mubr.msk.bf16.mxu0 %vm267_vm0, %v213_v35  ;;  %7404 = vmatprep.subr.bf16.mxu1 %v7737_v51  ;;  %v226_v55 = vld [vmem:[%s13122_s30 + $0x18] sm:$0xff]  ;;  %v223_v57 = vld [vmem:[%s13122_s30] sm:$0xff]  ;;  %v224_v58 = vld [vmem:[%s13122_s30 + $0x8] sm:$0xff] }
  0x39   :  { %7405 = vmatpush3.bf16.msra.mxu1 %v7737_v51  ;;  %v229_v3 = vld [vmem:[%s13122_s30 + $0x30] sm:$0xff]  ;;  %v230_v5 = vld [vmem:[%s13122_s30 + $0x38] sm:$0xff]  ;;  %v227_v7 = vld [vmem:[%s13122_s30 + $0x20] sm:$0xff] }
  0x3a   :  { %7406 = vmatprep.subr.bf16.mxu1 %v7738_v52  ;;  %v228_v8 = vld [vmem:[%s13122_s30 + $0x28] sm:$0xff]  ;;  %v233_v17 = vld [vmem:[%s13122_s30 + $0x50] sm:$0xff]  ;;  %v234_v19 = vld [vmem:[%s13122_s30 + $0x58] sm:$0xff] }
  0x3b   :  { %v231_v21 = vld [vmem:[%s13122_s30 + $0x40] sm:$0xff]  ;;  %v232_v22 = vld [vmem:[%s13122_s30 + $0x48] sm:$0xff]  ;;  %v237_v31 = vld [vmem:[%s13122_s30 + $0x70] sm:$0xff] }
  0x3c   :  { %v238_v33 = vld [vmem:[%s13122_s30 + $0x78] sm:$0xff]  ;;  %v235_v35 = vld [vmem:[%s13122_s30 + $0x60] sm:$0xff]  ;;  %v236_v36 = vld [vmem:[%s13122_s30 + $0x68] sm:$0xff] }
  0x3d   :  { %7407 = vmatpush3.bf16.msra.mxu1 %v7738_v52  ;;  %v241_v45 = vld [vmem:[%s13122_s30 + $0x90] sm:$0xff]  ;;  %v239_v49 = vld [vmem:[%s13122_s30 + $0x80] sm:$0xff] }
  0x3f   :  { %7393 = vmatmul.mubr.msk.bf16.gmra.mrb[20].mxu0 %vm267_vm0, %v214_v40 }
  0x40   :  { %7396 = vmatprep.mubr.msk.bf16.mxu0 %vm267_vm0, %v215_v41 }
  0x47   :  { %7397 = vmatmul.mubr.msk.bf16.gmra.mrb[24].mxu0 %vm267_vm0, %v216_v46 }
  0x48   :  { %7400 = vmatprep.mubr.msk.bf16.mxu0 %vm267_vm0, %v217_v47  ;;  %v242_v47 = vld [vmem:[%s13122_s30 + $0x98] sm:$0xff] }
  0x4f   :  { %7401 = vmatmul.mubr.msk.bf16.gmra.mrb[28].mxu0 %vm267_vm0, %v218_v50  ;;  %v240_v50 = vld [vmem:[%s13122_s30 + $0x88] sm:$0xff] }
  0xea   :  { %v7374_v54 = vpop.f32.mrb[0].mxu0 }
  0xeb   :  { %v350_v56 = vpop.f32.mrb[1].mxu0  ;;  %v359_v60 = vadd.f32 %v7374_v54, %v225_v53 }
  0xec   :  { %v7375_v59 = vpop.f32.mrb[2].mxu0  ;;  %v351_v63 = vadd.f32 %v350_v56, %v223_v57 }
  0xed   :  { %v362_v61 = vadd.f32 %v7375_v59, %v226_v55  ;;  %v353_v62 = vpop.f32.mrb[3].mxu0  ;;  %v245_v59 = vld [vmem:[%s13122_s30 + $0xb0] sm:$0xff] }
  0xee   :  { %v354_v0 = vadd.f32 %v353_v62, %v224_v58 }
  0xef   :  { %v8682_v1 = vpack.c.bf16 %v362_v61, %v359_v60  ;;  %v246_v61 = vld [vmem:[%s13122_s30 + $0xb8] sm:$0xff] }
  0xf0   :  { %v8684_v2 = vpack.c.bf16 %v354_v0, %v351_v63  ;;  %v243_v63 = vld [vmem:[%s13122_s30 + $0xa0] sm:$0xff]  ;;  %v244_v0 = vld [vmem:[%s13122_s30 + $0xa8] sm:$0xff] }
  0xf2   :  { %v7378_v4 = vpop.f32.mrb[4].mxu0  ;;  %7408 = vmatprep.mubr.msk.bf16.mxu1 %vm267_vm0, %v8684_v2 }
  0xf3   :  { %v366_v6 = vpop.f32.mrb[5].mxu0  ;;  %7409 = vmatmul.mubr.msk.bf16.vlgmr.msra.gmra.mrb[0].mxu1 %vm267_vm0, %v8682_v1  ;;  %v375_v10 = vadd.f32 %v7378_v4, %v229_v3 }
  0xf4   :  { %v7379_v9 = vpop.f32.mrb[6].mxu0  ;;  %v367_v13 = vadd.f32 %v366_v6, %v227_v7 }
  0xf5   :  { %v378_v11 = vadd.f32 %v7379_v9, %v230_v5  ;;  %v369_v12 = vpop.f32.mrb[7].mxu0 }
  0xf6   :  { %v370_v14 = vadd.f32 %v369_v12, %v228_v8 }
  0xf7   :  { %v8702_v15 = vpack.c.bf16 %v378_v11, %v375_v10  ;;  %v249_v11 = vld [vmem:[%s13122_s30 + $0xd0] sm:$0xff] }
  0xf8   :  { %v8704_v16 = vpack.c.bf16 %v370_v14, %v367_v13  ;;  %v250_v13 = vld [vmem:[%s13122_s30 + $0xd8] sm:$0xff] }
  0xfa   :  { %v7382_v18 = vpop.f32.mrb[8].mxu0  ;;  %7412 = vmatprep.mubr.msk.bf16.mxu1 %vm267_vm0, %v8704_v16 }
  0xfb   :  { %v382_v20 = vpop.f32.mrb[9].mxu0  ;;  %7413 = vmatmul.mubr.msk.bf16.gmra.mrb[4].mxu1 %vm267_vm0, %v8702_v15  ;;  %v391_v24 = vadd.f32 %v7382_v18, %v233_v17  ;;  %v247_v17 = vld [vmem:[%s13122_s30 + $0xc0] sm:$0xff]  ;;  %v248_v18 = vld [vmem:[%s13122_s30 + $0xc8] sm:$0xff] }
  0xfc   :  { %v7383_v23 = vpop.f32.mrb[10].mxu0  ;;  %v383_v27 = vadd.f32 %v382_v20, %v231_v21 }
  0xfd   :  { %v394_v25 = vadd.f32 %v7383_v23, %v234_v19  ;;  %v385_v26 = vpop.f32.mrb[11].mxu0 }
  0xfe   :  { %v386_v28 = vadd.f32 %v385_v26, %v232_v22 }
  0xff   :  { %v8722_v29 = vpack.c.bf16 %v394_v25, %v391_v24 }
 0x100   :  { %v8724_v30 = vpack.c.bf16 %v386_v28, %v383_v27  ;;  %v253_v27 = vld [vmem:[%s13122_s30 + $0xf0] sm:$0xff] }
 0x101   :  { %13123 = vst [vmem:[#allocation6_spill] sm:$0xff] %v8722_v29 }
 0x102   :  { %v7386_v32 = vpop.f32.mrb[12].mxu0  ;;  %7416 = vmatprep.mubr.msk.bf16.mxu1 %vm267_vm0, %v8724_v30 }
 0x103   :  { %v398_v34 = vpop.f32.mrb[13].mxu0  ;;  %7417 = vmatmul.mubr.msk.bf16.gmra.mrb[8].mxu1 %vm267_vm0, %v8722_v29  ;;  %v407_v38 = vadd.f32 %v7386_v32, %v237_v31  ;;  %v254_v31 = vld [vmem:[%s13122_s30 + $0xf8] sm:$0xff] }
 0x104   :  { %v7387_v37 = vpop.f32.mrb[14].mxu0  ;;  %v399_v41 = vadd.f32 %v398_v34, %v235_v35  ;;  %v252_v34 = vld [vmem:[%s13122_s30 + $0xe8] sm:$0xff] }
 0x105   :  { %v410_v39 = vadd.f32 %v7387_v37, %v238_v33  ;;  %v401_v40 = vpop.f32.mrb[15].mxu0  ;;  %v251_v33 = vld [vmem:[%s13122_s30 + $0xe0] sm:$0xff] }
 0x106   :  { %v402_v42 = vadd.f32 %v401_v40, %v236_v36 }
 0x107   :  { %v8742_v43 = vpack.c.bf16 %v410_v39, %v407_v38 }
 0x108   :  { %v8744_v44 = vpack.c.bf16 %v402_v42, %v399_v41 }
 0x109   :  { %13124 = vst [vmem:[#allocation7_spill] sm:$0xff] %v8742_v43 }
 0x10a   :  { %13125 = vst [vmem:[#allocation8_spill] sm:$0xff] %v8744_v44  ;;  %v7390_v46 = vpop.f32.mrb[16].mxu0  ;;  %7420 = vmatprep.mubr.msk.bf16.mxu1 %vm267_vm0, %v8744_v44 }
 0x10b   :  { %v414_v48 = vpop.f32.mrb[17].mxu0  ;;  %7421 = vmatmul.mubr.msk.bf16.gmra.mrb[12].mxu1 %vm267_vm0, %v8742_v43  ;;  %v423_v52 = vadd.f32 %v7390_v46, %v241_v45  ;;  %v7741_v45 = vld [vmem:[%s13134_s1 + $0x4] ss:$8 sps:$4 sm:$0xff]  }
 0x10c   :  { %v7391_v51 = vpop.f32.mrb[18].mxu0  ;;  %v415_v55 = vadd.f32 %v414_v48, %v239_v49  ;;  %933 = vmatprep.mubr.bf16.mxu0 %v7741_v45 }
 0x10d   :  { %v426_v53 = vadd.f32 %v7391_v51, %v242_v47  ;;  %v417_v54 = vpop.f32.mrb[19].mxu0 }
 0x10e   :  { %v418_v56 = vadd.f32 %v417_v54, %v240_v50 }
 0x10f   :  { %v8762_v57 = vpack.c.bf16 %v426_v53, %v423_v52 }
 0x110   :  { %v8764_v58 = vpack.c.bf16 %v418_v56, %v415_v55 }
 0x111   :  { %13126 = vst [vmem:[#allocation9_spill] sm:$0xff] %v8762_v57 }
 0x112   :  { %13127 = vst [vmem:[#allocation10_spill] sm:$0xff] %v8764_v58  ;;  %v7394_v60 = vpop.f32.mrb[20].mxu0  ;;  %7424 = vmatprep.mubr.msk.bf16.mxu1 %vm267_vm0, %v8764_v58 }
 0x113   :  { %v430_v62 = vpop.f32.mrb[21].mxu0  ;;  %7425 = vmatmul.mubr.msk.bf16.gmra.mrb[16].mxu1 %vm267_vm0, %v8762_v57  ;;  %v439_v4 = vadd.f32 %v7394_v60, %v245_v59 }
 0x114   :  { %v7395_v3 = vpop.f32.mrb[22].mxu0  ;;  %v431_v7 = vadd.f32 %v430_v62, %v243_v63 }
 0x115   :  { %v442_v5 = vadd.f32 %v7395_v3, %v246_v61  ;;  %v433_v6 = vpop.f32.mrb[23].mxu0 }
 0x116   :  { %v434_v8 = vadd.f32 %v433_v6, %v244_v0 }
 0x117   :  { %v8782_v9 = vpack.c.bf16 %v442_v5, %v439_v4 }
 0x118   :  { %v8784_v10 = vpack.c.bf16 %v434_v8, %v431_v7 }
 0x119   :  { %13128 = vst [vmem:[#allocation11_spill] sm:$0xff] %v8782_v9 }
 0x11a   :  { %13129 = vst [vmem:[#allocation12_spill] sm:$0xff] %v8784_v10  ;;  %v7398_v12 = vpop.f32.mrb[24].mxu0  ;;  %7428 = vmatprep.mubr.msk.bf16.mxu1 %vm267_vm0, %v8784_v10 }
 0x11b   :  { %v446_v14 = vpop.f32.mrb[25].mxu0  ;;  %7429 = vmatmul.mubr.msk.bf16.gmra.mrb[20].mxu1 %vm267_vm0, %v8782_v9  ;;  %v455_v20 = vadd.f32 %v7398_v12, %v249_v11 }
 0x11c   :  { %v7399_v19 = vpop.f32.mrb[26].mxu0  ;;  %v447_v23 = vadd.f32 %v446_v14, %v247_v17 }
 0x11d   :  { %v458_v21 = vadd.f32 %v7399_v19, %v250_v13  ;;  %v449_v22 = vpop.f32.mrb[27].mxu0 }
 0x11e   :  { %v450_v24 = vadd.f32 %v449_v22, %v248_v18 }
 0x11f   :  { %v8802_v25 = vpack.c.bf16 %v458_v21, %v455_v20 }
 0x120   :  { %v8804_v26 = vpack.c.bf16 %v450_v24, %v447_v23 }
 0x121   :  { %13130 = vst [vmem:[#allocation13_spill] sm:$0xff] %v8802_v25 }
 0x122   :  { %13131 = vst [vmem:[#allocation14_spill] sm:$0xff] %v8804_v26  ;;  %v7402_v28 = vpop.f32.mrb[28].mxu0  ;;  %7432 = vmatprep.mubr.msk.bf16.mxu1 %vm267_vm0, %v8804_v26 }
 0x123   :  { %v462_v32 = vpop.f32.mrb[29].mxu0  ;;  %7433 = vmatmul.mubr.msk.bf16.gmra.mrb[24].mxu1 %vm267_vm0, %v8802_v25  ;;  %v471_v36 = vadd.f32 %v7402_v28, %v253_v27 }
 0x124   :  { %v7403_v35 = vpop.f32.mrb[30].mxu0  ;;  %v463_v39 = vadd.f32 %v462_v32, %v251_v33 }
 0x125   :  { %v474_v37 = vadd.f32 %v7403_v35, %v254_v31  ;;  %v465_v38 = vpop.f32.mrb[31].mxu0 }
 0x126   :  { %v466_v40 = vadd.f32 %v465_v38, %v252_v34 }
 0x127   :  { %v8822_v41 = vpack.c.bf16 %v474_v37, %v471_v36 }
 0x128   :  { %v8824_v42 = vpack.c.bf16 %v466_v40, %v463_v39 }
 0x129   :  { %13132 = vst [vmem:[#allocation15_spill] sm:$0xff] %v8822_v41 }
 0x12a   :  { %13133 = vst [vmem:[#allocation16_spill] sm:$0xff] %v8824_v42  ;;  %7436 = vmatprep.mubr.msk.bf16.mxu1 %vm267_vm0, %v8824_v42 }
 0x12b   :  { %7437 = vmatmul.mubr.msk.bf16.gmra.mrb[28].mxu1 %vm267_vm0, %v8822_v41 }
 0x12c   :  { %1142 = vmatprep.mubr.bf16.mxu1 %v7741_v45 }
 0x1c6   :  { %v7410_v46 = vpop.f32.mrb[0].mxu1 }
 0x1c7   :  { %v591_v47 = vpop.f32.mrb[1].mxu1 }
 0x1c8   :  { %v7411_v48 = vpop.f32.mrb[2].mxu1 }
 0x1c9   :  { %v719_v49 = vpack.c.bf16 %v7411_v48, %v7410_v46  ;;  %v594_v50 = vpop.f32.mrb[3].mxu1  ;;  %v8836_v46 = vld [vmem:[%s13134_s1] ss:$8 sps:$4 sm:$0xff]   ;;  %v8848_v48 = vld [vmem:[%s13134_s1 + $0x10] ss:$8 sps:$4 sm:$0xff]  }
 0x1ca   :  { %v718_v51 = vpack.c.bf16 %v594_v50, %v591_v47  ;;  %v8841_v47 = vld [vmem:[%s13134_s1 + $0x14] ss:$8 sps:$4 sm:$0xff]   ;;  %v8860_v50 = vld [vmem:[%s13134_s1 + $0x20] ss:$8 sps:$4 sm:$0xff]  }
 0x1ce   :  { %v7414_v52 = vpop.f32.mrb[4].mxu1 }
 0x1cf   :  { %v607_v53 = vpop.f32.mrb[5].mxu1 }
 0x1d0   :  { %v7415_v54 = vpop.f32.mrb[6].mxu1 }
 0x1d1   :  { %v721_v55 = vpack.c.bf16 %v7415_v54, %v7414_v52  ;;  %v610_v56 = vpop.f32.mrb[7].mxu1  ;;  %v8872_v52 = vld [vmem:[%s13134_s1 + $0x30] ss:$8 sps:$4 sm:$0xff]   ;;  %v8884_v54 = vld [vmem:[%s13134_s1 + $0x40] ss:$8 sps:$4 sm:$0xff]  }
 0x1d2   :  { %v720_v59 = vpack.c.bf16 %v610_v56, %v607_v53  ;;  %v8877_v53 = vld [vmem:[%s13134_s1 + $0x44] ss:$8 sps:$4 sm:$0xff]   ;;  %v8896_v56 = vld [vmem:[%s13134_s1 + $0x50] ss:$8 sps:$4 sm:$0xff]  }
 0x1d6   :  { %v7418_v60 = vpop.f32.mrb[8].mxu1 }
 0x1d7   :  { %v623_v61 = vpop.f32.mrb[9].mxu1 }
 0x1d8   :  { %v7419_v62 = vpop.f32.mrb[10].mxu1 }
 0x1d9   :  { %v723_v63 = vpack.c.bf16 %v7419_v62, %v7418_v60  ;;  %v626_v0 = vpop.f32.mrb[11].mxu1  ;;  %v8908_v60 = vld [vmem:[%s13134_s1 + $0x60] ss:$8 sps:$4 sm:$0xff]   ;;  %v8920_v62 = vld [vmem:[%s13134_s1 + $0x70] ss:$8 sps:$4 sm:$0xff]  }
 0x1da   :  { %v722_v3 = vpack.c.bf16 %v626_v0, %v623_v61  ;;  %v8913_v61 = vld [vmem:[%s13134_s1 + $0x74] ss:$8 sps:$4 sm:$0xff]   ;;  %v8932_v0 = vld [vmem:[%s13134_s1 + $0x80] ss:$8 sps:$4 sm:$0xff]  }
 0x1de   :  { %v7422_v4 = vpop.f32.mrb[12].mxu1 }
 0x1df   :  { %v639_v5 = vpop.f32.mrb[13].mxu1 }
 0x1e0   :  { %v7423_v6 = vpop.f32.mrb[14].mxu1 }
 0x1e1   :  { %v725_v7 = vpack.c.bf16 %v7423_v6, %v7422_v4  ;;  %v642_v8 = vpop.f32.mrb[15].mxu1  ;;  %v8944_v4 = vld [vmem:[%s13134_s1 + $0x90] ss:$8 sps:$4 sm:$0xff]   ;;  %v8956_v6 = vld [vmem:[%s13134_s1 + $0xa0] ss:$8 sps:$4 sm:$0xff]  }
 0x1e2   :  { %v724_v11 = vpack.c.bf16 %v642_v8, %v639_v5  ;;  %v8949_v5 = vld [vmem:[%s13134_s1 + $0xa4] ss:$8 sps:$4 sm:$0xff]   ;;  %v8968_v8 = vld [vmem:[%s13134_s1 + $0xb0] ss:$8 sps:$4 sm:$0xff]  }
 0x1e6   :  { %v7426_v12 = vpop.f32.mrb[16].mxu1 }
 0x1e7   :  { %v655_v13 = vpop.f32.mrb[17].mxu1 }
 0x1e8   :  { %v7427_v14 = vpop.f32.mrb[18].mxu1 }
 0x1e9   :  { %v727_v17 = vpack.c.bf16 %v7427_v14, %v7426_v12  ;;  %v658_v18 = vpop.f32.mrb[19].mxu1  ;;  %v8980_v12 = vld [vmem:[%s13134_s1 + $0xc0] ss:$8 sps:$4 sm:$0xff]   ;;  %v8992_v14 = vld [vmem:[%s13134_s1 + $0xd0] ss:$8 sps:$4 sm:$0xff]  }
 0x1ea   :  { %v726_v19 = vpack.c.bf16 %v658_v18, %v655_v13  ;;  %v8985_v13 = vld [vmem:[%s13134_s1 + $0xd4] ss:$8 sps:$4 sm:$0xff]   ;;  %v9004_v18 = vld [vmem:[%s13134_s1 + $0xe0] ss:$8 sps:$4 sm:$0xff]  }
 0x1ec   :  { %6706 = vmatprep.subr.bf16.mxu0 %v726_v19  ;;  %v9009_v19 = vld [vmem:[%s13134_s1 + $0xf4] ss:$8 sps:$4 sm:$0xff]  }
 0x1ed   :  { %6707 = vmatpush3.bf16.msra.mxu0 %v718_v51  ;;  %v8865_v51 = vld [vmem:[%s13134_s1 + $0x34] ss:$8 sps:$4 sm:$0xff]  }
 0x1ee   :  { %v7430_v20 = vpop.f32.mrb[20].mxu1  ;;  %6708 = vmatprep.subr.bf16.mxu0 %v727_v17  ;;  %v8997_v17 = vld [vmem:[%s13134_s1 + $0xe4] ss:$8 sps:$4 sm:$0xff]  }
 0x1ef   :  { %v671_v21 = vpop.f32.mrb[21].mxu1 }
 0x1f0   :  { %v7431_v22 = vpop.f32.mrb[22].mxu1 }
 0x1f1   :  { %v729_v23 = vpack.c.bf16 %v7431_v22, %v7430_v20  ;;  %v674_v24 = vpop.f32.mrb[23].mxu1  ;;  %6709 = vmatpush3.bf16.msra.mxu0 %v719_v49  ;;  %v8853_v49 = vld [vmem:[%s13134_s1 + $0x24] ss:$8 sps:$4 sm:$0xff]   ;;  %v9016_v20 = vld [vmem:[%s13134_s1 + $0xf0] ss:$8 sps:$4 sm:$0xff]  }
 0x1f2   :  { %v728_v27 = vpack.c.bf16 %v674_v24, %v671_v21  ;;  %v9022_v22 = vld [vmem:[%s13135_s21] ss:$0 sm:$0xff] }
 0x1f4   :  { %6710 = vmatprep.subr.bf16.mxu0 %v728_v27 }
 0x1f5   :  { %6711 = vmatpush3.bf16.msra.mxu0 %v720_v59  ;;  %v8901_v59 = vld [vmem:[%s13134_s1 + $0x64] ss:$8 sps:$4 sm:$0xff]  }
 0x1f6   :  { %v7434_v28 = vpop.f32.mrb[24].mxu1  ;;  %6712 = vmatprep.subr.bf16.mxu0 %v729_v23 }
 0x1f7   :  { %v687_v31 = vpop.f32.mrb[25].mxu1 }
 0x1f8   :  { %v7435_v32 = vpop.f32.mrb[26].mxu1 }
 0x1f9   :  { %v731_v33 = vpack.c.bf16 %v7435_v32, %v7434_v28  ;;  %v690_v34 = vpop.f32.mrb[27].mxu1  ;;  %6713 = vmatpush3.bf16.msra.mxu0 %v721_v55  ;;  %v8889_v55 = vld [vmem:[%s13134_s1 + $0x54] ss:$8 sps:$4 sm:$0xff]  }
 0x1fa   :  { %v730_v35 = vpack.c.bf16 %v690_v34, %v687_v31 }
 0x1fc   :  { %6714 = vmatprep.subr.bf16.mxu0 %v730_v35 }
 0x1fd   :  { %6715 = vmatpush3.bf16.msra.mxu0 %v722_v3  ;;  %v8937_v3 = vld [vmem:[%s13134_s1 + $0x94] ss:$8 sps:$4 sm:$0xff]  }
 0x1fe   :  { %v7438_v36 = vpop.f32.mrb[28].mxu1  ;;  %6716 = vmatprep.subr.bf16.mxu0 %v731_v33 }
 0x1ff   :  { %v703_v37 = vpop.f32.mrb[29].mxu1 }
 0x200   :  { %v7439_v38 = vpop.f32.mrb[30].mxu1 }
 0x201   :  { %v733_v39 = vpack.c.bf16 %v7439_v38, %v7438_v36  ;;  %v706_v40 = vpop.f32.mrb[31].mxu1  ;;  %6717 = vmatpush3.bf16.msra.mxu0 %v723_v63  ;;  %v8925_v63 = vld [vmem:[%s13134_s1 + $0x84] ss:$8 sps:$4 sm:$0xff]  }
 0x202   :  { %v732_v45 = vpack.c.bf16 %v706_v40, %v703_v37 }
 0x204   :  { %6718 = vmatprep.subr.bf16.mxu0 %v732_v45 }
 0x205   :  { %6719 = vmatpush3.bf16.msra.mxu0 %v724_v11  ;;  %v8973_v11 = vld [vmem:[%s13134_s1 + $0xc4] ss:$8 sps:$4 sm:$0xff]  }
 0x206   :  { %6720 = vmatprep.subr.bf16.mxu0 %v733_v39 }
 0x209   :  { %6721 = vmatpush3.bf16.msra.mxu0 %v725_v7  ;;  %v8961_v7 = vld [vmem:[%s13134_s1 + $0xb4] ss:$8 sps:$4 sm:$0xff]  }
 0x20c   :  { %934 = vmatmul.mubr.bf16.vlgmr.msra.gmra.mrb[32].mxu0 %v8836_v46 }
 0x20d   :  { %941 = vmatprep.mubr.bf16.mxu0 %v8841_v47 }
 0x214   :  { %942 = vmatmul.mubr.bf16.gmra.mrb[36].mxu0 %v8848_v48 }
 0x215   :  { %949 = vmatprep.mubr.bf16.mxu0 %v8853_v49 }
 0x21c   :  { %950 = vmatmul.mubr.bf16.gmra.mrb[40].mxu0 %v8860_v50 }
 0x21d   :  { %957 = vmatprep.mubr.bf16.mxu0 %v8865_v51 }
 0x224   :  { %958 = vmatmul.mubr.bf16.gmra.mrb[44].mxu0 %v8872_v52 }
 0x225   :  { %965 = vmatprep.mubr.bf16.mxu0 %v8877_v53 }
 0x22c   :  { %966 = vmatmul.mubr.bf16.gmra.mrb[48].mxu0 %v8884_v54 }
 0x22d   :  { %973 = vmatprep.mubr.bf16.mxu0 %v8889_v55 }
 0x234   :  { %974 = vmatmul.mubr.bf16.gmra.mrb[52].mxu0 %v8896_v56 }
 0x235   :  { %981 = vmatprep.mubr.bf16.mxu0 %v8901_v59 }
 0x23c   :  { %982 = vmatmul.mubr.bf16.gmra.mrb[56].mxu0 %v8908_v60 }
 0x23d   :  { %989 = vmatprep.mubr.bf16.mxu0 %v8913_v61 }
 0x244   :  { %990 = vmatmul.mubr.bf16.gmra.mrb[60].mxu0 %v8920_v62 }
 0x245   :  { %997 = vmatprep.mubr.bf16.mxu0 %v8925_v63 }
 0x24c   :  { %998 = vmatmul.mubr.bf16.gmra.mrb[64].mxu0 %v8932_v0 }
 0x24d   :  { %1005 = vmatprep.mubr.bf16.mxu0 %v8937_v3 }
 0x254   :  { %1006 = vmatmul.mubr.bf16.gmra.mrb[68].mxu0 %v8944_v4 }
 0x255   :  { %1013 = vmatprep.mubr.bf16.mxu0 %v8949_v5 }
 0x25c   :  { %1014 = vmatmul.mubr.bf16.gmra.mrb[72].mxu0 %v8956_v6 }
 0x25d   :  { %1021 = vmatprep.mubr.bf16.mxu0 %v8961_v7 }
 0x264   :  { %1022 = vmatmul.mubr.bf16.gmra.mrb[76].mxu0 %v8968_v8 }
 0x265   :  { %1029 = vmatprep.mubr.bf16.mxu0 %v8973_v11 }
 0x26c   :  { %1030 = vmatmul.mubr.bf16.gmra.mrb[80].mxu0 %v8980_v12 }
 0x26d   :  { %1037 = vmatprep.mubr.bf16.mxu0 %v8985_v13 }
 0x274   :  { %1038 = vmatmul.mubr.bf16.gmra.mrb[84].mxu0 %v8992_v14 }
 0x275   :  { %1045 = vmatprep.mubr.bf16.mxu0 %v8997_v17 }
 0x27c   :  { %1046 = vmatmul.mubr.bf16.gmra.mrb[88].mxu0 %v9004_v18 }
 0x27d   :  { %1053 = vmatprep.mubr.bf16.mxu0 %v9009_v19 }
 0x284   :  { %1054 = vmatmul.mubr.bf16.gmra.mrb[92].mxu0 %v9016_v20 }
 0x2df   :  { %v6722_v21 = vpop.f32.mrb[32].mxu0 }
 0x2e0   :  { %v6723_v23 = vpop.f32.mrb[33].mxu0 }
 0x2e1   :  { %v6724_v24 = vadd.f32 %v6723_v23, %v6722_v21  ;;  %v6725_v27 = vpop.f32.mrb[34].mxu0 }
 0x2e2   :  { %v6726_v28 = vpop.f32.mrb[35].mxu0 }
 0x2e3   :  { %v936_v31 = vadd.f32 %v6724_v24, %v9022_v22  ;;  %v6727_v32 = vadd.f32 %v6726_v28, %v6725_v27 }
 0x2e5   :  { %v939_v33 = vadd.f32 %v6727_v32, %v9022_v22  ;;  %v1062_v34 = vmax.f32 %v936_v31, 0.0 }
 0x2e7   :  { %v1063_v35 = vmax.f32 %v939_v33, 0.0  ;;  %v6728_v36 = vpop.f32.mrb[36].mxu0 }
 0x2e8   :  { %v6729_v37 = vpop.f32.mrb[37].mxu0 }
 0x2e9   :  { %v9026_v38 = vpack.c.bf16 %v1063_v35, %v1062_v34  ;;  %v6730_v39 = vadd.f32 %v6729_v37, %v6728_v36  ;;  %v6731_v40 = vpop.f32.mrb[38].mxu0 }
 0x2ea   :  { %v6732_v45 = vpop.f32.mrb[39].mxu0 }
 0x2eb   :  { %v944_v41 = vadd.f32 %v6730_v39, %v9022_v22  ;;  %v6733_v42 = vadd.f32 %v6732_v45, %v6731_v40 }
 0x2ed   :  { %v947_v21 = vadd.f32 %v6733_v42, %v9022_v22  ;;  %v1064_v23 = vmax.f32 %v944_v41, 0.0 }
 0x2ef   :  { %v1065_v25 = vmax.f32 %v947_v21, 0.0  ;;  %v6734_v24 = vpop.f32.mrb[40].mxu0 }
 0x2f0   :  { %v6735_v27 = vpop.f32.mrb[41].mxu0 }
 0x2f1   :  { %v9030_v28 = vpack.c.bf16 %v1065_v25, %v1064_v23  ;;  %v6736_v31 = vadd.f32 %v6735_v27, %v6734_v24  ;;  %v6737_v32 = vpop.f32.mrb[42].mxu0 }
 0x2f2   :  { %v6738_v33 = vpop.f32.mrb[43].mxu0 }
 0x2f3   :  { %v952_v34 = vadd.f32 %v6736_v31, %v9022_v22  ;;  %v6739_v35 = vadd.f32 %v6738_v33, %v6737_v32 }
 0x2f5   :  { %v955_v36 = vadd.f32 %v6739_v35, %v9022_v22  ;;  %v1066_v37 = vmax.f32 %v952_v34, 0.0 }
 0x2f7   :  { %v1067_v26 = vmax.f32 %v955_v36, 0.0  ;;  %v6740_v39 = vpop.f32.mrb[44].mxu0 }
 0x2f8   :  { %v6741_v40 = vpop.f32.mrb[45].mxu0 }
 0x2f9   :  { %v9034_v45 = vpack.c.bf16 %v1067_v26, %v1066_v37  ;;  %v6742_v41 = vadd.f32 %v6741_v40, %v6740_v39  ;;  %v6743_v42 = vpop.f32.mrb[46].mxu0 }
 0x2fa   :  { %v6744_v21 = vpop.f32.mrb[47].mxu0 }
 0x2fb   :  { %v960_v25 = vadd.f32 %v6742_v41, %v9022_v22  ;;  %v6745_v23 = vadd.f32 %v6744_v21, %v6743_v42 }
 0x2fd   :  { %v963_v24 = vadd.f32 %v6745_v23, %v9022_v22  ;;  %v1068_v27 = vmax.f32 %v960_v25, 0.0 }
 0x2ff   :  { %v1069_v9 = vmax.f32 %v963_v24, 0.0  ;;  %v6746_v31 = vpop.f32.mrb[48].mxu0 }
 0x300   :  { %v6747_v32 = vpop.f32.mrb[49].mxu0 }
 0x301   :  { %v9038_v33 = vpack.c.bf16 %v1069_v9, %v1068_v27  ;;  %v6748_v34 = vadd.f32 %v6747_v32, %v6746_v31  ;;  %v6749_v35 = vpop.f32.mrb[50].mxu0 }
 0x302   :  { %v6750_v36 = vpop.f32.mrb[51].mxu0 }
 0x303   :  { %v968_v26 = vadd.f32 %v6748_v34, %v9022_v22  ;;  %v6751_v37 = vadd.f32 %v6750_v36, %v6749_v35 }
 0x305   :  { %v971_v39 = vadd.f32 %v6751_v37, %v9022_v22  ;;  %v1070_v40 = vmax.f32 %v968_v26, 0.0 }
 0x307   :  { %v1071_v10 = vmax.f32 %v971_v39, 0.0  ;;  %v6752_v41 = vpop.f32.mrb[52].mxu0 }
 0x308   :  { %v6753_v42 = vpop.f32.mrb[53].mxu0 }
 0x309   :  { %v9042_v21 = vpack.c.bf16 %v1071_v10, %v1070_v40  ;;  %v6754_v25 = vadd.f32 %v6753_v42, %v6752_v41  ;;  %v6755_v23 = vpop.f32.mrb[54].mxu0 }
 0x30a   :  { %v6756_v24 = vpop.f32.mrb[55].mxu0 }
 0x30b   :  { %v976_v9 = vadd.f32 %v6754_v25, %v9022_v22  ;;  %v6757_v27 = vadd.f32 %v6756_v24, %v6755_v23 }
 0x30d   :  { %v979_v31 = vadd.f32 %v6757_v27, %v9022_v22  ;;  %v1072_v32 = vmax.f32 %v976_v9, 0.0 }
 0x30f   :  { %v1073_v57 = vmax.f32 %v979_v31, 0.0  ;;  %v6758_v34 = vpop.f32.mrb[56].mxu0 }
 0x310   :  { %v6759_v35 = vpop.f32.mrb[57].mxu0 }
 0x311   :  { %v9046_v36 = vpack.c.bf16 %v1073_v57, %v1072_v32  ;;  %v6760_v26 = vadd.f32 %v6759_v35, %v6758_v34  ;;  %v6761_v37 = vpop.f32.mrb[58].mxu0 }
 0x312   :  { %v6762_v39 = vpop.f32.mrb[59].mxu0 }
 0x313   :  { %v984_v10 = vadd.f32 %v6760_v26, %v9022_v22  ;;  %v6763_v40 = vadd.f32 %v6762_v39, %v6761_v37 }
 0x315   :  { %v987_v41 = vadd.f32 %v6763_v40, %v9022_v22  ;;  %v1074_v42 = vmax.f32 %v984_v10, 0.0 }
 0x317   :  { %v1075_v58 = vmax.f32 %v987_v41, 0.0  ;;  %v6764_v25 = vpop.f32.mrb[60].mxu0 }
 0x318   :  { %v6765_v23 = vpop.f32.mrb[61].mxu0 }
 0x319   :  { %v9050_v24 = vpack.c.bf16 %v1075_v58, %v1074_v42  ;;  %v6766_v9 = vadd.f32 %v6765_v23, %v6764_v25  ;;  %v6767_v27 = vpop.f32.mrb[62].mxu0 }
 0x31a   :  { %v6768_v31 = vpop.f32.mrb[63].mxu0 }
 0x31b   :  { %v992_v57 = vadd.f32 %v6766_v9, %v9022_v22  ;;  %v6769_v32 = vadd.f32 %v6768_v31, %v6767_v27 }
 0x31d   :  { %v995_v34 = vadd.f32 %v6769_v32, %v9022_v22  ;;  %v1076_v35 = vmax.f32 %v992_v57, 0.0 }
 0x31f   :  { %v1077_v43 = vmax.f32 %v995_v34, 0.0  ;;  %v6770_v26 = vpop.f32.mrb[64].mxu0 }
 0x320   :  { %v6771_v37 = vpop.f32.mrb[65].mxu0 }
 0x321   :  { %v9054_v39 = vpack.c.bf16 %v1077_v43, %v1076_v35  ;;  %v6772_v10 = vadd.f32 %v6771_v37, %v6770_v26  ;;  %v6773_v40 = vpop.f32.mrb[66].mxu0 }
 0x322   :  { %v6774_v41 = vpop.f32.mrb[67].mxu0 }
 0x323   :  { %v1000_v58 = vadd.f32 %v6772_v10, %v9022_v22  ;;  %v6775_v42 = vadd.f32 %v6774_v41, %v6773_v40 }
 0x325   :  { %v1003_v25 = vadd.f32 %v6775_v42, %v9022_v22  ;;  %v1078_v23 = vmax.f32 %v1000_v58, 0.0 }
 0x327   :  { %v1079_v44 = vmax.f32 %v1003_v25, 0.0  ;;  %v6776_v9 = vpop.f32.mrb[68].mxu0 }
 0x328   :  { %v6777_v27 = vpop.f32.mrb[69].mxu0 }
 0x329   :  { %v6778_v31 = vadd.f32 %v6777_v27, %v6776_v9  ;;  %v6779_v32 = vpop.f32.mrb[70].mxu0  ;;  %v1102_v57 = vpack.c.bf16 %v1079_v44, %v1078_v23 }
 0x32a   :  { %v6780_v34 = vpop.f32.mrb[71].mxu0 }
 0x32b   :  { %v1008_v29 = vadd.f32 %v6778_v31, %v9022_v22  ;;  %v6781_v43 = vadd.f32 %v6780_v34, %v6779_v32  ;;  %6818 = vmatprep.subr.bf16.mxu1 %v1102_v57 }
 0x32c   :  { %6819 = vmatpush3.bf16.msra.mxu1 %v9026_v38 }
 0x32d   :  { %v1011_v35 = vadd.f32 %v6781_v43, %v9022_v22  ;;  %v1080_v26 = vmax.f32 %v1008_v29, 0.0 }
 0x32f   :  { %v1081_v37 = vmax.f32 %v1011_v35, 0.0  ;;  %v6782_v10 = vpop.f32.mrb[72].mxu0 }
 0x330   :  { %v6783_v40 = vpop.f32.mrb[73].mxu0 }
 0x331   :  { %v6784_v41 = vadd.f32 %v6783_v40, %v6782_v10  ;;  %v6785_v58 = vpop.f32.mrb[74].mxu0  ;;  %v1103_v42 = vpack.c.bf16 %v1081_v37, %v1080_v26 }
 0x332   :  { %v6786_v25 = vpop.f32.mrb[75].mxu0 }
 0x333   :  { %v1016_v9 = vadd.f32 %v6784_v41, %v9022_v22  ;;  %v6787_v44 = vadd.f32 %v6786_v25, %v6785_v58  ;;  %6820 = vmatprep.subr.bf16.mxu1 %v1103_v42 }
 0x334   :  { %6821 = vmatpush3.bf16.msra.mxu1 %v9030_v28 }
 0x335   :  { %v1019_v23 = vadd.f32 %v6787_v44, %v9022_v22  ;;  %v1082_v27 = vmax.f32 %v1016_v9, 0.0 }
 0x337   :  { %v1083_v38 = vmax.f32 %v1019_v23, 0.0  ;;  %v6788_v31 = vpop.f32.mrb[76].mxu0 }
 0x338   :  { %v6789_v32 = vpop.f32.mrb[77].mxu0 }
 0x339   :  { %v6790_v29 = vadd.f32 %v6789_v32, %v6788_v31  ;;  %v6791_v57 = vpop.f32.mrb[78].mxu0  ;;  %v1104_v34 = vpack.c.bf16 %v1083_v38, %v1082_v27 }
 0x33a   :  { %v6792_v43 = vpop.f32.mrb[79].mxu0 }
 0x33b   :  { %v1024_v35 = vadd.f32 %v6790_v29, %v9022_v22  ;;  %v6793_v26 = vadd.f32 %v6792_v43, %v6791_v57  ;;  %6822 = vmatprep.subr.bf16.mxu1 %v1104_v34 }
 0x33c   :  { %6823 = vmatpush3.bf16.msra.mxu1 %v9034_v45 }
 0x33d   :  { %v1027_v37 = vadd.f32 %v6793_v26, %v9022_v22  ;;  %v1084_v10 = vmax.f32 %v1024_v35, 0.0 }
 0x33f   :  { %v1085_v28 = vmax.f32 %v1027_v37, 0.0  ;;  %v6794_v40 = vpop.f32.mrb[80].mxu0 }
 0x340   :  { %v6795_v41 = vpop.f32.mrb[81].mxu0 }
 0x341   :  { %v6796_v58 = vadd.f32 %v6795_v41, %v6794_v40  ;;  %v6797_v42 = vpop.f32.mrb[82].mxu0  ;;  %v1105_v25 = vpack.c.bf16 %v1085_v28, %v1084_v10 }
 0x342   :  { %v6798_v9 = vpop.f32.mrb[83].mxu0 }
 0x343   :  { %v1032_v44 = vadd.f32 %v6796_v58, %v9022_v22  ;;  %v6799_v23 = vadd.f32 %v6798_v9, %v6797_v42  ;;  %6824 = vmatprep.subr.bf16.mxu1 %v1105_v25 }
 0x344   :  { %6825 = vmatpush3.bf16.msra.mxu1 %v9038_v33 }
 0x345   :  { %v1035_v27 = vadd.f32 %v6799_v23, %v9022_v22  ;;  %v1086_v38 = vmax.f32 %v1032_v44, 0.0 }
 0x347   :  { %v1087_v45 = vmax.f32 %v1035_v27, 0.0  ;;  %v6800_v31 = vpop.f32.mrb[84].mxu0 }
 0x348   :  { %v6801_v32 = vpop.f32.mrb[85].mxu0 }
 0x349   :  { %v6802_v29 = vadd.f32 %v6801_v32, %v6800_v31  ;;  %v6803_v57 = vpop.f32.mrb[86].mxu0  ;;  %v1106_v34 = vpack.c.bf16 %v1087_v45, %v1086_v38 }
 0x34a   :  { %v6804_v43 = vpop.f32.mrb[87].mxu0 }
 0x34b   :  { %v1040_v35 = vadd.f32 %v6802_v29, %v9022_v22  ;;  %v6805_v26 = vadd.f32 %v6804_v43, %v6803_v57  ;;  %6826 = vmatprep.subr.bf16.mxu1 %v1106_v34 }
 0x34c   :  { %6827 = vmatpush3.bf16.msra.mxu1 %v9042_v21 }
 0x34d   :  { %v1043_v37 = vadd.f32 %v6805_v26, %v9022_v22  ;;  %v1088_v10 = vmax.f32 %v1040_v35, 0.0 }
 0x34f   :  { %v1089_v33 = vmax.f32 %v1043_v37, 0.0  ;;  %v6806_v28 = vpop.f32.mrb[88].mxu0 }
 0x350   :  { %v6807_v40 = vpop.f32.mrb[89].mxu0 }
 0x351   :  { %v6808_v41 = vadd.f32 %v6807_v40, %v6806_v28  ;;  %v6809_v58 = vpop.f32.mrb[90].mxu0  ;;  %v1107_v42 = vpack.c.bf16 %v1089_v33, %v1088_v10  ;;  %v7787_v10 = vld [vmem:[%s12864_s9] sm:$0xff]   ;;  %v7788_v33 = vld [vmem:[%s12864_s9 + $0x8] sm:$0xff]   ;;  %s8419_s9 = smov 112  }
 0x352   :  { %v6810_v25 = vpop.f32.mrb[91].mxu0 }
 0x353   :  { %v1048_v9 = vadd.f32 %v6808_v41, %v9022_v22  ;;  %v6811_v44 = vadd.f32 %v6810_v25, %v6809_v58  ;;  %6828 = vmatprep.subr.bf16.mxu1 %v1107_v42 }
 0x354   :  { %6829 = vmatpush3.bf16.msra.mxu1 %v9046_v36 }
 0x355   :  { %v1051_v23 = vadd.f32 %v6811_v44, %v9022_v22  ;;  %v1090_v27 = vmax.f32 %v1048_v9, 0.0 }
 0x357   :  { %v1091_v21 = vmax.f32 %v1051_v23, 0.0  ;;  %v6812_v38 = vpop.f32.mrb[92].mxu0 }
 0x358   :  { %v6813_v45 = vpop.f32.mrb[93].mxu0 }
 0x359   :  { %v6814_v31 = vadd.f32 %v6813_v45, %v6812_v38  ;;  %v6815_v32 = vpop.f32.mrb[94].mxu0  ;;  %v1108_v29 = vpack.c.bf16 %v1091_v21, %v1090_v27 }
 0x35a   :  { %v6816_v57 = vpop.f32.mrb[95].mxu0 }
 0x35b   :  { %v1056_v34 = vadd.f32 %v6814_v31, %v9022_v22  ;;  %v6817_v43 = vadd.f32 %v6816_v57, %v6815_v32  ;;  %6830 = vmatprep.subr.bf16.mxu1 %v1108_v29 }
 0x35c   :  { %6831 = vmatpush3.bf16.msra.mxu1 %v9050_v24 }
 0x35d   :  { %v1059_v35 = vadd.f32 %v6817_v43, %v9022_v22  ;;  %v1092_v26 = vmax.f32 %v1056_v34, 0.0 }
 0x35f   :  { %v1093_v36 = vmax.f32 %v1059_v35, 0.0 }
 0x361   :  { %v1109_v37 = vpack.c.bf16 %v1093_v36, %v1092_v26 }
 0x363   :  { %6832 = vmatprep.subr.bf16.mxu1 %v1109_v37 }
 0x364   :  { %6833 = vmatpush3.bf16.msra.mxu1 %v9054_v39 }
 0x365   :  { %7488 = vmatprep.subr.bf16.mxu1 %v7787_v10 }
 0x367   :  { %1143 = vmatmul.mubr.bf16.vlgmr.msra.gmra.mrb[32].mxu1 %v8836_v46  ;;  %v7789_v46 = vld [vmem:[%s12862_s7] sm:$0xff]  }
 0x368   :  { %1150 = vmatprep.mubr.bf16.mxu1 %v8841_v47  ;;  %7489 = vmatpush3.bf16.msra.mxu1 %v7787_v10  ;;  %v7790_v47 = vld [vmem:[%s12862_s7 + $0x8] sm:$0xff]  }
 0x369   :  { %7490 = vmatprep.subr.bf16.mxu1 %v7788_v33  ;;  %7440 = vmatprep.subr.bf16.mxu0 %v7789_v46 }
 0x36a   :  { %7441 = vmatpush3.bf16.msra.mxu0 %v7789_v46 }
 0x36b   :  { %7442 = vmatprep.subr.bf16.mxu0 %v7790_v47 }
 0x36c   :  { %7491 = vmatpush3.bf16.msra.mxu1 %v7788_v33 }
 0x36e   :  { %7443 = vmatpush3.bf16.msra.mxu0 %v7790_v47 }
 0x36f   :  { %1151 = vmatmul.mubr.bf16.gmra.mrb[36].mxu1 %v8848_v48  ;;  %v7791_v48 = vld [vmem:[%s12862_s7 + $0x10] sm:$0xff]  }
 0x370   :  { %1158 = vmatprep.mubr.bf16.mxu1 %v8853_v49  ;;  %7444 = vmatprep.subr.bf16.mxu0 %v7791_v48  ;;  %v7792_v49 = vld [vmem:[%s12862_s7 + $0x18] sm:$0xff]  }
 0x372   :  { %7445 = vmatpush3.bf16.msra.mxu0 %v7791_v48 }
 0x373   :  { %7446 = vmatprep.subr.bf16.mxu0 %v7792_v49 }
 0x376   :  { %7447 = vmatpush3.bf16.msra.mxu0 %v7792_v49 }
 0x377   :  { %1159 = vmatmul.mubr.bf16.gmra.mrb[40].mxu1 %v8860_v50  ;;  %v7793_v50 = vld [vmem:[%s12862_s7 + $0x20] sm:$0xff]  }
 0x378   :  { %1166 = vmatprep.mubr.bf16.mxu1 %v8865_v51  ;;  %7448 = vmatprep.subr.bf16.mxu0 %v7793_v50  ;;  %v7794_v51 = vld [vmem:[%s12862_s7 + $0x28] sm:$0xff]  }
 0x37a   :  { %7449 = vmatpush3.bf16.msra.mxu0 %v7793_v50 }
 0x37b   :  { %7450 = vmatprep.subr.bf16.mxu0 %v7794_v51 }
 0x37e   :  { %7451 = vmatpush3.bf16.msra.mxu0 %v7794_v51 }
 0x37f   :  { %1167 = vmatmul.mubr.bf16.gmra.mrb[44].mxu1 %v8872_v52  ;;  %v7795_v52 = vld [vmem:[%s12862_s7 + $0x30] sm:$0xff]  }
 0x380   :  { %1174 = vmatprep.mubr.bf16.mxu1 %v8877_v53  ;;  %7452 = vmatprep.subr.bf16.mxu0 %v7795_v52  ;;  %v7796_v53 = vld [vmem:[%s12862_s7 + $0x38] sm:$0xff]  }
 0x382   :  { %7453 = vmatpush3.bf16.msra.mxu0 %v7795_v52 }
 0x383   :  { %7454 = vmatprep.subr.bf16.mxu0 %v7796_v53 }
 0x386   :  { %7455 = vmatpush3.bf16.msra.mxu0 %v7796_v53 }
 0x387   :  { %1175 = vmatmul.mubr.bf16.gmra.mrb[48].mxu1 %v8884_v54  ;;  %v13136_v54 = vld [vmem:[#allocation6_spill] sm:$0xff] }
 0x388   :  { %1182 = vmatprep.mubr.bf16.mxu1 %v8889_v55  ;;  %v13137_v55 = vld [vmem:[#allocation8_spill] sm:$0xff] }
 0x38f   :  { %1183 = vmatmul.mubr.bf16.gmra.mrb[52].mxu1 %v8896_v56  ;;  %v13138_v56 = vld [vmem:[#allocation7_spill] sm:$0xff] }
 0x390   :  { %1190 = vmatprep.mubr.bf16.mxu1 %v8901_v59  ;;  %v13144_v59 = vld [vmem:[#allocation13_spill] sm:$0xff] }
 0x397   :  { %1191 = vmatmul.mubr.bf16.gmra.mrb[56].mxu1 %v8908_v60  ;;  %v13145_v60 = vld [vmem:[#allocation16_spill] sm:$0xff] }
 0x398   :  { %1198 = vmatprep.mubr.bf16.mxu1 %v8913_v61  ;;  %v13146_v61 = vld [vmem:[#allocation15_spill] sm:$0xff] }
 0x39f   :  { %1199 = vmatmul.mubr.bf16.gmra.mrb[60].mxu1 %v8920_v62 }
 0x3a0   :  { %1206 = vmatprep.mubr.bf16.mxu1 %v8925_v63 }
 0x3a7   :  { %1207 = vmatmul.mubr.bf16.gmra.mrb[64].mxu1 %v8932_v0 }
 0x3a8   :  { %1214 = vmatprep.mubr.bf16.mxu1 %v8937_v3 }
 0x3af   :  { %1215 = vmatmul.mubr.bf16.gmra.mrb[68].mxu1 %v8944_v4 }
 0x3b0   :  { %1222 = vmatprep.mubr.bf16.mxu1 %v8949_v5 }
 0x3b7   :  { %1223 = vmatmul.mubr.bf16.gmra.mrb[72].mxu1 %v8956_v6 }
 0x3b8   :  { %1230 = vmatprep.mubr.bf16.mxu1 %v8961_v7 }
 0x3bf   :  { %1231 = vmatmul.mubr.bf16.gmra.mrb[76].mxu1 %v8968_v8 }
 0x3c0   :  { %1238 = vmatprep.mubr.bf16.mxu1 %v8973_v11 }
 0x3c7   :  { %1239 = vmatmul.mubr.bf16.gmra.mrb[80].mxu1 %v8980_v12 }
 0x3c8   :  { %1246 = vmatprep.mubr.bf16.mxu1 %v8985_v13 }
 0x3cf   :  { %1247 = vmatmul.mubr.bf16.gmra.mrb[84].mxu1 %v8992_v14 }
 0x3d0   :  { %1254 = vmatprep.mubr.bf16.mxu1 %v8997_v17 }
 0x3d7   :  { %1255 = vmatmul.mubr.bf16.gmra.mrb[88].mxu1 %v9004_v18 }
 0x3d8   :  { %1262 = vmatprep.mubr.bf16.mxu1 %v9009_v19 }
 0x3df   :  { %1263 = vmatmul.mubr.bf16.gmra.mrb[92].mxu1 %v9016_v20 }
 0x3e0   :  { %7492 = vmatprep.mubr.msk.bf16.mxu1 %vm267_vm0, %v8684_v2  ;;  %v13139_v2 = vld [vmem:[#allocation10_spill] sm:$0xff] }
 0x3e7   :  { %7493 = vmatmul.mubr.msk.bf16.vlgmr.msra.gmra.mrb[96].mxu1 %vm267_vm0, %v8682_v1  ;;  %v13140_v1 = vld [vmem:[#allocation9_spill] sm:$0xff] }
 0x3e8   :  { %7496 = vmatprep.mubr.msk.bf16.mxu1 %vm267_vm0, %v8704_v16  ;;  %v13141_v16 = vld [vmem:[#allocation12_spill] sm:$0xff] }
 0x3ef   :  { %7497 = vmatmul.mubr.msk.bf16.gmra.mrb[100].mxu1 %vm267_vm0, %v8702_v15  ;;  %v13142_v15 = vld [vmem:[#allocation11_spill] sm:$0xff] }
 0x3f0   :  { %7500 = vmatprep.mubr.msk.bf16.mxu1 %vm267_vm0, %v8724_v30  ;;  %v13143_v30 = vld [vmem:[#allocation14_spill] sm:$0xff] }
 0x3f7   :  { %7501 = vmatmul.mubr.msk.bf16.gmra.mrb[104].mxu1 %vm267_vm0, %v13136_v54 }
 0x3f8   :  { %7504 = vmatprep.mubr.msk.bf16.mxu1 %vm267_vm0, %v13137_v55 }
 0x3ff   :  { %7505 = vmatmul.mubr.msk.bf16.gmra.mrb[108].mxu1 %vm267_vm0, %v13138_v56 }
 0x400   :  { %7508 = vmatprep.mubr.msk.bf16.mxu1 %vm267_vm0, %v13139_v2 }
 0x407   :  { %7509 = vmatmul.mubr.msk.bf16.gmra.mrb[112].mxu1 %vm267_vm0, %v13140_v1 }
 0x408   :  { %7512 = vmatprep.mubr.msk.bf16.mxu1 %vm267_vm0, %v13141_v16 }
 0x40f   :  { %7513 = vmatmul.mubr.msk.bf16.gmra.mrb[116].mxu1 %vm267_vm0, %v13142_v15 }
 0x410   :  { %7516 = vmatprep.mubr.msk.bf16.mxu1 %vm267_vm0, %v13143_v30 }
 0x417   :  { %7517 = vmatmul.mubr.msk.bf16.gmra.mrb[120].mxu1 %vm267_vm0, %v13144_v59 }
 0x418   :  { %7520 = vmatprep.mubr.msk.bf16.mxu1 %vm267_vm0, %v13145_v60 }
 0x41f   :  { %7521 = vmatmul.mubr.msk.bf16.gmra.mrb[124].mxu1 %vm267_vm0, %v13146_v61 }
 0x43a   :  { %v6834_v62 = vpop.f32.mrb[32].mxu1 }
 0x43b   :  { %v6835_v63 = vpop.f32.mrb[33].mxu1 }
 0x43c   :  { %v6836_v0 = vadd.f32 %v6835_v63, %v6834_v62  ;;  %v6837_v3 = vpop.f32.mrb[34].mxu1 }
 0x43d   :  { %v6838_v4 = vpop.f32.mrb[35].mxu1 }
 0x43e   :  { %v6839_v5 = vadd.f32 %v6838_v4, %v6837_v3 }
 0x440   :  { %v1271_v6 = vpack.c.bf16 %v6839_v5, %v6836_v0 }
 0x442   :  { %v6840_v7 = vpop.f32.mrb[36].mxu1  ;;  %7456 = vmatprep.mubr.bf16.mxu0 %v1271_v6 }
 0x443   :  { %v6841_v8 = vpop.f32.mrb[37].mxu1 }
 0x444   :  { %v6842_v11 = vadd.f32 %v6841_v8, %v6840_v7  ;;  %v6843_v12 = vpop.f32.mrb[38].mxu1 }
 0x445   :  { %v6844_v13 = vpop.f32.mrb[39].mxu1 }
 0x446   :  { %v6845_v14 = vadd.f32 %v6844_v13, %v6843_v12 }
 0x448   :  { %v1272_v17 = vpack.c.bf16 %v6845_v14, %v6842_v11 }
 0x44a   :  { %7457 = vmatmul.mubr.bf16.vlgmr.msra.gmra.mrb[96].mxu0 %v1272_v17  ;;  %v6846_v18 = vpop.f32.mrb[40].mxu1 }
 0x44b   :  { %v6847_v19 = vpop.f32.mrb[41].mxu1 }
 0x44c   :  { %v6848_v20 = vadd.f32 %v6847_v19, %v6846_v18  ;;  %v6849_v22 = vpop.f32.mrb[42].mxu1 }
 0x44d   :  { %v6850_v24 = vpop.f32.mrb[43].mxu1 }
 0x44e   :  { %v6851_v39 = vadd.f32 %v6850_v24, %v6849_v22 }
 0x450   :  { %v1273_v28 = vpack.c.bf16 %v6851_v39, %v6848_v20 }
 0x452   :  { %v6852_v40 = vpop.f32.mrb[44].mxu1  ;;  %7460 = vmatprep.mubr.bf16.mxu0 %v1273_v28 }
 0x453   :  { %v6853_v41 = vpop.f32.mrb[45].mxu1 }
 0x454   :  { %v6854_v58 = vadd.f32 %v6853_v41, %v6852_v40  ;;  %v6855_v42 = vpop.f32.mrb[46].mxu1 }
 0x455   :  { %v6856_v25 = vpop.f32.mrb[47].mxu1 }
 0x456   :  { %v6857_v9 = vadd.f32 %v6856_v25, %v6855_v42 }
 0x458   :  { %v1274_v44 = vpack.c.bf16 %v6857_v9, %v6854_v58 }
 0x45a   :  { %7461 = vmatmul.mubr.bf16.gmra.mrb[100].mxu0 %v1274_v44  ;;  %v6858_v23 = vpop.f32.mrb[48].mxu1 }
 0x45b   :  { %v6859_v27 = vpop.f32.mrb[49].mxu1 }
 0x45c   :  { %v6860_v21 = vadd.f32 %v6859_v27, %v6858_v23  ;;  %v6861_v38 = vpop.f32.mrb[50].mxu1 }
 0x45d   :  { %v6862_v45 = vpop.f32.mrb[51].mxu1 }
 0x45e   :  { %v6863_v31 = vadd.f32 %v6862_v45, %v6861_v38 }
 0x460   :  { %v1275_v32 = vpack.c.bf16 %v6863_v31, %v6860_v21 }
 0x462   :  { %v6864_v29 = vpop.f32.mrb[52].mxu1  ;;  %7464 = vmatprep.mubr.bf16.mxu0 %v1275_v32 }
 0x463   :  { %v6865_v57 = vpop.f32.mrb[53].mxu1 }
 0x464   :  { %v6866_v34 = vadd.f32 %v6865_v57, %v6864_v29  ;;  %v6867_v43 = vpop.f32.mrb[54].mxu1 }
 0x465   :  { %v6868_v35 = vpop.f32.mrb[55].mxu1 }
 0x466   :  { %v6869_v26 = vadd.f32 %v6868_v35, %v6867_v43 }
 0x468   :  { %v1276_v36 = vpack.c.bf16 %v6869_v26, %v6866_v34 }
 0x46a   :  { %7465 = vmatmul.mubr.bf16.gmra.mrb[104].mxu0 %v1276_v36  ;;  %v6870_v37 = vpop.f32.mrb[56].mxu1 }
 0x46b   :  { %v6871_v10 = vpop.f32.mrb[57].mxu1 }
 0x46c   :  { %v6872_v33 = vadd.f32 %v6871_v10, %v6870_v37  ;;  %v6873_v46 = vpop.f32.mrb[58].mxu1 }
 0x46d   :  { %v6874_v47 = vpop.f32.mrb[59].mxu1 }
 0x46e   :  { %v6875_v48 = vadd.f32 %v6874_v47, %v6873_v46 }
 0x470   :  { %v1277_v49 = vpack.c.bf16 %v6875_v48, %v6872_v33 }
 0x472   :  { %v6876_v50 = vpop.f32.mrb[60].mxu1  ;;  %7468 = vmatprep.mubr.bf16.mxu0 %v1277_v49 }
 0x473   :  { %v6877_v51 = vpop.f32.mrb[61].mxu1 }
 0x474   :  { %v6878_v52 = vadd.f32 %v6877_v51, %v6876_v50  ;;  %v6879_v53 = vpop.f32.mrb[62].mxu1  ;;  %v9176_v50 = vld [vmem:[%s12865_s10] ss:$0 sm:$0xff]  ;;  %s8420_s10 = smov 64  }
 0x475   :  { %v6880_v54 = vpop.f32.mrb[63].mxu1 }
 0x476   :  { %v6881_v55 = vadd.f32 %v6880_v54, %v6879_v53 }
 0x478   :  { %v1278_v56 = vpack.c.bf16 %v6881_v55, %v6878_v52 }
 0x47a   :  { %7469 = vmatmul.mubr.bf16.gmra.mrb[108].mxu0 %v1278_v56  ;;  %v6882_v2 = vpop.f32.mrb[64].mxu1 }
 0x47b   :  { %v6883_v1 = vpop.f32.mrb[65].mxu1 }
 0x47c   :  { %v6884_v16 = vadd.f32 %v6883_v1, %v6882_v2  ;;  %v6885_v15 = vpop.f32.mrb[66].mxu1 }
 0x47d   :  { %v6886_v30 = vpop.f32.mrb[67].mxu1 }
 0x47e   :  { %v6887_v59 = vadd.f32 %v6886_v30, %v6885_v15 }
 0x480   :  { %v1279_v60 = vpack.c.bf16 %v6887_v59, %v6884_v16 }
 0x482   :  { %v6888_v61 = vpop.f32.mrb[68].mxu1  ;;  %7472 = vmatprep.mubr.bf16.mxu0 %v1279_v60 }
 0x483   :  { %v6889_v62 = vpop.f32.mrb[69].mxu1 }
 0x484   :  { %v6890_v63 = vadd.f32 %v6889_v62, %v6888_v61  ;;  %v6891_v0 = vpop.f32.mrb[70].mxu1 }
 0x485   :  { %v6892_v3 = vpop.f32.mrb[71].mxu1 }
 0x486   :  { %v6893_v4 = vadd.f32 %v6892_v3, %v6891_v0 }
 0x488   :  { %v1280_v5 = vpack.c.bf16 %v6893_v4, %v6890_v63 }
 0x48a   :  { %v6894_v6 = vpop.f32.mrb[72].mxu1  ;;  %7473 = vmatmul.mubr.bf16.gmra.mrb[112].mxu0 %v1280_v5 }
 0x48b   :  { %v6895_v7 = vpop.f32.mrb[73].mxu1 }
 0x48c   :  { %v6896_v8 = vadd.f32 %v6895_v7, %v6894_v6  ;;  %v6897_v11 = vpop.f32.mrb[74].mxu1 }
 0x48d   :  { %v6898_v12 = vpop.f32.mrb[75].mxu1 }
 0x48e   :  { %v6899_v13 = vadd.f32 %v6898_v12, %v6897_v11 }
 0x490   :  { %v1281_v14 = vpack.c.bf16 %v6899_v13, %v6896_v8 }
 0x492   :  { %v6900_v17 = vpop.f32.mrb[76].mxu1  ;;  %7476 = vmatprep.mubr.bf16.mxu0 %v1281_v14 }
 0x493   :  { %v6901_v18 = vpop.f32.mrb[77].mxu1 }
 0x494   :  { %v6902_v19 = vadd.f32 %v6901_v18, %v6900_v17  ;;  %v6903_v20 = vpop.f32.mrb[78].mxu1 }
 0x495   :  { %v6904_v22 = vpop.f32.mrb[79].mxu1 }
 0x496   :  { %v6905_v24 = vadd.f32 %v6904_v22, %v6903_v20 }
 0x498   :  { %v1282_v39 = vpack.c.bf16 %v6905_v24, %v6902_v19 }
 0x49a   :  { %v6906_v28 = vpop.f32.mrb[80].mxu1  ;;  %7477 = vmatmul.mubr.bf16.gmra.mrb[116].mxu0 %v1282_v39 }
 0x49b   :  { %v6907_v40 = vpop.f32.mrb[81].mxu1 }
 0x49c   :  { %v6908_v41 = vadd.f32 %v6907_v40, %v6906_v28  ;;  %v6909_v58 = vpop.f32.mrb[82].mxu1 }
 0x49d   :  { %v6910_v42 = vpop.f32.mrb[83].mxu1 }
 0x49e   :  { %v6911_v25 = vadd.f32 %v6910_v42, %v6909_v58 }
 0x4a0   :  { %v1283_v9 = vpack.c.bf16 %v6911_v25, %v6908_v41 }
 0x4a2   :  { %v6912_v44 = vpop.f32.mrb[84].mxu1  ;;  %7480 = vmatprep.mubr.bf16.mxu0 %v1283_v9 }
 0x4a3   :  { %v6913_v23 = vpop.f32.mrb[85].mxu1 }
 0x4a4   :  { %v6914_v27 = vadd.f32 %v6913_v23, %v6912_v44  ;;  %v6915_v21 = vpop.f32.mrb[86].mxu1 }
 0x4a5   :  { %v6916_v38 = vpop.f32.mrb[87].mxu1 }
 0x4a6   :  { %v6917_v45 = vadd.f32 %v6916_v38, %v6915_v21 }
 0x4a8   :  { %v1284_v31 = vpack.c.bf16 %v6917_v45, %v6914_v27 }
 0x4aa   :  { %v6918_v32 = vpop.f32.mrb[88].mxu1  ;;  %7481 = vmatmul.mubr.bf16.gmra.mrb[120].mxu0 %v1284_v31 }
 0x4ab   :  { %v6919_v29 = vpop.f32.mrb[89].mxu1 }
 0x4ac   :  { %v6920_v57 = vadd.f32 %v6919_v29, %v6918_v32  ;;  %v6921_v34 = vpop.f32.mrb[90].mxu1 }
 0x4ad   :  { %v6922_v43 = vpop.f32.mrb[91].mxu1 }
 0x4ae   :  { %v6923_v35 = vadd.f32 %v6922_v43, %v6921_v34 }
 0x4b0   :  { %v1285_v26 = vpack.c.bf16 %v6923_v35, %v6920_v57 }
 0x4b2   :  { %v6924_v36 = vpop.f32.mrb[92].mxu1  ;;  %7484 = vmatprep.mubr.bf16.mxu0 %v1285_v26 }
 0x4b3   :  { %v6925_v37 = vpop.f32.mrb[93].mxu1 }
 0x4b4   :  { %v6926_v10 = vadd.f32 %v6925_v37, %v6924_v36  ;;  %v6927_v33 = vpop.f32.mrb[94].mxu1 }
 0x4b5   :  { %v6928_v46 = vpop.f32.mrb[95].mxu1 }
 0x4b6   :  { %v6929_v47 = vadd.f32 %v6928_v46, %v6927_v33 }
 0x4b8   :  { %v1286_v48 = vpack.c.bf16 %v6929_v47, %v6926_v10 }
 0x4ba   :  { %v7494_v49 = vpop.f32.mrb[96].mxu1  ;;  %7485 = vmatmul.mubr.bf16.gmra.mrb[124].mxu0 %v1286_v48 }
 0x4bb   :  { %v1576_v51 = vpop.f32.mrb[97].mxu1  ;;  %v1585_v53 = vadd.f32 %v7494_v49, %v9176_v50 }
 0x4bc   :  { %v7495_v52 = vpop.f32.mrb[98].mxu1  ;;  %v1577_v56 = vadd.f32 %v9176_v50, %v1576_v51 }
 0x4bd   :  { %v1588_v54 = vadd.f32 %v7495_v52, %v9176_v50  ;;  %v1579_v55 = vpop.f32.mrb[99].mxu1 }
 0x4be   :  { %v1580_v2 = vadd.f32 %v9176_v50, %v1579_v55 }
 0x4bf   :  { %v9182_v1 = vpack.c.bf16 %v1588_v54, %v1585_v53 }
 0x4c0   :  { %v9184_v16 = vpack.c.bf16 %v1580_v2, %v1577_v56 }
 0x4c1   :  { %1741 = vrot.lane.b32.xlu1 %v9182_v1, %s8419_s9 }
 0x4c2   :  { %v7498_v15 = vpop.f32.mrb[100].mxu1  ;;  %1739 = vrot.lane.b32.xlu0 %v9184_v16, %s8419_s9  ;;  %6988 = vmatprep.mubr.msk.bf16.mxu0 %vm1771_vm1, %v9184_v16 }
 0x4c3   :  { %v1592_v30 = vpop.f32.mrb[101].mxu1  ;;  %v1601_v60 = vadd.f32 %v7498_v15, %v9176_v50 }
 0x4c4   :  { %v7499_v59 = vpop.f32.mrb[102].mxu1  ;;  %v1593_v63 = vadd.f32 %v9176_v50, %v1592_v30 }
 0x4c5   :  { %v1604_v61 = vadd.f32 %v7499_v59, %v9176_v50  ;;  %v1595_v62 = vpop.f32.mrb[103].mxu1 }
 0x4c6   :  { %v1596_v0 = vadd.f32 %v9176_v50, %v1595_v62 }
 0x4c7   :  { %v9196_v3 = vpack.c.bf16 %v1604_v61, %v1601_v60 }
 0x4c8   :  { %v9198_v4 = vpack.c.bf16 %v1596_v0, %v1593_v63 }
 0x4ca   :  { %v7502_v5 = vpop.f32.mrb[104].mxu1 }
 0x4cb   :  { %v1608_v6 = vpop.f32.mrb[105].mxu1  ;;  %v1617_v8 = vadd.f32 %v7502_v5, %v9176_v50 }
 0x4cc   :  { %v7503_v7 = vpop.f32.mrb[106].mxu1  ;;  %v1609_v13 = vadd.f32 %v9176_v50, %v1608_v6 }
 0x4cd   :  { %v1620_v11 = vadd.f32 %v7503_v7, %v9176_v50  ;;  %v1611_v12 = vpop.f32.mrb[107].mxu1 }
 0x4ce   :  { %v1612_v14 = vadd.f32 %v9176_v50, %v1611_v12 }
 0x4cf   :  { %v9204_v17 = vpack.c.bf16 %v1620_v11, %v1617_v8 }
 0x4d0   :  { %v9206_v18 = vpack.c.bf16 %v1612_v14, %v1609_v13 }
 0x4d2   :  { %v7506_v19 = vpop.f32.mrb[108].mxu1 }
 0x4d3   :  { %v1624_v20 = vpop.f32.mrb[109].mxu1  ;;  %v1633_v24 = vadd.f32 %v7506_v19, %v9176_v50 }
 0x4d4   :  { %v7507_v22 = vpop.f32.mrb[110].mxu1  ;;  %v1625_v40 = vadd.f32 %v9176_v50, %v1624_v20 }
 0x4d5   :  { %v1636_v39 = vadd.f32 %v7507_v22, %v9176_v50  ;;  %v1627_v28 = vpop.f32.mrb[111].mxu1 }
 0x4d6   :  { %v1628_v41 = vadd.f32 %v9176_v50, %v1627_v28 }
 0x4d7   :  { %v9212_v58 = vpack.c.bf16 %v1636_v39, %v1633_v24 }
 0x4d8   :  { %v9214_v42 = vpack.c.bf16 %v1628_v41, %v1625_v40 }
 0x4d9   :  { %13147 = vst [vmem:[#allocation6_spill] sm:$0xff] %v9212_v58 }
 0x4da   :  { %v7510_v25 = vpop.f32.mrb[112].mxu1 }
 0x4db   :  { %v1640_v9 = vpop.f32.mrb[113].mxu1  ;;  %v1649_v23 = vadd.f32 %v7510_v25, %v9176_v50 }
 0x4dc   :  { %v7511_v44 = vpop.f32.mrb[114].mxu1  ;;  %v1641_v38 = vadd.f32 %v9176_v50, %v1640_v9 }
 0x4dd   :  { %v1652_v27 = vadd.f32 %v7511_v44, %v9176_v50  ;;  %v1643_v21 = vpop.f32.mrb[115].mxu1 }
 0x4de   :  { %v1644_v45 = vadd.f32 %v9176_v50, %v1643_v21 }
 0x4df   :  { %v9220_v31 = vpack.c.bf16 %v1652_v27, %v1649_v23 }
 0x4e0   :  { %v9222_v32 = vpack.c.bf16 %v1644_v45, %v1641_v38 }
 0x4e1   :  { %1757 = vrot.lane.b32.xlu1 %v9220_v31, %s8419_s9 }
 0x4e2   :  { %v7514_v29 = vpop.f32.mrb[116].mxu1  ;;  %1755 = vrot.lane.b32.xlu0 %v9222_v32, %s8419_s9 }
 0x4e3   :  { %v1656_v57 = vpop.f32.mrb[117].mxu1  ;;  %v1665_v43 = vadd.f32 %v7514_v29, %v9176_v50 }
 0x4e4   :  { %v7515_v34 = vpop.f32.mrb[118].mxu1  ;;  %v1657_v36 = vadd.f32 %v9176_v50, %v1656_v57 }
 0x4e5   :  { %v1668_v35 = vadd.f32 %v7515_v34, %v9176_v50  ;;  %v1659_v26 = vpop.f32.mrb[119].mxu1 }
 0x4e6   :  { %v1660_v37 = vadd.f32 %v9176_v50, %v1659_v26  ;;  %1743 = vrot.lane.b32.xlu0 %v9198_v4, %s8419_s9 }
 0x4e7   :  { %v9234_v10 = vpack.c.bf16 %v1668_v35, %v1665_v43 }
 0x4e8   :  { %v9236_v33 = vpack.c.bf16 %v1660_v37, %v1657_v36 }
 0x4ea   :  { %v7518_v46 = vpop.f32.mrb[120].mxu1  ;;  %1759 = vrot.lane.b32.xlu1 %v9236_v33, %s8419_s9  ;;  %1745 = vrot.lane.b32.xlu0 %v9196_v3, %s8419_s9 }
 0x4eb   :  { %v1672_v47 = vpop.f32.mrb[121].mxu1  ;;  %v1681_v49 = vadd.f32 %v7518_v46, %v9176_v50 }
 0x4ec   :  { %v7519_v48 = vpop.f32.mrb[122].mxu1  ;;  %v1673_v53 = vadd.f32 %v9176_v50, %v1672_v47 }
 0x4ed   :  { %v1684_v51 = vadd.f32 %v7519_v48, %v9176_v50  ;;  %v1675_v52 = vpop.f32.mrb[123].mxu1 }
 0x4ee   :  { %v1676_v54 = vadd.f32 %v9176_v50, %v1675_v52  ;;  %1761 = vrot.lane.b32.xlu1 %v9234_v10, %s8419_s9  ;;  %1747 = vrot.lane.b32.xlu0 %v9206_v18, %s8419_s9 }
 0x4ef   :  { %v9250_v55 = vpack.c.bf16 %v1684_v51, %v1681_v49 }
 0x4f0   :  { %v9252_v56 = vpack.c.bf16 %v1676_v54, %v1673_v53 }
 0x4f2   :  { %v7522_v2 = vpop.f32.mrb[124].mxu1  ;;  %1763 = vrot.lane.b32.xlu1 %v9252_v56, %s8419_s9  ;;  %1749 = vrot.lane.b32.xlu0 %v9204_v17, %s8419_s9 }
 0x4f3   :  { %v1688_v15 = vpop.f32.mrb[125].mxu1  ;;  %v1697_v59 = vadd.f32 %v7522_v2, %v9176_v50 }
 0x4f4   :  { %v7523_v30 = vpop.f32.mrb[126].mxu1  ;;  %v1689_v62 = vadd.f32 %v9176_v50, %v1688_v15 }
 0x4f5   :  { %v1700_v60 = vadd.f32 %v7523_v30, %v9176_v50  ;;  %v1691_v61 = vpop.f32.mrb[127].mxu1 }
 0x4f6   :  { %v1692_v63 = vadd.f32 %v9176_v50, %v1691_v61  ;;  %1765 = vrot.lane.b32.xlu1 %v9250_v55, %s8419_s9  ;;  %1751 = vrot.lane.b32.xlu0 %v9214_v42, %s8419_s9 }
 0x4f7   :  { %v9266_v0 = vpack.c.bf16 %v1700_v60, %v1697_v59 }
 0x4f8   :  { %v9268_v5 = vpack.c.bf16 %v1692_v63, %v1689_v62 }
 0x4f9   :  { %13148 = vst [vmem:[#allocation8_spill] sm:$0xff] %v9266_v0 }
 0x4fa   :  { %1767 = vrot.lane.b32.xlu1 %v9268_v5, %s8419_s9  ;;  %1753 = vrot.lane.b32.xlu0 %v9212_v58, %s8419_s9 }
 0x4fe   :  { %1769 = vrot.lane.b32.xlu1 %v9266_v0, %s8419_s9  ;;  %2830 = vrot.lane.b32.xlu0 %v9184_v16, %s8420_s10 }
 0x502   :  { %2846 = vrot.lane.b32.xlu1 %v9222_v32, %s8420_s10  ;;  %2832 = vrot.lane.b32.xlu0 %v9182_v1, %s8420_s10 }
 0x506   :  { %2848 = vrot.lane.b32.xlu1 %v9220_v31, %s8420_s10  ;;  %2834 = vrot.lane.b32.xlu0 %v9198_v4, %s8420_s10 }
 0x50a   :  { %2850 = vrot.lane.b32.xlu1 %v9236_v33, %s8420_s10  ;;  %2836 = vrot.lane.b32.xlu0 %v9196_v3, %s8420_s10 }
 0x50e   :  { %2852 = vrot.lane.b32.xlu1 %v9234_v10, %s8420_s10  ;;  %2838 = vrot.lane.b32.xlu0 %v9206_v18, %s8420_s10 }
 0x512   :  { %2854 = vrot.lane.b32.xlu1 %v9252_v56, %s8420_s10  ;;  %2840 = vrot.lane.b32.xlu0 %v9204_v17, %s8420_s10 }
 0x516   :  { %2856 = vrot.lane.b32.xlu1 %v9250_v55, %s8420_s10  ;;  %2842 = vrot.lane.b32.xlu0 %v9214_v42, %s8420_s10 }
 0x51a   :  { %2858 = vrot.lane.b32.xlu1 %v9268_v5, %s8420_s10  ;;  %2844 = vrot.lane.b32.xlu0 %v9212_v58, %s8420_s10 }
 0x51d   :  { %v9291_v50 = vpop.f32.mrb[96].mxu0 }
 0x51e   :  { %13149 = vst [vmem:[#allocation7_spill] sm:$0xff] %v9291_v50  ;;  %2860 = vrot.lane.b32.xlu1 %v9266_v0, %s8420_s10  ;;  %2798 = vrot.lane.b32.xlu0 %v9184_v16, %s8421_s3  ;;  %v9296_v6 = vpop.f32.mrb[97].mxu0 }
 0x51f   :  { %13150 = vst [vmem:[#allocation10_spill] sm:$0xff] %v9296_v6  ;;  %v9298_v7 = vpop.f32.mrb[98].mxu0 }
 0x520   :  { %13151 = vst [vmem:[#allocation9_spill] sm:$0xff] %v9298_v7  ;;  %v9300_v8 = vpop.f32.mrb[99].mxu0 }
 0x521   :  { %13152 = vst [vmem:[#allocation12_spill] sm:$0xff] %v9300_v8 }
 0x522   :  { %2800 = vrot.lane.b32.xlu1 %v9182_v1, %s8421_s3  ;;  %2802 = vrot.lane.b32.xlu0 %v9198_v4, %s8421_s3 }
 0x526   :  { %2804 = vrot.lane.b32.xlu1 %v9196_v3, %s8421_s3  ;;  %2806 = vrot.lane.b32.xlu0 %v9206_v18, %s8421_s3 }
 0x52a   :  { %2808 = vrot.lane.b32.xlu1 %v9204_v17, %s8421_s3  ;;  %2810 = vrot.lane.b32.xlu0 %v9214_v42, %s8421_s3 }
 0x52d   :  { %v9314_v11 = vpop.f32.mrb[100].mxu0 }
 0x52e   :  { %13153 = vst [vmem:[#allocation11_spill] sm:$0xff] %v9314_v11  ;;  %2812 = vrot.lane.b32.xlu1 %v9212_v58, %s8421_s3  ;;  %2814 = vrot.lane.b32.xlu0 %v9222_v32, %s8421_s3  ;;  %v9320_v12 = vpop.f32.mrb[101].mxu0 }
 0x52f   :  { %13154 = vst [vmem:[#allocation14_spill] sm:$0xff] %v9320_v12  ;;  %v9322_v13 = vpop.f32.mrb[102].mxu0  ;;  %v9870_v12 = vld [vmem:[%s13189_s0 + $0xb8] sm:$0xff] }
 0x530   :  { %13155 = vst [vmem:[#allocation13_spill] sm:$0xff] %v9322_v13  ;;  %v9324_v14 = vpop.f32.mrb[103].mxu0  ;;  %v9832_v13 = vld [vmem:[%s13189_s0 + $0x98] sm:$0xff] }
 0x531   :  { %13156 = vst [vmem:[#allocation16_spill] sm:$0xff] %v9324_v14 }
 0x532   :  { %2816 = vrot.lane.b32.xlu1 %v9220_v31, %s8421_s3  ;;  %2818 = vrot.lane.b32.xlu0 %v9236_v33, %s8421_s3 }
 0x533   :  { %v1742_v9 = vpop.permute.xlu1 %1741 }
 0x534   :  { %v1740_v41 = vpop.permute.xlu0 %1739  ;;  %v1824_v57 = vsel %vm1771_vm1, %v1742_v9, 0 }
 0x535   :  { %v1821_v23 = vsel %vm1771_vm1, %v1740_v41, 0 }
 0x536   :  { %2820 = vrot.lane.b32.xlu1 %v9234_v10, %s8421_s3  ;;  %2822 = vrot.lane.b32.xlu0 %v9252_v56, %s8421_s3 }
 0x53a   :  { %2824 = vrot.lane.b32.xlu1 %v9250_v55, %s8421_s3  ;;  %2573 = vrot.lane.b32.xlu0 %v9184_v16, %s8422_s28 }
 0x53d   :  { %v9338_v19 = vpop.f32.mrb[104].mxu0 }
 0x53e   :  { %13157 = vst [vmem:[#allocation15_spill] sm:$0xff] %v9338_v19  ;;  %2828 = vrot.lane.b32.xlu1 %v9266_v0, %s8421_s3  ;;  %2575 = vrot.lane.b32.xlu0 %v9182_v1, %s8422_s28  ;;  %v9344_v20 = vpop.f32.mrb[105].mxu0 }
 0x53f   :  { %13158 = vst [vmem:[#allocation17_spill] sm:$0xff] %v9344_v20  ;;  %v9346_v22 = vpop.f32.mrb[106].mxu0 }
 0x540   :  { %13159 = vst [vmem:[#allocation18_spill] sm:$0xff] %v9346_v22  ;;  %v9348_v24 = vpop.f32.mrb[107].mxu0 }
 0x541   :  { %13160 = vst [vmem:[#allocation19_spill] sm:$0xff] %v9348_v24 }
 0x542   :  { %2589 = vrot.lane.b32.xlu1 %v9222_v32, %s8422_s28  ;;  %2595 = vrot.lane.b32.xlu0 %v9234_v10, %s8422_s28 }
 0x546   :  { %2591 = vrot.lane.b32.xlu1 %v9220_v31, %s8422_s28  ;;  %2599 = vrot.lane.b32.xlu0 %v9250_v55, %s8422_s28 }
 0x54a   :  { %2593 = vrot.lane.b32.xlu1 %v9236_v33, %s8422_s28  ;;  %2603 = vrot.lane.b32.xlu0 %v9266_v0, %s8422_s28 }
 0x54d   :  { %v9362_v39 = vpop.f32.mrb[108].mxu0 }
 0x54e   :  { %13161 = vst [vmem:[#allocation20_spill] sm:$0xff] %v9362_v39  ;;  %2577 = vrot.lane.b32.xlu1 %v9198_v4, %s8422_s28  ;;  %3663 = vrot.lane.b32.xlu0 %v9184_v16, %s8423_s29  ;;  %v9368_v28 = vpop.f32.mrb[109].mxu0 }
 0x54f   :  { %13162 = vst [vmem:[#allocation21_spill] sm:$0xff] %v9368_v28  ;;  %v9370_v40 = vpop.f32.mrb[110].mxu0 }
 0x550   :  { %13163 = vst [vmem:[#allocation22_spill] sm:$0xff] %v9370_v40  ;;  %v9372_v25 = vpop.f32.mrb[111].mxu0 }
 0x551   :  { %13164 = vst [vmem:[#allocation23_spill] sm:$0xff] %v9372_v25 }
 0x552   :  { %2579 = vrot.lane.b32.xlu1 %v9196_v3, %s8422_s28  ;;  %3665 = vrot.lane.b32.xlu0 %v9182_v1, %s8423_s29 }
 0x553   :  { %v1758_v27 = vpop.permute.xlu1 %1757 }
 0x554   :  { %v1756_v44 = vpop.permute.xlu0 %1755 }
 0x555   :  { %7708 = vmatprep.subr.msk.bf16.mxu0 %vm1771_vm1, %v1756_v44 }
 0x556   :  { %2597 = vrot.lane.b32.xlu1 %v9252_v56, %s8422_s28  ;;  %3685 = vrot.lane.b32.xlu0 %v9234_v10, %s8423_s29 }
 0x557   :  { %6973 = vmatpush3.bf16.xpose.msra.mxu0 %v1821_v23 }
 0x558   :  { %7709 = vmatprep.subr.msk.bf16.mxu0 %vm1771_vm1, %v1758_v27  ;;  %v1744_v21 = vpop.permute.xlu0 %1743 }
 0x559   :  { %v1827_v47 = vsel %vm1771_vm1, %v1744_v21, 0 }
 0x55a   :  { %2581 = vrot.lane.b32.xlu1 %v9206_v18, %s8422_s28  ;;  %3689 = vrot.lane.b32.xlu0 %v9250_v55, %s8423_s29 }
 0x55c   :  { %v1760_v38 = vpop.permute.xlu1 %1759  ;;  %v1746_v45 = vpop.permute.xlu0 %1745 }
 0x55d   :  { %v9389_v29 = vpop.f32.mrb[112].mxu0  ;;  %v1830_v54 = vsel %vm1771_vm1, %v1746_v45, 0 }
 0x55e   :  { %13165 = vst [vmem:[#allocation24_spill] sm:$0xff] %v9389_v29  ;;  %2583 = vrot.lane.b32.xlu1 %v9204_v17, %s8422_s28  ;;  %2826 = vrot.lane.b32.xlu0 %v9268_v5, %s8421_s3  ;;  %v9396_v34 = vpop.f32.mrb[113].mxu0  ;;  %v9793_v29 = vld [vmem:[%s13189_s0 + $0x78] sm:$0xff] }
 0x55f   :  { %13166 = vst [vmem:[#allocation25_spill] sm:$0xff] %v9396_v34  ;;  %6975 = vmatpush3.bf16.xpose.msra.mxu0 %v1824_v57  ;;  %v9398_v43 = vpop.f32.mrb[114].mxu0 }
 0x560   :  { %13167 = vst [vmem:[#allocation26_spill] sm:$0xff] %v9398_v43  ;;  %7710 = vmatprep.subr.msk.bf16.mxu0 %vm1771_vm1, %v1760_v38  ;;  %v1762_v35 = vpop.permute.xlu1 %1761  ;;  %v1748_v26 = vpop.permute.xlu0 %1747 }
 0x561   :  { %v9401_v36 = vpop.f32.mrb[115].mxu0  ;;  %v1833_v63 = vsel %vm1771_vm1, %v1748_v26, 0 }
 0x562   :  { %13168 = vst [vmem:[#allocation27_spill] sm:$0xff] %v9401_v36  ;;  %2585 = vrot.lane.b32.xlu1 %v9214_v42, %s8422_s28 }
 0x564   :  { %v1764_v37 = vpop.permute.xlu1 %1763  ;;  %v1750_v46 = vpop.permute.xlu0 %1749 }
 0x565   :  { %v1836_v21 = vsel %vm1771_vm1, %v1750_v46, 0 }
 0x566   :  { %2587 = vrot.lane.b32.xlu1 %v9212_v58, %s8422_s28 }
 0x567   :  { %6977 = vmatpush3.bf16.xpose.msra.mxu0 %v1827_v47 }
 0x568   :  { %7711 = vmatprep.subr.msk.bf16.mxu0 %vm1771_vm1, %v1762_v35  ;;  %v1766_v48 = vpop.permute.xlu1 %1765  ;;  %v1752_v49 = vpop.permute.xlu0 %1751 }
 0x569   :  { %v1839_v46 = vsel %vm1771_vm1, %v1752_v49, 0 }
 0x56a   :  { %3679 = vrot.lane.b32.xlu1 %v9222_v32, %s8423_s29 }
 0x56c   :  { %v1768_v51 = vpop.permute.xlu1 %1767  ;;  %v1754_v52 = vpop.permute.xlu0 %1753 }
 0x56d   :  { %v9411_v53 = vpop.f32.mrb[116].mxu0  ;;  %v1842_v49 = vsel %vm1771_vm1, %v1754_v52, 0 }
 0x56e   :  { %13169 = vst [vmem:[#allocation28_spill] sm:$0xff] %v9411_v53  ;;  %3681 = vrot.lane.b32.xlu1 %v9220_v31, %s8423_s29  ;;  %v9416_v2 = vpop.f32.mrb[117].mxu0 }
 0x56f   :  { %13170 = vst [vmem:[#allocation29_spill] sm:$0xff] %v9416_v2  ;;  %6979 = vmatpush3.bf16.xpose.msra.mxu0 %v1830_v54  ;;  %v9418_v15 = vpop.f32.mrb[118].mxu0 }
 0x570   :  { %13171 = vst [vmem:[#allocation30_spill] sm:$0xff] %v9418_v15  ;;  %7712 = vmatprep.subr.msk.bf16.mxu0 %vm1771_vm1, %v1764_v37  ;;  %v1770_v30 = vpop.permute.xlu1 %1769  ;;  %v2831_v59 = vpop.permute.xlu0 %2830 }
 0x571   :  { %v9421_v60 = vpop.f32.mrb[119].mxu0  ;;  %v2911_v52 = vsel %vm1771_vm1, %v2831_v59, 0 }
 0x572   :  { %13172 = vst [vmem:[#allocation31_spill] sm:$0xff] %v9421_v60  ;;  %3683 = vrot.lane.b32.xlu1 %v9236_v33, %s8423_s29 }
 0x574   :  { %v2847_v61 = vpop.permute.xlu1 %2846  ;;  %v2833_v62 = vpop.permute.xlu0 %2832 }
 0x576   :  { %3667 = vrot.lane.b32.xlu1 %v9198_v4, %s8423_s29 }
 0x577   :  { %6981 = vmatpush3.bf16.xpose.msra.mxu0 %v1833_v63 }
 0x578   :  { %7713 = vmatprep.subr.msk.bf16.mxu0 %vm1771_vm1, %v1766_v48  ;;  %v2849_v41 = vpop.permute.xlu1 %2848  ;;  %v2835_v9 = vpop.permute.xlu0 %2834 }
 0x57a   :  { %3669 = vrot.lane.b32.xlu1 %v9196_v3, %s8423_s29 }
 0x57c   :  { %v2851_v44 = vpop.permute.xlu1 %2850  ;;  %v2837_v23 = vpop.permute.xlu0 %2836 }
 0x57d   :  { %v9431_v27 = vpop.f32.mrb[120].mxu0  ;;  %v2920_v60 = vsel %vm1771_vm1, %v2837_v23, 0 }
 0x57e   :  { %13173 = vst [vmem:[#allocation32_spill] sm:$0xff] %v9431_v27  ;;  %3687 = vrot.lane.b32.xlu1 %v9252_v56, %s8423_s29  ;;  %v9436_v38 = vpop.f32.mrb[121].mxu0 }
 0x57f   :  { %13174 = vst [vmem:[#allocation33_spill] sm:$0xff] %v9436_v38  ;;  %6983 = vmatpush3.bf16.xpose.msra.mxu0 %v1836_v21  ;;  %v9438_v45 = vpop.f32.mrb[122].mxu0 }
 0x580   :  { %13175 = vst [vmem:[#allocation34_spill] sm:$0xff] %v9438_v45  ;;  %7714 = vmatprep.subr.msk.bf16.mxu0 %vm1771_vm1, %v1768_v51  ;;  %v2853_v57 = vpop.permute.xlu1 %2852  ;;  %v2839_v35 = vpop.permute.xlu0 %2838 }
 0x581   :  { %v9441_v26 = vpop.f32.mrb[123].mxu0 }
 0x582   :  { %13176 = vst [vmem:[#allocation35_spill] sm:$0xff] %v9441_v26  ;;  %3671 = vrot.lane.b32.xlu1 %v9206_v18, %s8423_s29 }
 0x584   :  { %v2855_v37 = vpop.permute.xlu1 %2854  ;;  %v9445_v47 = vpop.permute.xlu0 %2840 }
 0x586   :  { %3673 = vrot.lane.b32.xlu1 %v9204_v17, %s8423_s29 }
 0x587   :  { %6985 = vmatpush3.bf16.xpose.msra.mxu0 %v1839_v46 }
 0x588   :  { %7715 = vmatprep.subr.msk.bf16.mxu0 %vm1771_vm1, %v1770_v30  ;;  %v2857_v48 = vpop.permute.xlu1 %2856  ;;  %v9451_v51 = vpop.permute.xlu0 %2842 }
 0x58a   :  { %2601 = vrot.lane.b32.xlu1 %v9268_v5, %s8422_s28 }
 0x58c   :  { %v9455_v54 = vpop.permute.xlu1 %2858  ;;  %v9457_v63 = vpop.permute.xlu0 %2844 }
 0x58d   :  { %v9459_v21 = vpop.f32.mrb[124].mxu0 }
 0x58e   :  { %13177 = vst [vmem:[#allocation36_spill] sm:$0xff] %v9459_v21  ;;  %3691 = vrot.lane.b32.xlu1 %v9268_v5, %s8423_s29  ;;  %v9464_v46 = vpop.f32.mrb[125].mxu0 }
 0x58f   :  { %13178 = vst [vmem:[#allocation37_spill] sm:$0xff] %v9464_v46  ;;  %6987 = vmatpush3.bf16.xpose.msra.mxu0 %v1842_v49  ;;  %v9466_v30 = vpop.f32.mrb[126].mxu0  ;;  %v2914_v46 = vsel %vm1771_vm1, %v2833_v62, 0 }
 0x590   :  { %13179 = vst [vmem:[#allocation38_spill] sm:$0xff] %v9466_v30  ;;  %7716 = vmatprep.subr.msk.bf16.mxu0 %vm1771_vm1, %v2847_v61  ;;  %v9469_v45 = vpop.permute.xlu1 %2860  ;;  %v9471_v26 = vpop.permute.xlu0 %2798 }
 0x591   :  { %v9473_v15 = vpop.f32.mrb[127].mxu0 }
 0x592   :  { %13180 = vst [vmem:[#allocation39_spill] sm:$0xff] %v9473_v15 }
 0x594   :  { %v9475_v27 = vpop.permute.xlu1 %2800  ;;  %v9477_v21 = vpop.permute.xlu0 %2802 }
 0x596   :  { %6989 = vmatmul.mubr.msk.bf16.vlgmr.msra.gmra.mrb[128].mxu0 %vm1771_vm1, %v9184_v16 }
 0x597   :  { %6990 = vmatprep.mubr.msk.bf16.mxu0 %vm1771_vm1, %v9182_v1  ;;  %7133 = vmatpush3.bf16.xpose.msra.mxu0 %v2911_v52  ;;  %v2917_v52 = vsel %vm1771_vm1, %v2835_v9, 0 }
 0x598   :  { %7717 = vmatprep.subr.msk.bf16.mxu0 %vm1771_vm1, %v2849_v41  ;;  %v9485_v61 = vpop.permute.xlu1 %2804  ;;  %v9487_v49 = vpop.permute.xlu0 %2806 }
 0x59c   :  { %v9489_v30 = vpop.permute.xlu1 %2808  ;;  %v9491_v15 = vpop.permute.xlu0 %2810 }
 0x59e   :  { %6991 = vmatmul.mubr.msk.bf16.gmra.mrb[132].mxu0 %vm1771_vm1, %v9182_v1 }
 0x59f   :  { %6992 = vmatprep.mubr.msk.bf16.mxu0 %vm1771_vm1, %v9198_v4  ;;  %7135 = vmatpush3.bf16.xpose.msra.mxu0 %v2914_v46 }
 0x5a0   :  { %7718 = vmatprep.subr.msk.bf16.mxu0 %vm1771_vm1, %v2851_v44  ;;  %v9499_v16 = vpop.permute.xlu1 %2812  ;;  %v9501_v59 = vpop.permute.xlu0 %2814 }
 0x5a4   :  { %v9503_v41 = vpop.permute.xlu1 %2816  ;;  %v9508_v62 = vpop.permute.xlu0 %2818 }
 0x5a6   :  { %6993 = vmatmul.mubr.msk.bf16.gmra.mrb[136].mxu0 %vm1771_vm1, %v9198_v4 }
 0x5a7   :  { %6994 = vmatprep.mubr.msk.bf16.mxu0 %vm1771_vm1, %v9196_v3  ;;  %7137 = vmatpush3.bf16.xpose.msra.mxu0 %v2917_v52  ;;  %v2923_v52 = vsel %vm1771_vm1, %v2839_v35, 0 }
 0x5a8   :  { %7719 = vmatprep.subr.msk.bf16.mxu0 %vm1771_vm1, %v2853_v57  ;;  %v9513_v1 = vpop.permute.xlu1 %2820  ;;  %v9517_v46 = vpop.permute.xlu0 %2822 }
 0x5ac   :  { %v9515_v44 = vpop.permute.xlu1 %2824  ;;  %v2574_v9 = vpop.permute.xlu0 %2573 }
 0x5ae   :  { %6995 = vmatmul.mubr.msk.bf16.gmra.mrb[140].mxu0 %vm1771_vm1, %v9196_v3 }
 0x5af   :  { %6996 = vmatprep.mubr.msk.bf16.mxu0 %vm1771_vm1, %v9206_v18  ;;  %7139 = vmatpush3.bf16.xpose.msra.mxu0 %v2920_v60 }
 0x5b0   :  { %7720 = vmatprep.subr.msk.bf16.mxu0 %vm1771_vm1, %v2855_v37  ;;  %v9525_v4 = vpop.permute.xlu1 %2828  ;;  %v2576_v60 = vpop.permute.xlu0 %2575  ;;  %v2926_v37 = vsel %vm1771_vm1, %v9445_v47, 0 }
 0x5b4   :  { %v2590_v57 = vpop.permute.xlu1 %2589  ;;  %v2596_v35 = vpop.permute.xlu0 %2595 }
 0x5b5   :  { %7020 = vmatprep.subr.bf16.mxu1 %v2590_v57  ;;  %v2932_v57 = vsel %vm1771_vm1, %v9457_v63, 0 }
 0x5b6   :  { %6997 = vmatmul.mubr.msk.bf16.gmra.mrb[144].mxu0 %vm1771_vm1, %v9206_v18  ;;  %7021 = vmatpush3.bf16.msra.mxu1 %v2574_v9  ;;  %v2929_v9 = vsel %vm1771_vm1, %v9451_v51, 0 }
 0x5b7   :  { %6998 = vmatprep.mubr.msk.bf16.mxu0 %vm1771_vm1, %v9204_v17  ;;  %7141 = vmatpush3.bf16.xpose.msra.mxu0 %v2923_v52 }
 0x5b8   :  { %7721 = vmatprep.subr.msk.bf16.mxu0 %vm1771_vm1, %v2857_v48  ;;  %v2592_v3 = vpop.permute.xlu1 %2591 }
 0x5b9   :  { %7022 = vmatprep.subr.bf16.mxu1 %v2592_v3 }
 0x5ba   :  { %7023 = vmatpush3.bf16.msra.mxu1 %v2576_v60 }
 0x5bc   :  { %v2594_v23 = vpop.permute.xlu1 %2593 }
 0x5bd   :  { %7024 = vmatprep.subr.bf16.mxu1 %v2594_v23 }
 0x5be   :  { %6999 = vmatmul.mubr.msk.bf16.gmra.mrb[148].mxu0 %vm1771_vm1, %v9204_v17 }
 0x5bf   :  { %7000 = vmatprep.mubr.msk.bf16.mxu0 %vm1771_vm1, %v9214_v42  ;;  %7143 = vmatpush3.bf16.xpose.msra.mxu0 %v2926_v37 }
 0x5c0   :  { %7722 = vmatprep.subr.msk.bf16.mxu0 %vm1771_vm1, %v9455_v54  ;;  %v2578_v18 = vpop.permute.xlu1 %2577  ;;  %v2600_v54 = vpop.permute.xlu0 %2599 }
 0x5c1   :  { %7025 = vmatpush3.bf16.msra.mxu1 %v2578_v18 }
 0x5c2   :  { %7026 = vmatprep.subr.bf16.mxu1 %v2596_v35 }
 0x5c4   :  { %v2580_v48 = vpop.permute.xlu1 %2579  ;;  %v2604_v35 = vpop.permute.xlu0 %2603 }
 0x5c5   :  { %7027 = vmatpush3.bf16.msra.mxu1 %v2580_v48  ;;  %v9690_v48 = vld [vmem:[%s13189_s0 + $0x20] sm:$0xff] }
 0x5c6   :  { %7001 = vmatmul.mubr.msk.bf16.gmra.mrb[152].mxu0 %vm1771_vm1, %v9214_v42 }
 0x5c7   :  { %7002 = vmatprep.mubr.msk.bf16.mxu0 %vm1771_vm1, %v9212_v58  ;;  %7145 = vmatpush3.bf16.xpose.msra.mxu0 %v2929_v9 }
 0x5c8   :  { %7723 = vmatprep.subr.msk.bf16.mxu0 %vm1771_vm1, %v9469_v45  ;;  %v2598_v17 = vpop.permute.xlu1 %2597 }
 0x5c9   :  { %7028 = vmatprep.subr.bf16.mxu1 %v2598_v17  ;;  %v9697_v17 = vld [vmem:[%s13189_s0 + $0x28] sm:$0xff] }
 0x5cc   :  { %v2582_v47 = vpop.permute.xlu1 %2581 }
 0x5cd   :  { %7029 = vmatpush3.bf16.msra.mxu1 %v2582_v47 }
 0x5ce   :  { %7003 = vmatmul.mubr.msk.bf16.gmra.mrb[156].mxu0 %vm1771_vm1, %v9212_v58  ;;  %7030 = vmatprep.subr.bf16.mxu1 %v2600_v54  ;;  %v9922_v58 = vld [vmem:[%s13189_s0 + $0xe0] sm:$0xff] }
 0x5cf   :  { %7004 = vmatprep.mubr.msk.bf16.mxu0 %vm1771_vm1, %v9222_v32  ;;  %7147 = vmatpush3.bf16.xpose.msra.mxu0 %v2932_v57  ;;  %13205 = vst [vmem:[#allocation63_spill] sm:$0xff] %v9922_v58 }
 0x5d0   :  { %v2584_v51 = vpop.permute.xlu1 %2583 }
 0x5d1   :  { %7031 = vmatpush3.bf16.msra.mxu1 %v2584_v51  ;;  %v9707_v51 = vld [vmem:[%s13189_s0 + $0x30] sm:$0xff] }
 0x5d4   :  { %v2586_v52 = vpop.permute.xlu1 %2585 }
 0x5d6   :  { %7005 = vmatmul.mubr.msk.bf16.gmra.mrb[160].mxu0 %vm1771_vm1, %v9222_v32 }
 0x5d7   :  { %7006 = vmatprep.mubr.msk.bf16.mxu0 %vm1771_vm1, %v9220_v31 }
 0x5d8   :  { %v2588_v45 = vpop.permute.xlu1 %2587 }
 0x5dc   :  { %v3680_v3 = vpop.permute.xlu1 %3679 }
 0x5de   :  { %7007 = vmatmul.mubr.msk.bf16.gmra.mrb[164].mxu0 %vm1771_vm1, %v9220_v31 }
 0x5df   :  { %7008 = vmatprep.mubr.msk.bf16.mxu0 %vm1771_vm1, %v9236_v33 }
 0x5e0   :  { %v9563_v63 = vpop.permute.xlu1 %3681 }
 0x5e1   :  { %13181 = vst [vmem:[#allocation40_spill] sm:$0xff] %v9563_v63 }
 0x5e4   :  { %v9565_v60 = vpop.permute.xlu1 %3683 }
 0x5e5   :  { %13182 = vst [vmem:[#allocation41_spill] sm:$0xff] %v9565_v60 }
 0x5e6   :  { %7009 = vmatmul.mubr.msk.bf16.gmra.mrb[168].mxu0 %vm1771_vm1, %v9236_v33 }
 0x5e7   :  { %7010 = vmatprep.mubr.msk.bf16.mxu0 %vm1771_vm1, %v9234_v10 }
 0x5e8   :  { %v9571_v32 = vpop.permute.xlu1 %3667 }
 0x5e9   :  { %13183 = vst [vmem:[#allocation42_spill] sm:$0xff] %v9571_v32 }
 0x5ec   :  { %v9573_v23 = vpop.permute.xlu1 %3669 }
 0x5ed   :  { %13184 = vst [vmem:[#allocation43_spill] sm:$0xff] %v9573_v23  ;;  %v9906_v23 = vld [vmem:[%s13189_s0 + $0xd8] sm:$0xff] }
 0x5ee   :  { %7011 = vmatmul.mubr.msk.bf16.gmra.mrb[172].mxu0 %vm1771_vm1, %v9234_v10  ;;  %v9641_v10 = vpop.permute.xlu0 %3663 }
 0x5ef   :  { %7012 = vmatprep.mubr.msk.bf16.mxu0 %vm1771_vm1, %v9252_v56  ;;  %13188 = vst [vmem:[#allocation47_spill] sm:$0xff] %v9641_v10 }
 0x5f0   :  { %v9579_v31 = vpop.permute.xlu1 %3687 }
 0x5f1   :  { %13185 = vst [vmem:[#allocation44_spill] sm:$0xff] %v9579_v31 }
 0x5f4   :  { %v9581_v37 = vpop.permute.xlu1 %3671 }
 0x5f5   :  { %13186 = vst [vmem:[#allocation45_spill] sm:$0xff] %v9581_v37 }
 0x5f6   :  { %7013 = vmatmul.mubr.msk.bf16.gmra.mrb[176].mxu0 %vm1771_vm1, %v9252_v56  ;;  %v9655_v56 = vld [vmem:[%s13189_s0 + $0x8] sm:$0xff] }
 0x5f7   :  { %7014 = vmatprep.mubr.msk.bf16.mxu0 %vm1771_vm1, %v9250_v55 }
 0x5f8   :  { %v9587_v33 = vpop.permute.xlu1 %3673 }
 0x5f9   :  { %13187 = vst [vmem:[#allocation46_spill] sm:$0xff] %v9587_v33 }
 0x5fc   :  { %v2602_v18 = vpop.permute.xlu1 %2601 }
 0x5fd   :  { %7032 = vmatprep.subr.bf16.mxu1 %v2602_v18 }
 0x5fe   :  { %7015 = vmatmul.mubr.msk.bf16.gmra.mrb[180].mxu0 %vm1771_vm1, %v9250_v55  ;;  %7033 = vmatpush3.bf16.msra.mxu1 %v2586_v52  ;;  %v9650_v55 = vld [vmem:[%s13189_s0] sm:$0xff]  ;;  %v9712_v52 = vld [vmem:[%s13189_s0 + $0x38] sm:$0xff] }
 0x5ff   :  { %7016 = vmatprep.mubr.msk.bf16.mxu0 %vm1771_vm1, %v9268_v5  ;;  %7034 = vmatprep.subr.bf16.mxu1 %v2604_v35 }
 0x602   :  { %7035 = vmatpush3.bf16.msra.mxu1 %v2588_v45 }
 0x603   :  { %7180 = vmatprep.subr.bf16.mxu1 %v3680_v3 }
 0x606   :  { %7017 = vmatmul.mubr.msk.bf16.gmra.mrb[184].mxu0 %vm1771_vm1, %v9268_v5 }
 0x607   :  { %7018 = vmatprep.mubr.msk.bf16.mxu0 %vm1771_vm1, %v9266_v0 }
 0x60e   :  { %7019 = vmatmul.mubr.msk.bf16.gmra.mrb[188].mxu0 %vm1771_vm1, %v9266_v0  ;;  %v9886_v0 = vld [vmem:[%s13189_s0 + $0xc0] sm:$0xff] }
 0x60f   :  { %7148 = vmatprep.mubr.msk.bf16.mxu0 %vm1771_vm1, %v9471_v26  ;;  %13201 = vst [vmem:[#allocation59_spill] sm:$0xff] %v9886_v0 }
 0x616   :  { %7149 = vmatmul.mubr.msk.bf16.vlgmr.msra.gmra.mrb[192].mxu0 %vm1771_vm1, %v9471_v26 }
 0x617   :  { %7150 = vmatprep.mubr.msk.bf16.mxu0 %vm1771_vm1, %v9475_v27 }
 0x61e   :  { %7151 = vmatmul.mubr.msk.bf16.gmra.mrb[196].mxu0 %vm1771_vm1, %v9475_v27 }
 0x61f   :  { %7152 = vmatprep.mubr.msk.bf16.mxu0 %vm1771_vm1, %v9477_v21 }
 0x626   :  { %7153 = vmatmul.mubr.msk.bf16.gmra.mrb[200].mxu0 %vm1771_vm1, %v9477_v21  ;;  %v9668_v21 = vld [vmem:[%s13189_s0 + $0x18] sm:$0xff] }
 0x627   :  { %7154 = vmatprep.mubr.msk.bf16.mxu0 %vm1771_vm1, %v9485_v61 }
 0x62e   :  { %7155 = vmatmul.mubr.msk.bf16.gmra.mrb[204].mxu0 %vm1771_vm1, %v9485_v61 }
 0x62f   :  { %7156 = vmatprep.mubr.msk.bf16.mxu0 %vm1771_vm1, %v9487_v49 }
 0x636   :  { %7157 = vmatmul.mubr.msk.bf16.gmra.mrb[208].mxu0 %vm1771_vm1, %v9487_v49  ;;  %v9673_v49 = vpop.permute.xlu0 %3665 }
 0x637   :  { %7158 = vmatprep.mubr.msk.bf16.mxu0 %vm1771_vm1, %v9489_v30  ;;  %13190 = vst [vmem:[#allocation48_spill] sm:$0xff] %v9673_v49 }
 0x63e   :  { %7159 = vmatmul.mubr.msk.bf16.gmra.mrb[212].mxu0 %vm1771_vm1, %v9489_v30 }
 0x63f   :  { %7160 = vmatprep.mubr.msk.bf16.mxu0 %vm1771_vm1, %v9491_v15 }
 0x646   :  { %7161 = vmatmul.mubr.msk.bf16.gmra.mrb[216].mxu0 %vm1771_vm1, %v9491_v15  ;;  %v9660_v15 = vld [vmem:[%s13189_s0 + $0x10] sm:$0xff] }
 0x647   :  { %7162 = vmatprep.mubr.msk.bf16.mxu0 %vm1771_vm1, %v9499_v16 }
 0x64e   :  { %7163 = vmatmul.mubr.msk.bf16.gmra.mrb[220].mxu0 %vm1771_vm1, %v9499_v16 }
 0x64f   :  { %7164 = vmatprep.mubr.msk.bf16.mxu0 %vm1771_vm1, %v9501_v59 }
 0x656   :  { %7165 = vmatmul.mubr.msk.bf16.gmra.mrb[224].mxu0 %vm1771_vm1, %v9501_v59 }
 0x657   :  { %7166 = vmatprep.mubr.msk.bf16.mxu0 %vm1771_vm1, %v9503_v41 }
 0x65e   :  { %7167 = vmatmul.mubr.msk.bf16.gmra.mrb[228].mxu0 %vm1771_vm1, %v9503_v41 }
 0x65f   :  { %7168 = vmatprep.mubr.msk.bf16.mxu0 %vm1771_vm1, %v9508_v62 }
 0x666   :  { %7169 = vmatmul.mubr.msk.bf16.gmra.mrb[232].mxu0 %vm1771_vm1, %v9508_v62 }
 0x667   :  { %7170 = vmatprep.mubr.msk.bf16.mxu0 %vm1771_vm1, %v9513_v1 }
 0x669   :  { %v1902_v5 = vpop.f32.mrb[128].mxu0 }
 0x66a   :  { %v9663_v27 = vadd.f32 %v1902_v5, %v9650_v55  ;;  %v1904_v26 = vpop.f32.mrb[129].mxu0 }
 0x66b   :  { %v9671_v30 = vadd.f32 %v1904_v26, %v9655_v56  ;;  %v1906_v61 = vpop.f32.mrb[130].mxu0 }
 0x66c   :  { %v9676_v16 = vadd.f32 %v1906_v61, %v9660_v15  ;;  %v1908_v59 = vpop.f32.mrb[131].mxu0  ;;  %v9732_v61 = vld [vmem:[%s13189_s0 + $0x40] sm:$0xff] }
 0x66d   :  { %v9679_v41 = vadd.f32 %v1908_v59, %v9668_v21  ;;  %v2061_v62 = vmax.f32 %v9663_v27, %v9671_v30 }
 0x66e   :  { %7171 = vmatmul.mubr.msk.bf16.gmra.mrb[236].mxu0 %vm1771_vm1, %v9513_v1  ;;  %v9699_v1 = vpop.permute.xlu0 %3685 }
 0x66f   :  { %7172 = vmatprep.mubr.msk.bf16.mxu0 %vm1771_vm1, %v9517_v46  ;;  %2062 = vmax.xlane.f32.xlu0 %v2061_v62  ;;  %v2064_v9 = vmax.f32 %v9676_v16, %v9679_v41  ;;  %13191 = vst [vmem:[#allocation49_spill] sm:$0xff] %v9699_v1  ;;  %v9739_v62 = vld [vmem:[%s13189_s0 + $0x48] sm:$0xff] }
 0x671   :  { %v1912_v47 = vpop.f32.mrb[132].mxu0  ;;  %2065 = vmax.xlane.f32.xlu1 %v2064_v9 }
 0x672   :  { %v9702_v54 = vadd.f32 %v1912_v47, %v9690_v48  ;;  %v1914_v57 = vpop.f32.mrb[133].mxu0  ;;  %v9734_v59 = vpop.permute.xlu0 %3689 }
 0x673   :  { %v9715_v45 = vadd.f32 %v1914_v57, %v9697_v17  ;;  %v1916_v3 = vpop.f32.mrb[134].mxu0  ;;  %13192 = vst [vmem:[#allocation50_spill] sm:$0xff] %v9734_v59 }
 0x674   :  { %v1918_v18 = vpop.f32.mrb[135].mxu0  ;;  %v9718_v35 = vadd.f32 %v1916_v3, %v9707_v51 }
 0x675   :  { %v9721_v5 = vadd.f32 %v1918_v18, %v9712_v52  ;;  %v2067_v26 = vmax.f32 %v9702_v54, %v9715_v45  ;;  %v9754_v18 = vld [vmem:[%s13189_s0 + $0x58] sm:$0xff] }
 0x676   :  { %7173 = vmatmul.mubr.msk.bf16.gmra.mrb[240].mxu0 %vm1771_vm1, %v9517_v46  ;;  %v9744_v46 = vld [vmem:[%s13189_s0 + $0x50] sm:$0xff]  ;;  %v2827_v2 = vpop.permute.xlu0 %2826 }
 0x677   :  { %7174 = vmatprep.mubr.msk.bf16.mxu0 %vm1771_vm1, %v9515_v44  ;;  %2068 = vmax.xlane.f32.xlu0 %v2067_v26  ;;  %v2070_v47 = vmax.f32 %v9718_v35, %v9721_v5 }
 0x679   :  { %v1922_v9 = vpop.f32.mrb[136].mxu0 }
 0x67a   :  { %v9749_v57 = vadd.f32 %v1922_v9, %v9732_v61  ;;  %v1924_v3 = vpop.f32.mrb[137].mxu0 }
 0x67b   :  { %v9757_v26 = vadd.f32 %v1924_v3, %v9739_v62  ;;  %v1926_v38 = vpop.f32.mrb[138].mxu0  ;;  %2071 = vmax.xlane.f32.xlu0 %v2070_v47  ;;  %v9773_v47 = vld [vmem:[%s13189_s0 + $0x60] sm:$0xff] }
 0x67c   :  { %v9760_v43 = vadd.f32 %v1926_v38, %v9744_v46  ;;  %v1928_v53 = vpop.f32.mrb[139].mxu0 }
 0x67d   :  { %v9763_v36 = vadd.f32 %v1928_v53, %v9754_v18  ;;  %v2073_v9 = vmax.f32 %v9749_v57, %v9757_v26  ;;  %v9780_v53 = vld [vmem:[%s13189_s0 + $0x68] sm:$0xff] }
 0x67e   :  { %7175 = vmatmul.mubr.msk.bf16.gmra.mrb[244].mxu0 %vm1771_vm1, %v9515_v44  ;;  %v9785_v44 = vld [vmem:[%s13189_s0 + $0x70] sm:$0xff] }
 0x67f   :  { %7176 = vmatprep.mubr.msk.bf16.mxu0 %vm1771_vm1, %v2827_v2  ;;  %2074 = vmax.xlane.f32.xlu1 %v2073_v9  ;;  %v2076_v38 = vmax.f32 %v9760_v43, %v9763_v36 }
 0x681   :  { %v1932_v3 = vpop.f32.mrb[140].mxu0  ;;  %2077 = vmax.xlane.f32.xlu0 %v2076_v38 }
 0x682   :  { %v9788_v9 = vadd.f32 %v1932_v3, %v9773_v47  ;;  %v1934_v40 = vpop.f32.mrb[141].mxu0 }
 0x683   :  { %v9796_v25 = vadd.f32 %v1934_v40, %v9780_v53  ;;  %v1936_v34 = vpop.f32.mrb[142].mxu0  ;;  %v9812_v40 = vld [vmem:[%s13189_s0 + $0x80] sm:$0xff] }
 0x684   :  { %v9799_v38 = vadd.f32 %v1936_v34, %v9785_v44  ;;  %v1938_v22 = vpop.f32.mrb[143].mxu0  ;;  %13193 = vst [vmem:[#allocation51_spill] sm:$0xff] %v9812_v40 }
 0x685   :  { %v9802_v39 = vadd.f32 %v1938_v22, %v9793_v29  ;;  %v2079_v3 = vmax.f32 %v9788_v9, %v9796_v25  ;;  %v9819_v22 = vld [vmem:[%s13189_s0 + $0x88] sm:$0xff] }
 0x686   :  { %7177 = vmatmul.mubr.msk.bf16.gmra.mrb[248].mxu0 %vm1771_vm1, %v2827_v2  ;;  %13194 = vst [vmem:[#allocation52_spill] sm:$0xff] %v9819_v22  ;;  %v9824_v2 = vld [vmem:[%s13189_s0 + $0x90] sm:$0xff] }
 0x687   :  { %7178 = vmatprep.mubr.msk.bf16.mxu0 %vm1771_vm1, %v9525_v4  ;;  %2080 = vmax.xlane.f32.xlu1 %v2079_v3  ;;  %v2082_v34 = vmax.f32 %v9799_v38, %v9802_v39 }
 0x689   :  { %v1942_v24 = vpop.f32.mrb[144].mxu0  ;;  %2083 = vmax.xlane.f32.xlu0 %v2082_v34 }
 0x68a   :  { %v9827_v3 = vadd.f32 %v1942_v24, %v9812_v40  ;;  %v1944_v28 = vpop.f32.mrb[145].mxu0 }
 0x68b   :  { %v9835_v19 = vadd.f32 %v1944_v28, %v9819_v22  ;;  %v1946_v14 = vpop.f32.mrb[146].mxu0  ;;  %v9850_v28 = vld [vmem:[%s13189_s0 + $0xa0] sm:$0xff] }
 0x68c   :  { %v9838_v34 = vadd.f32 %v1946_v14, %v9824_v2  ;;  %v1948_v20 = vpop.f32.mrb[147].mxu0  ;;  %13197 = vst [vmem:[#allocation55_spill] sm:$0xff] %v9850_v28 }
 0x68d   :  { %v9841_v11 = vadd.f32 %v1948_v20, %v9832_v13  ;;  %v2085_v24 = vmax.f32 %v9827_v3, %v9835_v19  ;;  %v9857_v20 = vld [vmem:[%s13189_s0 + $0xa8] sm:$0xff] }
 0x68e   :  { %13195 = vst [vmem:[#allocation53_spill] sm:$0xff] %v9838_v34  ;;  %7179 = vmatmul.mubr.msk.bf16.gmra.mrb[252].mxu0 %vm1771_vm1, %v9525_v4  ;;  %13198 = vst [vmem:[#allocation56_spill] sm:$0xff] %v9857_v20  ;;  %v9862_v4 = vld [vmem:[%s13189_s0 + $0xb0] sm:$0xff] }
 0x68f   :  { %13196 = vst [vmem:[#allocation54_spill] sm:$0xff] %v9841_v11  ;;  %2086 = vmax.xlane.f32.xlu1 %v2085_v24  ;;  %v2088_v14 = vmax.f32 %v9838_v34, %v9841_v11 }
 0x691   :  { %v1952_v7 = vpop.f32.mrb[148].mxu0  ;;  %2089 = vmax.xlane.f32.xlu0 %v2088_v14 }
 0x692   :  { %v9865_v24 = vadd.f32 %v1952_v7, %v9850_v28  ;;  %v1954_v8 = vpop.f32.mrb[149].mxu0 }
 0x693   :  { %v9873_v50 = vadd.f32 %v1954_v8, %v9857_v20  ;;  %v1956_v6 = vpop.f32.mrb[150].mxu0 }
 0x694   :  { %13199 = vst [vmem:[#allocation57_spill] sm:$0xff] %v9865_v24  ;;  %v9876_v14 = vadd.f32 %v1956_v6, %v9862_v4  ;;  %v1958_v33 = vpop.f32.mrb[151].mxu0  ;;  %v9893_v6 = vld [vmem:[%s13189_s0 + $0xc8] sm:$0xff] }
 0x695   :  { %13200 = vst [vmem:[#allocation58_spill] sm:$0xff] %v9873_v50  ;;  %v9879_v59 = vadd.f32 %v1958_v33, %v9870_v12  ;;  %v2091_v7 = vmax.f32 %v9865_v24, %v9873_v50  ;;  %13202 = vst [vmem:[#allocation60_spill] sm:$0xff] %v9893_v6  ;;  %v9898_v33 = vld [vmem:[%s13189_s0 + $0xd0] sm:$0xff] }
 0x697   :  { %2092 = vmax.xlane.f32.xlu1 %v2091_v7  ;;  %v2094_v8 = vmax.f32 %v9876_v14, %v9879_v59 }
 0x699   :  { %v1962_v37 = vpop.f32.mrb[152].mxu0  ;;  %2095 = vmax.xlane.f32.xlu0 %v2094_v8 }
 0x69a   :  { %v9901_v7 = vadd.f32 %v1962_v37, %v9886_v0  ;;  %v1964_v31 = vpop.f32.mrb[153].mxu0 }
 0x69b   :  { %v9909_v1 = vadd.f32 %v1964_v31, %v9893_v6  ;;  %v1966_v32 = vpop.f32.mrb[154].mxu0 }
 0x69c   :  { %13203 = vst [vmem:[#allocation61_spill] sm:$0xff] %v9901_v7  ;;  %v9912_v8 = vadd.f32 %v1966_v32, %v9898_v33  ;;  %v1968_v60 = vpop.f32.mrb[155].mxu0  ;;  %v9929_v32 = vld [vmem:[%s13189_s0 + $0xe8] sm:$0xff] }
 0x69d   :  { %13204 = vst [vmem:[#allocation62_spill] sm:$0xff] %v9909_v1  ;;  %v2097_v49 = vmax.f32 %v9901_v7, %v9909_v1  ;;  %v9917_v37 = vadd.f32 %v1968_v60, %v9906_v23  ;;  %13206 = vst [vmem:[#allocation64_spill] sm:$0xff] %v9929_v32  ;;  %v9934_v60 = vld [vmem:[%s13189_s0 + $0xf0] sm:$0xff]  ;;  %v9942_v1 = vld [vmem:[%s13189_s0 + $0xf8] sm:$0xff] }
 0x69f   :  { %2098 = vmax.xlane.f32.xlu1 %v2097_v49  ;;  %v2100_v31 = vmax.f32 %v9912_v8, %v9917_v37 }
 0x6a1   :  { %v1972_v63 = vpop.f32.mrb[156].mxu0  ;;  %2101 = vmax.xlane.f32.xlu0 %v2100_v31 }
 0x6a2   :  { %v9937_v49 = vadd.f32 %v1972_v63, %v9922_v58  ;;  %v1974_v10 = vpop.f32.mrb[157].mxu0  ;;  %v9958_v58 = vld [vmem:[%s13189_s0 + $0x100] sm:$0xff] }
 0x6a3   :  { %v9945_v7 = vadd.f32 %v1974_v10, %v9929_v32  ;;  %v1976_v50 = vpop.f32.mrb[158].mxu0  ;;  %13210 = vst [vmem:[#allocation68_spill] sm:$0xff] %v9958_v58 }
 0x6a4   :  { %13207 = vst [vmem:[#allocation65_spill] sm:$0xff] %v9937_v49  ;;  %v9948_v31 = vadd.f32 %v1976_v50, %v9934_v60  ;;  %v1978_v24 = vpop.f32.mrb[159].mxu0  ;;  %v9965_v50 = vld [vmem:[%s13189_s0 + $0x108] sm:$0xff] }
 0x6a5   :  { %13208 = vst [vmem:[#allocation66_spill] sm:$0xff] %v9945_v7  ;;  %v2103_v6 = vmax.f32 %v9937_v49, %v9945_v7  ;;  %v9953_v63 = vadd.f32 %v1978_v24, %v9942_v1  ;;  %13211 = vst [vmem:[#allocation69_spill] sm:$0xff] %v9965_v50  ;;  %v9970_v24 = vld [vmem:[%s13189_s0 + $0x110] sm:$0xff]  ;;  %v9978_v49 = vld [vmem:[%s13189_s0 + $0x118] sm:$0xff] }
 0x6a7   :  { %13209 = vst [vmem:[#allocation67_spill] sm:$0xff] %v9953_v63  ;;  %2104 = vmax.xlane.f32.xlu1 %v2103_v6  ;;  %v2106_v10 = vmax.f32 %v9948_v31, %v9953_v63 }
 0x6a9   :  { %v1982_v32 = vpop.f32.mrb[160].mxu0  ;;  %2107 = vmax.xlane.f32.xlu0 %v2106_v10 }
 0x6aa   :  { %v9973_v6 = vadd.f32 %v1982_v32, %v9958_v58  ;;  %v1984_v7 = vpop.f32.mrb[161].mxu0  ;;  %v9994_v58 = vld [vmem:[%s13189_s0 + $0x120] sm:$0xff] }
 0x6ab   :  { %v9981_v0 = vadd.f32 %v1984_v7, %v9965_v50  ;;  %v1986_v11 = vpop.f32.mrb[162].mxu0  ;;  %13216 = vst [vmem:[#allocation74_spill] sm:$0xff] %v9994_v58 }
 0x6ac   :  { %13212 = vst [vmem:[#allocation70_spill] sm:$0xff] %v9973_v6  ;;  %v9984_v10 = vadd.f32 %v1986_v11, %v9970_v24  ;;  %v1988_v34 = vpop.f32.mrb[163].mxu0  ;;  %v10001_v11 = vld [vmem:[%s13189_s0 + $0x128] sm:$0xff] }
 0x6ad   :  { %13213 = vst [vmem:[#allocation71_spill] sm:$0xff] %v9981_v0  ;;  %v2109_v20 = vmax.f32 %v9973_v6, %v9981_v0  ;;  %v9989_v32 = vadd.f32 %v1988_v34, %v9978_v49  ;;  %13217 = vst [vmem:[#allocation75_spill] sm:$0xff] %v10001_v11  ;;  %v10006_v34 = vld [vmem:[%s13189_s0 + $0x130] sm:$0xff]  ;;  %v10014_v6 = vld [vmem:[%s13189_s0 + $0x138] sm:$0xff] }
 0x6ae   :  { %13214 = vst [vmem:[#allocation72_spill] sm:$0xff] %v9984_v10  ;;  %13218 = vst [vmem:[#allocation76_spill] sm:$0xff] %v10006_v34 }
 0x6af   :  { %13215 = vst [vmem:[#allocation73_spill] sm:$0xff] %v9989_v32  ;;  %2110 = vmax.xlane.f32.xlu1 %v2109_v20  ;;  %v2112_v7 = vmax.f32 %v9984_v10, %v9989_v32  ;;  %13220 = vst [vmem:[#allocation78_spill] sm:$0xff] %v10014_v6 }
 0x6b1   :  { %v1992_v50 = vpop.f32.mrb[164].mxu0  ;;  %2113 = vmax.xlane.f32.xlu0 %v2112_v7 }
 0x6b2   :  { %v10009_v20 = vadd.f32 %v1992_v50, %v9994_v58  ;;  %v1994_v0 = vpop.f32.mrb[165].mxu0  ;;  %v10030_v58 = vld [vmem:[%s13189_s0 + $0x140] sm:$0xff] }
 0x6b3   :  { %v10017_v32 = vadd.f32 %v1994_v0, %v10001_v11  ;;  %v1996_v10 = vpop.f32.mrb[166].mxu0  ;;  %13224 = vst [vmem:[#allocation82_spill] sm:$0xff] %v10030_v58 }
 0x6b4   :  { %13219 = vst [vmem:[#allocation77_spill] sm:$0xff] %v10009_v20  ;;  %v10020_v7 = vadd.f32 %v1996_v10, %v10006_v34  ;;  %v1998_v28 = vpop.f32.mrb[167].mxu0  ;;  %v10037_v10 = vld [vmem:[%s13189_s0 + $0x148] sm:$0xff] }
 0x6b5   :  { %13221 = vst [vmem:[#allocation79_spill] sm:$0xff] %v10017_v32  ;;  %v2115_v63 = vmax.f32 %v10009_v20, %v10017_v32  ;;  %v10025_v50 = vadd.f32 %v1998_v28, %v10014_v6  ;;  %13225 = vst [vmem:[#allocation83_spill] sm:$0xff] %v10037_v10  ;;  %v10042_v28 = vld [vmem:[%s13189_s0 + $0x150] sm:$0xff]  ;;  %v10050_v20 = vld [vmem:[%s13189_s0 + $0x158] sm:$0xff] }
 0x6b6   :  { %13222 = vst [vmem:[#allocation80_spill] sm:$0xff] %v10020_v7  ;;  %13226 = vst [vmem:[#allocation84_spill] sm:$0xff] %v10042_v28 }
 0x6b7   :  { %13223 = vst [vmem:[#allocation81_spill] sm:$0xff] %v10025_v50  ;;  %2116 = vmax.xlane.f32.xlu1 %v2115_v63  ;;  %v2118_v0 = vmax.f32 %v10020_v7, %v10025_v50  ;;  %13228 = vst [vmem:[#allocation86_spill] sm:$0xff] %v10050_v20 }
 0x6b9   :  { %v2002_v11 = vpop.f32.mrb[168].mxu0  ;;  %2119 = vmax.xlane.f32.xlu0 %v2118_v0 }
 0x6ba   :  { %v10045_v63 = vadd.f32 %v2002_v11, %v10030_v58  ;;  %v2004_v32 = vpop.f32.mrb[169].mxu0  ;;  %v10066_v58 = vld [vmem:[%s13189_s0 + $0x160] sm:$0xff] }
 0x6bb   :  { %v10053_v50 = vadd.f32 %v2004_v32, %v10037_v10  ;;  %v2006_v7 = vpop.f32.mrb[170].mxu0  ;;  %13232 = vst [vmem:[#allocation90_spill] sm:$0xff] %v10066_v58 }
 0x6bc   :  { %13227 = vst [vmem:[#allocation85_spill] sm:$0xff] %v10045_v63  ;;  %v10056_v0 = vadd.f32 %v2006_v7, %v10042_v28  ;;  %v2008_v6 = vpop.f32.mrb[171].mxu0  ;;  %v10073_v7 = vld [vmem:[%s13189_s0 + $0x168] sm:$0xff]  ;;  %v10102_v28 = vld [vmem:[%s13189_s0 + $0x180] sm:$0xff] }
 0x6bd   :  { %13229 = vst [vmem:[#allocation87_spill] sm:$0xff] %v10053_v50  ;;  %v2121_v34 = vmax.f32 %v10045_v63, %v10053_v50  ;;  %v10061_v11 = vadd.f32 %v2008_v6, %v10050_v20  ;;  %13233 = vst [vmem:[#allocation91_spill] sm:$0xff] %v10073_v7  ;;  %v10086_v63 = vld [vmem:[%s13189_s0 + $0x178] sm:$0xff] }
 0x6be   :  { %13230 = vst [vmem:[#allocation88_spill] sm:$0xff] %v10056_v0  ;;  %13236 = vst [vmem:[#allocation94_spill] sm:$0xff] %v10086_v63 }
 0x6bf   :  { %13231 = vst [vmem:[#allocation89_spill] sm:$0xff] %v10061_v11  ;;  %2122 = vmax.xlane.f32.xlu1 %v2121_v34  ;;  %v2124_v32 = vmax.f32 %v10056_v0, %v10061_v11  ;;  %v10081_v34 = vld [vmem:[%s13189_s0 + $0x170] sm:$0xff]  ;;  %13240 = vst [vmem:[#allocation98_spill] sm:$0xff] %v10102_v28 }
 0x6c0   :  { %13235 = vst [vmem:[#allocation93_spill] sm:$0xff] %v10081_v34 }
 0x6c1   :  { %v2012_v10 = vpop.f32.mrb[172].mxu0  ;;  %2125 = vmax.xlane.f32.xlu0 %v2124_v32 }
 0x6c2   :  { %v10076_v50 = vadd.f32 %v2012_v10, %v10066_v58  ;;  %v2014_v6 = vpop.f32.mrb[173].mxu0 }
 0x6c3   :  { %v10089_v11 = vadd.f32 %v2014_v6, %v10073_v7  ;;  %v2016_v0 = vpop.f32.mrb[174].mxu0  ;;  %v10107_v6 = vld [vmem:[%s13189_s0 + $0x188] sm:$0xff] }
 0x6c4   :  { %13234 = vst [vmem:[#allocation92_spill] sm:$0xff] %v10076_v50  ;;  %v2018_v20 = vpop.f32.mrb[175].mxu0  ;;  %v10092_v32 = vadd.f32 %v2016_v0, %v10081_v34  ;;  %13241 = vst [vmem:[#allocation99_spill] sm:$0xff] %v10107_v6 }
 0x6c5   :  { %13237 = vst [vmem:[#allocation95_spill] sm:$0xff] %v10089_v11  ;;  %v10095_v10 = vadd.f32 %v2018_v20, %v10086_v63  ;;  %v2127_v58 = vmax.f32 %v10076_v50, %v10089_v11  ;;  %v10112_v20 = vld [vmem:[%s13189_s0 + $0x190] sm:$0xff]  ;;  %v10122_v50 = vld [vmem:[%s13189_s0 + $0x198] sm:$0xff] }
 0x6c6   :  { %13238 = vst [vmem:[#allocation96_spill] sm:$0xff] %v10092_v32  ;;  %13242 = vst [vmem:[#allocation100_spill] sm:$0xff] %v10112_v20 }
 0x6c7   :  { %13239 = vst [vmem:[#allocation97_spill] sm:$0xff] %v10095_v10  ;;  %2128 = vmax.xlane.f32.xlu0 %v2127_v58  ;;  %v2130_v0 = vmax.f32 %v10092_v32, %v10095_v10  ;;  %13244 = vst [vmem:[#allocation102_spill] sm:$0xff] %v10122_v50 }
 0x6c9   :  { %v2022_v7 = vpop.f32.mrb[176].mxu0 }
 0x6ca   :  { %v10117_v58 = vadd.f32 %v2022_v7, %v10102_v28  ;;  %v2024_v11 = vpop.f32.mrb[177].mxu0  ;;  %v191_v28 = vld [vmem:[%s13189_s0 + $0x1a0] sm:$0xff] }
 0x6cb   :  { %v10125_v63 = vadd.f32 %v2024_v11, %v10107_v6  ;;  %v2026_v34 = vpop.f32.mrb[178].mxu0  ;;  %2131 = vmax.xlane.f32.xlu0 %v2130_v0 }
 0x6cc   :  { %13243 = vst [vmem:[#allocation101_spill] sm:$0xff] %v10117_v58  ;;  %v10128_v22 = vadd.f32 %v2026_v34, %v10112_v20  ;;  %v2028_v40 = vpop.f32.mrb[179].mxu0  ;;  %v192_v34 = vld [vmem:[%s13189_s0 + $0x1a8] sm:$0xff] }
 0x6cd   :  { %13245 = vst [vmem:[#allocation103_spill] sm:$0xff] %v10125_v63  ;;  %v2133_v10 = vmax.f32 %v10117_v58, %v10125_v63  ;;  %v10133_v7 = vadd.f32 %v2028_v40, %v10122_v50  ;;  %v10146_v63 = vld [vmem:[%s13189_s0 + $0x1b0] sm:$0xff]  ;;  %v10153_v58 = vld [vmem:[%s13189_s0 + $0x1b8] sm:$0xff] }
 0x6ce   :  { %13246 = vst [vmem:[#allocation104_spill] sm:$0xff] %v10128_v22  ;;  %13248 = vst [vmem:[#allocation106_spill] sm:$0xff] %v10146_v63 }
 0x6cf   :  { %13247 = vst [vmem:[#allocation105_spill] sm:$0xff] %v10133_v7  ;;  %2134 = vmax.xlane.f32.xlu1 %v2133_v10  ;;  %v2136_v11 = vmax.f32 %v10128_v22, %v10133_v7  ;;  %13250 = vst [vmem:[#allocation108_spill] sm:$0xff] %v10153_v58 }
 0x6d1   :  { %v2032_v0 = vpop.f32.mrb[180].mxu0  ;;  %2137 = vmax.xlane.f32.xlu0 %v2136_v11 }
 0x6d2   :  { %v10148_v40 = vadd.f32 %v2032_v0, %v191_v28  ;;  %v2034_v10 = vpop.f32.mrb[181].mxu0  ;;  %v195_v28 = vld [vmem:[%s13189_s0 + $0x1c0] sm:$0xff] }
 0x6d3   :  { %v10155_v6 = vadd.f32 %v2034_v10, %v192_v34  ;;  %v2036_v7 = vpop.f32.mrb[182].mxu0  ;;  %v10176_v10 = vld [vmem:[%s13189_s0 + $0x1d0] sm:$0xff] }
 0x6d4   :  { %13249 = vst [vmem:[#allocation107_spill] sm:$0xff] %v10148_v40  ;;  %v10158_v22 = vadd.f32 %v2036_v7, %v10146_v63  ;;  %v2038_v11 = vpop.f32.mrb[183].mxu0  ;;  %v196_v7 = vld [vmem:[%s13189_s0 + $0x1c8] sm:$0xff]  ;;  %13254 = vst [vmem:[#allocation112_spill] sm:$0xff] %v10176_v10 }
 0x6d5   :  { %13251 = vst [vmem:[#allocation109_spill] sm:$0xff] %v10155_v6  ;;  %v2139_v32 = vmax.f32 %v10148_v40, %v10155_v6  ;;  %v10163_v50 = vadd.f32 %v2038_v11, %v10153_v58  ;;  %v10183_v6 = vld [vmem:[%s13189_s0 + $0x1d8] sm:$0xff] }
 0x6d6   :  { %13252 = vst [vmem:[#allocation110_spill] sm:$0xff] %v10158_v22  ;;  %13256 = vst [vmem:[#allocation114_spill] sm:$0xff] %v10183_v6 }
 0x6d7   :  { %13253 = vst [vmem:[#allocation111_spill] sm:$0xff] %v10163_v50  ;;  %2140 = vmax.xlane.f32.xlu1 %v2139_v32  ;;  %v2142_v34 = vmax.f32 %v10158_v22, %v10163_v50 }
 0x6d9   :  { %v2042_v0 = vpop.f32.mrb[184].mxu0  ;;  %2143 = vmax.xlane.f32.xlu0 %v2142_v34 }
 0x6da   :  { %v10178_v11 = vadd.f32 %v2042_v0, %v195_v28  ;;  %v2044_v32 = vpop.f32.mrb[185].mxu0 }
 0x6db   :  { %v10185_v40 = vadd.f32 %v2044_v32, %v196_v7  ;;  %v2046_v50 = vpop.f32.mrb[186].mxu0  ;;  %v199_v7 = vld [vmem:[%s13189_s0 + $0x1e0] sm:$0xff]  ;;  %v201_v32 = vld [vmem:[%s13189_s0 + $0x1f0] sm:$0xff] }
 0x6dc   :  { %13255 = vst [vmem:[#allocation113_spill] sm:$0xff] %v10178_v11  ;;  %v10188_v22 = vadd.f32 %v2046_v50, %v10176_v10  ;;  %v2048_v34 = vpop.f32.mrb[187].mxu0  ;;  %v200_v50 = vld [vmem:[%s13189_s0 + $0x1e8] sm:$0xff] }
 0x6dd   :  { %13257 = vst [vmem:[#allocation115_spill] sm:$0xff] %v10185_v40  ;;  %v2145_v58 = vmax.f32 %v10178_v11, %v10185_v40  ;;  %v10193_v63 = vadd.f32 %v2048_v34, %v10183_v6 }
 0x6de   :  { %13258 = vst [vmem:[#allocation116_spill] sm:$0xff] %v10188_v22 }
 0x6df   :  { %13259 = vst [vmem:[#allocation117_spill] sm:$0xff] %v10193_v63  ;;  %v2148_v28 = vmax.f32 %v10188_v22, %v10193_v63  ;;  %2146 = vmax.xlane.f32.xlu1 %v2145_v58  ;;  %v202_v58 = vld [vmem:[%s13189_s0 + $0x1f8] sm:$0xff] }
 0x6e1   :  { %v2052_v0 = vpop.f32.mrb[188].mxu0  ;;  %2149 = vmax.xlane.f32.xlu0 %v2148_v28 }
 0x6e2   :  { %v10206_v34 = vadd.f32 %v2052_v0, %v199_v7  ;;  %v2054_v40 = vpop.f32.mrb[189].mxu0 }
 0x6e3   :  { %v10211_v11 = vadd.f32 %v2054_v40, %v200_v50  ;;  %v2056_v63 = vpop.f32.mrb[190].mxu0 }
 0x6e4   :  { %v10213_v22 = vadd.f32 %v2056_v63, %v201_v32  ;;  %v2058_v6 = vpop.f32.mrb[191].mxu0 }
 0x6e5   :  { %13260 = vst [vmem:[#allocation118_spill] sm:$0xff] %v10211_v11  ;;  %v2151_v28 = vmax.f32 %v10206_v34, %v10211_v11  ;;  %v10217_v10 = vadd.f32 %v2058_v6, %v202_v58 }
 0x6e7   :  { %v2154_v7 = vmax.f32 %v10213_v22, %v10217_v10  ;;  %2152 = vmax.xlane.f32.xlu1 %v2151_v28 }
 0x6e9   :  { %v2992_v0 = vpop.f32.mrb[192].mxu0  ;;  %2155 = vmax.xlane.f32.xlu0 %v2154_v7 }
 0x6ea   :  { %v10222_v20 = vadd.f32 %v2992_v0, %v9650_v55  ;;  %v2994_v40 = vpop.f32.mrb[193].mxu0 }
 0x6eb   :  { %v10225_v50 = vadd.f32 %v2994_v40, %v9655_v56  ;;  %v2996_v63 = vpop.f32.mrb[194].mxu0 }
 0x6ec   :  { %v10228_v32 = vadd.f32 %v2996_v63, %v9660_v15  ;;  %v2998_v11 = vpop.f32.mrb[195].mxu0 }
 0x6ed   :  { %13261 = vst [vmem:[#allocation119_spill] sm:$0xff] %v10225_v50  ;;  %v3151_v6 = vmax.f32 %v10222_v20, %v10225_v50  ;;  %v10233_v58 = vadd.f32 %v2998_v11, %v9668_v21 }
 0x6ef   :  { %v3154_v28 = vmax.f32 %v10228_v32, %v10233_v58  ;;  %3152 = vmax.xlane.f32.xlu1 %v3151_v6 }
 0x6f1   :  { %v3002_v55 = vpop.f32.mrb[196].mxu0  ;;  %3155 = vmax.xlane.f32.xlu0 %v3154_v28  ;;  %v10253_v28 = vpop.permute.xlu1 %3691 }
 0x6f2   :  { %v10238_v56 = vadd.f32 %v3002_v55, %v9690_v48  ;;  %v3004_v7 = vpop.f32.mrb[197].mxu0  ;;  %13262 = vst [vmem:[#allocation120_spill] sm:$0xff] %v10253_v28 }
 0x6f3   :  { %v10241_v15 = vadd.f32 %v3004_v7, %v9697_v17  ;;  %v3006_v0 = vpop.f32.mrb[198].mxu0 }
 0x6f4   :  { %v10244_v40 = vadd.f32 %v3006_v0, %v9707_v51  ;;  %v3008_v63 = vpop.f32.mrb[199].mxu0 }
 0x6f5   :  { %v3157_v21 = vmax.f32 %v10238_v56, %v10241_v15  ;;  %v10249_v11 = vadd.f32 %v3008_v63, %v9712_v52 }
 0x6f7   :  { %v3160_v6 = vmax.f32 %v10244_v40, %v10249_v11  ;;  %3158 = vmax.xlane.f32.xlu1 %v3157_v21 }
 0x6f9   :  { %v3012_v48 = vpop.f32.mrb[200].mxu0  ;;  %3161 = vmax.xlane.f32.xlu0 %v3160_v6 }
 0x6fa   :  { %v10256_v17 = vadd.f32 %v3012_v48, %v9732_v61  ;;  %v3014_v51 = vpop.f32.mrb[201].mxu0 }
 0x6fb   :  { %v10259_v55 = vadd.f32 %v3014_v51, %v9739_v62  ;;  %v3016_v7 = vpop.f32.mrb[202].mxu0 }
 0x6fc   :  { %13263 = vst [vmem:[#allocation121_spill] sm:$0xff] %v10256_v17  ;;  %v10262_v0 = vadd.f32 %v3016_v7, %v9744_v46  ;;  %v3018_v52 = vpop.f32.mrb[203].mxu0  ;;  %v2063_v63 = vpop.xlane.xlu0 %2062 }
 0x6fd   :  { %13264 = vst [vmem:[#allocation122_spill] sm:$0xff] %v10259_v55  ;;  %v3163_v21 = vmax.f32 %v10256_v17, %v10259_v55  ;;  %v10267_v6 = vadd.f32 %v3018_v52, %v9754_v18  ;;  %v2157_v28 = vsub.f32 %v9663_v27, %v2063_v63  ;;  %v2158_v61 = vsub.f32 %v9671_v30, %v2063_v63 }
 0x6fe   :  { %v2066_v48 = vpop.xlane.xlu1 %2065 }
 0x6ff   :  { %v3166_v62 = vmax.f32 %v10262_v0, %v10267_v6  ;;  %v2221_v51 = vmul.f32 1.442695, %v2157_v28  ;;  %v2223_v50 = vmul.f32 1.442695, %v2158_v61  ;;  %v2159_v46 = vsub.f32 %v9676_v16, %v2066_v48  ;;  %3164 = vmax.xlane.f32.xlu1 %v3163_v21 }
 0x700   :  { %v2160_v7 = vsub.f32 %v9679_v41, %v2066_v48 }
 0x701   :  { %7809 = vpow2.f32 %v2221_v51  ;;  %v2225_v55 = vmul.f32 1.442695, %v2159_v46  ;;  %v3022_v17 = vpop.f32.mrb[204].mxu0  ;;  %3167 = vmax.xlane.f32.xlu0 %v3166_v62 }
 0x702   :  { %7811 = vpow2.f32 %v2223_v50  ;;  %v2227_v18 = vmul.f32 1.442695, %v2160_v7  ;;  %v10276_v27 = vadd.f32 %v3022_v17, %v9773_v47  ;;  %v3024_v30 = vpop.f32.mrb[205].mxu0 }
 0x703   :  { %7813 = vpow2.f32 %v2225_v55  ;;  %v10279_v52 = vadd.f32 %v3024_v30, %v9780_v53  ;;  %v3026_v28 = vpop.f32.mrb[206].mxu0 }
 0x704   :  { %7815 = vpow2.f32 %v2227_v18  ;;  %v10282_v16 = vadd.f32 %v3026_v28, %v9785_v44  ;;  %v3028_v41 = vpop.f32.mrb[207].mxu0  ;;  %v2069_v63 = vpop.xlane.xlu0 %2068 }
 0x705   :  { %v3169_v21 = vmax.f32 %v10276_v27, %v10279_v52  ;;  %v10287_v50 = vadd.f32 %v3028_v41, %v9793_v29  ;;  %v2161_v47 = vsub.f32 %v9702_v54, %v2069_v63  ;;  %v2162_v17 = vsub.f32 %v9715_v45, %v2069_v63 }
 0x707   :  { %v3172_v53 = vmax.f32 %v10282_v16, %v10287_v50  ;;  %v2229_v55 = vmul.f32 1.442695, %v2161_v47  ;;  %v2231_v61 = vmul.f32 1.442695, %v2162_v17  ;;  %3170 = vmax.xlane.f32.xlu1 %v3169_v21 }
 0x708   :  { %v2072_v44 = vpop.xlane.xlu0 %2071 }
 0x709   :  { %v2163_v48 = vsub.f32 %v9718_v35, %v2072_v44  ;;  %v2164_v62 = vsub.f32 %v9721_v5, %v2072_v44  ;;  %v10295_v51 = vpop.f32.mrb[208].mxu0  ;;  %3173 = vmax.xlane.f32.xlu0 %v3172_v53  ;;  %7817 = vpow2.f32 %v2229_v55 }
 0x70a   :  { %v10297_v29 = vpop.f32.mrb[209].mxu0  ;;  %7819 = vpow2.f32 %v2231_v61 }
 0x70b   :  { %v10299_v54 = vpop.eup %7809  ;;  %v2233_v45 = vmul.f32 1.442695, %v2163_v48  ;;  %v2235_v46 = vmul.f32 1.442695, %v2164_v62  ;;  %v3036_v7 = vpop.f32.mrb[210].mxu0 }
 0x70c   :  { %v10301_v18 = vpop.eup %7811  ;;  %v3038_v30 = vpop.f32.mrb[211].mxu0  ;;  %v10312_v17 = vadd.f32 %v3036_v7, %v9824_v2 }
 0x70d   :  { %v2075_v28 = vpop.xlane.xlu1 %2074  ;;  %v10303_v41 = vpop.eup %7813  ;;  %7821 = vpow2.f32 %v2233_v45  ;;  %v2349_v63 = vadd.f32 %v10301_v18, %v10299_v54  ;;  %v10315_v53 = vadd.f32 %v3038_v30, %v9832_v13 }
 0x70e   :  { %v10305_v35 = vpop.eup %7815  ;;  %v2165_v5 = vsub.f32 %v9749_v57, %v2075_v28  ;;  %7823 = vpow2.f32 %v2235_v46  ;;  %v2166_v21 = vsub.f32 %v9757_v26, %v2075_v28  ;;  %v2078_v47 = vpop.xlane.xlu0 %2077  ;;  %13265 = vst [vmem:[#allocation123_spill] sm:$0xff] %v10312_v17 }
 0x70f   :  { %13266 = vst [vmem:[#allocation124_spill] sm:$0xff] %v10315_v53  ;;  %2350 = vadd.xlane.f32.xlu1 %v2349_v63  ;;  %v2352_v55 = vadd.f32 %v10305_v35, %v10303_v41  ;;  %v2167_v44 = vsub.f32 %v9760_v43, %v2078_v47  ;;  %v2168_v62 = vsub.f32 %v9763_v36, %v2078_v47 }
 0x710   :  { %v2237_v57 = vmul.f32 1.442695, %v2165_v5  ;;  %v2239_v26 = vmul.f32 1.442695, %v2166_v21  ;;  %v3178_v13 = vmax.f32 %v10312_v17, %v10315_v53 }
 0x711   :  { %v10319_v61 = vpop.f32.mrb[212].mxu0  ;;  %2353 = vadd.xlane.f32.xlu0 %v2352_v55  ;;  %v2241_v30 = vmul.f32 1.442695, %v2167_v44  ;;  %v2243_v43 = vmul.f32 1.442695, %v2168_v62 }
 0x712   :  { %v10322_v48 = vpop.f32.mrb[213].mxu0  ;;  %7825 = vpow2.f32 %v2237_v57 }
 0x713   :  { %v3046_v2 = vpop.f32.mrb[214].mxu0  ;;  %v10325_v45 = vpop.eup %7817  ;;  %7827 = vpow2.f32 %v2239_v26 }
 0x714   :  { %13267 = vst [vmem:[#allocation125_spill] sm:$0xff] %v10325_v45  ;;  %v3048_v46 = vpop.f32.mrb[215].mxu0  ;;  %v10329_v7 = vpop.eup %7819  ;;  %7829 = vpow2.f32 %v2241_v30  ;;  %v10344_v62 = vadd.f32 %v3046_v2, %v9862_v4 }
 0x715   :  { %3179 = vmax.xlane.f32.xlu0 %v3178_v13  ;;  %v2081_v28 = vpop.xlane.xlu1 %2080  ;;  %v2355_v36 = vadd.f32 %v10329_v7, %v10325_v45  ;;  %7831 = vpow2.f32 %v2243_v43  ;;  %v10347_v13 = vadd.f32 %v3048_v46, %v9870_v12 }
 0x716   :  { %v2169_v47 = vsub.f32 %v9788_v9, %v2081_v28  ;;  %v2170_v57 = vsub.f32 %v9796_v25, %v2081_v28  ;;  %v2084_v44 = vpop.xlane.xlu0 %2083  ;;  %13269 = vst [vmem:[#allocation127_spill] sm:$0xff] %v10344_v62 }
 0x717   :  { %v10331_v5 = vpop.eup %7821  ;;  %13270 = vst [vmem:[#allocation128_spill] sm:$0xff] %v10347_v13  ;;  %v2171_v9 = vsub.f32 %v9799_v38, %v2084_v44  ;;  %v2172_v43 = vsub.f32 %v9802_v39, %v2084_v44  ;;  %v3184_v4 = vmax.f32 %v10344_v62, %v10347_v13 }
 0x718   :  { %13268 = vst [vmem:[#allocation126_spill] sm:$0xff] %v10331_v5  ;;  %v10335_v63 = vpop.eup %7823  ;;  %v2245_v17 = vmul.f32 1.442695, %v2169_v47 }
 0x719   :  { %v10337_v21 = vpop.f32.mrb[216].mxu0  ;;  %2356 = vadd.xlane.f32.xlu0 %v2355_v36  ;;  %v2358_v30 = vadd.f32 %v10335_v63, %v10331_v5  ;;  %v2247_v36 = vmul.f32 1.442695, %v2170_v57  ;;  %v2249_v46 = vmul.f32 1.442695, %v2171_v9 }
 0x71a   :  { %v10340_v55 = vpop.f32.mrb[217].mxu0  ;;  %7833 = vpow2.f32 %v2245_v17  ;;  %v2251_v28 = vmul.f32 1.442695, %v2172_v43 }
 0x71b   :  { %v3056_v26 = vpop.f32.mrb[218].mxu0  ;;  %7835 = vpow2.f32 %v2247_v36 }
 0x71c   :  { %v3058_v53 = vpop.f32.mrb[219].mxu0  ;;  %v10353_v25 = vpop.eup %7825  ;;  %7837 = vpow2.f32 %v2249_v46  ;;  %v10374_v17 = vadd.f32 %v3056_v26, %v9898_v33 }
 0x71d   :  { %2359 = vadd.xlane.f32.xlu0 %v2358_v30  ;;  %13271 = vst [vmem:[#allocation129_spill] sm:$0xff] %v10353_v25  ;;  %v10357_v2 = vpop.eup %7827  ;;  %7839 = vpow2.f32 %v2251_v28  ;;  %v10377_v9 = vadd.f32 %v3058_v53, %v9906_v23 }
 0x71e   :  { %13272 = vst [vmem:[#allocation130_spill] sm:$0xff] %v10357_v2  ;;  %v10365_v39 = vpop.xlane.xlu0 %2089  ;;  %v10367_v57 = vpop.eup %7829  ;;  %v2361_v30 = vadd.f32 %v10357_v2, %v10353_v25  ;;  %13275 = vst [vmem:[#allocation133_spill] sm:$0xff] %v10374_v17 }
 0x71f   :  { %13273 = vst [vmem:[#allocation131_spill] sm:$0xff] %v10367_v57  ;;  %v10371_v13 = vpop.eup %7831  ;;  %13276 = vst [vmem:[#allocation134_spill] sm:$0xff] %v10377_v9  ;;  %v3190_v33 = vmax.f32 %v10374_v17, %v10377_v9 }
 0x720   :  { %3675 = vrot.lane.b32.xlu1 %v9214_v42, %s8423_s29  ;;  %13274 = vst [vmem:[#allocation132_spill] sm:$0xff] %v10371_v13  ;;  %v2364_v36 = vadd.f32 %v10371_v13, %v10367_v57 }
 0x721   :  { %v10361_v12 = vpop.f32.mrb[220].mxu0  ;;  %3185 = vmax.xlane.f32.xlu0 %v3184_v4 }
 0x722   :  { %v10363_v38 = vpop.f32.mrb[221].mxu0 }
 0x723   :  { %v3066_v47 = vpop.f32.mrb[222].mxu0 }
 0x724   :  { %v3068_v44 = vpop.f32.mrb[223].mxu0 }
 0x725   :  { %2362 = vadd.xlane.f32.xlu0 %v2361_v30  ;;  %v10387_v30 = vpop.eup %7833  ;;  %v10409_v17 = vadd.f32 %v3068_v44, %v9942_v1 }
 0x726   :  { %v2096_v42 = vpop.xlane.xlu0 %2095  ;;  %13277 = vst [vmem:[#allocation135_spill] sm:$0xff] %v10387_v30  ;;  %v10391_v53 = vpop.eup %7835 }
 0x727   :  { %v2179_v4 = vsub.f32 %v9876_v14, %v2096_v42  ;;  %v2180_v46 = vsub.f32 %v9879_v59, %v2096_v42  ;;  %13278 = vst [vmem:[#allocation136_spill] sm:$0xff] %v10391_v53  ;;  %v10393_v13 = vpop.eup %7837  ;;  %v2367_v14 = vadd.f32 %v10391_v53, %v10387_v30  ;;  %13282 = vst [vmem:[#allocation140_spill] sm:$0xff] %v10409_v17 }
 0x728   :  { %13279 = vst [vmem:[#allocation137_spill] sm:$0xff] %v10393_v13 }
 0x729   :  { %v10381_v43 = vpop.f32.mrb[224].mxu0  ;;  %2365 = vadd.xlane.f32.xlu0 %v2364_v36  ;;  %v2265_v26 = vmul.f32 1.442695, %v2179_v4  ;;  %v2267_v57 = vmul.f32 1.442695, %v2180_v46  ;;  %v10397_v36 = vpop.eup %7839 }
 0x72a   :  { %v10384_v62 = vpop.f32.mrb[225].mxu0  ;;  %13280 = vst [vmem:[#allocation138_spill] sm:$0xff] %v10397_v36  ;;  %v2370_v53 = vadd.f32 %v10397_v36, %v10393_v13  ;;  %v13294_v36 = vld [vmem:[#allocation78_spill] sm:$0xff] }
 0x72b   :  { %v3076_v28 = vpop.f32.mrb[226].mxu0  ;;  %7841 = vpow2.f32 %v2265_v26 }
 0x72c   :  { %v3078_v23 = vpop.f32.mrb[227].mxu0  ;;  %7843 = vpow2.f32 %v2267_v57  ;;  %v10416_v57 = vadd.f32 %v3076_v28, %v9970_v24 }
 0x72d   :  { %3191 = vmax.xlane.f32.xlu0 %v3190_v33  ;;  %v10406_v33 = vadd.f32 %v3066_v47, %v9934_v60  ;;  %v2087_v60 = vpop.xlane.xlu1 %2086 }
 0x72e   :  { %v2102_v25 = vpop.xlane.xlu0 %2101  ;;  %13283 = vst [vmem:[#allocation141_spill] sm:$0xff] %v10416_v57 }
 0x72f   :  { %v2183_v42 = vsub.f32 %v9912_v8, %v2102_v25  ;;  %v2184_v4 = vsub.f32 %v9917_v37, %v2102_v25  ;;  %13281 = vst [vmem:[#allocation139_spill] sm:$0xff] %v10406_v33  ;;  %v10419_v37 = vadd.f32 %v3078_v23, %v9978_v49  ;;  %v2174_v23 = vsub.f32 %v9835_v19, %v2087_v60 }
 0x731   :  { %v10399_v59 = vpop.f32.mrb[228].mxu0  ;;  %2368 = vadd.xlane.f32.xlu0 %v2367_v14  ;;  %v2273_v26 = vmul.f32 1.442695, %v2183_v42  ;;  %v2275_v8 = vmul.f32 1.442695, %v2184_v4  ;;  %v3196_v14 = vmax.f32 %v10406_v33, %v10409_v17  ;;  %13284 = vst [vmem:[#allocation142_spill] sm:$0xff] %v10419_v37  ;;  %v2173_v42 = vsub.f32 %v9827_v3, %v2087_v60 }
 0x732   :  { %v10402_v9 = vpop.f32.mrb[229].mxu0  ;;  %v3202_v24 = vmax.f32 %v10416_v57, %v10419_v37  ;;  %v13291_v3 = vld [vmem:[#allocation67_spill] sm:$0xff]  ;;  %v13292_v37 = vld [vmem:[#allocation76_spill] sm:$0xff] }
 0x733   :  { %v3086_v46 = vpop.f32.mrb[230].mxu0  ;;  %7845 = vpow2.f32 %v2273_v26  ;;  %v13287_v26 = vld [vmem:[#allocation51_spill] sm:$0xff]  ;;  %v2253_v13 = vmul.f32 1.442695, %v2173_v42 }
 0x734   :  { %v3088_v30 = vpop.f32.mrb[231].mxu0  ;;  %7847 = vpow2.f32 %v2275_v8  ;;  %v10436_v8 = vadd.f32 %v10295_v51, %v13287_v26  ;;  %v10444_v57 = vadd.f32 %v3086_v46, %v13292_v37  ;;  %v13296_v51 = vld [vmem:[#allocation55_spill] sm:$0xff] }
 0x735   :  { %2371 = vadd.xlane.f32.xlu0 %v2370_v53  ;;  %v10425_v53 = vpop.eup %7841  ;;  %v10447_v2 = vadd.f32 %v3088_v30, %v13294_v36  ;;  %7849 = vpow2.f32 %v2253_v13  ;;  %v13304_v13 = vld [vmem:[#allocation72_spill] sm:$0xff] }
 0x736   :  { %v2108_v47 = vpop.xlane.xlu0 %2107  ;;  %13285 = vst [vmem:[#allocation143_spill] sm:$0xff] %v10425_v53  ;;  %v10430_v49 = vpop.eup %7843  ;;  %13288 = vst [vmem:[#allocation51_spill] sm:$0xff] %v10436_v8 }
 0x737   :  { %13286 = vst [vmem:[#allocation144_spill] sm:$0xff] %v10430_v49  ;;  %v2187_v4 = vsub.f32 %v9948_v31, %v2108_v47  ;;  %v2188_v33 = vsub.f32 %v13291_v3, %v2108_v47  ;;  %13293 = vst [vmem:[#allocation67_spill] sm:$0xff] %v10444_v57  ;;  %v2382_v19 = vadd.f32 %v10430_v49, %v10425_v53  ;;  %v2255_v31 = vmul.f32 1.442695, %v2174_v23 }
 0x738   :  { %13295 = vst [vmem:[#allocation76_spill] sm:$0xff] %v10447_v2 }
 0x739   :  { %v10421_v25 = vpop.f32.mrb[232].mxu0  ;;  %3197 = vmax.xlane.f32.xlu0 %v3196_v14  ;;  %v13289_v14 = vld [vmem:[#allocation52_spill] sm:$0xff]  ;;  %v2281_v47 = vmul.f32 1.442695, %v2187_v4  ;;  %v2283_v36 = vmul.f32 1.442695, %v2188_v33  ;;  %7851 = vpow2.f32 %v2255_v31 }
 0x73a   :  { %v10423_v1 = vpop.f32.mrb[233].mxu0  ;;  %v10440_v17 = vadd.f32 %v10297_v29, %v13289_v14  ;;  %v13298_v29 = vld [vmem:[#allocation56_spill] sm:$0xff]  ;;  %v13309_v31 = vld [vmem:[#allocation73_spill] sm:$0xff] }
 0x73b   :  { %v3096_v44 = vpop.f32.mrb[234].mxu0  ;;  %v10457_v26 = vadd.f32 %v10322_v48, %v13298_v29  ;;  %v3208_v48 = vmax.f32 %v10444_v57, %v10447_v2  ;;  %v2093_v29 = vpop.xlane.xlu1 %2092  ;;  %7853 = vpow2.f32 %v2281_v47  ;;  %v13307_v2 = vld [vmem:[#allocation60_spill] sm:$0xff] }
 0x73c   :  { %v3098_v28 = vpop.f32.mrb[235].mxu0  ;;  %13290 = vst [vmem:[#allocation52_spill] sm:$0xff] %v10440_v17  ;;  %v3175_v30 = vmax.f32 %v10436_v8, %v10440_v17  ;;  %v10484_v57 = vadd.f32 %v10340_v55, %v13307_v2  ;;  %7855 = vpow2.f32 %v2283_v36  ;;  %v13315_v55 = vld [vmem:[#allocation58_spill] sm:$0xff]  ;;  %v13356_v8 = vld [vmem:[#allocation75_spill] sm:$0xff] }
 0x73d   :  { %3203 = vmax.xlane.f32.xlu0 %v3202_v24  ;;  %v10453_v24 = vadd.f32 %v10319_v61, %v13296_v51  ;;  %13299 = vst [vmem:[#allocation55_spill] sm:$0xff] %v10457_v26  ;;  %v10463_v23 = vpop.eup %7845  ;;  %v13301_v61 = vld [vmem:[#allocation53_spill] sm:$0xff]  ;;  %v2178_v2 = vsub.f32 %v13315_v55, %v2093_v29 }
 0x73e   :  { %v2114_v37 = vpop.xlane.xlu0 %2113  ;;  %13300 = vst [vmem:[#allocation56_spill] sm:$0xff] %v10463_v23  ;;  %v2175_v14 = vsub.f32 %v13301_v61, %v10365_v39  ;;  %v10471_v4 = vpop.eup %7847  ;;  %v13305_v61 = vld [vmem:[#allocation59_spill] sm:$0xff]  ;;  %13308 = vst [vmem:[#allocation72_spill] sm:$0xff] %v10484_v57 }
 0x73f   :  { %13297 = vst [vmem:[#allocation78_spill] sm:$0xff] %v10453_v24  ;;  %13302 = vst [vmem:[#allocation53_spill] sm:$0xff] %v10471_v4  ;;  %v3181_v51 = vmax.f32 %v10453_v24, %v10457_v26  ;;  %v2191_v53 = vsub.f32 %v13304_v13, %v2114_v37  ;;  %v10480_v49 = vadd.f32 %v10337_v21, %v13305_v61  ;;  %v13312_v26 = vld [vmem:[#allocation86_spill] sm:$0xff]  ;;  %v13314_v21 = vld [vmem:[#allocation57_spill] sm:$0xff] }
 0x740   :  { %v10491_v47 = vadd.f32 %v3098_v28, %v13312_v26  ;;  %v2177_v61 = vsub.f32 %v13314_v21, %v2093_v29  ;;  %v13316_v28 = vld [vmem:[#allocation63_spill] sm:$0xff]  ;;  %v13320_v29 = vld [vmem:[#allocation90_spill] sm:$0xff] }
 0x741   :  { %v3102_v60 = vpop.f32.mrb[236].mxu0  ;;  %2383 = vadd.xlane.f32.xlu0 %v2382_v19  ;;  %v13303_v19 = vld [vmem:[#allocation54_spill] sm:$0xff]  ;;  %v2289_v36 = vmul.f32 1.442695, %v2191_v53  ;;  %v10505_v26 = vadd.f32 %v10361_v12, %v13316_v28  ;;  %v13322_v21 = vld [vmem:[#allocation91_spill] sm:$0xff] }
 0x742   :  { %v3104_v46 = vpop.f32.mrb[237].mxu0  ;;  %v2176_v33 = vsub.f32 %v13303_v19, %v10365_v39  ;;  %13306 = vst [vmem:[#allocation54_spill] sm:$0xff] %v10480_v49  ;;  %v2192_v39 = vsub.f32 %v13309_v31, %v2114_v37  ;;  %v13310_v19 = vld [vmem:[#allocation84_spill] sm:$0xff]  ;;  %13313 = vst [vmem:[#allocation60_spill] sm:$0xff] %v10491_v47  ;;  %v2261_v28 = vmul.f32 1.442695, %v2177_v61 }
 0x743   :  { %v10461_v42 = vpop.f32.mrb[238].mxu0  ;;  %v10488_v17 = vadd.f32 %v3096_v44, %v13310_v19  ;;  %v3187_v44 = vmax.f32 %v10480_v49, %v10484_v57  ;;  %13317 = vst [vmem:[#allocation73_spill] sm:$0xff] %v10505_v26  ;;  %v10519_v55 = vadd.f32 %v3104_v46, %v13322_v21  ;;  %v13327_v46 = vld [vmem:[#allocation81_spill] sm:$0xff] }
 0x744   :  { %v10469_v3 = vpop.f32.mrb[239].mxu0  ;;  %3176 = vmax.xlane.f32.xlu1 %v3175_v30  ;;  %v2257_v30 = vmul.f32 1.442695, %v2175_v14  ;;  %v2259_v13 = vmul.f32 1.442695, %v2176_v33  ;;  %v13318_v14 = vld [vmem:[#allocation64_spill] sm:$0xff] }
 0x745   :  { %3209 = vmax.xlane.f32.xlu0 %v3208_v48  ;;  %13311 = vst [vmem:[#allocation59_spill] sm:$0xff] %v10488_v17  ;;  %v2388_v48 = vadd.f32 %v10471_v4, %v10463_v23  ;;  %v10509_v33 = vadd.f32 %v10363_v38, %v13318_v14  ;;  %v3214_v53 = vmax.f32 %v10488_v17, %v10491_v47  ;;  %13323 = vst [vmem:[#allocation57_spill] sm:$0xff] %v10519_v55  ;;  %v10523_v38 = vpop.eup %7849  ;;  %v2099_v14 = vpop.xlane.xlu1 %2098 }
 0x746   :  { %v2120_v31 = vpop.xlane.xlu0 %2119  ;;  %7857 = vpow2.f32 %v2257_v30  ;;  %13324 = vst [vmem:[#allocation58_spill] sm:$0xff] %v10523_v38  ;;  %v13325_v30 = vld [vmem:[#allocation80_spill] sm:$0xff]  ;;  %v10526_v4 = vpop.eup %7851 }
 0x747   :  { %13319 = vst [vmem:[#allocation84_spill] sm:$0xff] %v10509_v33  ;;  %7859 = vpow2.f32 %v2259_v13  ;;  %v2195_v23 = vsub.f32 %v13325_v30, %v2120_v31  ;;  %13326 = vst [vmem:[#allocation63_spill] sm:$0xff] %v10526_v4  ;;  %v10531_v21 = vpop.eup %7853  ;;  %v13331_v30 = vld [vmem:[#allocation62_spill] sm:$0xff] }
 0x748   :  { %3182 = vmax.xlane.f32.xlu1 %v3181_v51  ;;  %v2291_v51 = vmul.f32 1.442695, %v2192_v39  ;;  %v2263_v39 = vmul.f32 1.442695, %v2178_v2  ;;  %7861 = vpow2.f32 %v2289_v36  ;;  %13328 = vst [vmem:[#allocation64_spill] sm:$0xff] %v10531_v21  ;;  %v10535_v61 = vpop.eup %7855  ;;  %v13330_v2 = vld [vmem:[#allocation61_spill] sm:$0xff]  ;;  %v2182_v47 = vsub.f32 %v13331_v30, %v2099_v14 }
 0x749   :  { %v10496_v24 = vpop.f32.mrb[240].mxu0  ;;  %2389 = vadd.xlane.f32.xlu0 %v2388_v48  ;;  %v10516_v48 = vadd.f32 %v3102_v60, %v13320_v29  ;;  %v3193_v60 = vmax.f32 %v10505_v26, %v10509_v33  ;;  %v2196_v29 = vsub.f32 %v13327_v46, %v2120_v31  ;;  %13329 = vst [vmem:[#allocation90_spill] sm:$0xff] %v10535_v61  ;;  %v13332_v46 = vld [vmem:[#allocation68_spill] sm:$0xff] }
 0x74a   :  { %v10499_v37 = vpop.f32.mrb[241].mxu0  ;;  %7863 = vpow2.f32 %v2291_v51  ;;  %v2181_v36 = vsub.f32 %v13330_v2, %v2099_v14  ;;  %v2297_v51 = vmul.f32 1.442695, %v2195_v23  ;;  %v10545_v17 = vadd.f32 %v10381_v43, %v13332_v46  ;;  %v13336_v14 = vld [vmem:[#allocation93_spill] sm:$0xff] }
 0x74b   :  { %v10511_v19 = vpop.f32.mrb[242].mxu0  ;;  %13321 = vst [vmem:[#allocation86_spill] sm:$0xff] %v10516_v48  ;;  %v3217_v13 = vmax.f32 %v10516_v48, %v10519_v55  ;;  %7865 = vpow2.f32 %v2261_v28  ;;  %v13334_v55 = vld [vmem:[#allocation69_spill] sm:$0xff]  ;;  %v2299_v2 = vmul.f32 1.442695, %v2196_v29  ;;  %v10557_v23 = vadd.f32 %v10461_v42, %v13336_v14 }
 0x74c   :  { %v10521_v12 = vpop.f32.mrb[243].mxu0  ;;  %3188 = vmax.xlane.f32.xlu1 %v3187_v44  ;;  %7867 = vpow2.f32 %v2263_v39  ;;  %13333 = vst [vmem:[#allocation91_spill] sm:$0xff] %v10545_v17  ;;  %v10549_v28 = vadd.f32 %v10384_v62, %v13334_v55  ;;  %v2373_v39 = vadd.f32 %v10526_v4, %v10523_v38  ;;  %v2394_v62 = vadd.f32 %v10535_v61, %v10531_v21  ;;  %v13341_v4 = vld [vmem:[#allocation88_spill] sm:$0xff] }
 0x74d   :  { %3215 = vmax.xlane.f32.xlu0 %v3214_v53  ;;  %13337 = vst [vmem:[#allocation81_spill] sm:$0xff] %v10557_v23  ;;  %v2269_v55 = vmul.f32 1.442695, %v2181_v36  ;;  %v2271_v38 = vmul.f32 1.442695, %v2182_v47  ;;  %7869 = vpow2.f32 %v2297_v51  ;;  %v13346_v47 = vld [vmem:[#allocation65_spill] sm:$0xff] }
 0x74e   :  { %v2126_v44 = vpop.xlane.xlu0 %2125  ;;  %13335 = vst [vmem:[#allocation80_spill] sm:$0xff] %v10549_v28  ;;  %7871 = vpow2.f32 %v2299_v2 }
 0x74f   :  { %v2199_v42 = vsub.f32 %v13341_v4, %v2126_v44  ;;  %7873 = vpow2.f32 %v2269_v55 }
 0x750   :  { %3194 = vmax.xlane.f32.xlu1 %v3193_v60  ;;  %v2105_v60 = vpop.xlane.xlu1 %2104  ;;  %v10569_v46 = vpop.eup %7857  ;;  %7875 = vpow2.f32 %v2271_v38  ;;  %v13351_v38 = vld [vmem:[#allocation100_spill] sm:$0xff] }
 0x751   :  { %v10538_v53 = vpop.f32.mrb[244].mxu0  ;;  %3218 = vmax.xlane.f32.xlu0 %v3217_v13  ;;  %v13338_v13 = vld [vmem:[#allocation94_spill] sm:$0xff]  ;;  %13340 = vst [vmem:[#allocation62_spill] sm:$0xff] %v10569_v46  ;;  %v10572_v14 = vpop.eup %7859  ;;  %v2185_v4 = vsub.f32 %v13346_v47, %v2105_v60  ;;  %v2305_v2 = vmul.f32 1.442695, %v2199_v42 }
 0x752   :  { %v10541_v31 = vpop.f32.mrb[245].mxu0  ;;  %v10561_v30 = vadd.f32 %v10469_v3, %v13338_v13  ;;  %13342 = vst [vmem:[#allocation68_spill] sm:$0xff] %v10572_v14  ;;  %v3199_v3 = vmax.f32 %v10545_v17, %v10549_v28  ;;  %v13343_v13 = vld [vmem:[#allocation89_spill] sm:$0xff]  ;;  %v10577_v21 = vpop.eup %7861  ;;  %v13349_v17 = vld [vmem:[#allocation70_spill] sm:$0xff]  ;;  %v2376_v55 = vadd.f32 %v10572_v14, %v10569_v46  ;;  %v13355_v14 = vld [vmem:[#allocation71_spill] sm:$0xff] }
 0x753   :  { %v10551_v48 = vpop.f32.mrb[246].mxu0  ;;  %v2200_v33 = vsub.f32 %v13343_v13, %v2126_v44  ;;  %13344 = vst [vmem:[#allocation69_spill] sm:$0xff] %v10577_v21  ;;  %v13352_v42 = vld [vmem:[#allocation102_spill] sm:$0xff]  ;;  %v2277_v46 = vmul.f32 1.442695, %v2185_v4  ;;  %7877 = vpow2.f32 %v2305_v2 }
 0x754   :  { %13339 = vst [vmem:[#allocation61_spill] sm:$0xff] %v10561_v30  ;;  %v10563_v43 = vpop.f32.mrb[247].mxu0  ;;  %2374 = vadd.xlane.f32.xlu1 %v2373_v39  ;;  %v10567_v29 = vpop.xlane.xlu0 %2128  ;;  %v3220_v39 = vmax.f32 %v10557_v23, %v10561_v30 }
 0x755   :  { %2395 = vadd.xlane.f32.xlu0 %v2394_v62  ;;  %v2111_v36 = vpop.xlane.xlu1 %2110  ;;  %v10581_v61 = vpop.eup %7863  ;;  %v13347_v62 = vld [vmem:[#allocation66_spill] sm:$0xff]  ;;  %v2307_v30 = vmul.f32 1.442695, %v2200_v33 }
 0x756   :  { %13345 = vst [vmem:[#allocation93_spill] sm:$0xff] %v10581_v61  ;;  %v2186_v28 = vsub.f32 %v13347_v62, %v2105_v60  ;;  %v10589_v13 = vpop.eup %7865  ;;  %v2189_v26 = vsub.f32 %v13349_v17, %v2111_v36  ;;  %v10600_v60 = vadd.f32 %v10511_v19, %v13351_v38  ;;  %v2400_v17 = vadd.f32 %v10581_v61, %v10577_v21  ;;  %v13353_v33 = vld [vmem:[#allocation74_spill] sm:$0xff]  ;;  %v13359_v21 = vld [vmem:[#allocation97_spill] sm:$0xff] }
 0x757   :  { %13348 = vst [vmem:[#allocation94_spill] sm:$0xff] %v10589_v13  ;;  %v10612_v62 = vadd.f32 %v10399_v59, %v13353_v33  ;;  %v2190_v49 = vsub.f32 %v13355_v14, %v2111_v36  ;;  %v10617_v19 = vadd.f32 %v10402_v9, %v13356_v8  ;;  %7879 = vpow2.f32 %v2307_v30 }
 0x758   :  { %3200 = vmax.xlane.f32.xlu1 %v3199_v3  ;;  %v2132_v23 = vpop.xlane.xlu0 %2131  ;;  %v10596_v3 = vpop.eup %7867  ;;  %v2279_v38 = vmul.f32 1.442695, %v2186_v28  ;;  %v2285_v5 = vmul.f32 1.442695, %v2189_v26  ;;  %7881 = vpow2.f32 %v2277_v46  ;;  %v13364_v46 = vld [vmem:[#allocation105_spill] sm:$0xff] }
 0x759   :  { %v10584_v51 = vpop.f32.mrb[248].mxu0  ;;  %3221 = vmax.xlane.f32.xlu0 %v3220_v39  ;;  %13350 = vst [vmem:[#allocation88_spill] sm:$0xff] %v10596_v3  ;;  %v10604_v39 = vadd.f32 %v10521_v12, %v13352_v42  ;;  %13354 = vst [vmem:[#allocation89_spill] sm:$0xff] %v10612_v62  ;;  %v13358_v12 = vld [vmem:[#allocation96_spill] sm:$0xff]  ;;  %v2204_v61 = vsub.f32 %v13359_v21, %v2132_v23  ;;  %v2379_v59 = vadd.f32 %v10596_v3, %v10589_v13  ;;  %v10623_v4 = vpop.eup %7869 }
 0x75a   :  { %v10587_v44 = vpop.f32.mrb[249].mxu0  ;;  %13357 = vst [vmem:[#allocation65_spill] sm:$0xff] %v10617_v19  ;;  %v2203_v42 = vsub.f32 %v13358_v12, %v2132_v23  ;;  %13360 = vst [vmem:[#allocation66_spill] sm:$0xff] %v10623_v4  ;;  %v10627_v9 = vpop.eup %7871  ;;  %v2287_v8 = vmul.f32 1.442695, %v2190_v49  ;;  %7883 = vpow2.f32 %v2279_v38  ;;  %v13362_v21 = vld [vmem:[#allocation104_spill] sm:$0xff] }
 0x75b   :  { %v10592_v57 = vpop.f32.mrb[250].mxu0  ;;  %v3226_v14 = vmax.f32 %v10600_v60, %v10604_v39  ;;  %13361 = vst [vmem:[#allocation70_spill] sm:$0xff] %v10627_v9  ;;  %v2117_v28 = vpop.xlane.xlu1 %2116  ;;  %7885 = vpow2.f32 %v2285_v5  ;;  %v13365_v38 = vld [vmem:[#allocation77_spill] sm:$0xff]  ;;  %v2406_v5 = vadd.f32 %v10627_v9, %v10623_v4 }
 0x75c   :  { %v10606_v47 = vpop.f32.mrb[251].mxu0  ;;  %2377 = vadd.xlane.f32.xlu1 %v2376_v55  ;;  %v2313_v26 = vmul.f32 1.442695, %v2203_v42  ;;  %v10634_v2 = vpop.eup %7873  ;;  %v3205_v55 = vmax.f32 %v10612_v62, %v10617_v19  ;;  %v2193_v42 = vsub.f32 %v13365_v38, %v2117_v28  ;;  %7887 = vpow2.f32 %v2287_v8  ;;  %v13370_v19 = vld [vmem:[#allocation83_spill] sm:$0xff]  ;;  %v13371_v62 = vld [vmem:[#allocation110_spill] sm:$0xff] }
 0x75d   :  { %2401 = vadd.xlane.f32.xlu0 %v2400_v17  ;;  %13363 = vst [vmem:[#allocation100_spill] sm:$0xff] %v10634_v2  ;;  %v2315_v17 = vmul.f32 1.442695, %v2204_v61  ;;  %v10641_v12 = vpop.eup %7875 }
 0x75e   :  { %v2138_v45 = vpop.xlane.xlu0 %2137  ;;  %7889 = vpow2.f32 %v2313_v26  ;;  %v2385_v8 = vadd.f32 %v10641_v12, %v10634_v2 }
 0x75f   :  { %v2207_v23 = vsub.f32 %v13362_v21, %v2138_v45  ;;  %v2208_v49 = vsub.f32 %v13364_v46, %v2138_v45  ;;  %v13367_v21 = vld [vmem:[#allocation108_spill] sm:$0xff]  ;;  %v13368_v45 = vld [vmem:[#allocation79_spill] sm:$0xff]  ;;  %v13369_v46 = vld [vmem:[#allocation82_spill] sm:$0xff]  ;;  %7891 = vpow2.f32 %v2315_v17 }
 0x760   :  { %2380 = vadd.xlane.f32.xlu1 %v2379_v59  ;;  %v13366_v59 = vld [vmem:[#allocation106_spill] sm:$0xff]  ;;  %v10650_v13 = vadd.f32 %v10563_v43, %v13367_v21  ;;  %v2194_v61 = vsub.f32 %v13368_v45, %v2117_v28  ;;  %v10659_v38 = vadd.f32 %v10421_v25, %v13369_v46  ;;  %v10668_v28 = vpop.eup %7877  ;;  %v13373_v45 = vld [vmem:[#allocation111_spill] sm:$0xff]  ;;  %v13377_v46 = vld [vmem:[#allocation112_spill] sm:$0xff] }
 0x761   :  { %v10629_v36 = vpop.f32.mrb[252].mxu0  ;;  %3227 = vmax.xlane.f32.xlu0 %v3226_v14  ;;  %v10646_v14 = vadd.f32 %v10551_v48, %v13366_v59  ;;  %v10663_v48 = vadd.f32 %v10423_v1, %v13370_v19  ;;  %v2321_v43 = vmul.f32 1.442695, %v2207_v23  ;;  %v2323_v21 = vmul.f32 1.442695, %v2208_v49  ;;  %13372 = vst [vmem:[#allocation102_spill] sm:$0xff] %v10668_v28  ;;  %v10673_v19 = vpop.eup %7879 }
 0x762   :  { %v10632_v30 = vpop.f32.mrb[253].mxu0  ;;  %13374 = vst [vmem:[#allocation74_spill] sm:$0xff] %v10673_v19  ;;  %v2295_v26 = vmul.f32 1.442695, %v2194_v61  ;;  %v2123_v23 = vpop.xlane.xlu1 %2122  ;;  %v13378_v61 = vld [vmem:[#allocation114_spill] sm:$0xff] }
 0x763   :  { %v10639_v33 = vpop.f32.mrb[254].mxu0  ;;  %v3232_v25 = vmax.f32 %v10646_v14, %v10650_v13  ;;  %7893 = vpow2.f32 %v2321_v43  ;;  %v3211_v49 = vmax.f32 %v10659_v38, %v10663_v48 }
 0x764   :  { %v10652_v3 = vpop.f32.mrb[255].mxu0  ;;  %3206 = vmax.xlane.f32.xlu1 %v3205_v55  ;;  %v2293_v55 = vmul.f32 1.442695, %v2193_v42  ;;  %7895 = vpow2.f32 %v2323_v21 }
 0x765   :  { %2407 = vadd.xlane.f32.xlu0 %v2406_v5 }
 0x766   :  { %v2144_v59 = vpop.xlane.xlu0 %2143  ;;  %7897 = vpow2.f32 %v2293_v55 }
 0x767   :  { %v2211_v4 = vsub.f32 %v13371_v62, %v2144_v59  ;;  %v2212_v1 = vsub.f32 %v13373_v45, %v2144_v59  ;;  %v10675_v62 = vpop.eup %7881  ;;  %v10683_v59 = vadd.f32 %v10592_v57, %v13377_v46  ;;  %7899 = vpow2.f32 %v2295_v26  ;;  %v13381_v45 = vld [vmem:[#allocation87_spill] sm:$0xff]  ;;  %v13383_v46 = vld [vmem:[#allocation116_spill] sm:$0xff] }
 0x768   :  { %2386 = vadd.xlane.f32.xlu1 %v2385_v8  ;;  %13375 = vst [vmem:[#allocation71_spill] sm:$0xff] %v10675_v62  ;;  %v10679_v5 = vpop.eup %7883  ;;  %v10687_v8 = vadd.f32 %v10606_v47, %v13378_v61  ;;  %v13384_v61 = vld [vmem:[#allocation117_spill] sm:$0xff] }
 0x769   :  { %v2329_v17 = vmul.f32 1.442695, %v2211_v4  ;;  %3233 = vmax.xlane.f32.xlu0 %v3232_v25  ;;  %v2331_v42 = vmul.f32 1.442695, %v2212_v1  ;;  %13376 = vst [vmem:[#allocation75_spill] sm:$0xff] %v10679_v5  ;;  %v2412_v4 = vadd.f32 %v10673_v19, %v10668_v28  ;;  %v10691_v43 = vpop.eup %7885  ;;  %v13380_v25 = vld [vmem:[#allocation85_spill] sm:$0xff]  ;;  %v2198_v1 = vsub.f32 %v13381_v45, %v2123_v23 }
 0x76a   :  { %13379 = vst [vmem:[#allocation96_spill] sm:$0xff] %v10691_v43  ;;  %v2197_v21 = vsub.f32 %v13380_v25, %v2123_v23  ;;  %v10695_v57 = vpop.eup %7887  ;;  %v2391_v28 = vadd.f32 %v10679_v5, %v10675_v62  ;;  %v3238_v26 = vmax.f32 %v10683_v59, %v10687_v8  ;;  %v13387_v45 = vld [vmem:[#allocation98_spill] sm:$0xff] }
 0x76b   :  { %7901 = vpow2.f32 %v2329_v17  ;;  %13382 = vst [vmem:[#allocation97_spill] sm:$0xff] %v10695_v57  ;;  %v10701_v19 = vpop.eup %7889  ;;  %v2397_v62 = vadd.f32 %v10695_v57, %v10691_v43  ;;  %v13395_v57 = vld [vmem:[#allocation107_spill] sm:$0xff] }
 0x76c   :  { %3212 = vmax.xlane.f32.xlu1 %v3211_v49  ;;  %7903 = vpow2.f32 %v2331_v42  ;;  %13385 = vst [vmem:[#allocation104_spill] sm:$0xff] %v10701_v19  ;;  %v2135_v49 = vpop.xlane.xlu1 %2134  ;;  %v10705_v23 = vpop.eup %7891  ;;  %v2301_v17 = vmul.f32 1.442695, %v2197_v21  ;;  %v2303_v42 = vmul.f32 1.442695, %v2198_v1 }
 0x76d   :  { %2413 = vadd.xlane.f32.xlu0 %v2412_v4  ;;  %13386 = vst [vmem:[#allocation105_spill] sm:$0xff] %v10705_v23  ;;  %v10717_v5 = vpop.eup %7893 }
 0x76e   :  { %v2150_v55 = vpop.xlane.xlu0 %2149 }
 0x76f   :  { %v2215_v47 = vsub.f32 %v13383_v46, %v2150_v55  ;;  %v2216_v9 = vsub.f32 %v13384_v61, %v2150_v55  ;;  %v10709_v55 = vadd.f32 %v10496_v24, %v13387_v45  ;;  %v13389_v46 = vld [vmem:[#allocation99_spill] sm:$0xff]  ;;  %v13391_v24 = vld [vmem:[#allocation92_spill] sm:$0xff] }
 0x770   :  { %2392 = vadd.xlane.f32.xlu1 %v2391_v28  ;;  %v10713_v61 = vadd.f32 %v10499_v37, %v13389_v46  ;;  %v2141_v21 = vpop.xlane.xlu1 %2140  ;;  %v10721_v28 = vpop.eup %7895  ;;  %v2201_v1 = vsub.f32 %v13391_v24, %v10567_v29  ;;  %v13393_v46 = vld [vmem:[#allocation101_spill] sm:$0xff] }
 0x771   :  { %v2337_v4 = vmul.f32 1.442695, %v2215_v47  ;;  %v2339_v25 = vmul.f32 1.442695, %v2216_v9  ;;  %3239 = vmax.xlane.f32.xlu0 %v3238_v26  ;;  %13388 = vst [vmem:[#allocation77_spill] sm:$0xff] %v10709_v55  ;;  %v2418_v9 = vadd.f32 %v10705_v23, %v10701_v19  ;;  %v10725_v37 = vpop.eup %7897  ;;  %v13392_v47 = vld [vmem:[#allocation95_spill] sm:$0xff]  ;;  %v2205_v19 = vsub.f32 %v13393_v46, %v2135_v49 }
 0x772   :  { %13390 = vst [vmem:[#allocation106_spill] sm:$0xff] %v10713_v61  ;;  %v2202_v26 = vsub.f32 %v13392_v47, %v10567_v29  ;;  %v10729_v45 = vpop.eup %7899  ;;  %v13394_v23 = vld [vmem:[#allocation103_spill] sm:$0xff]  ;;  %v2424_v29 = vadd.f32 %v10721_v28, %v10717_v5  ;;  %v2309_v47 = vmul.f32 1.442695, %v2201_v1  ;;  %v2209_v2 = vsub.f32 %v13395_v57, %v2141_v21 }
 0x773   :  { %7905 = vpow2.f32 %v2337_v4  ;;  %v8386_v1 = vld [vmem:[%s13189_s0 + $0x1a8] sm:$0xff]  ;;  %v2317_v46 = vmul.f32 1.442695, %v2205_v19 }
 0x774   :  { %7907 = vpow2.f32 %v2339_v25  ;;  %2398 = vadd.xlane.f32.xlu1 %v2397_v62  ;;  %v3223_v25 = vmax.f32 %v10709_v55, %v10713_v61  ;;  %v2147_v43 = vpop.xlane.xlu1 %2146  ;;  %v10755_v57 = vadd.f32 %v8386_v1, %v10541_v31 }
 0x775   :  { %7909 = vpow2.f32 %v2301_v17  ;;  %2419 = vadd.xlane.f32.xlu0 %v2418_v9  ;;  %v10736_v62 = vpop.eup %7901 }
 0x776   :  { %7911 = vpow2.f32 %v2303_v42  ;;  %v2156_v4 = vpop.xlane.xlu0 %2155  ;;  %v2206_v42 = vsub.f32 %v13394_v23, %v2135_v49  ;;  %v10741_v9 = vpop.eup %7903  ;;  %v2311_v49 = vmul.f32 1.442695, %v2202_v26  ;;  %v13396_v23 = vld [vmem:[#allocation109_spill] sm:$0xff]  ;;  %v2325_v26 = vmul.f32 1.442695, %v2209_v2 }
 0x777   :  { %v2219_v17 = vsub.f32 %v10213_v22, %v2156_v4  ;;  %v2220_v24 = vsub.f32 %v10217_v10, %v2156_v4  ;;  %v8385_v22 = vld [vmem:[%s13189_s0 + $0x1a0] sm:$0xff]  ;;  %v2210_v4 = vsub.f32 %v13396_v23, %v2141_v21 }
 0x778   :  { %3224 = vmax.xlane.f32.xlu1 %v3223_v25  ;;  %v10748_v10 = vadd.f32 %v8385_v22, %v10538_v53  ;;  %v2403_v25 = vadd.f32 %v10729_v45, %v10725_v37  ;;  %v2430_v53 = vadd.f32 %v10741_v9, %v10736_v62 }
 0x779   :  { %v2345_v61 = vmul.f32 1.442695, %v2219_v17  ;;  %v2347_v55 = vmul.f32 1.442695, %v2220_v24  ;;  %2425 = vadd.xlane.f32.xlu0 %v2424_v29  ;;  %v2319_v17 = vmul.f32 1.442695, %v2206_v42  ;;  %v2153_v24 = vpop.xlane.xlu1 %2152 }
 0x77a   :  { %v13398_v29 = vld [vmem:[#allocation113_spill] sm:$0xff]  ;;  %v2327_v19 = vmul.f32 1.442695, %v2210_v4 }
 0x77b   :  { %7913 = vpow2.f32 %v2345_v61  ;;  %v2213_v22 = vsub.f32 %v13398_v29, %v2147_v43  ;;  %v13399_v61 = vld [vmem:[#allocation115_spill] sm:$0xff] }
 0x77c   :  { %7915 = vpow2.f32 %v2347_v55  ;;  %2404 = vadd.xlane.f32.xlu1 %v2403_v25  ;;  %v2214_v23 = vsub.f32 %v13399_v61, %v2147_v43  ;;  %v3229_v55 = vmax.f32 %v10748_v10, %v10755_v57 }
 0x77d   :  { %v10761_v21 = vpop.eup %7905  ;;  %7917 = vpow2.f32 %v2309_v47  ;;  %2431 = vadd.xlane.f32.xlu0 %v2430_v53  ;;  %v3153_v4 = vpop.xlane.xlu1 %3152  ;;  %v2333_v25 = vmul.f32 1.442695, %v2213_v22 }
 0x77e   :  { %13397 = vst [vmem:[#allocation108_spill] sm:$0xff] %v10761_v21  ;;  %v10764_v31 = vpop.eup %7907  ;;  %7919 = vpow2.f32 %v2311_v49  ;;  %v3156_v42 = vpop.xlane.xlu0 %3155  ;;  %v2217_v49 = vsub.f32 %v10206_v34, %v2153_v24  ;;  %v8388_v34 = vld [vmem:[%s13189_s0 + $0x1c8] sm:$0xff] }
 0x77f   :  { %v10767_v1 = vpop.eup %7909  ;;  %7921 = vpow2.f32 %v2317_v46  ;;  %v3249_v47 = vsub.f32 %v10228_v32, %v3156_v42  ;;  %v3250_v2 = vsub.f32 %v10233_v58, %v3156_v42  ;;  %v2436_v43 = vadd.f32 %v10764_v31, %v10761_v21  ;;  %v8387_v32 = vld [vmem:[%s13189_s0 + $0x1c0] sm:$0xff] }
 0x780   :  { %v10773_v29 = vpop.eup %7911  ;;  %7923 = vpow2.f32 %v2319_v17  ;;  %3230 = vmax.xlane.f32.xlu1 %v3229_v55  ;;  %v10782_v58 = vadd.f32 %v8387_v32, %v10584_v51  ;;  %v10788_v46 = vadd.f32 %v8388_v34, %v10587_v44  ;;  %v2335_v17 = vmul.f32 1.442695, %v2214_v23  ;;  %v13401_v51 = vld [vmem:[#allocation118_spill] sm:$0xff] }
 0x781   :  { %7925 = vpow2.f32 %v2325_v26  ;;  %v3315_v53 = vmul.f32 1.442695, %v3249_v47  ;;  %v3317_v61 = vmul.f32 1.442695, %v3250_v2  ;;  %2437 = vadd.xlane.f32.xlu0 %v2436_v43  ;;  %v2409_v26 = vadd.f32 %v10773_v29, %v10767_v1 }
 0x782   :  { %7927 = vpow2.f32 %v2327_v19  ;;  %v2341_v22 = vmul.f32 1.442695, %v2217_v49  ;;  %v2218_v47 = vsub.f32 %v13401_v51, %v2153_v24  ;;  %v3235_v23 = vmax.f32 %v10782_v58, %v10788_v46 }
 0x783   :  { %7929 = vpow2.f32 %v3315_v53  ;;  %v3247_v49 = vsub.f32 %v10222_v20, %v3153_v4 }
 0x784   :  { %7931 = vpow2.f32 %v3317_v61  ;;  %v3159_v42 = vpop.xlane.xlu1 %3158  ;;  %2410 = vadd.xlane.f32.xlu1 %v2409_v26  ;;  %v2343_v20 = vmul.f32 1.442695, %v2218_v47 }
 0x785   :  { %v10792_v55 = vpop.eup %7913  ;;  %7933 = vpow2.f32 %v2333_v25  ;;  %v3251_v2 = vsub.f32 %v10238_v56, %v3159_v42  ;;  %v3252_v44 = vsub.f32 %v10241_v15, %v3159_v42  ;;  %v13403_v15 = vld [vmem:[#allocation119_spill] sm:$0xff] }
 0x786   :  { %13400 = vst [vmem:[#allocation79_spill] sm:$0xff] %v10792_v55  ;;  %v10797_v19 = vpop.eup %7915  ;;  %7935 = vpow2.f32 %v2335_v17  ;;  %v3162_v43 = vpop.xlane.xlu0 %3161  ;;  %v3248_v34 = vsub.f32 %v13403_v15, %v3153_v4 }
 0x787   :  { %13402 = vst [vmem:[#allocation82_spill] sm:$0xff] %v10797_v19  ;;  %v10802_v53 = vpop.eup %7917  ;;  %v3319_v61 = vmul.f32 1.442695, %v3251_v2  ;;  %v3321_v25 = vmul.f32 1.442695, %v3252_v44  ;;  %v3253_v24 = vsub.f32 %v10244_v40, %v3162_v43  ;;  %v3254_v32 = vsub.f32 %v10249_v11, %v3162_v43 }
 0x788   :  { %v10806_v56 = vpop.eup %7919  ;;  %7937 = vpow2.f32 %v2341_v22  ;;  %v2442_v26 = vadd.f32 %v10797_v19, %v10792_v55  ;;  %3236 = vmax.xlane.f32.xlu1 %v3235_v23  ;;  %v3311_v40 = vmul.f32 1.442695, %v3247_v49  ;;  %v3313_v44 = vmul.f32 1.442695, %v3248_v34  ;;  %v13405_v23 = vld [vmem:[#allocation121_spill] sm:$0xff]  ;;  %v13406_v49 = vld [vmem:[#allocation122_spill] sm:$0xff] }
 0x789   :  { %v10811_v17 = vpop.eup %7921  ;;  %7939 = vpow2.f32 %v3319_v61  ;;  %v3323_v42 = vmul.f32 1.442695, %v3253_v24  ;;  %v3325_v51 = vmul.f32 1.442695, %v3254_v32  ;;  %v2415_v4 = vadd.f32 %v10806_v56, %v10802_v53  ;;  %v13455_v19 = vld [vmem:[#allocation52_spill] sm:$0xff] }
 0x78a   :  { %v10813_v2 = vpop.eup %7923  ;;  %7941 = vpow2.f32 %v3321_v25  ;;  %2443 = vadd.xlane.f32.xlu0 %v2442_v26 }
 0x78b   :  { %v10815_v11 = vpop.eup %7925  ;;  %7943 = vpow2.f32 %v3323_v42  ;;  %v2421_v15 = vadd.f32 %v10813_v2, %v10811_v17 }
 0x78c   :  { %v10819_v22 = vpop.eup %7927  ;;  %7945 = vpow2.f32 %v3325_v51  ;;  %v3165_v47 = vpop.xlane.xlu1 %3164  ;;  %2416 = vadd.xlane.f32.xlu1 %v2415_v4 }
 0x78d   :  { %v10821_v43 = vpop.eup %7929  ;;  %7947 = vpow2.f32 %v2343_v20  ;;  %v3255_v61 = vsub.f32 %v13405_v23, %v3165_v47  ;;  %v3256_v25 = vsub.f32 %v13406_v49, %v3165_v47 }
 0x78e   :  { %13404 = vst [vmem:[#allocation83_spill] sm:$0xff] %v10821_v43  ;;  %v10825_v24 = vpop.eup %7931  ;;  %7949 = vpow2.f32 %v3311_v40  ;;  %v3168_v32 = vpop.xlane.xlu0 %3167 }
 0x78f   :  { %13407 = vst [vmem:[#allocation110_spill] sm:$0xff] %v10825_v24  ;;  %v10829_v26 = vpop.eup %7933  ;;  %v3327_v34 = vmul.f32 1.442695, %v3255_v61  ;;  %v3329_v42 = vmul.f32 1.442695, %v3256_v25  ;;  %v3257_v51 = vsub.f32 %v10262_v0, %v3168_v32  ;;  %v3258_v20 = vsub.f32 %v10267_v6, %v3168_v32 }
 0x790   :  { %v10833_v4 = vpop.eup %7935  ;;  %7951 = vpow2.f32 %v3313_v44  ;;  %v3442_v47 = vadd.f32 %v10825_v24, %v10821_v43  ;;  %2422 = vadd.xlane.f32.xlu1 %v2421_v15  ;;  %v2427_v0 = vadd.f32 %v10819_v22, %v10815_v11 }
 0x791   :  { %7953 = vpow2.f32 %v3327_v34  ;;  %v3331_v40 = vmul.f32 1.442695, %v3257_v51  ;;  %v3333_v23 = vmul.f32 1.442695, %v3258_v20  ;;  %v2433_v20 = vadd.f32 %v10833_v4, %v10829_v26 }
 0x792   :  { %v10837_v49 = vpop.eup %7937  ;;  %7955 = vpow2.f32 %v3329_v42  ;;  %3443 = vadd.xlane.f32.xlu0 %v3442_v47 }
 0x793   :  { %13408 = vst [vmem:[#allocation111_spill] sm:$0xff] %v10837_v49  ;;  %v10839_v61 = vpop.eup %7939  ;;  %7957 = vpow2.f32 %v3331_v40 }
 0x794   :  { %13409 = vst [vmem:[#allocation112_spill] sm:$0xff] %v10839_v61  ;;  %v10843_v6 = vpop.eup %7941  ;;  %7959 = vpow2.f32 %v3333_v23  ;;  %v3171_v44 = vpop.xlane.xlu1 %3170  ;;  %2428 = vadd.xlane.f32.xlu1 %v2427_v0 }
 0x795   :  { %13410 = vst [vmem:[#allocation114_spill] sm:$0xff] %v10843_v6  ;;  %v10845_v25 = vpop.eup %7943  ;;  %v3259_v32 = vsub.f32 %v10276_v27, %v3171_v44  ;;  %v3260_v15 = vsub.f32 %v10279_v52, %v3171_v44  ;;  %v3445_v34 = vadd.f32 %v10843_v6, %v10839_v61 }
 0x796   :  { %13411 = vst [vmem:[#allocation85_spill] sm:$0xff] %v10845_v25  ;;  %v10851_v42 = vpop.eup %7945  ;;  %v3174_v51 = vpop.xlane.xlu0 %3173 }
 0x797   :  { %13412 = vst [vmem:[#allocation87_spill] sm:$0xff] %v10851_v42  ;;  %v10855_v47 = vpop.eup %7947  ;;  %v3335_v40 = vmul.f32 1.442695, %v3259_v32  ;;  %v3337_v23 = vmul.f32 1.442695, %v3260_v15  ;;  %3446 = vadd.xlane.f32.xlu0 %v3445_v34  ;;  %v3261_v0 = vsub.f32 %v10282_v16, %v3174_v51  ;;  %v3262_v27 = vsub.f32 %v10287_v50, %v3174_v51 }
 0x798   :  { %v10859_v43 = vpop.eup %7949  ;;  %2434 = vadd.xlane.f32.xlu1 %v2433_v20  ;;  %v3448_v61 = vadd.f32 %v10851_v42, %v10845_v25  ;;  %v2439_v16 = vadd.f32 %v10855_v47, %v10837_v49  ;;  %v13450_v25 = vld [vmem:[#allocation135_spill] sm:$0xff] }
 0x799   :  { %13413 = vst [vmem:[#allocation116_spill] sm:$0xff] %v10859_v43  ;;  %7961 = vpow2.f32 %v3335_v40  ;;  %v3339_v52 = vmul.f32 1.442695, %v3261_v0  ;;  %v3341_v44 = vmul.f32 1.442695, %v3262_v27 }
 0x79a   :  { %v10863_v6 = vpop.eup %7951  ;;  %7963 = vpow2.f32 %v3337_v23 }
 0x79b   :  { %13414 = vst [vmem:[#allocation117_spill] sm:$0xff] %v10863_v6  ;;  %v10865_v24 = vpop.eup %7953  ;;  %7965 = vpow2.f32 %v3339_v52  ;;  %3449 = vadd.xlane.f32.xlu0 %v3448_v61  ;;  %v3439_v61 = vadd.f32 %v10863_v6, %v10859_v43  ;;  %v13451_v43 = vld [vmem:[#allocation137_spill] sm:$0xff] }
 0x79c   :  { %13415 = vst [vmem:[#allocation98_spill] sm:$0xff] %v10865_v24  ;;  %v10869_v50 = vpop.eup %7955  ;;  %7967 = vpow2.f32 %v3341_v44  ;;  %v2351_v15 = vpop.xlane.xlu1 %2350  ;;  %2440 = vadd.xlane.f32.xlu1 %v2439_v16 }
 0x79d   :  { %13416 = vst [vmem:[#allocation99_spill] sm:$0xff] %v10869_v50  ;;  %v10871_v32 = vpop.eup %7957  ;;  %v3451_v34 = vadd.f32 %v10869_v50, %v10865_v24  ;;  %7969 = vrcp.f32 %v2351_v15 }
 0x79e   :  { %13417 = vst [vmem:[#allocation92_spill] sm:$0xff] %v10871_v32  ;;  %v10875_v51 = vpop.eup %7959  ;;  %v2354_v20 = vpop.xlane.xlu0 %2353 }
 0x79f   :  { %13418 = vst [vmem:[#allocation95_spill] sm:$0xff] %v10875_v51  ;;  %3452 = vadd.xlane.f32.xlu0 %v3451_v34  ;;  %7971 = vrcp.f32 %v2354_v20  ;;  %v3454_v40 = vadd.f32 %v10875_v51, %v10871_v32 }
 0x7a0   :  { %3440 = vadd.xlane.f32.xlu1 %v3439_v61 }
 0x7a2   :  { %v10883_v0 = vpop.xlane.xlu0 %3179 }
 0x7a3   :  { %v10881_v23 = vpop.eup %7961  ;;  %3455 = vadd.xlane.f32.xlu0 %v3454_v40 }
 0x7a4   :  { %13419 = vst [vmem:[#allocation101_spill] sm:$0xff] %v10881_v23  ;;  %v10885_v27 = vpop.eup %7963 }
 0x7a5   :  { %13420 = vst [vmem:[#allocation103_spill] sm:$0xff] %v10885_v27  ;;  %v10887_v52 = vpop.eup %7965  ;;  %v3457_v44 = vadd.f32 %v10885_v27, %v10881_v23 }
 0x7a6   :  { %13421 = vst [vmem:[#allocation107_spill] sm:$0xff] %v10887_v52  ;;  %v10891_v16 = vpop.eup %7967  ;;  %v2357_v15 = vpop.xlane.xlu0 %2356 }
 0x7a7   :  { %13422 = vst [vmem:[#allocation109_spill] sm:$0xff] %v10891_v16  ;;  %3458 = vadd.xlane.f32.xlu0 %v3457_v44  ;;  %v7970_v34 = vpop.eup %7969  ;;  %v3460_v20 = vadd.f32 %v10891_v16, %v10887_v52  ;;  %7973 = vrcp.f32 %v2357_v15  ;;  %v13423_v52 = vld [vmem:[#allocation47_spill] sm:$0xff]  ;;  %v13424_v15 = vld [vmem:[#allocation40_spill] sm:$0xff] }
 0x7a8   :  { %v2477_v24 = vmul.f32 %v7970_v34, %v10299_v54  ;;  %v2478_v50 = vmul.f32 %v7970_v34, %v10301_v18  ;;  %v13425_v54 = vld [vmem:[#allocation6_spill] sm:$0xff]  ;;  %v13426_v16 = vld [vmem:[#allocation48_spill] sm:$0xff] }
 0x7a9   :  { %v7972_v61 = vpop.eup %7971  ;;  %v13430_v34 = vld [vmem:[#allocation42_spill] sm:$0xff] }
 0x7aa   :  { %v2479_v40 = vmul.f32 %v7972_v61, %v10303_v41  ;;  %v2360_v32 = vpop.xlane.xlu0 %2359  ;;  %v2480_v23 = vmul.f32 %v7972_v61, %v10305_v35  ;;  %v13427_v35 = vld [vmem:[#allocation41_spill] sm:$0xff] }
 0x7ab   :  { %3461 = vadd.xlane.f32.xlu0 %v3460_v20  ;;  %7975 = vrcp.f32 %v2360_v32 }
 0x7ac   :  { %v2542_v27 = vpack.c.bf16 %v2480_v23, %v2478_v50  ;;  %v2541_v51 = vpack.c.bf16 %v2479_v40, %v2477_v24 }
 0x7ae   :  { %2653 = vmatprep.mubr.bf16.mxu1 %v2542_v27  ;;  %v10899_v44 = vpop.xlane.xlu0 %3185  ;;  %v13429_v27 = vld [vmem:[#allocation126_spill] sm:$0xff] }
 0x7af   :  { %2654 = vmatmul.mubr.bf16.vlgmr.msra.gmra.mrb[128].mxu1 %v2541_v51  ;;  %v13428_v51 = vld [vmem:[#allocation125_spill] sm:$0xff] }
 0x7b0   :  { %7181 = vmatpush3.bf16.msra.mxu1 %v13423_v52 }
 0x7b1   :  { %7182 = vmatprep.subr.bf16.mxu1 %v13424_v15  ;;  %3677 = vrot.lane.b32.xlu1 %v13425_v54, %s8423_s29  ;;  %v7974_v20 = vpop.eup %7973  ;;  %v13431_v15 = vld [vmem:[#allocation49_spill] sm:$0xff]  ;;  %v13432_v54 = vld [vmem:[#allocation43_spill] sm:$0xff] }
 0x7b2   :  { %v2363_v41 = vpop.xlane.xlu0 %2362  ;;  %v2482_v50 = vmul.f32 %v7974_v20, %v10329_v7  ;;  %v2481_v23 = vmul.f32 %v7974_v20, %v13428_v51  ;;  %v13433_v7 = vld [vmem:[#allocation44_spill] sm:$0xff]  ;;  %v13434_v20 = vld [vmem:[#allocation45_spill] sm:$0xff] }
 0x7b3   :  { %7977 = vrcp.f32 %v2363_v41 }
 0x7b4   :  { %7183 = vmatpush3.bf16.msra.mxu1 %v13426_v16 }
 0x7b5   :  { %v7976_v18 = vpop.eup %7975  ;;  %7184 = vmatprep.subr.bf16.mxu1 %v13427_v35 }
 0x7b6   :  { %v2366_v24 = vpop.xlane.xlu0 %2365  ;;  %v2484_v32 = vmul.f32 %v7976_v18, %v10335_v63  ;;  %v2483_v52 = vmul.f32 %v7976_v18, %v13429_v27  ;;  %v13435_v18 = vld [vmem:[#allocation8_spill] sm:$0xff] }
 0x7b7   :  { %7979 = vrcp.f32 %v2366_v24  ;;  %v13436_v24 = vld [vmem:[#allocation50_spill] sm:$0xff] }
 0x7b8   :  { %7185 = vmatpush3.bf16.msra.mxu1 %v13430_v34  ;;  %v2544_v61 = vpack.c.bf16 %v2484_v32, %v2482_v50  ;;  %v2543_v40 = vpack.c.bf16 %v2483_v52, %v2481_v23  ;;  %v13437_v32 = vld [vmem:[#allocation130_spill] sm:$0xff]  ;;  %v13438_v23 = vld [vmem:[#allocation132_spill] sm:$0xff]  ;;  %v13439_v52 = vld [vmem:[#allocation129_spill] sm:$0xff] }
 0x7b9   :  { %7186 = vmatprep.subr.bf16.mxu1 %v13431_v15  ;;  %v13441_v15 = vld [vmem:[#allocation46_spill] sm:$0xff] }
 0x7ba   :  { %2661 = vmatprep.mubr.bf16.mxu1 %v2544_v61  ;;  %v10913_v16 = vpop.xlane.xlu0 %3191  ;;  %v13440_v61 = vld [vmem:[#allocation131_spill] sm:$0xff] }
 0x7bb   :  { %2662 = vmatmul.mubr.bf16.gmra.mrb[132].mxu1 %v2543_v40 }
 0x7bc   :  { %7187 = vmatpush3.bf16.msra.mxu1 %v13432_v54 }
 0x7bd   :  { %7188 = vmatprep.subr.bf16.mxu1 %v13433_v7  ;;  %v7978_v41 = vpop.eup %7977 }
 0x7be   :  { %v2369_v63 = vpop.xlane.xlu0 %2368  ;;  %v2486_v51 = vmul.f32 %v7978_v41, %v13437_v32  ;;  %v2485_v34 = vmul.f32 %v7978_v41, %v13439_v52 }
 0x7bf   :  { %7981 = vrcp.f32 %v2369_v63 }
 0x7c0   :  { %7189 = vmatpush3.bf16.msra.mxu1 %v13434_v20  ;;  %v13442_v20 = vld [vmem:[#allocation120_spill] sm:$0xff] }
 0x7c1   :  { %3693 = vrot.lane.b32.xlu0 %v13435_v18, %s8423_s29  ;;  %v7980_v35 = vpop.eup %7979  ;;  %7190 = vmatprep.subr.bf16.mxu1 %v13436_v24  ;;  %v3676_v18 = vpop.permute.xlu1 %3675  ;;  %v13443_v24 = vld [vmem:[#allocation123_spill] sm:$0xff] }
 0x7c2   :  { %v2372_v50 = vpop.xlane.xlu0 %2371  ;;  %v2488_v27 = vmul.f32 %v7980_v35, %v13438_v23  ;;  %v2487_v40 = vmul.f32 %v7980_v35, %v13440_v61  ;;  %v3265_v32 = vsub.f32 %v13443_v24, %v10883_v0  ;;  %v13444_v23 = vld [vmem:[#allocation124_spill] sm:$0xff] }
 0x7c3   :  { %7983 = vrcp.f32 %v2372_v50  ;;  %v3266_v41 = vsub.f32 %v13444_v23, %v10883_v0  ;;  %v13445_v50 = vld [vmem:[#allocation127_spill] sm:$0xff]  ;;  %v13449_v0 = vld [vmem:[#allocation138_spill] sm:$0xff] }
 0x7c4   :  { %7191 = vmatpush3.bf16.msra.mxu1 %v13441_v15  ;;  %v2546_v54 = vpack.c.bf16 %v2488_v27, %v2486_v51  ;;  %v2545_v7 = vpack.c.bf16 %v2487_v40, %v2485_v34  ;;  %v3269_v51 = vsub.f32 %v13445_v50, %v10899_v44  ;;  %v13446_v27 = vld [vmem:[#allocation128_spill] sm:$0xff]  ;;  %v3347_v40 = vmul.f32 1.442695, %v3265_v32 }
 0x7c5   :  { %7192 = vmatprep.subr.bf16.mxu1 %v13442_v20  ;;  %v3270_v34 = vsub.f32 %v13446_v27, %v10899_v44  ;;  %v3349_v15 = vmul.f32 1.442695, %v3266_v41  ;;  %v8389_v44 = vld [vmem:[%s13189_s0 + $0x1e0] sm:$0xff]  ;;  %v8390_v41 = vld [vmem:[%s13189_s0 + $0x1e8] sm:$0xff] }
 0x7c6   :  { %2669 = vmatprep.mubr.bf16.mxu1 %v2546_v54  ;;  %v3198_v63 = vpop.xlane.xlu0 %3197  ;;  %v13447_v54 = vld [vmem:[#allocation133_spill] sm:$0xff]  ;;  %v10949_v32 = vadd.f32 %v8389_v44, %v10629_v36  ;;  %v10955_v50 = vadd.f32 %v8390_v41, %v10632_v30  ;;  %v3355_v27 = vmul.f32 1.442695, %v3269_v51  ;;  %7985 = vpow2.f32 %v3347_v40  ;;  %v13454_v44 = vld [vmem:[#allocation51_spill] sm:$0xff] }
 0x7c7   :  { %2670 = vmatmul.mubr.bf16.gmra.mrb[136].mxu1 %v2545_v7  ;;  %v3273_v7 = vsub.f32 %v13447_v54, %v10913_v16  ;;  %v3357_v54 = vmul.f32 1.442695, %v3270_v34  ;;  %7987 = vpow2.f32 %v3349_v15  ;;  %v13456_v34 = vld [vmem:[#allocation140_spill] sm:$0xff] }
 0x7c8   :  { %7193 = vmatpush3.bf16.msra.mxu1 %v3676_v18  ;;  %v13448_v18 = vld [vmem:[#allocation136_spill] sm:$0xff]  ;;  %v3241_v51 = vmax.f32 %v10949_v32, %v10955_v50  ;;  %7989 = vpow2.f32 %v3355_v27 }
 0x7c9   :  { %v7982_v35 = vpop.eup %7981  ;;  %7991 = vpow2.f32 %v3357_v54  ;;  %v13460_v54 = vld [vmem:[#allocation142_spill] sm:$0xff] }
 0x7ca   :  { %v10931_v52 = vpop.xlane.xlu0 %3203  ;;  %v2490_v24 = vmul.f32 %v7982_v35, %v13448_v18  ;;  %v2489_v42 = vmul.f32 %v7982_v35, %v13450_v25  ;;  %v13452_v25 = vld [vmem:[#allocation134_spill] sm:$0xff]  ;;  %v3363_v18 = vmul.f32 1.442695, %v3273_v7 }
 0x7cb   :  { %v3274_v35 = vsub.f32 %v13452_v25, %v10913_v16  ;;  %v3278_v16 = vsub.f32 %v13456_v34, %v3198_v63  ;;  %v13459_v25 = vld [vmem:[#allocation55_spill] sm:$0xff]  ;;  %v13462_v34 = vld [vmem:[#allocation54_spill] sm:$0xff] }
 0x7cc   :  { %7993 = vpow2.f32 %v3363_v18 }
 0x7cd   :  { %v7984_v61 = vpop.eup %7983 }
 0x7ce   :  { %v10939_v20 = vpop.xlane.xlu0 %2383  ;;  %v2492_v23 = vmul.f32 %v7984_v61, %v13449_v0  ;;  %v2491_v55 = vmul.f32 %v7984_v61, %v13451_v43  ;;  %v13453_v0 = vld [vmem:[#allocation139_spill] sm:$0xff] }
 0x7cf   :  { %v3277_v6 = vsub.f32 %v13453_v0, %v3198_v63  ;;  %v3373_v63 = vmul.f32 1.442695, %v3278_v16 }
 0x7d0   :  { %v2548_v43 = vpack.c.bf16 %v2492_v23, %v2490_v24  ;;  %v2547_v61 = vpack.c.bf16 %v2491_v55, %v2489_v42  ;;  %v3365_v55 = vmul.f32 1.442695, %v3274_v35  ;;  %v13457_v24 = vld [vmem:[#allocation141_spill] sm:$0xff]  ;;  %v13458_v23 = vld [vmem:[#allocation78_spill] sm:$0xff]  ;;  %v3282_v35 = vsub.f32 %v13460_v54, %v10931_v52 }
 0x7d1   :  { %v3177_v36 = vpop.xlane.xlu1 %3176  ;;  %v3371_v7 = vmul.f32 1.442695, %v3277_v6 }
 0x7d2   :  { %v3263_v49 = vsub.f32 %v13454_v44, %v3177_v36  ;;  %v3264_v21 = vsub.f32 %v13455_v19, %v3177_v36  ;;  %2677 = vmatprep.mubr.bf16.mxu1 %v2548_v43  ;;  %v3210_v30 = vpop.xlane.xlu0 %3209  ;;  %v3281_v19 = vsub.f32 %v13457_v24, %v10931_v52  ;;  %v13461_v44 = vld [vmem:[#allocation67_spill] sm:$0xff]  ;;  %v13465_v24 = vld [vmem:[#allocation76_spill] sm:$0xff] }
 0x7d3   :  { %2678 = vmatmul.mubr.bf16.gmra.mrb[140].mxu1 %v2547_v61  ;;  %v8392_v61 = vld [vmem:[%s13189_s0 + $0x1f8] sm:$0xff] }
 0x7d4   :  { %v3343_v42 = vmul.f32 1.442695, %v3263_v49  ;;  %v3345_v40 = vmul.f32 1.442695, %v3264_v21  ;;  %v8391_v49 = vld [vmem:[%s13189_s0 + $0x1f0] sm:$0xff]  ;;  %v10983_v18 = vadd.f32 %v8392_v61, %v10652_v3 }
 0x7d5   :  { %v3183_v15 = vpop.xlane.xlu1 %3182  ;;  %3242 = vmax.xlane.f32.xlu1 %v3241_v51  ;;  %v10977_v6 = vadd.f32 %v8391_v49, %v10639_v33  ;;  %v3379_v36 = vmul.f32 1.442695, %v3281_v19  ;;  %v3285_v51 = vsub.f32 %v13461_v44, %v3210_v30  ;;  %v10988_v33 = vpop.eup %7985  ;;  %v13469_v61 = vld [vmem:[#allocation84_spill] sm:$0xff] }
 0x7d6   :  { %7995 = vpow2.f32 %v3343_v42  ;;  %v3267_v41 = vsub.f32 %v13458_v23, %v3183_v15  ;;  %v3268_v43 = vsub.f32 %v13459_v25, %v3183_v15  ;;  %v10969_v27 = vpop.xlane.xlu0 %2389  ;;  %13464 = vst [vmem:[#allocation113_spill] sm:$0xff] %v10988_v33  ;;  %v3381_v15 = vmul.f32 1.442695, %v3282_v35 }
 0x7d7   :  { %7997 = vpow2.f32 %v3345_v40  ;;  %v3286_v23 = vsub.f32 %v13465_v24, %v3210_v30  ;;  %v3244_v19 = vmax.f32 %v10977_v6, %v10983_v18  ;;  %v3387_v49 = vmul.f32 1.442695, %v3285_v51 }
 0x7d8   :  { %7999 = vpow2.f32 %v3365_v55  ;;  %v3351_v21 = vmul.f32 1.442695, %v3267_v41  ;;  %v3353_v0 = vmul.f32 1.442695, %v3268_v43  ;;  %v13463_v55 = vld [vmem:[#allocation72_spill] sm:$0xff]  ;;  %v10991_v41 = vpop.eup %7987 }
 0x7d9   :  { %8001 = vpow2.f32 %v3371_v7  ;;  %v3189_v52 = vpop.xlane.xlu1 %3188  ;;  %v10993_v7 = vpop.eup %7989  ;;  %v3389_v44 = vmul.f32 1.442695, %v3286_v23 }
 0x7da   :  { %v3271_v16 = vsub.f32 %v13462_v34, %v3189_v52  ;;  %v3272_v42 = vsub.f32 %v13463_v55, %v3189_v52  ;;  %v3216_v40 = vpop.xlane.xlu0 %3215  ;;  %8003 = vpow2.f32 %v3373_v63  ;;  %13466 = vst [vmem:[#allocation115_spill] sm:$0xff] %v10993_v7  ;;  %v10997_v54 = vpop.eup %7991  ;;  %v13468_v63 = vld [vmem:[#allocation73_spill] sm:$0xff]  ;;  %v13471_v34 = vld [vmem:[#allocation59_spill] sm:$0xff]  ;;  %v13473_v55 = vld [vmem:[#allocation60_spill] sm:$0xff] }
 0x7db   :  { %8005 = vpow2.f32 %v3351_v21  ;;  %13467 = vst [vmem:[#allocation118_spill] sm:$0xff] %v10997_v54  ;;  %v11003_v21 = vpop.eup %7993 }
 0x7dc   :  { %v3359_v3 = vmul.f32 1.442695, %v3271_v16  ;;  %8007 = vpow2.f32 %v3353_v0  ;;  %v3361_v25 = vmul.f32 1.442695, %v3272_v42  ;;  %13470 = vst [vmem:[#allocation119_spill] sm:$0xff] %v11003_v21  ;;  %v3289_v16 = vsub.f32 %v13471_v34, %v3216_v40  ;;  %v13478_v34 = vld [vmem:[#allocation91_spill] sm:$0xff] }
 0x7dd   :  { %v3195_v43 = vpop.xlane.xlu1 %3194  ;;  %8009 = vpow2.f32 %v3379_v36  ;;  %v3290_v42 = vsub.f32 %v13473_v55, %v3216_v40 }
 0x7de   :  { %v3275_v35 = vsub.f32 %v13468_v63, %v3195_v43  ;;  %v3276_v30 = vsub.f32 %v13469_v61, %v3195_v43  ;;  %v11001_v52 = vpop.xlane.xlu0 %3218  ;;  %8011 = vpow2.f32 %v3381_v15  ;;  %v3472_v63 = vadd.f32 %v10997_v54, %v10993_v7  ;;  %v13479_v7 = vld [vmem:[#allocation80_spill] sm:$0xff] }
 0x7df   :  { %8013 = vpow2.f32 %v3359_v3  ;;  %v3395_v40 = vmul.f32 1.442695, %v3289_v16 }
 0x7e0   :  { %3245 = vmax.xlane.f32.xlu0 %v3244_v19  ;;  %v11006_v0 = vpop.eup %7995  ;;  %v3367_v36 = vmul.f32 1.442695, %v3275_v35  ;;  %8015 = vpow2.f32 %v3361_v25  ;;  %v3369_v24 = vmul.f32 1.442695, %v3276_v30  ;;  %v3397_v19 = vmul.f32 1.442695, %v3290_v42 }
 0x7e1   :  { %13472 = vst [vmem:[#allocation121_spill] sm:$0xff] %v11006_v0  ;;  %v11009_v51 = vpop.eup %7997  ;;  %v2375_v43 = vpop.xlane.xlu1 %2374  ;;  %8017 = vpow2.f32 %v3387_v49  ;;  %v3466_v42 = vadd.f32 %v10991_v41, %v10988_v33 }
 0x7e2   :  { %v11013_v61 = vpop.eup %7999  ;;  %v11015_v15 = vpop.xlane.xlu0 %2395  ;;  %v3463_v23 = vadd.f32 %v11009_v51, %v11006_v0  ;;  %8019 = vpow2.f32 %v3389_v44 }
 0x7e3   :  { %13474 = vst [vmem:[#allocation122_spill] sm:$0xff] %v11013_v61  ;;  %v11019_v3 = vpop.eup %8001  ;;  %8021 = vpow2.f32 %v3367_v36  ;;  %v3478_v49 = vadd.f32 %v11013_v61, %v11003_v21 }
 0x7e4   :  { %13475 = vst [vmem:[#allocation47_spill] sm:$0xff] %v11019_v3  ;;  %3473 = vadd.xlane.f32.xlu0 %v3472_v63  ;;  %3464 = vadd.xlane.f32.xlu1 %v3463_v23  ;;  %v11021_v25 = vpop.eup %8003  ;;  %8023 = vpow2.f32 %v3369_v24  ;;  %v13480_v24 = vld [vmem:[#allocation81_spill] sm:$0xff] }
 0x7e5   :  { %13476 = vst [vmem:[#allocation40_spill] sm:$0xff] %v11021_v25  ;;  %v3201_v35 = vpop.xlane.xlu1 %3200  ;;  %v11025_v30 = vpop.eup %8005  ;;  %8025 = vrcp.f32 %v10939_v20  ;;  %v13481_v23 = vld [vmem:[#allocation61_spill] sm:$0xff] }
 0x7e6   :  { %13477 = vst [vmem:[#allocation6_spill] sm:$0xff] %v11025_v30  ;;  %v3279_v55 = vsub.f32 %v13478_v34, %v3201_v35  ;;  %v3280_v44 = vsub.f32 %v13479_v7, %v3201_v35  ;;  %v3222_v16 = vpop.xlane.xlu0 %3221  ;;  %v11032_v36 = vpop.eup %8007  ;;  %8027 = vpow2.f32 %v3395_v40  ;;  %v3484_v40 = vadd.f32 %v11021_v25, %v11019_v3  ;;  %v13492_v3 = vld [vmem:[#allocation86_spill] sm:$0xff]  ;;  %v13493_v25 = vld [vmem:[#allocation89_spill] sm:$0xff] }
 0x7e7   :  { %v3293_v63 = vsub.f32 %v13480_v24, %v3222_v16  ;;  %v3294_v54 = vsub.f32 %v13481_v23, %v3222_v16  ;;  %v11036_v21 = vpop.eup %8009  ;;  %8029 = vpow2.f32 %v3397_v19  ;;  %v3469_v19 = vadd.f32 %v11032_v36, %v11025_v30 }
 0x7e8   :  { %3479 = vadd.xlane.f32.xlu0 %v3478_v49  ;;  %13482 = vst [vmem:[#allocation48_spill] sm:$0xff] %v11036_v21  ;;  %v3375_v20 = vmul.f32 1.442695, %v3279_v55  ;;  %v3377_v61 = vmul.f32 1.442695, %v3280_v44  ;;  %3467 = vadd.xlane.f32.xlu1 %v3466_v42  ;;  %v11038_v34 = vpop.eup %8011  ;;  %8031 = vrcp.f32 %v2375_v43 }
 0x7e9   :  { %13483 = vst [vmem:[#allocation41_spill] sm:$0xff] %v11038_v34  ;;  %v3403_v7 = vmul.f32 1.442695, %v3293_v63  ;;  %v3405_v35 = vmul.f32 1.442695, %v3294_v54  ;;  %v2378_v33 = vpop.xlane.xlu1 %2377  ;;  %v11042_v0 = vpop.eup %8013  ;;  %v3490_v44 = vadd.f32 %v11038_v34, %v11036_v21 }
 0x7ea   :  { %13484 = vst [vmem:[#allocation125_spill] sm:$0xff] %v11042_v0  ;;  %8033 = vpow2.f32 %v3375_v20  ;;  %v11044_v16 = vpop.xlane.xlu0 %2401  ;;  %v11048_v49 = vpop.eup %8015 }
 0x7eb   :  { %13485 = vst [vmem:[#allocation126_spill] sm:$0xff] %v11048_v49  ;;  %8035 = vpow2.f32 %v3377_v61  ;;  %v11050_v55 = vpop.eup %8017  ;;  %v3475_v63 = vadd.f32 %v11048_v49, %v11042_v0 }
 0x7ec   :  { %3485 = vadd.xlane.f32.xlu0 %v3484_v40  ;;  %13486 = vst [vmem:[#allocation42_spill] sm:$0xff] %v11050_v55  ;;  %8037 = vpow2.f32 %v3403_v7  ;;  %3470 = vadd.xlane.f32.xlu1 %v3469_v19  ;;  %v11052_v54 = vpop.eup %8019 }
 0x7ed   :  { %13487 = vst [vmem:[#allocation49_spill] sm:$0xff] %v11052_v54  ;;  %8039 = vpow2.f32 %v3405_v35  ;;  %v2381_v43 = vpop.xlane.xlu1 %2380  ;;  %v11056_v42 = vpop.eup %8021  ;;  %v3496_v21 = vadd.f32 %v11052_v54, %v11050_v55 }
 0x7ee   :  { %13488 = vst [vmem:[#allocation43_spill] sm:$0xff] %v11056_v42  ;;  %8041 = vrcp.f32 %v2378_v33  ;;  %v3228_v24 = vpop.xlane.xlu0 %3227  ;;  %v11060_v61 = vpop.eup %8023 }
 0x7ef   :  { %13489 = vst [vmem:[#allocation44_spill] sm:$0xff] %v11060_v61  ;;  %v3297_v23 = vsub.f32 %v10600_v60, %v3228_v24  ;;  %v3298_v20 = vsub.f32 %v10604_v39, %v3228_v24  ;;  %v11064_v7 = vpop.eup %8025  ;;  %8043 = vrcp.f32 %v2381_v43  ;;  %v3291_v60 = vsub.f32 %v13492_v3, %v11001_v52 }
 0x7f0   :  { %3491 = vadd.xlane.f32.xlu0 %v3490_v44  ;;  %3476 = vadd.xlane.f32.xlu1 %v3475_v63  ;;  %v11066_v35 = vpop.eup %8027  ;;  %v13494_v44 = vld [vmem:[#allocation65_spill] sm:$0xff]  ;;  %v3481_v43 = vadd.f32 %v11060_v61, %v11056_v42 }
 0x7f1   :  { %13490 = vst [vmem:[#allocation45_spill] sm:$0xff] %v11066_v35  ;;  %v3411_v40 = vmul.f32 1.442695, %v3297_v23  ;;  %v3413_v19 = vmul.f32 1.442695, %v3298_v20  ;;  %v3207_v33 = vpop.xlane.xlu1 %3206  ;;  %v11070_v34 = vpop.eup %8029 }
 0x7f2   :  { %13491 = vst [vmem:[#allocation8_spill] sm:$0xff] %v11070_v34  ;;  %v3283_v39 = vsub.f32 %v13493_v25, %v3207_v33  ;;  %v3284_v24 = vsub.f32 %v13494_v44, %v3207_v33  ;;  %v11076_v0 = vpop.xlane.xlu0 %2407  ;;  %v8032_v63 = vpop.eup %8031  ;;  %v3502_v25 = vadd.f32 %v11070_v34, %v11066_v35  ;;  %v3399_v44 = vmul.f32 1.442695, %v3291_v60  ;;  %v13498_v60 = vld [vmem:[#allocation63_spill] sm:$0xff]  ;;  %v13499_v34 = vld [vmem:[#allocation58_spill] sm:$0xff] }
 0x7f3   :  { %8045 = vpow2.f32 %v3411_v40  ;;  %v2493_v42 = vmul.f32 %v8032_v63, %v13499_v34 }
 0x7f4   :  { %3497 = vadd.xlane.f32.xlu0 %v3496_v21  ;;  %v11080_v23 = vpop.eup %8033  ;;  %8047 = vpow2.f32 %v3413_v19  ;;  %v3383_v20 = vmul.f32 1.442695, %v3283_v39  ;;  %v3385_v55 = vmul.f32 1.442695, %v3284_v24  ;;  %3482 = vadd.xlane.f32.xlu1 %v3481_v43  ;;  %v13497_v39 = vld [vmem:[#allocation57_spill] sm:$0xff] }
 0x7f5   :  { %13495 = vst [vmem:[#allocation50_spill] sm:$0xff] %v11080_v23  ;;  %v11082_v54 = vpop.eup %8035  ;;  %8049 = vrcp.f32 %v10969_v27  ;;  %v2387_v3 = vpop.xlane.xlu1 %2386  ;;  %v3292_v24 = vsub.f32 %v13497_v39, %v11001_v52  ;;  %v13500_v52 = vld [vmem:[#allocation68_spill] sm:$0xff]  ;;  %v13501_v39 = vld [vmem:[#allocation62_spill] sm:$0xff] }
 0x7f6   :  { %13496 = vst [vmem:[#allocation130_spill] sm:$0xff] %v11082_v54  ;;  %v11087_v33 = vpop.eup %8037  ;;  %8051 = vpow2.f32 %v3383_v20  ;;  %v3234_v40 = vpop.xlane.xlu0 %3233  ;;  %v3487_v21 = vadd.f32 %v11082_v54, %v11080_v23  ;;  %v2494_v20 = vmul.f32 %v8032_v63, %v13498_v60 }
 0x7f7   :  { %v11091_v19 = vpop.eup %8039  ;;  %8053 = vpow2.f32 %v3385_v55  ;;  %v3301_v27 = vsub.f32 %v10646_v14, %v3234_v40  ;;  %v3302_v43 = vsub.f32 %v10650_v13, %v3234_v40  ;;  %v13502_v40 = vld [vmem:[#allocation144_spill] sm:$0xff] }
 0x7f8   :  { %3503 = vadd.xlane.f32.xlu0 %v3502_v25  ;;  %v8042_v35 = vpop.eup %8041  ;;  %8055 = vrcp.f32 %v2387_v3  ;;  %3488 = vadd.xlane.f32.xlu1 %v3487_v21  ;;  %v3508_v23 = vadd.f32 %v11091_v19, %v11087_v33  ;;  %v2500_v34 = vmul.f32 %v11064_v7, %v13502_v40 }
 0x7f9   :  { %v3419_v54 = vmul.f32 1.442695, %v3301_v27  ;;  %v3421_v61 = vmul.f32 1.442695, %v3302_v43  ;;  %v3213_v49 = vpop.xlane.xlu1 %3212  ;;  %v2496_v55 = vmul.f32 %v8042_v35, %v13500_v52  ;;  %v2495_v14 = vmul.f32 %v8042_v35, %v13501_v39  ;;  %v8044_v30 = vpop.eup %8043  ;;  %v13503_v27 = vld [vmem:[#allocation88_spill] sm:$0xff] }
 0x7fa   :  { %8057 = vpow2.f32 %v3399_v44  ;;  %v3287_v13 = vsub.f32 %v10659_v38, %v3213_v49  ;;  %v3288_v3 = vsub.f32 %v10663_v48, %v3213_v49  ;;  %v11105_v25 = vpop.xlane.xlu0 %2413  ;;  %v2498_v43 = vmul.f32 %v8044_v30, %v13503_v27 }
 0x7fb   :  { %8059 = vpow2.f32 %v3419_v54  ;;  %v2550_v63 = vpack.c.bf16 %v2496_v55, %v2494_v20  ;;  %v2549_v21 = vpack.c.bf16 %v2495_v14, %v2493_v42  ;;  %v3401_v44 = vmul.f32 1.442695, %v3292_v24 }
 0x7fc   :  { %3509 = vadd.xlane.f32.xlu0 %v3508_v23  ;;  %8061 = vpow2.f32 %v3421_v61  ;;  %v3391_v60 = vmul.f32 1.442695, %v3287_v13  ;;  %v3393_v35 = vmul.f32 1.442695, %v3288_v3  ;;  %v2552_v48 = vpack.c.bf16 %v2500_v34, %v2498_v43 }
 0x7fd   :  { %v11110_v52 = vpop.eup %8045  ;;  %8063 = vrcp.f32 %v11015_v15  ;;  %2685 = vmatprep.mubr.bf16.mxu1 %v2550_v63  ;;  %v2393_v38 = vpop.xlane.xlu1 %2392  ;;  %v13504_v15 = vld [vmem:[#allocation94_spill] sm:$0xff] }
 0x7fe   :  { %v11113_v49 = vpop.eup %8047  ;;  %8065 = vpow2.f32 %v3391_v60  ;;  %2686 = vmatmul.mubr.bf16.gmra.mrb[144].mxu1 %v2549_v21  ;;  %v3240_v54 = vpop.xlane.xlu0 %3239  ;;  %v2497_v55 = vmul.f32 %v8044_v30, %v13504_v15  ;;  %v13506_v21 = vld [vmem:[#allocation53_spill] sm:$0xff] }
 0x7ff   :  { %v8050_v42 = vpop.eup %8049  ;;  %8067 = vpow2.f32 %v3393_v35  ;;  %2693 = vmatprep.mubr.bf16.mxu1 %v2552_v48  ;;  %v3305_v61 = vsub.f32 %v10683_v59, %v3240_v54  ;;  %v3306_v23 = vsub.f32 %v10687_v8, %v3240_v54  ;;  %v3514_v24 = vadd.f32 %v11113_v49, %v11110_v52  ;;  %v13505_v59 = vld [vmem:[#allocation143_spill] sm:$0xff]  ;;  %v13508_v48 = vld [vmem:[#allocation77_spill] sm:$0xff]  ;;  %v13509_v54 = vld [vmem:[#allocation106_spill] sm:$0xff] }
 0x800   :  { %v11119_v20 = vpop.eup %8051  ;;  %8069 = vrcp.f32 %v2393_v38  ;;  %v2499_v8 = vmul.f32 %v11064_v7, %v13505_v59  ;;  %v2504_v30 = vmul.f32 %v8050_v42, %v13506_v21 }
 0x801   :  { %v11122_v39 = vpop.eup %8053  ;;  %8071 = vpow2.f32 %v3401_v44  ;;  %v3427_v14 = vmul.f32 1.442695, %v3305_v61  ;;  %v3429_v13 = vmul.f32 1.442695, %v3306_v23  ;;  %3515 = vadd.xlane.f32.xlu0 %v3514_v24  ;;  %v2399_v3 = vpop.xlane.xlu1 %2398 }
 0x802   :  { %v8056_v40 = vpop.eup %8055  ;;  %8073 = vrcp.f32 %v2399_v3  ;;  %v3493_v34 = vadd.f32 %v11122_v39, %v11119_v20  ;;  %v2551_v43 = vpack.c.bf16 %v2499_v8, %v2497_v55  ;;  %v11134_v35 = vpop.xlane.xlu0 %2419 }
 0x803   :  { %8075 = vpow2.f32 %v3427_v14  ;;  %v2502_v63 = vmul.f32 %v8056_v40, %v10641_v12 }
 0x804   :  { %v11130_v27 = vpop.eup %8057  ;;  %8077 = vpow2.f32 %v3429_v13  ;;  %3494 = vadd.xlane.f32.xlu1 %v3493_v34  ;;  %v13510_v13 = vld [vmem:[#allocation100_spill] sm:$0xff] }
 0x805   :  { %v11132_v60 = vpop.eup %8059  ;;  %v3225_v44 = vpop.xlane.xlu1 %3224  ;;  %v2554_v38 = vpack.c.bf16 %v2504_v30, %v2502_v63  ;;  %8079 = vrcp.f32 %v11044_v16  ;;  %v2501_v3 = vmul.f32 %v8056_v40, %v13510_v13  ;;  %v13511_v34 = vld [vmem:[#allocation56_spill] sm:$0xff] }
 0x806   :  { %13507 = vst [vmem:[#allocation132_spill] sm:$0xff] %v11132_v60  ;;  %v11136_v7 = vpop.eup %8061  ;;  %2694 = vmatmul.mubr.bf16.gmra.mrb[148].mxu1 %v2551_v43  ;;  %v3295_v12 = vsub.f32 %v13508_v48, %v3225_v44  ;;  %v3296_v61 = vsub.f32 %v13509_v54, %v3225_v44  ;;  %v2503_v63 = vmul.f32 %v8050_v42, %v13511_v34  ;;  %v11153_v43 = vpop.xlane.xlu0 %2425  ;;  %v13512_v44 = vld [vmem:[#allocation75_spill] sm:$0xff]  ;;  %v13513_v48 = vld [vmem:[#allocation90_spill] sm:$0xff] }
 0x807   :  { %v8064_v23 = vpop.eup %8063  ;;  %2701 = vmatprep.mubr.bf16.mxu1 %v2554_v38  ;;  %v3520_v24 = vadd.f32 %v11136_v7, %v11132_v60 }
 0x808   :  { %v11143_v15 = vpop.eup %8065  ;;  %v3407_v55 = vmul.f32 1.442695, %v3295_v12  ;;  %v3409_v14 = vmul.f32 1.442695, %v3296_v61  ;;  %v2508_v40 = vmul.f32 %v8064_v23, %v13513_v48  ;;  %v2553_v54 = vpack.c.bf16 %v2503_v63, %v2501_v3 }
 0x809   :  { %v11146_v59 = vpop.eup %8067  ;;  %3521 = vadd.xlane.f32.xlu0 %v3520_v24  ;;  %v2405_v16 = vpop.xlane.xlu1 %2404 }
 0x80a   :  { %v8070_v8 = vpop.eup %8069  ;;  %8081 = vpow2.f32 %v3407_v55  ;;  %v3499_v21 = vadd.f32 %v11146_v59, %v11143_v15  ;;  %v11169_v48 = vpop.xlane.xlu0 %2431 }
 0x80b   :  { %v11151_v30 = vpop.eup %8071  ;;  %8083 = vpow2.f32 %v3409_v14  ;;  %v2506_v38 = vmul.f32 %v8070_v8, %v13512_v44  ;;  %v13515_v44 = vld [vmem:[#allocation71_spill] sm:$0xff] }
 0x80c   :  { %v8074_v12 = vpop.eup %8073  ;;  %8085 = vrcp.f32 %v2405_v16  ;;  %3500 = vadd.xlane.f32.xlu1 %v3499_v21  ;;  %v3505_v34 = vadd.f32 %v11151_v30, %v11130_v27 }
 0x80d   :  { %v11157_v61 = vpop.eup %8075  ;;  %v3231_v24 = vpop.xlane.xlu1 %3230  ;;  %v2556_v42 = vpack.c.bf16 %v2508_v40, %v2506_v38  ;;  %8087 = vrcp.f32 %v11076_v0  ;;  %v2505_v38 = vmul.f32 %v8070_v8, %v13515_v44 }
 0x80e   :  { %13514 = vst [vmem:[#allocation129_spill] sm:$0xff] %v11157_v61  ;;  %v11159_v55 = vpop.eup %8077  ;;  %2702 = vmatmul.mubr.bf16.gmra.mrb[152].mxu1 %v2553_v54  ;;  %v3299_v14 = vsub.f32 %v10748_v10, %v3231_v24  ;;  %v3300_v13 = vsub.f32 %v10755_v57, %v3231_v24  ;;  %v13516_v10 = vld [vmem:[#allocation97_spill] sm:$0xff]  ;;  %v13517_v57 = vld [vmem:[#allocation64_spill] sm:$0xff] }
 0x80f   :  { %2709 = vmatprep.mubr.bf16.mxu1 %v2556_v42  ;;  %v3526_v3 = vadd.f32 %v11159_v55, %v11157_v61  ;;  %v8080_v16 = vpop.eup %8079  ;;  %v2510_v40 = vmul.f32 %v8074_v12, %v13516_v10  ;;  %v2507_v54 = vmul.f32 %v8064_v23, %v13517_v57  ;;  %v13518_v24 = vld [vmem:[#allocation93_spill] sm:$0xff] }
 0x810   :  { %v3415_v63 = vmul.f32 1.442695, %v3299_v14  ;;  %v3417_v21 = vmul.f32 1.442695, %v3300_v13  ;;  %3506 = vadd.xlane.f32.xlu1 %v3505_v34  ;;  %v2512_v42 = vmul.f32 %v8080_v16, %v13518_v24  ;;  %v13520_v24 = vld [vmem:[#allocation69_spill] sm:$0xff] }
 0x811   :  { %3527 = vadd.xlane.f32.xlu0 %v3526_v3  ;;  %v2411_v0 = vpop.xlane.xlu1 %2410  ;;  %v2555_v14 = vpack.c.bf16 %v2507_v54, %v2505_v38 }
 0x812   :  { %8089 = vpow2.f32 %v3415_v63  ;;  %v2558_v34 = vpack.c.bf16 %v2512_v42, %v2510_v40  ;;  %v13519_v40 = vld [vmem:[#allocation96_spill] sm:$0xff]  ;;  %v13521_v42 = vld [vmem:[#allocation70_spill] sm:$0xff] }
 0x813   :  { %8091 = vpow2.f32 %v3417_v21  ;;  %v11183_v21 = vpop.xlane.xlu0 %2437  ;;  %v2509_v57 = vmul.f32 %v8074_v12, %v13519_v40 }
 0x814   :  { %v11174_v60 = vpop.eup %8081  ;;  %8093 = vrcp.f32 %v2411_v0 }
 0x815   :  { %v11176_v13 = vpop.eup %8083  ;;  %v3237_v8 = vpop.xlane.xlu1 %3236  ;;  %8095 = vrcp.f32 %v11105_v25 }
 0x816   :  { %v8086_v44 = vpop.eup %8085  ;;  %2710 = vmatmul.mubr.bf16.gmra.mrb[156].mxu1 %v2555_v14  ;;  %v3303_v3 = vsub.f32 %v10782_v58, %v3237_v8  ;;  %v3304_v63 = vsub.f32 %v10788_v46, %v3237_v8  ;;  %v3511_v23 = vadd.f32 %v11176_v13, %v11174_v60  ;;  %v2511_v58 = vmul.f32 %v8080_v16, %v13520_v24 }
 0x817   :  { %2717 = vmatprep.mubr.bf16.mxu1 %v2558_v34  ;;  %v8088_v0 = vpop.eup %8087  ;;  %v2514_v25 = vmul.f32 %v8086_v44, %v10729_v45  ;;  %v11188_v46 = vpop.xlane.xlu0 %2443 }
 0x818   :  { %v3423_v38 = vmul.f32 1.442695, %v3303_v3  ;;  %v3425_v10 = vmul.f32 1.442695, %v3304_v63  ;;  %3512 = vadd.xlane.f32.xlu1 %v3511_v23  ;;  %v2516_v14 = vmul.f32 %v8088_v0, %v13521_v42  ;;  %v2557_v34 = vpack.c.bf16 %v2511_v58, %v2509_v57  ;;  %v13522_v57 = vld [vmem:[#allocation66_spill] sm:$0xff] }
 0x819   :  { %v2417_v54 = vpop.xlane.xlu1 %2416 }
 0x81a   :  { %8097 = vpow2.f32 %v3423_v38  ;;  %v2560_v63 = vpack.c.bf16 %v2516_v14, %v2514_v25  ;;  %v13523_v25 = vld [vmem:[#allocation74_spill] sm:$0xff] }
 0x81b   :  { %8099 = vpow2.f32 %v3425_v10  ;;  %v2513_v10 = vmul.f32 %v8086_v44, %v10725_v37 }
 0x81c   :  { %v11191_v8 = vpop.eup %8089  ;;  %8101 = vrcp.f32 %v2417_v54  ;;  %v2515_v54 = vmul.f32 %v8088_v0, %v13522_v57 }
 0x81d   :  { %v11193_v3 = vpop.eup %8091  ;;  %8103 = vrcp.f32 %v11134_v35  ;;  %v2423_v45 = vpop.xlane.xlu1 %2422 }
 0x81e   :  { %v8094_v23 = vpop.eup %8093  ;;  %2718 = vmatmul.mubr.bf16.gmra.mrb[160].mxu1 %v2557_v34  ;;  %v3517_v12 = vadd.f32 %v11193_v3, %v11191_v8  ;;  %8105 = vrcp.f32 %v2423_v45  ;;  %v2559_v14 = vpack.c.bf16 %v2515_v54, %v2513_v10  ;;  %v13525_v10 = vld [vmem:[#allocation102_spill] sm:$0xff] }
 0x81f   :  { %2725 = vmatprep.mubr.bf16.mxu1 %v2560_v63  ;;  %v11198_v16 = vpop.xlane.xlu0 %3443  ;;  %v8096_v38 = vpop.eup %8095  ;;  %v2518_v40 = vmul.f32 %v8094_v23, %v10773_v29  ;;  %8107 = vrcp.f32 %v11153_v43  ;;  %v2517_v0 = vmul.f32 %v8094_v23, %v10767_v1 }
 0x820   :  { %3518 = vadd.xlane.f32.xlu1 %v3517_v12  ;;  %v2520_v24 = vmul.f32 %v8096_v38, %v13523_v25  ;;  %v2519_v57 = vmul.f32 %v8096_v38, %v13525_v10  ;;  %v13527_v38 = vld [vmem:[#allocation104_spill] sm:$0xff] }
 0x821   :  { %v2429_v42 = vpop.xlane.xlu1 %2428 }
 0x822   :  { %v2562_v63 = vpack.c.bf16 %v2520_v24, %v2518_v40  ;;  %v13526_v40 = vld [vmem:[#allocation105_spill] sm:$0xff]  ;;  %8109 = vrcp.f32 %v2429_v42  ;;  %v2561_v43 = vpack.c.bf16 %v2519_v57, %v2517_v0 }
 0x823   :  { %8111 = vrcp.f32 %v11169_v48 }
 0x824   :  { %v11204_v58 = vpop.xlane.xlu0 %3446  ;;  %v11206_v35 = vpop.eup %8097 }
 0x825   :  { %13524 = vst [vmem:[#allocation131_spill] sm:$0xff] %v11206_v35  ;;  %v11208_v34 = vpop.eup %8099  ;;  %v2435_v12 = vpop.xlane.xlu1 %2434 }
 0x826   :  { %v8102_v61 = vpop.eup %8101  ;;  %2726 = vmatmul.mubr.bf16.gmra.mrb[164].mxu1 %v2559_v14  ;;  %v3523_v37 = vadd.f32 %v11208_v34, %v11206_v35  ;;  %8113 = vrcp.f32 %v2435_v12 }
 0x827   :  { %2733 = vmatprep.mubr.bf16.mxu1 %v2562_v63  ;;  %v8104_v44 = vpop.eup %8103  ;;  %v2522_v45 = vmul.f32 %v8102_v61, %v10806_v56  ;;  %v2521_v56 = vmul.f32 %v8102_v61, %v10802_v53  ;;  %8115 = vrcp.f32 %v11183_v21 }
 0x828   :  { %v11213_v29 = vpop.xlane.xlu0 %3449  ;;  %3524 = vadd.xlane.f32.xlu1 %v3523_v37  ;;  %v2524_v54 = vmul.f32 %v8104_v44, %v13526_v40  ;;  %v8106_v14 = vpop.eup %8105  ;;  %v2523_v10 = vmul.f32 %v8104_v44, %v13527_v38 }
 0x829   :  { %v8108_v37 = vpop.eup %8107  ;;  %v2441_v1 = vpop.xlane.xlu1 %2440  ;;  %v2526_v23 = vmul.f32 %v8106_v14, %v10813_v2  ;;  %v2525_v53 = vmul.f32 %v8106_v14, %v10811_v17 }
 0x82a   :  { %v2564_v24 = vpack.c.bf16 %v2524_v54, %v2522_v45  ;;  %v2528_v40 = vmul.f32 %v8108_v37, %v10721_v28  ;;  %v2563_v42 = vpack.c.bf16 %v2523_v10, %v2521_v56  ;;  %v2527_v61 = vmul.f32 %v8108_v37, %v10717_v5 }
 0x82b   :  { %8117 = vrcp.f32 %v2441_v1 }
 0x82c   :  { %v11219_v25 = vpop.xlane.xlu0 %3452  ;;  %v2566_v0 = vpack.c.bf16 %v2528_v40, %v2526_v23  ;;  %v8110_v45 = vpop.eup %8109  ;;  %8119 = vrcp.f32 %v11188_v46 }
 0x82d   :  { %v3441_v48 = vpop.xlane.xlu1 %3440  ;;  %v8112_v54 = vpop.eup %8111  ;;  %v2530_v2 = vmul.f32 %v8110_v45, %v10819_v22  ;;  %v2529_v17 = vmul.f32 %v8110_v45, %v10815_v11  ;;  %v13528_v11 = vld [vmem:[#allocation108_spill] sm:$0xff] }
 0x82e   :  { %2734 = vmatmul.mubr.bf16.gmra.mrb[168].mxu1 %v2561_v43  ;;  %v2532_v28 = vmul.f32 %v8112_v54, %v10741_v9  ;;  %v2565_v43 = vpack.c.bf16 %v2527_v61, %v2525_v53  ;;  %v2531_v5 = vmul.f32 %v8112_v54, %v10736_v62  ;;  %8121 = vrcp.f32 %v3441_v48  ;;  %v13531_v48 = vld [vmem:[#allocation117_spill] sm:$0xff]  ;;  %v13532_v54 = vld [vmem:[#allocation79_spill] sm:$0xff]  ;;  %v13533_v53 = vld [vmem:[#allocation110_spill] sm:$0xff] }
 0x82f   :  { %2741 = vmatprep.mubr.bf16.mxu1 %v2564_v24  ;;  %8123 = vrcp.f32 %v11198_v16 }
 0x830   :  { %v3456_v63 = vpop.xlane.xlu0 %3455  ;;  %v2568_v24 = vpack.c.bf16 %v2532_v28, %v2530_v2  ;;  %v8114_v21 = vpop.eup %8113  ;;  %v2567_v14 = vpack.c.bf16 %v2531_v5, %v2529_v17  ;;  %8125 = vrcp.f32 %v11213_v29  ;;  %v13537_v17 = vld [vmem:[#allocation114_spill] sm:$0xff] }
 0x831   :  { %v3678_v12 = vpop.permute.xlu1 %3677  ;;  %v8116_v56 = vpop.eup %8115  ;;  %v2534_v22 = vmul.f32 %v8114_v21, %v10833_v4  ;;  %v2533_v23 = vmul.f32 %v8114_v21, %v10829_v26  ;;  %v13529_v4 = vld [vmem:[#allocation82_spill] sm:$0xff]  ;;  %8127 = vrcp.f32 %v11204_v58  ;;  %v13536_v21 = vld [vmem:[#allocation83_spill] sm:$0xff] }
 0x832   :  { %v2536_v9 = vmul.f32 %v8116_v56, %v10764_v31  ;;  %v2535_v10 = vmul.f32 %v8116_v56, %v13528_v11  ;;  %8129 = vrcp.f32 %v3456_v63 }
 0x833   :  { %8131 = vrcp.f32 %v11219_v25 }
 0x834   :  { %v11226_v35 = vpop.xlane.xlu0 %3458  ;;  %v2570_v37 = vpack.c.bf16 %v2536_v9, %v2534_v22  ;;  %v2569_v62 = vpack.c.bf16 %v2535_v10, %v2533_v23 }
 0x835   :  { %v8118_v1 = vpop.eup %8117 }
 0x836   :  { %2742 = vmatmul.mubr.bf16.gmra.mrb[172].mxu1 %v2563_v42  ;;  %v8120_v46 = vpop.eup %8119  ;;  %v2538_v38 = vmul.f32 %v8118_v1, %v10855_v47 }
 0x837   :  { %2749 = vmatprep.mubr.bf16.mxu1 %v2566_v0  ;;  %v2540_v40 = vmul.f32 %v8120_v46, %v13529_v4  ;;  %v13530_v0 = vld [vmem:[#allocation111_spill] sm:$0xff]  ;;  %v2539_v47 = vmul.f32 %v8120_v46, %v13532_v54 }
 0x838   :  { %v3462_v57 = vpop.xlane.xlu0 %3461  ;;  %v8122_v42 = vpop.eup %8121  ;;  %v2537_v45 = vmul.f32 %v8118_v1, %v13530_v0  ;;  %v13539_v1 = vld [vmem:[#allocation95_spill] sm:$0xff] }
 0x839   :  { %v2572_v31 = vpack.c.bf16 %v2540_v40, %v2538_v38  ;;  %v8124_v16 = vpop.eup %8123  ;;  %v3568_v26 = vmul.f32 %v8122_v42, %v13531_v48  ;;  %8133 = vrcp.f32 %v3462_v57  ;;  %v13540_v38 = vld [vmem:[#allocation112_spill] sm:$0xff]  ;;  %v13541_v57 = vld [vmem:[#allocation99_spill] sm:$0xff] }
 0x83a   :  { %v3570_v2 = vmul.f32 %v8124_v16, %v13533_v53  ;;  %v2571_v61 = vpack.c.bf16 %v2539_v47, %v2537_v45  ;;  %v8126_v29 = vpop.eup %8125  ;;  %v3569_v56 = vmul.f32 %v8124_v16, %v13536_v21  ;;  %8135 = vrcp.f32 %v11226_v35  ;;  %v13542_v45 = vld [vmem:[#allocation92_spill] sm:$0xff]  ;;  %v13544_v47 = vld [vmem:[#allocation98_spill] sm:$0xff]  ;;  %v13545_v53 = vld [vmem:[#allocation103_spill] sm:$0xff] }
 0x83b   :  { %v8128_v58 = vpop.eup %8127 }
 0x83c   :  { %v3694_v44 = vpop.permute.xlu0 %3693  ;;  %v3632_v28 = vpack.c.bf16 %v3570_v2, %v3568_v26  ;;  %v3572_v22 = vmul.f32 %v8128_v58, %v13537_v17  ;;  %v8130_v63 = vpop.eup %8129  ;;  %v3571_v11 = vmul.f32 %v8128_v58, %v13540_v38  ;;  %v13543_v26 = vld [vmem:[#allocation109_spill] sm:$0xff] }
 0x83d   :  { %7194 = vmatprep.subr.bf16.mxu1 %v3694_v44  ;;  %v13534_v44 = vld [vmem:[#allocation116_spill] sm:$0xff]  ;;  %v8132_v25 = vpop.eup %8131  ;;  %v3578_v46 = vmul.f32 %v8130_v63, %v13539_v1  ;;  %v3577_v48 = vmul.f32 %v8130_v63, %v13542_v45 }
 0x83e   :  { %7195 = vmatpush3.bf16.msra.mxu1 %v3678_v12  ;;  %v3567_v12 = vmul.f32 %v8122_v42, %v13534_v44  ;;  %v3576_v40 = vmul.f32 %v8132_v25, %v13541_v57 }
 0x83f   :  { %2750 = vmatmul.mubr.bf16.gmra.mrb[176].mxu1 %v2565_v43  ;;  %v13535_v43 = vld [vmem:[#allocation87_spill] sm:$0xff] }
 0x840   :  { %2757 = vmatprep.mubr.bf16.mxu1 %v2568_v24  ;;  %v3574_v24 = vmul.f32 %v8126_v29, %v13535_v43  ;;  %v3631_v5 = vpack.c.bf16 %v3569_v56, %v3567_v12  ;;  %v3636_v35 = vpack.c.bf16 %v3578_v46, %v3576_v40  ;;  %v13548_v56 = vld [vmem:[#allocation107_spill] sm:$0xff] }
 0x842   :  { %v3634_v9 = vpack.c.bf16 %v3574_v24, %v3572_v22  ;;  %v13546_v24 = vld [vmem:[#allocation10_spill] sm:$0xff] }
 0x843   :  { %v8134_v16 = vpop.eup %8133 }
 0x844   :  { %v8136_v0 = vpop.eup %8135  ;;  %v3582_v54 = vmul.f32 %v8134_v16, %v13543_v26  ;;  %v3581_v17 = vmul.f32 %v8134_v16, %v13548_v56 }
 0x847   :  { %2758 = vmatmul.mubr.bf16.gmra.mrb[180].mxu1 %v2567_v14  ;;  %v13538_v14 = vld [vmem:[#allocation85_spill] sm:$0xff] }
 0x848   :  { %2765 = vmatprep.mubr.bf16.mxu1 %v2570_v37  ;;  %v3573_v37 = vmul.f32 %v8126_v29, %v13538_v14  ;;  %v13550_v14 = vld [vmem:[#allocation7_spill] sm:$0xff] }
 0x84f   :  { %2766 = vmatmul.mubr.bf16.gmra.mrb[184].mxu1 %v2569_v62  ;;  %v3633_v62 = vpack.c.bf16 %v3573_v37, %v3571_v11 }
 0x850   :  { %2773 = vmatprep.mubr.bf16.mxu1 %v2572_v31 }
 0x857   :  { %2774 = vmatmul.mubr.bf16.gmra.mrb[188].mxu1 %v2571_v61 }
 0x858   :  { %3743 = vmatprep.mubr.bf16.mxu1 %v3632_v28  ;;  %v11268_v28 = vld [vmem:[%s12863_s8] ss:$0 sm:$0xff] }
 0x859   :  { %v11274_v21 = vadd.f32 %v11268_v28, %v13546_v24  ;;  %v11291_v37 = vadd.f32 %v13550_v14, %v11268_v28 }
 0x85b   :  { %13547 = vst [vmem:[#allocation46_spill] sm:$0xff] %v11274_v21  ;;  %13551 = vst [vmem:[#allocation120_spill] sm:$0xff] %v11291_v37 }
 0x85f   :  { %3744 = vmatmul.mubr.bf16.vlgmr.msra.gmra.mrb[192].mxu1 %v3631_v5  ;;  %v11282_v5 = vld [vmem:[%s12875_s20] ss:$0 sm:$0xff] }
 0x860   :  { %3751 = vmatprep.mubr.bf16.mxu1 %v3634_v9  ;;  %v13549_v9 = vld [vmem:[#allocation101_spill] sm:$0xff]  ;;  %v5554_v1 = vmul.f32 %v11282_v5, %v11274_v21  ;;  %v5556_v11 = vmul.f32 %v11282_v5, %v11291_v37 }
 0x861   :  { %v3579_v63 = vmul.f32 %v8136_v0, %v13549_v9 }
 0x862   :  { %v3243_v23 = vpop.xlane.xlu1 %3242  ;;  %v5586_v57 = vsel %vm267_vm0, %v5554_v1, 0.0  ;;  %v13564_v1 = vld [vmem:[#allocation16_spill] sm:$0xff] }
 0x863   :  { %v3307_v10 = vsub.f32 %v10949_v32, %v3243_v23  ;;  %v3308_v4 = vsub.f32 %v10955_v50, %v3243_v23  ;;  %v3575_v32 = vmul.f32 %v8132_v25, %v13544_v47  ;;  %v3580_v50 = vmul.f32 %v8136_v0, %v13545_v53  ;;  %v13556_v0 = vld [vmem:[#allocation9_spill] sm:$0xff] }
 0x864   :  { %v3637_v23 = vpack.c.bf16 %v3581_v17, %v3579_v63  ;;  %v11312_v45 = vadd.f32 %v13556_v0, %v11268_v28  ;;  %v5592_v47 = vsel %vm267_vm0, %v5556_v11, 0.0  ;;  %v13563_v63 = vld [vmem:[#allocation113_spill] sm:$0xff]  ;;  %v13566_v11 = vld [vmem:[#allocation15_spill] sm:$0xff] }
 0x865   :  { %v3431_v31 = vmul.f32 1.442695, %v3307_v10  ;;  %v3433_v42 = vmul.f32 1.442695, %v3308_v4  ;;  %v3635_v2 = vpack.c.bf16 %v3577_v48, %v3575_v32  ;;  %v3638_v29 = vpack.c.bf16 %v3582_v54, %v3580_v50  ;;  %v13552_v10 = vld [vmem:[#allocation14_spill] sm:$0xff]  ;;  %v13558_v48 = vld [vmem:[#allocation11_spill] sm:$0xff] }
 0x866   :  { %v11299_v4 = vadd.f32 %v11268_v28, %v13552_v10  ;;  %13557 = vst [vmem:[#allocation127_spill] sm:$0xff] %v11312_v45  ;;  %v11316_v26 = vadd.f32 %v13558_v48, %v11268_v28  ;;  %v11345_v10 = vadd.f32 %v13566_v11, %v11268_v28 }
 0x867   :  { %3752 = vmatmul.mubr.bf16.gmra.mrb[196].mxu1 %v3633_v62  ;;  %8137 = vpow2.f32 %v3431_v31  ;;  %v13554_v62 = vld [vmem:[#allocation12_spill] sm:$0xff] }
 0x868   :  { %3759 = vmatprep.mubr.bf16.mxu1 %v3636_v35  ;;  %8139 = vpow2.f32 %v3433_v42  ;;  %13553 = vst [vmem:[#allocation123_spill] sm:$0xff] %v11299_v4  ;;  %v11304_v31 = vadd.f32 %v11268_v28, %v13554_v62  ;;  %13559 = vst [vmem:[#allocation128_spill] sm:$0xff] %v11316_v26  ;;  %v5558_v54 = vmul.f32 %v11282_v5, %v11299_v4 }
 0x869   :  { %13567 = vst [vmem:[#allocation138_spill] sm:$0xff] %v11345_v10 }
 0x86a   :  { %13555 = vst [vmem:[#allocation124_spill] sm:$0xff] %v11304_v31 }
 0x86d   :  { %v3246_v61 = vpop.xlane.xlu0 %3245 }
 0x86e   :  { %v3309_v58 = vsub.f32 %v10977_v6, %v3246_v61  ;;  %v3310_v44 = vsub.f32 %v10983_v18, %v3246_v61 }
 0x86f   :  { %3760 = vmatmul.mubr.bf16.gmra.mrb[200].mxu1 %v3635_v2  ;;  %v5555_v2 = vmul.f32 %v11282_v5, %v11304_v31 }
 0x870   :  { %3767 = vmatprep.mubr.bf16.mxu1 %v3638_v29  ;;  %v3435_v12 = vmul.f32 1.442695, %v3309_v58  ;;  %v3437_v43 = vmul.f32 1.442695, %v3310_v44  ;;  %v5557_v29 = vmul.f32 %v11282_v5, %v11312_v45  ;;  %v5560_v58 = vmul.f32 %v11282_v5, %v11316_v26  ;;  %v13560_v44 = vld [vmem:[#allocation17_spill] sm:$0xff] }
 0x871   :  { %v11277_v22 = vpop.eup %8137  ;;  %v3465_v6 = vpop.xlane.xlu1 %3464 }
 0x872   :  { %8141 = vpow2.f32 %v3435_v12  ;;  %v11284_v18 = vpop.eup %8139  ;;  %v3474_v46 = vpop.xlane.xlu0 %3473  ;;  %v11331_v12 = vadd.f32 %v11268_v28, %v13560_v44 }
 0x873   :  { %8143 = vpow2.f32 %v3437_v43  ;;  %v3529_v25 = vadd.f32 %v11284_v18, %v11277_v22  ;;  %v5598_v43 = vsel %vm267_vm0, %v5558_v54, 0.0  ;;  %v5604_v54 = vsel %vm267_vm0, %v5560_v58, 0.0 }
 0x874   :  { %8145 = vrcp.f32 %v3465_v6  ;;  %13561 = vst [vmem:[#allocation133_spill] sm:$0xff] %v11331_v12  ;;  %v13562_v6 = vld [vmem:[#allocation121_spill] sm:$0xff] }
 0x875   :  { %v3468_v38 = vpop.xlane.xlu1 %3467  ;;  %3530 = vadd.xlane.f32.xlu1 %v3529_v25 }
 0x876   :  { %8147 = vrcp.f32 %v3468_v38  ;;  %v3480_v42 = vpop.xlane.xlu0 %3479  ;;  %v5589_v38 = vsel %vm267_vm0, %v5555_v2, 0.0 }
 0x877   :  { %3768 = vmatmul.mubr.bf16.gmra.mrb[204].mxu1 %v3637_v23  ;;  %8149 = vrcp.f32 %v3474_v46  ;;  %v11340_v46 = vadd.f32 %v11268_v28, %v13564_v1 }
 0x879   :  { %v3471_v40 = vpop.xlane.xlu1 %3470  ;;  %5587 = vadd.xlane.f32.xlu1 %v5586_v57  ;;  %13565 = vst [vmem:[#allocation136_spill] sm:$0xff] %v11340_v46 }
 0x87a   :  { %8151 = vrcp.f32 %v3471_v40  ;;  %v3486_v57 = vpop.xlane.xlu0 %3485 }
 0x87b   :  { %8153 = vrcp.f32 %v3480_v42  ;;  %v5562_v42 = vmul.f32 %v11282_v5, %v11331_v12 }
 0x87c   :  { %v11306_v35 = vpop.eup %8141 }
 0x87d   :  { %v11308_v16 = vpop.eup %8143  ;;  %v3477_v32 = vpop.xlane.xlu1 %3476  ;;  %5593 = vadd.xlane.f32.xlu1 %v5592_v47 }
 0x87e   :  { %v3532_v53 = vadd.f32 %v11308_v16, %v11306_v35  ;;  %v8146_v50 = vpop.eup %8145  ;;  %8155 = vrcp.f32 %v3477_v32  ;;  %v5595_v32 = vsel %vm267_vm0, %v5557_v29, 0.0 }
 0x87f   :  { %v3584_v56 = vmul.f32 %v8146_v50, %v11009_v51  ;;  %v3583_v9 = vmul.f32 %v8146_v50, %v13562_v6  ;;  %v13568_v50 = vld [vmem:[#allocation118_spill] sm:$0xff] }
 0x880   :  { %3533 = vadd.xlane.f32.xlu0 %v3532_v53  ;;  %v8148_v61 = vpop.eup %8147 }
 0x881   :  { %v3483_v24 = vpop.xlane.xlu1 %3482  ;;  %5599 = vadd.xlane.f32.xlu1 %v5598_v43  ;;  %v3586_v17 = vmul.f32 %v8148_v61, %v10991_v41  ;;  %v3585_v25 = vmul.f32 %v8148_v61, %v13563_v63  ;;  %v8150_v14 = vpop.eup %8149  ;;  %v13569_v61 = vld [vmem:[#allocation13_spill] sm:$0xff]  ;;  %v5559_v43 = vmul.f32 %v11282_v5, %v11340_v46  ;;  %v5610_v63 = vsel %vm267_vm0, %v5562_v42, 0.0  ;;  %v13578_v42 = vld [vmem:[#allocation20_spill] sm:$0xff] }
 0x882   :  { %v7036_v23 = vpop.f32.mrb[128].mxu1  ;;  %8157 = vrcp.f32 %v3483_v24  ;;  %v3590_v2 = vmul.f32 %v8150_v14, %v13568_v50  ;;  %v11357_v44 = vadd.f32 %v13569_v61, %v11268_v28 }
 0x883   :  { %v7037_v51 = vpop.f32.mrb[129].mxu1  ;;  %v3640_v41 = vpack.c.bf16 %v3586_v17, %v3584_v56  ;;  %v3639_v40 = vpack.c.bf16 %v3585_v25, %v3583_v9  ;;  %8159 = vrcp.f32 %v3486_v57  ;;  %v5564_v56 = vmul.f32 %v11282_v5, %v11345_v10  ;;  %v13571_v17 = vld [vmem:[#allocation21_spill] sm:$0xff]  ;;  %v13573_v25 = vld [vmem:[#allocation6_spill] sm:$0xff]  ;;  %v13592_v9 = vld [vmem:[#allocation40_spill] sm:$0xff] }
 0x884   :  { %5590 = vadd.xlane.f32.xlu0 %v5589_v38  ;;  %v8152_v62 = vpop.eup %8151  ;;  %v11349_v0 = vadd.f32 %v7037_v51, %v7036_v23  ;;  %v7039_v48 = vpop.f32.mrb[130].mxu1  ;;  %13570 = vst [vmem:[#allocation135_spill] sm:$0xff] %v11357_v44  ;;  %v11367_v6 = vadd.f32 %v11268_v28, %v13571_v17  ;;  %v13574_v38 = vld [vmem:[#allocation126_spill] sm:$0xff]  ;;  %v5561_v57 = vmul.f32 %v11282_v5, %v11357_v44  ;;  %v13575_v51 = vld [vmem:[#allocation19_spill] sm:$0xff] }
 0x885   :  { %3775 = vmatprep.mubr.bf16.mxu1 %v3640_v41  ;;  %5605 = vadd.xlane.f32.xlu1 %v5604_v54  ;;  %v7040_v47 = vpop.f32.mrb[131].mxu1  ;;  %v3588_v53 = vmul.f32 %v8152_v62, %v11032_v36  ;;  %v8154_v58 = vpop.eup %8153  ;;  %v3587_v1 = vmul.f32 %v8152_v62, %v13573_v25  ;;  %v11378_v41 = vadd.f32 %v11268_v28, %v13575_v51  ;;  %v13583_v51 = vld [vmem:[#allocation25_spill] sm:$0xff] }
 0x886   :  { %v11361_v24 = vadd.f32 %v7040_v47, %v7039_v48  ;;  %3776 = vmatmul.mubr.bf16.gmra.mrb[208].mxu1 %v3639_v40  ;;  %13572 = vst [vmem:[#allocation137_spill] sm:$0xff] %v11367_v6  ;;  %v3489_v23 = vpop.xlane.xlu1 %3488  ;;  %v5601_v40 = vsel %vm267_vm0, %v5559_v43, 0.0  ;;  %v13577_v48 = vld [vmem:[#allocation115_spill] sm:$0xff]  ;;  %v11384_v47 = vadd.f32 %v13578_v42, %v11268_v28  ;;  %v3492_v62 = vpop.xlane.xlu0 %3491  ;;  %v5566_v50 = vmul.f32 %v11282_v5, %v11367_v6  ;;  %v13585_v42 = vld [vmem:[#allocation125_spill] sm:$0xff] }
 0x887   :  { %v3642_v29 = vpack.c.bf16 %v3590_v2, %v3588_v53  ;;  %13576 = vst [vmem:[#allocation134_spill] sm:$0xff] %v11378_v41  ;;  %v3589_v54 = vmul.f32 %v8150_v14, %v13577_v48  ;;  %8161 = vrcp.f32 %v3489_v23  ;;  %v5616_v2 = vsel %vm267_vm0, %v5564_v56, 0.0 }
 0x888   :  { %5596 = vadd.xlane.f32.xlu0 %v5595_v32  ;;  %v8156_v36 = vpop.eup %8155  ;;  %13579 = vst [vmem:[#allocation139_spill] sm:$0xff] %v11384_v47  ;;  %v13580_v32 = vld [vmem:[#allocation122_spill] sm:$0xff]  ;;  %8163 = vrcp.f32 %v3492_v62  ;;  %v5568_v23 = vmul.f32 %v11282_v5, %v11384_v47 }
 0x889   :  { %3783 = vmatprep.mubr.bf16.mxu1 %v3642_v29  ;;  %5611 = vadd.xlane.f32.xlu1 %v5610_v63  ;;  %v3592_v11 = vmul.f32 %v8156_v36, %v13574_v38  ;;  %v3594_v53 = vmul.f32 %v8154_v58, %v13580_v32  ;;  %v3641_v61 = vpack.c.bf16 %v3589_v54, %v3587_v1  ;;  %v13581_v29 = vld [vmem:[#allocation18_spill] sm:$0xff]  ;;  %v5607_v38 = vsel %vm267_vm0, %v5561_v57, 0.0 }
 0x88a   :  { %v11392_v43 = vadd.f32 %v13581_v29, %v11268_v28  ;;  %v5563_v63 = vmul.f32 %v11282_v5, %v11378_v41  ;;  %v5622_v54 = vsel %vm267_vm0, %v5566_v50, 0.0  ;;  %v3591_v62 = vmul.f32 %v8156_v36, %v13585_v42  ;;  %v13587_v29 = vld [vmem:[#allocation23_spill] sm:$0xff]  ;;  %v13590_v36 = vld [vmem:[#allocation24_spill] sm:$0xff]  ;;  %v3498_v42 = vpop.xlane.xlu0 %3497 }
 0x88b   :  { %v3644_v14 = vpack.c.bf16 %v3594_v53, %v3592_v11 }
 0x88c   :  { %5602 = vadd.xlane.f32.xlu0 %v5601_v40  ;;  %13582 = vst [vmem:[#allocation51_spill] sm:$0xff] %v11392_v43  ;;  %v8158_v17 = vpop.eup %8157  ;;  %v11401_v40 = vadd.f32 %v11268_v28, %v13583_v51  ;;  %v5565_v57 = vmul.f32 %v11282_v5, %v11392_v43  ;;  %v11420_v51 = vadd.f32 %v13590_v36, %v11268_v28 }
 0x88d   :  { %5617 = vadd.xlane.f32.xlu1 %v5616_v2  ;;  %v8160_v1 = vpop.eup %8159  ;;  %v13586_v2 = vld [vmem:[#allocation44_spill] sm:$0xff] }
 0x88e   :  { %3784 = vmatmul.mubr.bf16.gmra.mrb[212].mxu1 %v3641_v61  ;;  %v7042_v25 = vpop.f32.mrb[132].mxu1  ;;  %13584 = vst [vmem:[#allocation52_spill] sm:$0xff] %v11401_v40  ;;  %v3596_v61 = vmul.f32 %v8158_v17, %v13586_v2  ;;  %13591 = vst [vmem:[#allocation141_spill] sm:$0xff] %v11420_v51  ;;  %v3598_v2 = vmul.f32 %v8160_v1, %v13592_v9  ;;  %v5619_v9 = vsel %vm267_vm0, %v5565_v57, 0.0  ;;  %v13598_v57 = vld [vmem:[#allocation130_spill] sm:$0xff] }
 0x88f   :  { %3791 = vmatprep.mubr.bf16.mxu1 %v3644_v14  ;;  %v7043_v56 = vpop.f32.mrb[133].mxu1  ;;  %v11412_v14 = vadd.f32 %v11268_v28, %v13587_v29  ;;  %v5570_v29 = vmul.f32 %v11282_v5, %v11401_v40 }
 0x890   :  { %5608 = vadd.xlane.f32.xlu0 %v5607_v38  ;;  %v11403_v11 = vadd.f32 %v7043_v56, %v7042_v25  ;;  %v7045_v48 = vpop.f32.mrb[134].mxu1  ;;  %v5613_v25 = vsel %vm267_vm0, %v5563_v63, 0.0  ;;  %v13589_v56 = vld [vmem:[#allocation119_spill] sm:$0xff] }
 0x891   :  { %v3495_v32 = vpop.xlane.xlu1 %3494  ;;  %5623 = vadd.xlane.f32.xlu1 %v5622_v54  ;;  %v7046_v53 = vpop.f32.mrb[135].mxu1  ;;  %13588 = vst [vmem:[#allocation140_spill] sm:$0xff] %v11412_v14  ;;  %v3593_v50 = vmul.f32 %v8154_v58, %v13589_v56  ;;  %v5628_v54 = vsel %vm267_vm0, %v5568_v23, 0.0  ;;  %v13593_v58 = vld [vmem:[#allocation22_spill] sm:$0xff]  ;;  %v3646_v56 = vpack.c.bf16 %v3598_v2, %v3596_v61  ;;  %v5567_v23 = vmul.f32 %v11282_v5, %v11412_v14 }
 0x892   :  { %v11414_v38 = vadd.f32 %v7046_v53, %v7045_v48  ;;  %8165 = vrcp.f32 %v3495_v32  ;;  %v11430_v53 = vadd.f32 %v13593_v58, %v11268_v28  ;;  %v8162_v36 = vpop.eup %8161  ;;  %v5572_v32 = vmul.f32 %v11282_v5, %v11420_v51  ;;  %v13599_v48 = vld [vmem:[#allocation27_spill] sm:$0xff] }
 0x893   :  { %v3643_v63 = vpack.c.bf16 %v3593_v50, %v3591_v62  ;;  %8167 = vrcp.f32 %v3498_v42  ;;  %v8164_v62 = vpop.eup %8163  ;;  %v5634_v61 = vsel %vm267_vm0, %v5570_v29, 0.0  ;;  %v3600_v58 = vmul.f32 %v8162_v36, %v13598_v57  ;;  %v13602_v29 = vld [vmem:[#allocation28_spill] sm:$0xff] }
 0x894   :  { %5614 = vadd.xlane.f32.xlu0 %v5613_v25  ;;  %13594 = vst [vmem:[#allocation78_spill] sm:$0xff] %v11430_v53  ;;  %v13595_v25 = vld [vmem:[#allocation29_spill] sm:$0xff]  ;;  %v5569_v42 = vmul.f32 %v11282_v5, %v11430_v53  ;;  %v5625_v14 = vsel %vm267_vm0, %v5567_v23, 0.0  ;;  %v11454_v41 = vadd.f32 %v13602_v29, %v11268_v28 }
 0x895   :  { %5629 = vadd.xlane.f32.xlu1 %v5628_v54  ;;  %v11439_v50 = vadd.f32 %v11268_v28, %v13595_v25  ;;  %v13597_v54 = vld [vmem:[#allocation43_spill] sm:$0xff]  ;;  %v13604_v53 = vld [vmem:[#allocation41_spill] sm:$0xff] }
 0x896   :  { %3792 = vmatmul.mubr.bf16.gmra.mrb[216].mxu1 %v3643_v63  ;;  %v3595_v2 = vmul.f32 %v8158_v17, %v13597_v54  ;;  %v13601_v25 = vld [vmem:[#allocation47_spill] sm:$0xff]  ;;  %13603 = vst [vmem:[#allocation67_spill] sm:$0xff] %v11454_v41  ;;  %v3504_v17 = vpop.xlane.xlu0 %3503  ;;  %v3602_v57 = vmul.f32 %v8164_v62, %v13604_v53  ;;  %v5631_v29 = vsel %vm267_vm0, %v5569_v42, 0.0 }
 0x897   :  { %3799 = vmatprep.mubr.bf16.mxu1 %v3646_v56  ;;  %13596 = vst [vmem:[#allocation55_spill] sm:$0xff] %v11439_v50  ;;  %v11448_v56 = vadd.f32 %v11268_v28, %v13599_v48  ;;  %v3597_v40 = vmul.f32 %v8160_v1, %v13601_v25  ;;  %v5574_v48 = vmul.f32 %v11282_v5, %v11439_v50 }
 0x898   :  { %5620 = vadd.xlane.f32.xlu0 %v5619_v9  ;;  %v3648_v25 = vpack.c.bf16 %v3602_v57, %v3600_v58 }
 0x899   :  { %v3501_v63 = vpop.xlane.xlu1 %3500  ;;  %5635 = vadd.xlane.f32.xlu1 %v5634_v61  ;;  %13600 = vst [vmem:[#allocation142_spill] sm:$0xff] %v11448_v56  ;;  %v5640_v61 = vsel %vm267_vm0, %v5572_v32, 0.0  ;;  %v3645_v43 = vpack.c.bf16 %v3597_v40, %v3595_v2  ;;  %v5571_v53 = vmul.f32 %v11282_v5, %v11448_v56  ;;  %v5576_v40 = vmul.f32 %v11282_v5, %v11454_v41  ;;  %v13616_v56 = vld [vmem:[#allocation30_spill] sm:$0xff] }
 0x89a   :  { %v7048_v9 = vpop.f32.mrb[136].mxu1  ;;  %8169 = vrcp.f32 %v3501_v63  ;;  %v13607_v63 = vld [vmem:[#allocation33_spill] sm:$0xff] }
 0x89b   :  { %v7049_v54 = vpop.f32.mrb[137].mxu1  ;;  %8171 = vrcp.f32 %v3504_v17  ;;  %v11475_v42 = vadd.f32 %v11268_v28, %v13607_v63  ;;  %v3510_v63 = vpop.xlane.xlu0 %3509 }
 0x89c   :  { %5626 = vadd.xlane.f32.xlu0 %v5625_v14  ;;  %v11460_v51 = vadd.f32 %v7049_v54, %v7048_v9  ;;  %v7051_v23 = vpop.f32.mrb[138].mxu1  ;;  %v8166_v6 = vpop.eup %8165  ;;  %v13605_v14 = vld [vmem:[#allocation26_spill] sm:$0xff]  ;;  %v5646_v9 = vsel %vm267_vm0, %v5574_v48, 0.0  ;;  %v5652_v48 = vsel %vm267_vm0, %v5576_v40, 0.0 }
 0x89d   :  { %5641 = vadd.xlane.f32.xlu1 %v5640_v61  ;;  %v7052_v1 = vpop.f32.mrb[139].mxu1  ;;  %v11465_v12 = vadd.f32 %v13605_v14, %v11268_v28  ;;  %v8168_v2 = vpop.eup %8167  ;;  %13608 = vst [vmem:[#allocation72_spill] sm:$0xff] %v11475_v42  ;;  %v13609_v54 = vld [vmem:[#allocation50_spill] sm:$0xff]  ;;  %v5578_v58 = vmul.f32 %v11282_v5, %v11475_v42 }
 0x89e   :  { %v11469_v32 = vadd.f32 %v7052_v1, %v7051_v23  ;;  %3800 = vmatmul.mubr.bf16.gmra.mrb[220].mxu1 %v3645_v43  ;;  %v3599_v17 = vmul.f32 %v8162_v36, %v13609_v54  ;;  %v3507_v61 = vpop.xlane.xlu1 %3506  ;;  %v3604_v43 = vmul.f32 %v8166_v6, %v11122_v39  ;;  %v13610_v23 = vld [vmem:[#allocation31_spill] sm:$0xff]  ;;  %v13613_v36 = vld [vmem:[#allocation49_spill] sm:$0xff] }
 0x89f   :  { %13606 = vst [vmem:[#allocation54_spill] sm:$0xff] %v11465_v12  ;;  %3807 = vmatprep.mubr.bf16.mxu1 %v3648_v25  ;;  %v5573_v57 = vmul.f32 %v11282_v5, %v11465_v12  ;;  %v11486_v1 = vadd.f32 %v11268_v28, %v13610_v23  ;;  %v5637_v25 = vsel %vm267_vm0, %v5571_v53, 0.0  ;;  %v3606_v54 = vmul.f32 %v8168_v2, %v13613_v36  ;;  %v3516_v42 = vpop.xlane.xlu0 %3515 }
 0x8a0   :  { %5632 = vadd.xlane.f32.xlu0 %v5631_v29  ;;  %v13612_v29 = vld [vmem:[#allocation48_spill] sm:$0xff]  ;;  %8173 = vrcp.f32 %v3507_v61  ;;  %v11500_v53 = vadd.f32 %v13616_v56, %v11268_v28 }
 0x8a1   :  { %5647 = vadd.xlane.f32.xlu1 %v5646_v9  ;;  %13611 = vst [vmem:[#allocation76_spill] sm:$0xff] %v11486_v1  ;;  %v3601_v14 = vmul.f32 %v8164_v62, %v13612_v29  ;;  %v13614_v9 = vld [vmem:[#allocation32_spill] sm:$0xff]  ;;  %v3650_v62 = vpack.c.bf16 %v3606_v54, %v3604_v43  ;;  %v5575_v40 = vmul.f32 %v11282_v5, %v11486_v1  ;;  %8175 = vrcp.f32 %v3510_v63 }
 0x8a2   :  { %v11494_v39 = vadd.f32 %v13614_v9, %v11268_v28  ;;  %13617 = vst [vmem:[#allocation84_spill] sm:$0xff] %v11500_v53  ;;  %v5643_v36 = vsel %vm267_vm0, %v5573_v57, 0.0  ;;  %v5658_v43 = vsel %vm267_vm0, %v5578_v58, 0.0  ;;  %v5577_v63 = vmul.f32 %v11282_v5, %v11500_v53 }
 0x8a3   :  { %v3647_v23 = vpack.c.bf16 %v3601_v14, %v3599_v17 }
 0x8a4   :  { %5638 = vadd.xlane.f32.xlu0 %v5637_v25  ;;  %13615 = vst [vmem:[#allocation73_spill] sm:$0xff] %v11494_v39  ;;  %v8170_v25 = vpop.eup %8169  ;;  %v5580_v17 = vmul.f32 %v11282_v5, %v11494_v39 }
 0x8a5   :  { %5653 = vadd.xlane.f32.xlu1 %v5652_v48  ;;  %v8172_v61 = vpop.eup %8171  ;;  %v3603_v48 = vmul.f32 %v8166_v6, %v11119_v20  ;;  %v3513_v54 = vpop.xlane.xlu1 %3512  ;;  %v13621_v20 = vld [vmem:[#allocation8_spill] sm:$0xff] }
 0x8a6   :  { %3808 = vmatmul.mubr.bf16.gmra.mrb[224].mxu1 %v3647_v23  ;;  %v7054_v29 = vpop.f32.mrb[140].mxu1  ;;  %v3608_v23 = vmul.f32 %v8170_v25, %v11146_v59  ;;  %v3610_v6 = vmul.f32 %v8172_v61, %v13621_v20  ;;  %8177 = vrcp.f32 %v3513_v54  ;;  %v5664_v59 = vsel %vm267_vm0, %v5580_v17, 0.0 }
 0x8a7   :  { %3815 = vmatprep.mubr.bf16.mxu1 %v3650_v62  ;;  %v7055_v9 = vpop.f32.mrb[141].mxu1  ;;  %v13618_v62 = vld [vmem:[#allocation35_spill] sm:$0xff]  ;;  %8179 = vrcp.f32 %v3516_v42  ;;  %v3607_v54 = vmul.f32 %v8170_v25, %v11143_v15 }
 0x8a8   :  { %5644 = vadd.xlane.f32.xlu0 %v5643_v36  ;;  %v11507_v56 = vadd.f32 %v7055_v9, %v7054_v29  ;;  %v7057_v14 = vpop.f32.mrb[142].mxu1  ;;  %v11516_v36 = vadd.f32 %v11268_v28, %v13618_v62  ;;  %v5649_v29 = vsel %vm267_vm0, %v5575_v40, 0.0  ;;  %v13620_v9 = vld [vmem:[#allocation42_spill] sm:$0xff]  ;;  %v3652_v28 = vpack.c.bf16 %v3610_v6, %v3608_v23 }
 0x8a9   :  { %5659 = vadd.xlane.f32.xlu1 %v5658_v43  ;;  %v7058_v57 = vpop.f32.mrb[143].mxu1  ;;  %v3605_v58 = vmul.f32 %v8168_v2, %v13620_v9  ;;  %v5655_v2 = vsel %vm267_vm0, %v5577_v63, 0.0  ;;  %v3522_v9 = vpop.xlane.xlu0 %3521 }
 0x8aa   :  { %13619 = vst [vmem:[#allocation59_spill] sm:$0xff] %v11516_v36  ;;  %v11518_v1 = vadd.f32 %v7058_v57, %v7057_v14  ;;  %v8174_v62 = vpop.eup %8173  ;;  %v5579_v14 = vmul.f32 %v11282_v5, %v11516_v36 }
 0x8ab   :  { %v3649_v53 = vpack.c.bf16 %v3605_v58, %v3603_v48  ;;  %v8176_v40 = vpop.eup %8175  ;;  %v13622_v48 = vld [vmem:[#allocation45_spill] sm:$0xff]  ;;  %v3611_v15 = vmul.f32 %v8174_v62, %v11130_v27 }
 0x8ac   :  { %5650 = vadd.xlane.f32.xlu0 %v5649_v29  ;;  %v3612_v29 = vmul.f32 %v8174_v62, %v11151_v30  ;;  %v5661_v17 = vsel %vm267_vm0, %v5579_v14, 0.0  ;;  %v3609_v23 = vmul.f32 %v8172_v61, %v13622_v48  ;;  %v3614_v5 = vmul.f32 %v8176_v40, %v11091_v19  ;;  %v13623_v48 = vld [vmem:[#allocation132_spill] sm:$0xff] }
 0x8ad   :  { %5665 = vadd.xlane.f32.xlu1 %v5664_v59  ;;  %v3519_v57 = vpop.xlane.xlu1 %3518  ;;  %v3613_v20 = vmul.f32 %v8176_v40, %v11087_v33  ;;  %v3528_v61 = vpop.xlane.xlu0 %3527 }
 0x8ae   :  { %3816 = vmatmul.mubr.bf16.gmra.mrb[228].mxu1 %v3649_v53  ;;  %8181 = vrcp.f32 %v3519_v57  ;;  %v3651_v42 = vpack.c.bf16 %v3609_v23, %v3607_v54  ;;  %v3654_v53 = vpack.c.bf16 %v3614_v5, %v3612_v29 }
 0x8af   :  { %3823 = vmatprep.mubr.bf16.mxu1 %v3652_v28  ;;  %8183 = vrcp.f32 %v3522_v9  ;;  %v3653_v19 = vpack.c.bf16 %v3613_v20, %v3611_v15  ;;  %v7797_v28 = vld [vmem:[%s12866_s11 + $0x8] sm:$0xff]  }
 0x8b0   :  { %5656 = vadd.xlane.f32.xlu0 %v5655_v2  ;;  %v8178_v63 = vpop.eup %8177  ;;  %7524 = vmatprep.subr.bf16.mxu0 %v7797_v28 }
 0x8b1   :  { %v8180_v58 = vpop.eup %8179  ;;  %v3616_v30 = vmul.f32 %v8178_v63, %v11176_v13  ;;  %v3615_v13 = vmul.f32 %v8178_v63, %v11174_v60  ;;  %7525 = vmatpush3.bf16.msra.mxu0 %v7797_v28 }
 0x8b2   :  { %v3618_v6 = vmul.f32 %v8180_v58, %v11113_v49  ;;  %v3617_v49 = vmul.f32 %v8180_v58, %v11110_v52  ;;  %v13624_v52 = vld [vmem:[#allocation131_spill] sm:$0xff] }
 0x8b4   :  { %5662 = vadd.xlane.f32.xlu0 %v5661_v17  ;;  %v3656_v59 = vpack.c.bf16 %v3618_v6, %v3616_v30  ;;  %v3655_v2 = vpack.c.bf16 %v3617_v49, %v3615_v13 }
 0x8b5   :  { %v3525_v25 = vpop.xlane.xlu1 %3524 }
 0x8b6   :  { %3824 = vmatmul.mubr.bf16.gmra.mrb[232].mxu1 %v3651_v42  ;;  %8185 = vrcp.f32 %v3525_v25 }
 0x8b7   :  { %3831 = vmatprep.mubr.bf16.mxu1 %v3654_v53  ;;  %8187 = vrcp.f32 %v3528_v61  ;;  %v13625_v53 = vld [vmem:[#allocation129_spill] sm:$0xff] }
 0x8b8   :  { %v8182_v14 = vpop.eup %8181 }
 0x8b9   :  { %v8184_v27 = vpop.eup %8183  ;;  %v3620_v33 = vmul.f32 %v8182_v14, %v11193_v3  ;;  %v3619_v29 = vmul.f32 %v8182_v14, %v11191_v8 }
 0x8ba   :  { %v3622_v62 = vmul.f32 %v8184_v27, %v11136_v7  ;;  %v3621_v23 = vmul.f32 %v8184_v27, %v13623_v48 }
 0x8bc   :  { %v3658_v40 = vpack.c.bf16 %v3622_v62, %v3620_v33  ;;  %v3657_v9 = vpack.c.bf16 %v3621_v23, %v3619_v29 }
 0x8be   :  { %3832 = vmatmul.mubr.bf16.gmra.mrb[236].mxu1 %v3653_v19 }
 0x8bf   :  { %3839 = vmatprep.mubr.bf16.mxu1 %v3656_v59 }
 0x8c0   :  { %v8186_v54 = vpop.eup %8185 }
 0x8c1   :  { %v8188_v57 = vpop.eup %8187  ;;  %v3624_v17 = vmul.f32 %v8186_v54, %v11208_v34  ;;  %v3623_v7 = vmul.f32 %v8186_v54, %v13624_v52 }
 0x8c2   :  { %v3626_v60 = vmul.f32 %v8188_v57, %v11159_v55  ;;  %v3625_v63 = vmul.f32 %v8188_v57, %v13625_v53 }
 0x8c4   :  { %v3660_v3 = vpack.c.bf16 %v3626_v60, %v3624_v17  ;;  %v3659_v25 = vpack.c.bf16 %v3625_v63, %v3623_v7 }
 0x8c6   :  { %3840 = vmatmul.mubr.bf16.gmra.mrb[240].mxu1 %v3655_v2 }
 0x8c7   :  { %3847 = vmatprep.mubr.bf16.mxu1 %v3658_v40 }
 0x8ce   :  { %3848 = vmatmul.mubr.bf16.gmra.mrb[244].mxu1 %v3657_v9 }
 0x8cf   :  { %3855 = vmatprep.mubr.bf16.mxu1 %v3660_v3 }
 0x8d1   :  { %v7060_v5 = vpop.f32.mrb[144].mxu1 }
 0x8d2   :  { %v7061_v42 = vpop.f32.mrb[145].mxu1 }
 0x8d3   :  { %v11551_v58 = vadd.f32 %v7061_v42, %v7060_v5  ;;  %v7063_v15 = vpop.f32.mrb[146].mxu1 }
 0x8d4   :  { %v7064_v8 = vpop.f32.mrb[147].mxu1 }
 0x8d5   :  { %v11553_v34 = vadd.f32 %v7064_v8, %v7063_v15 }
 0x8d6   :  { %3856 = vmatmul.mubr.bf16.gmra.mrb[248].mxu1 %v3659_v25 }
 0x8d9   :  { %v7066_v30 = vpop.f32.mrb[148].mxu1 }
 0x8da   :  { %v7067_v20 = vpop.f32.mrb[149].mxu1 }
 0x8db   :  { %v11557_v61 = vadd.f32 %v7067_v20, %v7066_v30  ;;  %v7069_v6 = vpop.f32.mrb[150].mxu1 }
 0x8dc   :  { %v7070_v19 = vpop.f32.mrb[151].mxu1 }
 0x8dd   :  { %v11559_v59 = vadd.f32 %v7070_v19, %v7069_v6 }
 0x8e1   :  { %v7072_v14 = vpop.f32.mrb[152].mxu1 }
 0x8e2   :  { %v7073_v27 = vpop.f32.mrb[153].mxu1 }
 0x8e3   :  { %v11563_v13 = vadd.f32 %v7073_v27, %v7072_v14  ;;  %v7075_v33 = vpop.f32.mrb[154].mxu1 }
 0x8e4   :  { %v7076_v49 = vpop.f32.mrb[155].mxu1 }
 0x8e5   :  { %v11565_v62 = vadd.f32 %v7076_v49, %v7075_v33 }
 0x8e9   :  { %v7078_v40 = vpop.f32.mrb[156].mxu1 }
 0x8ea   :  { %v7079_v54 = vpop.f32.mrb[157].mxu1 }
 0x8eb   :  { %v11569_v57 = vadd.f32 %v7079_v54, %v7078_v40  ;;  %v7081_v29 = vpop.f32.mrb[158].mxu1 }
 0x8ec   :  { %v7082_v17 = vpop.f32.mrb[159].mxu1 }
 0x8ed   :  { %v11571_v48 = vadd.f32 %v7082_v17, %v7081_v29 }
 0x8f1   :  { %v7084_v60 = vpop.f32.mrb[160].mxu1 }
 0x8f2   :  { %v7085_v9 = vpop.f32.mrb[161].mxu1 }
 0x8f3   :  { %v11575_v3 = vadd.f32 %v7085_v9, %v7084_v60  ;;  %v7087_v52 = vpop.f32.mrb[162].mxu1 }
 0x8f4   :  { %v7088_v7 = vpop.f32.mrb[163].mxu1 }
 0x8f5   :  { %v11577_v5 = vadd.f32 %v7088_v7, %v7087_v52 }
 0x8f9   :  { %v7090_v53 = vpop.f32.mrb[164].mxu1 }
 0x8fa   :  { %v7091_v63 = vpop.f32.mrb[165].mxu1 }
 0x8fb   :  { %v11581_v15 = vadd.f32 %v7091_v63, %v7090_v53  ;;  %v7093_v8 = vpop.f32.mrb[166].mxu1 }
 0x8fc   :  { %v7094_v25 = vpop.f32.mrb[167].mxu1 }
 0x8fd   :  { %v11583_v30 = vadd.f32 %v7094_v25, %v7093_v8 }
 0x901   :  { %v7096_v6 = vpop.f32.mrb[168].mxu1 }
 0x902   :  { %v7097_v19 = vpop.f32.mrb[169].mxu1  ;;  %v3531_v54 = vpop.xlane.xlu1 %3530 }
 0x903   :  { %v11587_v14 = vadd.f32 %v7097_v19, %v7096_v6  ;;  %v7099_v27 = vpop.f32.mrb[170].mxu1  ;;  %8189 = vrcp.f32 %v3531_v54 }
 0x904   :  { %v7100_v33 = vpop.f32.mrb[171].mxu1 }
 0x905   :  { %v11589_v49 = vadd.f32 %v7100_v33, %v7099_v27 }
 0x909   :  { %v7102_v29 = vpop.f32.mrb[172].mxu1 }
 0x90a   :  { %v7103_v17 = vpop.f32.mrb[173].mxu1 }
 0x90b   :  { %v11593_v60 = vadd.f32 %v7103_v17, %v7102_v29  ;;  %v7105_v9 = vpop.f32.mrb[174].mxu1 }
 0x90c   :  { %v7106_v52 = vpop.f32.mrb[175].mxu1 }
 0x90d   :  { %v3534_v7 = vpop.xlane.xlu0 %3533  ;;  %v11595_v53 = vadd.f32 %v7106_v52, %v7105_v9  ;;  %v8190_v33 = vpop.eup %8189 }
 0x90e   :  { %8191 = vrcp.f32 %v3534_v7  ;;  %v3628_v17 = vmul.f32 %v8190_v33, %v11284_v18  ;;  %v3627_v52 = vmul.f32 %v8190_v33, %v11277_v22 }
 0x912   :  { %v7108_v8 = vpop.f32.mrb[176].mxu1 }
 0x913   :  { %v7109_v25 = vpop.f32.mrb[177].mxu1 }
 0x914   :  { %v11599_v6 = vadd.f32 %v7109_v25, %v7108_v8  ;;  %v7111_v19 = vpop.f32.mrb[178].mxu1 }
 0x915   :  { %v7112_v27 = vpop.f32.mrb[179].mxu1 }
 0x916   :  { %v11601_v40 = vadd.f32 %v7112_v27, %v7111_v19 }
 0x918   :  { %v8192_v54 = vpop.eup %8191 }
 0x919   :  { %v3630_v9 = vmul.f32 %v8192_v54, %v11308_v16  ;;  %v3629_v7 = vmul.f32 %v8192_v54, %v11306_v35 }
 0x91a   :  { %v7114_v63 = vpop.f32.mrb[180].mxu1 }
 0x91b   :  { %v7115_v8 = vpop.f32.mrb[181].mxu1  ;;  %v3662_v25 = vpack.c.bf16 %v3630_v9, %v3628_v17  ;;  %v3661_v20 = vpack.c.bf16 %v3629_v7, %v3627_v52 }
 0x91c   :  { %v11609_v42 = vadd.f32 %v7115_v8, %v7114_v63  ;;  %v7117_v19 = vpop.f32.mrb[182].mxu1 }
 0x91d   :  { %v7118_v27 = vpop.f32.mrb[183].mxu1  ;;  %3863 = vmatprep.mubr.bf16.mxu1 %v3662_v25 }
 0x91e   :  { %v11611_v23 = vadd.f32 %v7118_v27, %v7117_v19  ;;  %3864 = vmatmul.mubr.bf16.gmra.mrb[252].mxu1 %v3661_v20  ;;  %v7798_v19 = vld [vmem:[%s12866_s11] sm:$0xff]  }
 0x91f   :  { %7558 = vmatprep.subr.bf16.mxu0 %v7798_v19 }
 0x922   :  { %v7120_v16 = vpop.f32.mrb[184].mxu1 }
 0x923   :  { %v7121_v29 = vpop.f32.mrb[185].mxu1 }
 0x924   :  { %v11615_v22 = vadd.f32 %v7121_v29, %v7120_v16  ;;  %v7123_v35 = vpop.f32.mrb[186].mxu1 }
 0x925   :  { %v7124_v33 = vpop.f32.mrb[187].mxu1 }
 0x926   :  { %v11617_v54 = vadd.f32 %v7124_v33, %v7123_v35 }
 0x92a   :  { %v7126_v17 = vpop.f32.mrb[188].mxu1 }
 0x92b   :  { %v7127_v9 = vpop.f32.mrb[189].mxu1 }
 0x92c   :  { %v11621_v52 = vadd.f32 %v7127_v9, %v7126_v17  ;;  %v7129_v7 = vpop.f32.mrb[190].mxu1 }
 0x92d   :  { %v7130_v20 = vpop.f32.mrb[191].mxu1 }
 0x92e   :  { %v11623_v8 = vadd.f32 %v7130_v20, %v7129_v7 }
 0x932   :  { %v7196_v29 = vpop.f32.mrb[192].mxu1 }
 0x933   :  { %v7197_v27 = vpop.f32.mrb[193].mxu1 }
 0x934   :  { %v7198_v16 = vadd.f32 %v7197_v27, %v7196_v29  ;;  %v7199_v35 = vpop.f32.mrb[194].mxu1 }
 0x935   :  { %v7200_v33 = vpop.f32.mrb[195].mxu1 }
 0x936   :  { %v7201_v63 = vadd.f32 %v7200_v33, %v7199_v35 }
 0x938   :  { %v3872_v17 = vpack.c.bf16 %v7201_v63, %v7198_v16 }
 0x93a   :  { %v7202_v9 = vpop.f32.mrb[196].mxu1  ;;  %7526 = vmatprep.mubr.msk.bf16.mxu0 %vm1771_vm1, %v3872_v17 }
 0x93b   :  { %v7203_v7 = vpop.f32.mrb[197].mxu1 }
 0x93c   :  { %v7204_v20 = vadd.f32 %v7203_v7, %v7202_v9  ;;  %v7205_v18 = vpop.f32.mrb[198].mxu1 }
 0x93d   :  { %v7206_v2 = vpop.f32.mrb[199].mxu1 }
 0x93e   :  { %v7207_v25 = vadd.f32 %v7206_v2, %v7205_v18 }
 0x940   :  { %v3873_v28 = vpack.c.bf16 %v7207_v25, %v7204_v20 }
 0x942   :  { %v7208_v55 = vpop.f32.mrb[200].mxu1  ;;  %7527 = vmatmul.mubr.msk.bf16.vlgmr.msra.gmra.mrb[0].mxu0 %vm1771_vm1, %v3873_v28 }
 0x943   :  { %v7209_v43 = vpop.f32.mrb[201].mxu1  ;;  %7559 = vmatpush3.bf16.msra.mxu0 %v7798_v19 }
 0x944   :  { %v7210_v29 = vadd.f32 %v7209_v43, %v7208_v55  ;;  %v7211_v27 = vpop.f32.mrb[202].mxu1 }
 0x945   :  { %v7212_v36 = vpop.f32.mrb[203].mxu1 }
 0x946   :  { %v7213_v39 = vadd.f32 %v7212_v36, %v7211_v27 }
 0x948   :  { %v3874_v35 = vpack.c.bf16 %v7213_v39, %v7210_v29 }
 0x94a   :  { %v7214_v63 = vpop.f32.mrb[204].mxu1  ;;  %7530 = vmatprep.mubr.msk.bf16.mxu0 %vm1771_vm1, %v3874_v35 }
 0x94b   :  { %v7215_v16 = vpop.f32.mrb[205].mxu1 }
 0x94c   :  { %v7216_v33 = vadd.f32 %v7215_v16, %v7214_v63  ;;  %v7217_v17 = vpop.f32.mrb[206].mxu1 }
 0x94d   :  { %v7218_v9 = vpop.f32.mrb[207].mxu1 }
 0x94e   :  { %v7219_v7 = vadd.f32 %v7218_v9, %v7217_v17 }
 0x950   :  { %v3875_v2 = vpack.c.bf16 %v7219_v7, %v7216_v33 }
 0x952   :  { %7531 = vmatmul.mubr.msk.bf16.gmra.mrb[4].mxu0 %vm1771_vm1, %v3875_v2 }
 0x959   :  { %v7220_v18 = vpop.f32.mrb[208].mxu1 }
 0x95a   :  { %v7221_v28 = vpop.f32.mrb[209].mxu1 }
 0x95b   :  { %v7222_v25 = vadd.f32 %v7221_v28, %v7220_v18  ;;  %v7223_v19 = vpop.f32.mrb[210].mxu1 }
 0x95c   :  { %v7224_v43 = vpop.f32.mrb[211].mxu1 }
 0x95d   :  { %v7225_v55 = vadd.f32 %v7224_v43, %v7223_v19 }
 0x95f   :  { %v3876_v20 = vpack.c.bf16 %v7225_v55, %v7222_v25 }
 0x961   :  { %v7226_v36 = vpop.f32.mrb[212].mxu1  ;;  %7534 = vmatprep.mubr.msk.bf16.mxu0 %vm1771_vm1, %v3876_v20 }
 0x962   :  { %v7227_v39 = vpop.f32.mrb[213].mxu1 }
 0x963   :  { %v7228_v29 = vadd.f32 %v7227_v39, %v7226_v36  ;;  %v7229_v27 = vpop.f32.mrb[214].mxu1 }
 0x964   :  { %v7230_v35 = vpop.f32.mrb[215].mxu1 }
 0x965   :  { %v7231_v63 = vadd.f32 %v7230_v35, %v7229_v27 }
 0x967   :  { %v3877_v16 = vpack.c.bf16 %v7231_v63, %v7228_v29 }
 0x969   :  { %v7232_v17 = vpop.f32.mrb[216].mxu1  ;;  %7535 = vmatmul.mubr.msk.bf16.gmra.mrb[8].mxu0 %vm1771_vm1, %v3877_v16 }
 0x96a   :  { %v7233_v33 = vpop.f32.mrb[217].mxu1 }
 0x96b   :  { %v7234_v9 = vadd.f32 %v7233_v33, %v7232_v17  ;;  %v7235_v7 = vpop.f32.mrb[218].mxu1 }
 0x96c   :  { %v7236_v2 = vpop.f32.mrb[219].mxu1 }
 0x96d   :  { %v7237_v18 = vadd.f32 %v7236_v2, %v7235_v7 }
 0x96f   :  { %v3878_v28 = vpack.c.bf16 %v7237_v18, %v7234_v9 }
 0x971   :  { %v7238_v19 = vpop.f32.mrb[220].mxu1  ;;  %7538 = vmatprep.mubr.msk.bf16.mxu0 %vm1771_vm1, %v3878_v28 }
 0x972   :  { %v7239_v25 = vpop.f32.mrb[221].mxu1 }
 0x973   :  { %v7240_v43 = vadd.f32 %v7239_v25, %v7238_v19  ;;  %v7241_v55 = vpop.f32.mrb[222].mxu1 }
 0x974   :  { %v7242_v20 = vpop.f32.mrb[223].mxu1 }
 0x975   :  { %v7243_v36 = vadd.f32 %v7242_v20, %v7241_v55 }
 0x977   :  { %v3879_v39 = vpack.c.bf16 %v7243_v36, %v7240_v43 }
 0x979   :  { %v7244_v27 = vpop.f32.mrb[224].mxu1  ;;  %7539 = vmatmul.mubr.msk.bf16.gmra.mrb[12].mxu0 %vm1771_vm1, %v3879_v39 }
 0x97a   :  { %v7245_v29 = vpop.f32.mrb[225].mxu1 }
 0x97b   :  { %v7246_v35 = vadd.f32 %v7245_v29, %v7244_v27  ;;  %v7247_v63 = vpop.f32.mrb[226].mxu1 }
 0x97c   :  { %v7248_v16 = vpop.f32.mrb[227].mxu1 }
 0x97d   :  { %v7249_v17 = vadd.f32 %v7248_v16, %v7247_v63 }
 0x97f   :  { %v3880_v33 = vpack.c.bf16 %v7249_v17, %v7246_v35 }
 0x981   :  { %v7250_v7 = vpop.f32.mrb[228].mxu1  ;;  %7542 = vmatprep.mubr.msk.bf16.mxu0 %vm1771_vm1, %v3880_v33 }
 0x982   :  { %v7251_v9 = vpop.f32.mrb[229].mxu1 }
 0x983   :  { %v7252_v2 = vadd.f32 %v7251_v9, %v7250_v7  ;;  %v7253_v18 = vpop.f32.mrb[230].mxu1 }
 0x984   :  { %v7254_v28 = vpop.f32.mrb[231].mxu1 }
 0x985   :  { %v7255_v19 = vadd.f32 %v7254_v28, %v7253_v18 }
 0x987   :  { %v3881_v25 = vpack.c.bf16 %v7255_v19, %v7252_v2 }
 0x989   :  { %v7256_v55 = vpop.f32.mrb[232].mxu1  ;;  %7543 = vmatmul.mubr.msk.bf16.gmra.mrb[16].mxu0 %vm1771_vm1, %v3881_v25 }
 0x98a   :  { %v7257_v43 = vpop.f32.mrb[233].mxu1 }
 0x98b   :  { %v7258_v20 = vadd.f32 %v7257_v43, %v7256_v55  ;;  %v7259_v36 = vpop.f32.mrb[234].mxu1 }
 0x98c   :  { %v7260_v39 = vpop.f32.mrb[235].mxu1 }
 0x98d   :  { %v7261_v27 = vadd.f32 %v7260_v39, %v7259_v36 }
 0x98f   :  { %v3882_v29 = vpack.c.bf16 %v7261_v27, %v7258_v20 }
 0x991   :  { %v7262_v63 = vpop.f32.mrb[236].mxu1  ;;  %7546 = vmatprep.mubr.msk.bf16.mxu0 %vm1771_vm1, %v3882_v29 }
 0x992   :  { %v7263_v35 = vpop.f32.mrb[237].mxu1 }
 0x993   :  { %v7264_v16 = vadd.f32 %v7263_v35, %v7262_v63  ;;  %v7265_v17 = vpop.f32.mrb[238].mxu1 }
 0x994   :  { %v7266_v33 = vpop.f32.mrb[239].mxu1 }
 0x995   :  { %v7267_v7 = vadd.f32 %v7266_v33, %v7265_v17 }
 0x997   :  { %v3883_v9 = vpack.c.bf16 %v7267_v7, %v7264_v16 }
 0x999   :  { %v7268_v18 = vpop.f32.mrb[240].mxu1  ;;  %7547 = vmatmul.mubr.msk.bf16.gmra.mrb[20].mxu0 %vm1771_vm1, %v3883_v9 }
 0x99a   :  { %v7269_v2 = vpop.f32.mrb[241].mxu1 }
 0x99b   :  { %v7270_v28 = vadd.f32 %v7269_v2, %v7268_v18  ;;  %v7271_v19 = vpop.f32.mrb[242].mxu1 }
 0x99c   :  { %v7272_v25 = vpop.f32.mrb[243].mxu1 }
 0x99d   :  { %v7273_v55 = vadd.f32 %v7272_v25, %v7271_v19  ;;  %v7800_v19 = vld [vmem:[%s12868_s13 + $0x8] sm:$0xff]  }
 0x99f   :  { %v3884_v43 = vpack.c.bf16 %v7273_v55, %v7270_v28  ;;  %v7799_v28 = vld [vmem:[%s12868_s13] sm:$0xff]  }
 0x9a0   :  { %7592 = vmatprep.subr.bf16.mxu1 %v7799_v28 }
 0x9a1   :  { %v7274_v36 = vpop.f32.mrb[244].mxu1  ;;  %7550 = vmatprep.mubr.msk.bf16.mxu0 %vm1771_vm1, %v3884_v43  ;;  %7593 = vmatpush3.bf16.msra.mxu1 %v7799_v28 }
 0x9a2   :  { %v7275_v20 = vpop.f32.mrb[245].mxu1  ;;  %7594 = vmatprep.subr.bf16.mxu1 %v7800_v19 }
 0x9a3   :  { %v7276_v39 = vadd.f32 %v7275_v20, %v7274_v36  ;;  %v7277_v27 = vpop.f32.mrb[246].mxu1 }
 0x9a4   :  { %v7278_v29 = vpop.f32.mrb[247].mxu1 }
 0x9a5   :  { %v7279_v63 = vadd.f32 %v7278_v29, %v7277_v27  ;;  %7595 = vmatpush3.bf16.msra.mxu1 %v7800_v19  ;;  %v13626_v29 = vpack.c.bf16 %v11361_v24, %v11349_v0  ;;  %v13630_v0 = vpack.c.bf16 %v11553_v34, %v11551_v58  ;;  %v13631_v24 = vpack.c.bf16 %v11559_v59, %v11557_v61 }
 0x9a6   :  { %v13638_v58 = vpack.c.bf16 %v11601_v40, %v11599_v6  ;;  %v13639_v34 = vpack.c.bf16 %v11611_v23, %v11609_v42  ;;  %v13640_v61 = vpack.c.bf16 %v11617_v54, %v11615_v22  ;;  %v13641_v59 = vpack.c.bf16 %v11623_v8, %v11621_v52  ;;  %v7802_v40 = vld [vmem:[%s12870_s15 + $0x8] sm:$0xff]   ;;  %v7803_v52 = vld [vmem:[%s12870_s15 + $0x10] sm:$0xff]  }
 0x9a7   :  { %v3885_v35 = vpack.c.bf16 %v7279_v63, %v7276_v39  ;;  %v13627_v63 = vpack.c.bf16 %v11414_v38, %v11403_v11  ;;  %v13632_v11 = vpack.c.bf16 %v11565_v62, %v11563_v13  ;;  %v13633_v38 = vpack.c.bf16 %v11571_v48, %v11569_v57  ;;  %v7801_v13 = vld [vmem:[%s12870_s15] sm:$0xff]  }
 0x9a8   :  { %7628 = vmatprep.subr.bf16.mxu1 %v7801_v13  ;;  %v11722_v57 = vld [vmem:[%s12867_s12] ss:$0 sm:$0xff] }
 0x9a9   :  { %v7280_v17 = vpop.f32.mrb[248].mxu1  ;;  %7551 = vmatmul.mubr.msk.bf16.gmra.mrb[24].mxu0 %vm1771_vm1, %v3885_v35  ;;  %v13628_v35 = vpack.c.bf16 %v11469_v32, %v11460_v51  ;;  %v13634_v51 = vpack.c.bf16 %v11577_v5, %v11575_v3  ;;  %v13635_v32 = vpack.c.bf16 %v11583_v30, %v11581_v15 }
 0x9aa   :  { %v7281_v16 = vpop.f32.mrb[249].mxu1 }
 0x9ab   :  { %v7282_v33 = vadd.f32 %v7281_v16, %v7280_v17  ;;  %v7283_v7 = vpop.f32.mrb[250].mxu1  ;;  %v13629_v17 = vpack.c.bf16 %v11518_v1, %v11507_v56  ;;  %v13636_v1 = vpack.c.bf16 %v11589_v49, %v11587_v14  ;;  %v13637_v56 = vpack.c.bf16 %v11595_v53, %v11593_v60 }
 0x9ac   :  { %v7284_v9 = vpop.f32.mrb[251].mxu1 }
 0x9ad   :  { %v7285_v18 = vadd.f32 %v7284_v9, %v7283_v7 }
 0x9af   :  { %v3886_v2 = vpack.c.bf16 %v7285_v18, %v7282_v33  ;;  %v7804_v18 = vld [vmem:[%s12870_s15 + $0x18] sm:$0xff]  }
 0x9b1   :  { %7554 = vmatprep.mubr.msk.bf16.mxu0 %vm1771_vm1, %v3886_v2 }
 0x9f1   :  { %v7286_v25 = vpop.f32.mrb[252].mxu1 }
 0x9f2   :  { %v7287_v55 = vpop.f32.mrb[253].mxu1 }
 0x9f3   :  { %v7288_v43 = vadd.f32 %v7287_v55, %v7286_v25  ;;  %v7289_v36 = vpop.f32.mrb[254].mxu1 }
 0x9f4   :  { %v7290_v20 = vpop.f32.mrb[255].mxu1 }
 0x9f5   :  { %v7291_v39 = vadd.f32 %v7290_v20, %v7289_v36 }
 0x9f7   :  { %v3887_v27 = vpack.c.bf16 %v7291_v39, %v7288_v43  ;;  %v7805_v43 = vld [vmem:[%s12870_s15 + $0x20] sm:$0xff]  }
 0x9f9   :  { %7555 = vmatmul.mubr.msk.bf16.gmra.mrb[28].mxu0 %vm1771_vm1, %v3887_v27 }
 0x9fa   :  { %7560 = vmatprep.mubr.msk.bf16.mxu0 %vm1771_vm1, %v13626_v29 }
 0xa01   :  { %7561 = vmatmul.mubr.msk.bf16.vlgmr.msra.gmra.mrb[0].mxu0 %vm1771_vm1, %v13627_v63  ;;  %v7806_v63 = vld [vmem:[%s12870_s15 + $0x28] sm:$0xff]  }
 0xa02   :  { %7564 = vmatprep.mubr.msk.bf16.mxu0 %vm1771_vm1, %v13628_v35 }
 0xa09   :  { %7565 = vmatmul.mubr.msk.bf16.gmra.mrb[4].mxu0 %vm1771_vm1, %v13629_v17 }
 0xa0a   :  { %7568 = vmatprep.mubr.msk.bf16.mxu0 %vm1771_vm1, %v13630_v0 }
 0xa11   :  { %7569 = vmatmul.mubr.msk.bf16.gmra.mrb[8].mxu0 %vm1771_vm1, %v13631_v24 }
 0xa12   :  { %7572 = vmatprep.mubr.msk.bf16.mxu0 %vm1771_vm1, %v13632_v11 }
 0xa19   :  { %7573 = vmatmul.mubr.msk.bf16.gmra.mrb[12].mxu0 %vm1771_vm1, %v13633_v38 }
 0xa1a   :  { %7576 = vmatprep.mubr.msk.bf16.mxu0 %vm1771_vm1, %v13634_v51 }
 0xa21   :  { %7577 = vmatmul.mubr.msk.bf16.gmra.mrb[16].mxu0 %vm1771_vm1, %v13635_v32 }
 0xa22   :  { %7580 = vmatprep.mubr.msk.bf16.mxu0 %vm1771_vm1, %v13636_v1 }
 0xa29   :  { %7581 = vmatmul.mubr.msk.bf16.gmra.mrb[20].mxu0 %vm1771_vm1, %v13637_v56 }
 0xa2a   :  { %7584 = vmatprep.mubr.msk.bf16.mxu0 %vm1771_vm1, %v13638_v58 }
 0xa31   :  { %7585 = vmatmul.mubr.msk.bf16.gmra.mrb[24].mxu0 %vm1771_vm1, %v13639_v34 }
 0xa32   :  { %7588 = vmatprep.mubr.msk.bf16.mxu0 %vm1771_vm1, %v13640_v61 }
 0xa39   :  { %7589 = vmatmul.mubr.msk.bf16.gmra.mrb[28].mxu0 %vm1771_vm1, %v13641_v59 }
 0xad4   :  { %v7562_v62 = vpop.f32.mrb[0].mxu0 }
 0xad5   :  { %v4191_v48 = vpop.f32.mrb[1].mxu0  ;;  %v11734_v30 = vadd.f32 %v7562_v62, %v11722_v57 }
 0xad6   :  { %v7563_v23 = vpop.f32.mrb[2].mxu0  ;;  %v11728_v42 = vadd.f32 %v11722_v57, %v4191_v48 }
 0xad7   :  { %v11725_v3 = vadd.f32 %v7563_v23, %v11722_v57  ;;  %v4194_v5 = vpop.f32.mrb[3].mxu0 }
 0xad8   :  { %v11731_v15 = vadd.f32 %v11722_v57, %v4194_v5 }
 0xad9   :  { %v4358_v49 = vpack.c.bf16 %v11725_v3, %v11734_v30 }
 0xada   :  { %v4357_v14 = vpack.c.bf16 %v11731_v15, %v11728_v42 }
 0xadc   :  { %v7566_v60 = vpop.f32.mrb[4].mxu0  ;;  %7596 = vmatprep.mubr.msk.bf16.mxu1 %vm267_vm0, %v4357_v14 }
 0xadd   :  { %v4207_v53 = vpop.f32.mrb[5].mxu0  ;;  %7597 = vmatmul.mubr.msk.bf16.vlgmr.msra.gmra.mrb[0].mxu1 %vm267_vm0, %v4358_v49  ;;  %v11758_v33 = vadd.f32 %v7566_v60, %v11722_v57 }
 0xade   :  { %v7567_v6 = vpop.f32.mrb[6].mxu0  ;;  %7629 = vmatpush3.bf16.msra.mxu1 %v7801_v13  ;;  %v11752_v8 = vadd.f32 %v11722_v57, %v4207_v53 }
 0xadf   :  { %v11746_v22 = vadd.f32 %v7567_v6, %v11722_v57  ;;  %v4210_v54 = vpop.f32.mrb[7].mxu0  ;;  %7630 = vmatprep.subr.bf16.mxu1 %v7802_v40 }
 0xae0   :  { %v11755_v16 = vadd.f32 %v11722_v57, %v4210_v54 }
 0xae1   :  { %v4360_v9 = vpack.c.bf16 %v11746_v22, %v11758_v33 }
 0xae2   :  { %v4359_v7 = vpack.c.bf16 %v11755_v16, %v11752_v8  ;;  %7631 = vmatpush3.bf16.msra.mxu1 %v7802_v40 }
 0xae3   :  { %7632 = vmatprep.subr.bf16.mxu1 %v7803_v52 }
 0xae4   :  { %v7570_v2 = vpop.f32.mrb[8].mxu0  ;;  %7600 = vmatprep.mubr.msk.bf16.mxu1 %vm267_vm0, %v4359_v7 }
 0xae5   :  { %v4223_v28 = vpop.f32.mrb[9].mxu0  ;;  %7601 = vmatmul.mubr.msk.bf16.gmra.mrb[4].mxu1 %vm267_vm0, %v4360_v9  ;;  %v11782_v39 = vadd.f32 %v7570_v2, %v11722_v57 }
 0xae6   :  { %v7571_v19 = vpop.f32.mrb[10].mxu0  ;;  %7633 = vmatpush3.bf16.msra.mxu1 %v7803_v52  ;;  %v11776_v36 = vadd.f32 %v11722_v57, %v4223_v28 }
 0xae7   :  { %v11770_v25 = vadd.f32 %v7571_v19, %v11722_v57  ;;  %v4226_v55 = vpop.f32.mrb[11].mxu0  ;;  %7634 = vmatprep.subr.bf16.mxu1 %v7804_v18 }
 0xae8   :  { %v11779_v20 = vadd.f32 %v11722_v57, %v4226_v55 }
 0xae9   :  { %v4362_v29 = vpack.c.bf16 %v11770_v25, %v11782_v39 }
 0xaea   :  { %v4361_v27 = vpack.c.bf16 %v11779_v20, %v11776_v36  ;;  %7635 = vmatpush3.bf16.msra.mxu1 %v7804_v18 }
 0xaeb   :  { %7636 = vmatprep.subr.bf16.mxu1 %v7805_v43 }
 0xaec   :  { %v7574_v35 = vpop.f32.mrb[12].mxu0  ;;  %7604 = vmatprep.mubr.msk.bf16.mxu1 %vm267_vm0, %v4361_v27 }
 0xaed   :  { %v4239_v17 = vpop.f32.mrb[13].mxu0  ;;  %7605 = vmatmul.mubr.msk.bf16.gmra.mrb[8].mxu1 %vm267_vm0, %v4362_v29  ;;  %v11803_v32 = vadd.f32 %v7574_v35, %v11722_v57 }
 0xaee   :  { %v7575_v0 = vpop.f32.mrb[14].mxu0  ;;  %7637 = vmatpush3.bf16.msra.mxu1 %v7805_v43  ;;  %v11797_v38 = vadd.f32 %v11722_v57, %v4239_v17 }
 0xaef   :  { %v11794_v24 = vadd.f32 %v7575_v0, %v11722_v57  ;;  %v4242_v11 = vpop.f32.mrb[15].mxu0  ;;  %7638 = vmatprep.subr.bf16.mxu1 %v7806_v63 }
 0xaf0   :  { %v11800_v51 = vadd.f32 %v11722_v57, %v4242_v11 }
 0xaf1   :  { %v4364_v56 = vpack.c.bf16 %v11794_v24, %v11803_v32 }
 0xaf2   :  { %v4363_v1 = vpack.c.bf16 %v11800_v51, %v11797_v38  ;;  %7639 = vmatpush3.bf16.msra.mxu1 %v7806_v63 }
 0xaf4   :  { %v7578_v58 = vpop.f32.mrb[16].mxu0  ;;  %7608 = vmatprep.mubr.msk.bf16.mxu1 %vm267_vm0, %v4363_v1 }
 0xaf5   :  { %v4255_v34 = vpop.f32.mrb[17].mxu0  ;;  %7609 = vmatmul.mubr.msk.bf16.gmra.mrb[12].mxu1 %vm267_vm0, %v4364_v56  ;;  %v11821_v23 = vadd.f32 %v7578_v58, %v11722_v57 }
 0xaf6   :  { %v7579_v61 = vpop.f32.mrb[18].mxu0  ;;  %v11815_v62 = vadd.f32 %v11722_v57, %v4255_v34 }
 0xaf7   :  { %v11812_v59 = vadd.f32 %v7579_v61, %v11722_v57  ;;  %v4258_v13 = vpop.f32.mrb[19].mxu0 }
 0xaf8   :  { %v11818_v48 = vadd.f32 %v11722_v57, %v4258_v13 }
 0xaf9   :  { %v4366_v14 = vpack.c.bf16 %v11812_v59, %v11821_v23 }
 0xafa   :  { %v4365_v5 = vpack.c.bf16 %v11818_v48, %v11815_v62 }
 0xafc   :  { %v7582_v49 = vpop.f32.mrb[20].mxu0  ;;  %7612 = vmatprep.mubr.msk.bf16.mxu1 %vm267_vm0, %v4365_v5 }
 0xafd   :  { %v4271_v40 = vpop.f32.mrb[21].mxu0  ;;  %7613 = vmatmul.mubr.msk.bf16.gmra.mrb[16].mxu1 %vm267_vm0, %v4366_v14  ;;  %v11839_v7 = vadd.f32 %v7582_v49, %v11722_v57  ;;  %v7807_v49 = vld [vmem:[%s12870_s15 + $0x30] sm:$0xff]  }
 0xafe   :  { %v7583_v60 = vpop.f32.mrb[22].mxu0  ;;  %v11833_v54 = vadd.f32 %v11722_v57, %v4271_v40  ;;  %v7808_v40 = vld [vmem:[%s12870_s15 + $0x38] sm:$0xff]   ;;  %7640 = vmatprep.subr.bf16.mxu1 %v7807_v49 }
 0xaff   :  { %v11830_v53 = vadd.f32 %v7583_v60, %v11722_v57  ;;  %v4274_v6 = vpop.f32.mrb[23].mxu0  ;;  %7641 = vmatpush3.bf16.msra.mxu1 %v7807_v49 }
 0xb00   :  { %v11836_v52 = vadd.f32 %v11722_v57, %v4274_v6  ;;  %7642 = vmatprep.subr.bf16.mxu1 %v7808_v40 }
 0xb01   :  { %v4368_v18 = vpack.c.bf16 %v11830_v53, %v11839_v7 }
 0xb02   :  { %v4367_v9 = vpack.c.bf16 %v11836_v52, %v11833_v54 }
 0xb03   :  { %7643 = vmatpush3.bf16.msra.mxu1 %v7808_v40 }
 0xb04   :  { %v7586_v2 = vpop.f32.mrb[24].mxu0  ;;  %7616 = vmatprep.mubr.msk.bf16.mxu1 %vm267_vm0, %v4367_v9 }
 0xb05   :  { %v4287_v28 = vpop.f32.mrb[25].mxu0  ;;  %7617 = vmatmul.mubr.msk.bf16.gmra.mrb[20].mxu1 %vm267_vm0, %v4368_v18  ;;  %v11857_v63 = vadd.f32 %v7586_v2, %v11722_v57 }
 0xb06   :  { %v7587_v19 = vpop.f32.mrb[26].mxu0  ;;  %v11851_v27 = vadd.f32 %v11722_v57, %v4287_v28 }
 0xb07   :  { %v11848_v55 = vadd.f32 %v7587_v19, %v11722_v57  ;;  %v4290_v43 = vpop.f32.mrb[27].mxu0 }
 0xb08   :  { %v11854_v29 = vadd.f32 %v11722_v57, %v4290_v43 }
 0xb09   :  { %v4370_v17 = vpack.c.bf16 %v11848_v55, %v11857_v63 }
 0xb0a   :  { %v4369_v35 = vpack.c.bf16 %v11854_v29, %v11851_v27 }
 0xb0c   :  { %v7590_v0 = vpop.f32.mrb[28].mxu0  ;;  %7620 = vmatprep.mubr.msk.bf16.mxu1 %vm267_vm0, %v4369_v35 }
 0xb0d   :  { %v4303_v11 = vpop.f32.mrb[29].mxu0  ;;  %7621 = vmatmul.mubr.msk.bf16.gmra.mrb[24].mxu1 %vm267_vm0, %v4370_v17  ;;  %v11875_v13 = vadd.f32 %v7590_v0, %v11722_v57 }
 0xb0e   :  { %v7591_v1 = vpop.f32.mrb[30].mxu0  ;;  %v11869_v34 = vadd.f32 %v11722_v57, %v4303_v11 }
 0xb0f   :  { %v11866_v56 = vadd.f32 %v7591_v1, %v11722_v57  ;;  %v4306_v58 = vpop.f32.mrb[31].mxu0 }
 0xb10   :  { %v11872_v61 = vadd.f32 %v11722_v57, %v4306_v58  ;;  %v11892_v57 = vld [vmem:[%s12869_s14] ss:$0 sm:$0xff] }
 0xb11   :  { %v4372_v14 = vpack.c.bf16 %v11866_v56, %v11875_v13 }
 0xb12   :  { %v4371_v5 = vpack.c.bf16 %v11872_v61, %v11869_v34 }
 0xb14   :  { %7624 = vmatprep.mubr.msk.bf16.mxu1 %vm267_vm0, %v4371_v5 }
 0xb15   :  { %7625 = vmatmul.mubr.msk.bf16.gmra.mrb[28].mxu1 %vm267_vm0, %v4372_v14 }
 0xbb0   :  { %v7598_v60 = vpop.f32.mrb[0].mxu1 }
 0xbb1   :  { %v4487_v6 = vadd.f32 %v7598_v60, %v11892_v57  ;;  %v4478_v9 = vpop.f32.mrb[1].mxu1 }
 0xbb2   :  { %v4479_v18 = vadd.f32 %v11892_v57, %v4478_v9  ;;  %v7599_v2 = vpop.f32.mrb[2].mxu1 }
 0xbb3   :  { %v4490_v28 = vadd.f32 %v7599_v2, %v11892_v57  ;;  %v4481_v19 = vpop.f32.mrb[3].mxu1  ;;  %v4607_v35 = vmax.f32 %v4487_v6, 0.0 }
 0xbb4   :  { %v4482_v43 = vadd.f32 %v11892_v57, %v4481_v19  ;;  %v4605_v0 = vmax.f32 %v4479_v18, 0.0 }
 0xbb5   :  { %v4608_v17 = vmax.f32 %v4490_v28, 0.0 }
 0xbb6   :  { %v4606_v11 = vmax.f32 %v4482_v43, 0.0 }
 0xbb7   :  { %v4638_v1 = vpack.c.bf16 %v4608_v17, %v4607_v35 }
 0xbb8   :  { %v4637_v58 = vpack.c.bf16 %v4606_v11, %v4605_v0  ;;  %v7602_v5 = vpop.f32.mrb[4].mxu1 }
 0xbb9   :  { %v4503_v14 = vadd.f32 %v7602_v5, %v11892_v57  ;;  %v4494_v49 = vpop.f32.mrb[5].mxu1 }
 0xbba   :  { %v4495_v40 = vadd.f32 %v11892_v57, %v4494_v49  ;;  %v7603_v60 = vpop.f32.mrb[6].mxu1  ;;  %7644 = vmatprep.mubr.bf16.mxu1 %v4637_v58 }
 0xbbb   :  { %v4506_v9 = vadd.f32 %v7603_v60, %v11892_v57  ;;  %v4497_v2 = vpop.f32.mrb[7].mxu1  ;;  %7645 = vmatmul.mubr.bf16.vlgmr.msra.gmra.mrb[32].mxu1 %v4638_v1  ;;  %v4611_v6 = vmax.f32 %v4503_v14, 0.0 }
 0xbbc   :  { %v4498_v19 = vadd.f32 %v11892_v57, %v4497_v2  ;;  %v4609_v18 = vmax.f32 %v4495_v40, 0.0 }
 0xbbd   :  { %v4612_v28 = vmax.f32 %v4506_v9, 0.0 }
 0xbbe   :  { %v4610_v43 = vmax.f32 %v4498_v19, 0.0 }
 0xbbf   :  { %v4640_v35 = vpack.c.bf16 %v4612_v28, %v4611_v6 }
 0xbc0   :  { %v4639_v17 = vpack.c.bf16 %v4610_v43, %v4609_v18  ;;  %v7606_v0 = vpop.f32.mrb[8].mxu1 }
 0xbc1   :  { %v4519_v11 = vadd.f32 %v7606_v0, %v11892_v57  ;;  %v4510_v5 = vpop.f32.mrb[9].mxu1 }
 0xbc2   :  { %v4511_v49 = vadd.f32 %v11892_v57, %v4510_v5  ;;  %v7607_v12 = vpop.f32.mrb[10].mxu1  ;;  %7648 = vmatprep.mubr.bf16.mxu1 %v4639_v17 }
 0xbc3   :  { %v4522_v58 = vadd.f32 %v7607_v12, %v11892_v57  ;;  %v4513_v60 = vpop.f32.mrb[11].mxu1  ;;  %7649 = vmatmul.mubr.bf16.gmra.mrb[36].mxu1 %v4640_v35  ;;  %v4615_v14 = vmax.f32 %v4519_v11, 0.0 }
 0xbc4   :  { %v4514_v1 = vadd.f32 %v11892_v57, %v4513_v60  ;;  %v4613_v40 = vmax.f32 %v4511_v49, 0.0 }
 0xbc5   :  { %v4616_v9 = vmax.f32 %v4522_v58, 0.0 }
 0xbc6   :  { %v4614_v2 = vmax.f32 %v4514_v1, 0.0 }
 0xbc7   :  { %v4642_v19 = vpack.c.bf16 %v4616_v9, %v4615_v14 }
 0xbc8   :  { %v4641_v6 = vpack.c.bf16 %v4614_v2, %v4613_v40  ;;  %v7610_v28 = vpop.f32.mrb[12].mxu1 }
 0xbc9   :  { %v4535_v18 = vadd.f32 %v7610_v28, %v11892_v57  ;;  %v4526_v43 = vpop.f32.mrb[13].mxu1 }
 0xbca   :  { %v4527_v0 = vadd.f32 %v11892_v57, %v4526_v43  ;;  %v7611_v5 = vpop.f32.mrb[14].mxu1  ;;  %7652 = vmatprep.mubr.bf16.mxu1 %v4641_v6 }
 0xbcb   :  { %v4538_v12 = vadd.f32 %v7611_v5, %v11892_v57  ;;  %v4529_v17 = vpop.f32.mrb[15].mxu1  ;;  %7653 = vmatmul.mubr.bf16.gmra.mrb[40].mxu1 %v4642_v19  ;;  %v4619_v11 = vmax.f32 %v4535_v18, 0.0 }
 0xbcc   :  { %v4530_v35 = vadd.f32 %v11892_v57, %v4529_v17  ;;  %v4617_v49 = vmax.f32 %v4527_v0, 0.0 }
 0xbcd   :  { %v4620_v58 = vmax.f32 %v4538_v12, 0.0 }
 0xbce   :  { %v4618_v60 = vmax.f32 %v4530_v35, 0.0 }
 0xbcf   :  { %v4644_v1 = vpack.c.bf16 %v4620_v58, %v4619_v11 }
 0xbd0   :  { %v4643_v14 = vpack.c.bf16 %v4618_v60, %v4617_v49  ;;  %v7614_v9 = vpop.f32.mrb[16].mxu1 }
 0xbd1   :  { %v4551_v40 = vadd.f32 %v7614_v9, %v11892_v57  ;;  %v4542_v2 = vpop.f32.mrb[17].mxu1 }
 0xbd2   :  { %v4543_v28 = vadd.f32 %v11892_v57, %v4542_v2  ;;  %v7615_v43 = vpop.f32.mrb[18].mxu1  ;;  %7656 = vmatprep.mubr.bf16.mxu1 %v4643_v14 }
 0xbd3   :  { %v4554_v6 = vadd.f32 %v7615_v43, %v11892_v57  ;;  %v4545_v5 = vpop.f32.mrb[19].mxu1  ;;  %7657 = vmatmul.mubr.bf16.gmra.mrb[44].mxu1 %v4644_v1  ;;  %v4623_v18 = vmax.f32 %v4551_v40, 0.0 }
 0xbd4   :  { %v4546_v19 = vadd.f32 %v11892_v57, %v4545_v5  ;;  %v4621_v0 = vmax.f32 %v4543_v28, 0.0 }
 0xbd5   :  { %v4624_v12 = vmax.f32 %v4554_v6, 0.0 }
 0xbd6   :  { %v4622_v17 = vmax.f32 %v4546_v19, 0.0 }
 0xbd7   :  { %v4646_v35 = vpack.c.bf16 %v4624_v12, %v4623_v18 }
 0xbd8   :  { %v4645_v11 = vpack.c.bf16 %v4622_v17, %v4621_v0  ;;  %v7618_v58 = vpop.f32.mrb[20].mxu1 }
 0xbd9   :  { %v4567_v49 = vadd.f32 %v7618_v58, %v11892_v57  ;;  %v4558_v60 = vpop.f32.mrb[21].mxu1 }
 0xbda   :  { %v4559_v9 = vadd.f32 %v11892_v57, %v4558_v60  ;;  %v7619_v2 = vpop.f32.mrb[22].mxu1  ;;  %7660 = vmatprep.mubr.bf16.mxu1 %v4645_v11 }
 0xbdb   :  { %v4570_v14 = vadd.f32 %v7619_v2, %v11892_v57  ;;  %v4561_v43 = vpop.f32.mrb[23].mxu1  ;;  %7661 = vmatmul.mubr.bf16.gmra.mrb[48].mxu1 %v4646_v35  ;;  %v4627_v40 = vmax.f32 %v4567_v49, 0.0 }
 0xbdc   :  { %v4562_v1 = vadd.f32 %v11892_v57, %v4561_v43  ;;  %v4625_v28 = vmax.f32 %v4559_v9, 0.0 }
 0xbdd   :  { %v4628_v6 = vmax.f32 %v4570_v14, 0.0 }
 0xbde   :  { %v4626_v5 = vmax.f32 %v4562_v1, 0.0 }
 0xbdf   :  { %v4648_v19 = vpack.c.bf16 %v4628_v6, %v4627_v40 }
 0xbe0   :  { %v4647_v18 = vpack.c.bf16 %v4626_v5, %v4625_v28  ;;  %v7622_v12 = vpop.f32.mrb[24].mxu1 }
 0xbe1   :  { %v4583_v0 = vadd.f32 %v7622_v12, %v11892_v57  ;;  %v4574_v17 = vpop.f32.mrb[25].mxu1 }
 0xbe2   :  { %v4575_v58 = vadd.f32 %v11892_v57, %v4574_v17  ;;  %v7623_v60 = vpop.f32.mrb[26].mxu1  ;;  %7664 = vmatprep.mubr.bf16.mxu1 %v4647_v18 }
 0xbe3   :  { %v4586_v11 = vadd.f32 %v7623_v60, %v11892_v57  ;;  %v4577_v2 = vpop.f32.mrb[27].mxu1  ;;  %7665 = vmatmul.mubr.bf16.gmra.mrb[52].mxu1 %v4648_v19  ;;  %v4631_v49 = vmax.f32 %v4583_v0, 0.0 }
 0xbe4   :  { %v4578_v35 = vadd.f32 %v11892_v57, %v4577_v2  ;;  %v4629_v9 = vmax.f32 %v4575_v58, 0.0 }
 0xbe5   :  { %v4632_v14 = vmax.f32 %v4586_v11, 0.0 }
 0xbe6   :  { %v4630_v43 = vmax.f32 %v4578_v35, 0.0 }
 0xbe7   :  { %v4650_v1 = vpack.c.bf16 %v4632_v14, %v4631_v49  ;;  %v11929_v14 = vld [vmem:[%s12871_s16] ss:$0 sm:$0xff] }
 0xbe8   :  { %v4649_v40 = vpack.c.bf16 %v4630_v43, %v4629_v9  ;;  %v7626_v6 = vpop.f32.mrb[28].mxu1 }
 0xbe9   :  { %v4599_v28 = vadd.f32 %v7626_v6, %v11892_v57  ;;  %v4590_v5 = vpop.f32.mrb[29].mxu1 }
 0xbea   :  { %v4591_v12 = vadd.f32 %v11892_v57, %v4590_v5  ;;  %v7627_v17 = vpop.f32.mrb[30].mxu1  ;;  %7668 = vmatprep.mubr.bf16.mxu1 %v4649_v40 }
 0xbeb   :  { %v4602_v18 = vadd.f32 %v7627_v17, %v11892_v57  ;;  %v4593_v60 = vpop.f32.mrb[31].mxu1  ;;  %7669 = vmatmul.mubr.bf16.gmra.mrb[56].mxu1 %v4650_v1  ;;  %v4635_v0 = vmax.f32 %v4599_v28, 0.0 }
 0xbec   :  { %v4594_v19 = vadd.f32 %v11892_v57, %v4593_v60  ;;  %v4633_v58 = vmax.f32 %v4591_v12, 0.0 }
 0xbed   :  { %v4636_v11 = vmax.f32 %v4602_v18, 0.0 }
 0xbee   :  { %v4634_v2 = vmax.f32 %v4594_v19, 0.0 }
 0xbef   :  { %v4652_v35 = vpack.c.bf16 %v4636_v11, %v4635_v0 }
 0xbf0   :  { %v4651_v49 = vpack.c.bf16 %v4634_v2, %v4633_v58 }
 0xbf2   :  { %7672 = vmatprep.mubr.bf16.mxu1 %v4651_v49 }
 0xbf3   :  { %7673 = vmatmul.mubr.bf16.gmra.mrb[60].mxu1 %v4652_v35 }
 0xc8e   :  { %v7646_v9 = vpop.f32.mrb[32].mxu1 }
 0xc8f   :  { %v4767_v43 = vadd.f32 %v7646_v9, %v11929_v14  ;;  %v4758_v40 = vpop.f32.mrb[33].mxu1 }
 0xc90   :  { %v4759_v1 = vadd.f32 %v11929_v14, %v4758_v40  ;;  %v7647_v57 = vpop.f32.mrb[34].mxu1 }
 0xc91   :  { %v11934_v6 = vadd.f32 %v4767_v43, %v11734_v30  ;;  %v4770_v28 = vadd.f32 %v7647_v57, %v11929_v14  ;;  %v4761_v5 = vpop.f32.mrb[35].mxu1 }
 0xc92   :  { %v4762_v12 = vadd.f32 %v11929_v14, %v4761_v5  ;;  %v11939_v17 = vadd.f32 %v4759_v1, %v11728_v42 }
 0xc93   :  { %v11942_v18 = vadd.f32 %v4770_v28, %v11725_v3  ;;  %v4923_v60 = vsel %vm267_vm0, %v11934_v6, 0.0 }
 0xc94   :  { %4924 = vadd.xlane.f32.xlu1 %v4923_v60  ;;  %v11947_v19 = vadd.f32 %v4762_v12, %v11731_v15  ;;  %v4917_v42 = vsel %vm267_vm0, %v11939_v17, 0.0 }
 0xc95   :  { %v4926_v30 = vsel %vm267_vm0, %v11942_v18, 0.0 }
 0xc96   :  { %v7650_v0 = vpop.f32.mrb[36].mxu1  ;;  %4927 = vadd.xlane.f32.xlu0 %v4926_v30  ;;  %v4920_v9 = vsel %vm267_vm0, %v11947_v19, 0.0 }
 0xc97   :  { %v4783_v11 = vadd.f32 %v7650_v0, %v11929_v14  ;;  %v4774_v58 = vpop.f32.mrb[37].mxu1 }
 0xc98   :  { %v4775_v3 = vadd.f32 %v11929_v14, %v4774_v58  ;;  %v7651_v2 = vpop.f32.mrb[38].mxu1  ;;  %4918 = vadd.xlane.f32.xlu1 %v4917_v42 }
 0xc99   :  { %v11956_v35 = vadd.f32 %v4783_v11, %v11758_v33  ;;  %v4786_v15 = vadd.f32 %v7651_v2, %v11929_v14  ;;  %v4777_v49 = vpop.f32.mrb[39].mxu1 }
 0xc9a   :  { %v4778_v43 = vadd.f32 %v11929_v14, %v4777_v49  ;;  %4921 = vadd.xlane.f32.xlu0 %v4920_v9  ;;  %v11963_v40 = vadd.f32 %v4775_v3, %v11752_v8 }
 0xc9b   :  { %v11966_v1 = vadd.f32 %v4786_v15, %v11746_v22  ;;  %v4935_v57 = vsel %vm267_vm0, %v11956_v35, 0.0 }
 0xc9c   :  { %4936 = vadd.xlane.f32.xlu1 %v4935_v57  ;;  %v11971_v33 = vadd.f32 %v4778_v43, %v11755_v16  ;;  %v4929_v8 = vsel %vm267_vm0, %v11963_v40, 0.0 }
 0xc9d   :  { %v4938_v28 = vsel %vm267_vm0, %v11966_v1, 0.0 }
 0xc9e   :  { %v7654_v5 = vpop.f32.mrb[40].mxu1  ;;  %4939 = vadd.xlane.f32.xlu0 %v4938_v28  ;;  %v4932_v58 = vsel %vm267_vm0, %v11971_v33, 0.0 }
 0xc9f   :  { %v4799_v12 = vadd.f32 %v7654_v5, %v11929_v14  ;;  %v4790_v60 = vpop.f32.mrb[41].mxu1 }
 0xca0   :  { %v4791_v22 = vadd.f32 %v11929_v14, %v4790_v60  ;;  %v7655_v30 = vpop.f32.mrb[42].mxu1  ;;  %4930 = vadd.xlane.f32.xlu1 %v4929_v8 }
 0xca1   :  { %v11980_v0 = vadd.f32 %v4799_v12, %v11782_v39  ;;  %v4802_v16 = vadd.f32 %v7655_v30, %v11929_v14  ;;  %v4793_v11 = vpop.f32.mrb[43].mxu1 }
 0xca2   :  { %v4794_v42 = vadd.f32 %v11929_v14, %v4793_v11  ;;  %4933 = vadd.xlane.f32.xlu0 %v4932_v58  ;;  %v11987_v3 = vadd.f32 %v4791_v22, %v11776_v36 }
 0xca3   :  { %v11990_v2 = vadd.f32 %v4802_v16, %v11770_v25  ;;  %v4947_v15 = vsel %vm267_vm0, %v11980_v0, 0.0 }
 0xca4   :  { %4948 = vadd.xlane.f32.xlu1 %v4947_v15  ;;  %v11995_v39 = vadd.f32 %v4794_v42, %v11779_v20  ;;  %v4941_v36 = vsel %vm267_vm0, %v11987_v3, 0.0 }
 0xca5   :  { %v4950_v49 = vsel %vm267_vm0, %v11990_v2, 0.0 }
 0xca6   :  { %v7658_v9 = vpop.f32.mrb[44].mxu1  ;;  %4951 = vadd.xlane.f32.xlu0 %v4950_v49  ;;  %v4944_v60 = vsel %vm267_vm0, %v11995_v39, 0.0 }
 0xca7   :  { %v4815_v43 = vadd.f32 %v7658_v9, %v11929_v14  ;;  %v4806_v57 = vpop.f32.mrb[45].mxu1 }
 0xca8   :  { %v4807_v25 = vadd.f32 %v11929_v14, %v4806_v57  ;;  %v7659_v28 = vpop.f32.mrb[46].mxu1  ;;  %4942 = vadd.xlane.f32.xlu1 %v4941_v36 }
 0xca9   :  { %v12004_v5 = vadd.f32 %v4815_v43, %v11803_v32  ;;  %v4818_v20 = vadd.f32 %v7659_v28, %v11929_v14  ;;  %v4809_v12 = vpop.f32.mrb[47].mxu1 }
 0xcaa   :  { %v4810_v8 = vadd.f32 %v11929_v14, %v4809_v12  ;;  %4945 = vadd.xlane.f32.xlu0 %v4944_v60  ;;  %v12011_v22 = vadd.f32 %v4807_v25, %v11797_v38 }
 0xcab   :  { %v12014_v30 = vadd.f32 %v4818_v20, %v11794_v24  ;;  %v4959_v16 = vsel %vm267_vm0, %v12004_v5, 0.0 }
 0xcac   :  { %4960 = vadd.xlane.f32.xlu1 %v4959_v16  ;;  %v12019_v32 = vadd.f32 %v4810_v8, %v11800_v51  ;;  %v4953_v38 = vsel %vm267_vm0, %v12011_v22, 0.0 }
 0xcad   :  { %v4962_v11 = vsel %vm267_vm0, %v12014_v30, 0.0 }
 0xcae   :  { %v7662_v58 = vpop.f32.mrb[48].mxu1  ;;  %4963 = vadd.xlane.f32.xlu0 %v4962_v11  ;;  %v4956_v57 = vsel %vm267_vm0, %v12019_v32, 0.0 }
 0xcaf   :  { %v4831_v42 = vadd.f32 %v7662_v58, %v11929_v14  ;;  %v4822_v15 = vpop.f32.mrb[49].mxu1 }
 0xcb0   :  { %v4823_v24 = vadd.f32 %v11929_v14, %v4822_v15  ;;  %v7663_v49 = vpop.f32.mrb[50].mxu1  ;;  %4954 = vadd.xlane.f32.xlu1 %v4953_v38 }
 0xcb1   :  { %v12028_v9 = vadd.f32 %v4831_v42, %v11821_v23  ;;  %v4834_v51 = vadd.f32 %v7663_v49, %v11929_v14  ;;  %v4825_v43 = vpop.f32.mrb[51].mxu1 }
 0xcb2   :  { %v4826_v36 = vadd.f32 %v11929_v14, %v4825_v43  ;;  %4957 = vadd.xlane.f32.xlu0 %v4956_v57  ;;  %v12035_v25 = vadd.f32 %v4823_v24, %v11815_v62 }
 0xcb3   :  { %v12038_v28 = vadd.f32 %v4834_v51, %v11812_v59  ;;  %v4971_v20 = vsel %vm267_vm0, %v12028_v9, 0.0 }
 0xcb4   :  { %4972 = vadd.xlane.f32.xlu1 %v4971_v20  ;;  %v12043_v23 = vadd.f32 %v4826_v36, %v11818_v48  ;;  %v4965_v62 = vsel %vm267_vm0, %v12035_v25, 0.0 }
 0xcb5   :  { %v4974_v12 = vsel %vm267_vm0, %v12038_v28, 0.0 }
 0xcb6   :  { %v7666_v60 = vpop.f32.mrb[52].mxu1  ;;  %4975 = vadd.xlane.f32.xlu0 %v4974_v12  ;;  %v4968_v15 = vsel %vm267_vm0, %v12043_v23, 0.0 }
 0xcb7   :  { %v4847_v8 = vadd.f32 %v7666_v60, %v11929_v14  ;;  %v4838_v16 = vpop.f32.mrb[53].mxu1 }
 0xcb8   :  { %v4839_v59 = vadd.f32 %v11929_v14, %v4838_v16  ;;  %v7667_v11 = vpop.f32.mrb[54].mxu1  ;;  %4966 = vadd.xlane.f32.xlu1 %v4965_v62 }
 0xcb9   :  { %v12052_v58 = vadd.f32 %v4847_v8, %v11839_v7  ;;  %v4850_v48 = vadd.f32 %v7667_v11, %v11929_v14  ;;  %v4841_v42 = vpop.f32.mrb[55].mxu1 }
 0xcba   :  { %v4842_v38 = vadd.f32 %v11929_v14, %v4841_v42  ;;  %4969 = vadd.xlane.f32.xlu0 %v4968_v15  ;;  %v12059_v24 = vadd.f32 %v4839_v59, %v11833_v54 }
 0xcbb   :  { %v12062_v49 = vadd.f32 %v4850_v48, %v11830_v53  ;;  %v4983_v51 = vsel %vm267_vm0, %v12052_v58, 0.0 }
 0xcbc   :  { %4984 = vadd.xlane.f32.xlu1 %v4983_v51  ;;  %v12067_v7 = vadd.f32 %v4842_v38, %v11836_v52  ;;  %v4977_v54 = vsel %vm267_vm0, %v12059_v24, 0.0 }
 0xcbd   :  { %v4986_v43 = vsel %vm267_vm0, %v12062_v49, 0.0 }
 0xcbe   :  { %v7670_v57 = vpop.f32.mrb[56].mxu1  ;;  %4987 = vadd.xlane.f32.xlu0 %v4986_v43  ;;  %v4980_v16 = vsel %vm267_vm0, %v12067_v7, 0.0 }
 0xcbf   :  { %v4863_v36 = vadd.f32 %v7670_v57, %v11929_v14  ;;  %v4854_v20 = vpop.f32.mrb[57].mxu1 }
 0xcc0   :  { %v4855_v53 = vadd.f32 %v11929_v14, %v4854_v20  ;;  %v7671_v12 = vpop.f32.mrb[58].mxu1  ;;  %4978 = vadd.xlane.f32.xlu1 %v4977_v54 }
 0xcc1   :  { %v12076_v60 = vadd.f32 %v4863_v36, %v11857_v63  ;;  %v4866_v52 = vadd.f32 %v7671_v12, %v11929_v14  ;;  %v4857_v8 = vpop.f32.mrb[59].mxu1  ;;  %v13642_v12 = vld [vmem:[#allocation37_spill] sm:$0xff] }
 0xcc2   :  { %v4858_v62 = vadd.f32 %v11929_v14, %v4857_v8  ;;  %4981 = vadd.xlane.f32.xlu0 %v4980_v16  ;;  %v12083_v59 = vadd.f32 %v4855_v53, %v11851_v27  ;;  %v8393_v53 = vld [vmem:[%s12863_s8] ss:$0 sm:$0xff] }
 0xcc3   :  { %v12086_v11 = vadd.f32 %v4866_v52, %v11848_v55  ;;  %v4995_v48 = vsel %vm267_vm0, %v12076_v60, 0.0  ;;  %v12110_v52 = vadd.f32 %v8393_v53, %v13642_v12 }
 0xcc4   :  { %4996 = vadd.xlane.f32.xlu1 %v4995_v48  ;;  %v12091_v63 = vadd.f32 %v4858_v62, %v11854_v29  ;;  %v4989_v27 = vsel %vm267_vm0, %v12083_v59, 0.0  ;;  %v13644_v62 = vld [vmem:[#allocation34_spill] sm:$0xff] }
 0xcc5   :  { %v4998_v42 = vsel %vm267_vm0, %v12086_v11, 0.0  ;;  %13643 = vst [vmem:[#allocation60_spill] sm:$0xff] %v12110_v52 }
 0xcc6   :  { %v7674_v15 = vpop.f32.mrb[60].mxu1  ;;  %4999 = vadd.xlane.f32.xlu0 %v4998_v42  ;;  %v4992_v20 = vsel %vm267_vm0, %v12091_v63, 0.0 }
 0xcc7   :  { %v4879_v38 = vadd.f32 %v7674_v15, %v11929_v14  ;;  %v4870_v51 = vpop.f32.mrb[61].mxu1  ;;  %v13646_v15 = vld [vmem:[#allocation36_spill] sm:$0xff] }
 0xcc8   :  { %v4871_v55 = vadd.f32 %v11929_v14, %v4870_v51  ;;  %v7675_v43 = vpop.f32.mrb[62].mxu1  ;;  %4990 = vadd.xlane.f32.xlu1 %v4989_v27  ;;  %v12135_v51 = vpop.xlane.xlu1 %5587 }
 0xcc9   :  { %v12100_v57 = vadd.f32 %v4879_v38, %v11875_v13  ;;  %v4882_v29 = vadd.f32 %v7675_v43, %v11929_v14  ;;  %v4873_v36 = vpop.f32.mrb[63].mxu1 }
 0xcca   :  { %v4874_v54 = vadd.f32 %v11929_v14, %v4873_v36  ;;  %4993 = vadd.xlane.f32.xlu0 %v4992_v20  ;;  %v12113_v8 = vadd.f32 %v4871_v55, %v11869_v34  ;;  %v12121_v14 = vadd.f32 %v8393_v53, %v13644_v62  ;;  %v12129_v34 = vadd.f32 %v8393_v53, %v13646_v15  ;;  %v13648_v55 = vld [vmem:[#allocation39_spill] sm:$0xff]  ;;  %v12154_v15 = vpop.xlane.xlu0 %5590 }
 0xccb   :  { %v12116_v13 = vadd.f32 %v4882_v29, %v11866_v56  ;;  %v5007_v16 = vsel %vm267_vm0, %v12100_v57, 0.0  ;;  %v8394_v56 = vld [vmem:[%s12875_s20] ss:$0 sm:$0xff]  ;;  %v12141_v43 = vadd.f32 %v8393_v53, %v13648_v55 }
 0xccc   :  { %5008 = vadd.xlane.f32.xlu1 %v5007_v16  ;;  %13645 = vst [vmem:[#allocation91_spill] sm:$0xff] %v12121_v14  ;;  %v12124_v48 = vadd.f32 %v4874_v54, %v11872_v61  ;;  %13647 = vst [vmem:[#allocation80_spill] sm:$0xff] %v12129_v34  ;;  %v5582_v38 = vmul.f32 %v8394_v56, %v12110_v52  ;;  %v5001_v27 = vsel %vm267_vm0, %v12113_v8, 0.0  ;;  %v13650_v54 = vld [vmem:[#allocation38_spill] sm:$0xff]  ;;  %v12151_v62 = vpop.xlane.xlu1 %5593 }
 0xccd   :  { %v5010_v42 = vsel %vm267_vm0, %v12116_v13, 0.0  ;;  %v5581_v61 = vmul.f32 %v8394_v56, %v12121_v14  ;;  %13649 = vst [vmem:[#allocation81_spill] sm:$0xff] %v12141_v43  ;;  %v5584_v36 = vmul.f32 %v8394_v56, %v12129_v34  ;;  %v12148_v12 = vadd.f32 %v8393_v53, %v13650_v54 }
 0xcce   :  { %5011 = vadd.xlane.f32.xlu0 %v5010_v42  ;;  %v5004_v29 = vsel %vm267_vm0, %v12124_v48, 0.0  ;;  %v5670_v20 = vsel %vm267_vm0, %v5582_v38, 0.0  ;;  %v5583_v16 = vmul.f32 %v8394_v56, %v12141_v43  ;;  %v12161_v53 = vpop.xlane.xlu0 %5596 }
 0xccf   :  { %13651 = vst [vmem:[#allocation61_spill] sm:$0xff] %v12148_v12  ;;  %v5667_v42 = vsel %vm267_vm0, %v5581_v61, 0.0  ;;  %v5585_v55 = vmul.f32 %v8394_v56, %v12148_v12 }
 0xcd0   :  { %5002 = vadd.xlane.f32.xlu1 %v5001_v27  ;;  %v5676_v27 = vsel %vm267_vm0, %v5584_v36, 0.0  ;;  %v5673_v38 = vsel %vm267_vm0, %v5583_v16, 0.0 }
 0xcd2   :  { %5005 = vadd.xlane.f32.xlu0 %v5004_v29  ;;  %v12159_v29 = vpop.xlane.xlu1 %5599  ;;  %v12166_v61 = vpop.xlane.xlu0 %5602 }
 0xcd4   :  { %5671 = vadd.xlane.f32.xlu1 %v5670_v20  ;;  %v5679_v20 = vsel %vm267_vm0, %v5585_v55, 0.0 }
 0xcd6   :  { %5668 = vadd.xlane.f32.xlu0 %v5667_v42  ;;  %v12164_v54 = vpop.xlane.xlu1 %5605  ;;  %v12170_v36 = vpop.xlane.xlu0 %5608 }
 0xcd8   :  { %5677 = vadd.xlane.f32.xlu1 %v5676_v27 }
 0xcda   :  { %5674 = vadd.xlane.f32.xlu0 %v5673_v38  ;;  %v12168_v42 = vpop.xlane.xlu1 %5611  ;;  %v12174_v56 = vpop.xlane.xlu0 %5614 }
 0xcdb   :  { %13652 = vst [vmem:[#allocation86_spill] sm:$0xff] %v12174_v56 }
 0xcde   :  { %5680 = vadd.xlane.f32.xlu0 %v5679_v20  ;;  %v12172_v27 = vpop.xlane.xlu1 %5617  ;;  %v12178_v38 = vpop.xlane.xlu0 %5620 }
 0xce2   :  { %v12176_v16 = vpop.xlane.xlu1 %5623  ;;  %v12182_v55 = vpop.xlane.xlu0 %5626 }
 0xce3   :  { %13653 = vst [vmem:[#allocation89_spill] sm:$0xff] %v12182_v55 }
 0xce6   :  { %v12180_v12 = vpop.xlane.xlu1 %5629  ;;  %v12186_v43 = vpop.xlane.xlu0 %5632 }
 0xce7   :  { %13655 = vst [vmem:[#allocation57_spill] sm:$0xff] %v12186_v43 }
 0xcea   :  { %v12184_v20 = vpop.xlane.xlu1 %5635  ;;  %v12190_v34 = vpop.xlane.xlu0 %5638 }
 0xceb   :  { %13654 = vst [vmem:[#allocation65_spill] sm:$0xff] %v12184_v20  ;;  %13657 = vst [vmem:[#allocation58_spill] sm:$0xff] %v12190_v34 }
 0xcee   :  { %v12188_v14 = vpop.xlane.xlu1 %5641  ;;  %v12194_v50 = vpop.xlane.xlu0 %5644 }
 0xcef   :  { %13656 = vst [vmem:[#allocation63_spill] sm:$0xff] %v12188_v14  ;;  %13659 = vst [vmem:[#allocation62_spill] sm:$0xff] %v12194_v50 }
 0xcf2   :  { %v12192_v52 = vpop.xlane.xlu1 %5647  ;;  %v12198_v47 = vpop.xlane.xlu0 %5650 }
 0xcf3   :  { %13658 = vst [vmem:[#allocation68_spill] sm:$0xff] %v12192_v52  ;;  %13661 = vst [vmem:[#allocation88_spill] sm:$0xff] %v12198_v47 }
 0xcf6   :  { %v12196_v41 = vpop.xlane.xlu1 %5653  ;;  %v12202_v44 = vpop.xlane.xlu0 %5656 }
 0xcf7   :  { %13660 = vst [vmem:[#allocation144_spill] sm:$0xff] %v12196_v41  ;;  %13663 = vst [vmem:[#allocation143_spill] sm:$0xff] %v12202_v44 }
 0xcfa   :  { %v12200_v46 = vpop.xlane.xlu1 %5659  ;;  %v12206_v4 = vpop.xlane.xlu0 %5662 }
 0xcfb   :  { %13662 = vst [vmem:[#allocation94_spill] sm:$0xff] %v12200_v46  ;;  %13665 = vst [vmem:[#allocation77_spill] sm:$0xff] %v12206_v4 }
 0xcfe   :  { %v12204_v10 = vpop.xlane.xlu1 %5665 }
 0xcff   :  { %13664 = vst [vmem:[#allocation53_spill] sm:$0xff] %v12204_v10 }
 0xd21   :  { %v4925_v26 = vpop.xlane.xlu1 %4924 }
 0xd22   :  { %v5016_v31 = vmul.f32 0.03125, %v4925_v26 }
 0xd23   :  { %v4928_v45 = vpop.xlane.xlu0 %4927 }
 0xd24   :  { %v12209_v21 = vsub.f32 %v11934_v6, %v5016_v31  ;;  %v5017_v37 = vmul.f32 0.03125, %v4928_v45 }
 0xd25   :  { %v4919_v34 = vpop.xlane.xlu1 %4918 }
 0xd26   :  { %v12212_v50 = vsub.f32 %v11942_v18, %v5017_v37  ;;  %v5014_v47 = vmul.f32 0.03125, %v4919_v34  ;;  %v5080_v46 = vmul.f32 %v12209_v21, %v12209_v21 }
 0xd27   :  { %v4922_v44 = vpop.xlane.xlu0 %4921 }
 0xd28   :  { %v12217_v10 = vsub.f32 %v11939_v17, %v5014_v47  ;;  %v5015_v4 = vmul.f32 0.03125, %v4922_v44  ;;  %v5116_v26 = vsel %vm267_vm0, %v5080_v46, 0.0  ;;  %v5081_v31 = vmul.f32 %v12212_v50, %v12212_v50 }
 0xd29   :  { %5117 = vadd.xlane.f32.xlu1 %v5116_v26  ;;  %v4937_v45 = vpop.xlane.xlu1 %4936 }
 0xd2a   :  { %v12223_v6 = vsub.f32 %v11947_v19, %v5015_v4  ;;  %v5020_v37 = vmul.f32 0.03125, %v4937_v45  ;;  %v5119_v18 = vsel %vm267_vm0, %v5081_v31, 0.0  ;;  %v5078_v34 = vmul.f32 %v12217_v10, %v12217_v10 }
 0xd2b   :  { %5120 = vadd.xlane.f32.xlu0 %v5119_v18  ;;  %v4940_v47 = vpop.xlane.xlu0 %4939 }
 0xd2c   :  { %v12229_v44 = vsub.f32 %v11956_v35, %v5020_v37  ;;  %v5021_v46 = vmul.f32 0.03125, %v4940_v47  ;;  %v5110_v17 = vsel %vm267_vm0, %v5078_v34, 0.0  ;;  %v5079_v26 = vmul.f32 %v12223_v6, %v12223_v6 }
 0xd2d   :  { %5111 = vadd.xlane.f32.xlu1 %v5110_v17  ;;  %v4931_v4 = vpop.xlane.xlu1 %4930 }
 0xd2e   :  { %v12235_v19 = vsub.f32 %v11966_v1, %v5021_v46  ;;  %v5018_v31 = vmul.f32 0.03125, %v4931_v4  ;;  %v5113_v45 = vsel %vm267_vm0, %v5079_v26, 0.0  ;;  %v5084_v18 = vmul.f32 %v12229_v44, %v12229_v44 }
 0xd2f   :  { %5114 = vadd.xlane.f32.xlu0 %v5113_v45  ;;  %v4934_v35 = vpop.xlane.xlu0 %4933 }
 0xd30   :  { %v12241_v37 = vsub.f32 %v11963_v40, %v5018_v31  ;;  %v5019_v34 = vmul.f32 0.03125, %v4934_v35  ;;  %v5128_v47 = vsel %vm267_vm0, %v5084_v18, 0.0  ;;  %v5085_v17 = vmul.f32 %v12235_v19, %v12235_v19 }
 0xd31   :  { %5129 = vadd.xlane.f32.xlu1 %v5128_v47  ;;  %v4949_v1 = vpop.xlane.xlu1 %4948 }
 0xd32   :  { %v12247_v46 = vsub.f32 %v11971_v33, %v5019_v34  ;;  %v5024_v26 = vmul.f32 0.03125, %v4949_v1  ;;  %v5131_v4 = vsel %vm267_vm0, %v5085_v17, 0.0  ;;  %v5082_v45 = vmul.f32 %v12241_v37, %v12241_v37 }
 0xd33   :  { %5132 = vadd.xlane.f32.xlu0 %v5131_v4  ;;  %v4952_v40 = vpop.xlane.xlu0 %4951 }
 0xd34   :  { %v12253_v31 = vsub.f32 %v11980_v0, %v5024_v26  ;;  %v5025_v18 = vmul.f32 0.03125, %v4952_v40  ;;  %v5122_v35 = vsel %vm267_vm0, %v5082_v45, 0.0  ;;  %v5083_v47 = vmul.f32 %v12247_v46, %v12247_v46 }
 0xd35   :  { %5123 = vadd.xlane.f32.xlu1 %v5122_v35  ;;  %v4943_v33 = vpop.xlane.xlu1 %4942 }
 0xd36   :  { %v12259_v34 = vsub.f32 %v11990_v2, %v5025_v18  ;;  %v5022_v17 = vmul.f32 0.03125, %v4943_v33  ;;  %v5125_v1 = vsel %vm267_vm0, %v5083_v47, 0.0  ;;  %v5088_v4 = vmul.f32 %v12253_v31, %v12253_v31 }
 0xd37   :  { %5126 = vadd.xlane.f32.xlu0 %v5125_v1  ;;  %v4946_v0 = vpop.xlane.xlu0 %4945 }
 0xd38   :  { %v12265_v26 = vsub.f32 %v11987_v3, %v5022_v17  ;;  %v5023_v45 = vmul.f32 0.03125, %v4946_v0  ;;  %v5140_v40 = vsel %vm267_vm0, %v5088_v4, 0.0  ;;  %v5089_v35 = vmul.f32 %v12259_v34, %v12259_v34 }
 0xd39   :  { %5141 = vadd.xlane.f32.xlu1 %v5140_v40  ;;  %v4961_v2 = vpop.xlane.xlu1 %4960 }
 0xd3a   :  { %v12271_v18 = vsub.f32 %v11995_v39, %v5023_v45  ;;  %v5028_v47 = vmul.f32 0.03125, %v4961_v2  ;;  %v5143_v33 = vsel %vm267_vm0, %v5089_v35, 0.0  ;;  %v5086_v1 = vmul.f32 %v12265_v26, %v12265_v26 }
 0xd3b   :  { %5144 = vadd.xlane.f32.xlu0 %v5143_v33  ;;  %v4964_v3 = vpop.xlane.xlu0 %4963 }
 0xd3c   :  { %v12277_v17 = vsub.f32 %v12004_v5, %v5028_v47  ;;  %v5029_v4 = vmul.f32 0.03125, %v4964_v3  ;;  %v5134_v0 = vsel %vm267_vm0, %v5086_v1, 0.0  ;;  %v5087_v40 = vmul.f32 %v12271_v18, %v12271_v18 }
 0xd3d   :  { %5135 = vadd.xlane.f32.xlu1 %v5134_v0  ;;  %v4955_v39 = vpop.xlane.xlu1 %4954 }
 0xd3e   :  { %v12283_v45 = vsub.f32 %v12014_v30, %v5029_v4  ;;  %v5026_v35 = vmul.f32 0.03125, %v4955_v39  ;;  %v5137_v2 = vsel %vm267_vm0, %v5087_v40, 0.0  ;;  %v5092_v33 = vmul.f32 %v12277_v17, %v12277_v17 }
 0xd3f   :  { %5138 = vadd.xlane.f32.xlu0 %v5137_v2  ;;  %v4958_v5 = vpop.xlane.xlu0 %4957 }
 0xd40   :  { %v12289_v47 = vsub.f32 %v12011_v22, %v5026_v35  ;;  %v5027_v1 = vmul.f32 0.03125, %v4958_v5  ;;  %v5152_v3 = vsel %vm267_vm0, %v5092_v33, 0.0  ;;  %v5093_v0 = vmul.f32 %v12283_v45, %v12283_v45 }
 0xd41   :  { %5153 = vadd.xlane.f32.xlu1 %v5152_v3  ;;  %v4973_v30 = vpop.xlane.xlu1 %4972 }
 0xd42   :  { %v12295_v4 = vsub.f32 %v12019_v32, %v5027_v1  ;;  %v5032_v40 = vmul.f32 0.03125, %v4973_v30  ;;  %v5155_v39 = vsel %vm267_vm0, %v5093_v0, 0.0  ;;  %v5090_v2 = vmul.f32 %v12289_v47, %v12289_v47 }
 0xd43   :  { %5156 = vadd.xlane.f32.xlu0 %v5155_v39  ;;  %v4976_v22 = vpop.xlane.xlu0 %4975 }
 0xd44   :  { %v12301_v35 = vsub.f32 %v12028_v9, %v5032_v40  ;;  %v5033_v33 = vmul.f32 0.03125, %v4976_v22  ;;  %v5146_v5 = vsel %vm267_vm0, %v5090_v2, 0.0  ;;  %v5091_v3 = vmul.f32 %v12295_v4, %v12295_v4 }
 0xd45   :  { %5147 = vadd.xlane.f32.xlu1 %v5146_v5  ;;  %v4967_v32 = vpop.xlane.xlu1 %4966 }
 0xd46   :  { %v12307_v1 = vsub.f32 %v12038_v28, %v5033_v33  ;;  %v5030_v0 = vmul.f32 0.03125, %v4967_v32  ;;  %v5149_v30 = vsel %vm267_vm0, %v5091_v3, 0.0  ;;  %v5096_v39 = vmul.f32 %v12301_v35, %v12301_v35 }
 0xd47   :  { %5150 = vadd.xlane.f32.xlu0 %v5149_v30  ;;  %v4970_v9 = vpop.xlane.xlu0 %4969 }
 0xd48   :  { %v12313_v40 = vsub.f32 %v12035_v25, %v5030_v0  ;;  %v5031_v2 = vmul.f32 0.03125, %v4970_v9  ;;  %v5164_v22 = vsel %vm267_vm0, %v5096_v39, 0.0  ;;  %v5097_v5 = vmul.f32 %v12307_v1, %v12307_v1 }
 0xd49   :  { %5165 = vadd.xlane.f32.xlu1 %v5164_v22  ;;  %v4985_v28 = vpop.xlane.xlu1 %4984 }
 0xd4a   :  { %v12319_v33 = vsub.f32 %v12043_v23, %v5031_v2  ;;  %v5036_v3 = vmul.f32 0.03125, %v4985_v28  ;;  %v5167_v32 = vsel %vm267_vm0, %v5097_v5, 0.0  ;;  %v5094_v30 = vmul.f32 %v12313_v40, %v12313_v40 }
 0xd4b   :  { %5168 = vadd.xlane.f32.xlu0 %v5167_v32  ;;  %v4988_v25 = vpop.xlane.xlu0 %4987 }
 0xd4c   :  { %v12325_v0 = vsub.f32 %v12052_v58, %v5036_v3  ;;  %v5037_v39 = vmul.f32 0.03125, %v4988_v25  ;;  %v5158_v9 = vsel %vm267_vm0, %v5094_v30, 0.0  ;;  %v5095_v22 = vmul.f32 %v12319_v33, %v12319_v33 }
 0xd4d   :  { %5159 = vadd.xlane.f32.xlu1 %v5158_v9  ;;  %v4979_v23 = vpop.xlane.xlu1 %4978 }
 0xd4e   :  { %v12331_v2 = vsub.f32 %v12062_v49, %v5037_v39  ;;  %v5034_v5 = vmul.f32 0.03125, %v4979_v23  ;;  %v5161_v28 = vsel %vm267_vm0, %v5095_v22, 0.0  ;;  %v5100_v32 = vmul.f32 %v12325_v0, %v12325_v0 }
 0xd4f   :  { %5162 = vadd.xlane.f32.xlu0 %v5161_v28  ;;  %v4982_v58 = vpop.xlane.xlu0 %4981 }
 0xd50   :  { %v12337_v3 = vsub.f32 %v12059_v24, %v5034_v5  ;;  %v5035_v30 = vmul.f32 0.03125, %v4982_v58  ;;  %v5176_v25 = vsel %vm267_vm0, %v5100_v32, 0.0  ;;  %v5101_v9 = vmul.f32 %v12331_v2, %v12331_v2 }
 0xd51   :  { %5177 = vadd.xlane.f32.xlu1 %v5176_v25  ;;  %v4997_v49 = vpop.xlane.xlu1 %4996 }
 0xd52   :  { %v12343_v39 = vsub.f32 %v12067_v7, %v5035_v30  ;;  %v5040_v22 = vmul.f32 0.03125, %v4997_v49  ;;  %v5179_v23 = vsel %vm267_vm0, %v5101_v9, 0.0  ;;  %v5098_v28 = vmul.f32 %v12337_v3, %v12337_v3 }
 0xd53   :  { %5180 = vadd.xlane.f32.xlu0 %v5179_v23  ;;  %v5000_v24 = vpop.xlane.xlu0 %4999 }
 0xd54   :  { %v12349_v5 = vsub.f32 %v12076_v60, %v5040_v22  ;;  %v5041_v32 = vmul.f32 0.03125, %v5000_v24  ;;  %v5170_v58 = vsel %vm267_vm0, %v5098_v28, 0.0  ;;  %v5099_v25 = vmul.f32 %v12343_v39, %v12343_v39 }
 0xd55   :  { %5171 = vadd.xlane.f32.xlu1 %v5170_v58  ;;  %v4991_v7 = vpop.xlane.xlu1 %4990 }
 0xd56   :  { %v12355_v30 = vsub.f32 %v12086_v11, %v5041_v32  ;;  %v5038_v9 = vmul.f32 0.03125, %v4991_v7  ;;  %v5173_v49 = vsel %vm267_vm0, %v5099_v25, 0.0  ;;  %v5104_v23 = vmul.f32 %v12349_v5, %v12349_v5 }
 0xd57   :  { %5174 = vadd.xlane.f32.xlu0 %v5173_v49  ;;  %v4994_v60 = vpop.xlane.xlu0 %4993 }
 0xd58   :  { %v12361_v22 = vsub.f32 %v12083_v59, %v5038_v9  ;;  %v5039_v28 = vmul.f32 0.03125, %v4994_v60  ;;  %v5188_v24 = vsel %vm267_vm0, %v5104_v23, 0.0  ;;  %v5105_v58 = vmul.f32 %v12355_v30, %v12355_v30 }
 0xd59   :  { %5189 = vadd.xlane.f32.xlu1 %v5188_v24  ;;  %v5009_v11 = vpop.xlane.xlu1 %5008 }
 0xd5a   :  { %v12367_v32 = vsub.f32 %v12091_v63, %v5039_v28  ;;  %v5044_v25 = vmul.f32 0.03125, %v5009_v11  ;;  %v5191_v7 = vsel %vm267_vm0, %v5105_v58, 0.0  ;;  %v5102_v49 = vmul.f32 %v12361_v22, %v12361_v22 }
 0xd5b   :  { %5192 = vadd.xlane.f32.xlu0 %v5191_v7  ;;  %v5012_v59 = vpop.xlane.xlu0 %5011 }
 0xd5c   :  { %v12373_v9 = vsub.f32 %v12100_v57, %v5044_v25  ;;  %v5045_v23 = vmul.f32 0.03125, %v5012_v59  ;;  %v5182_v60 = vsel %vm267_vm0, %v5102_v49, 0.0  ;;  %v5103_v24 = vmul.f32 %v12367_v32, %v12367_v32 }
 0xd5d   :  { %5183 = vadd.xlane.f32.xlu1 %v5182_v60  ;;  %v5003_v63 = vpop.xlane.xlu1 %5002 }
 0xd5e   :  { %v12379_v28 = vsub.f32 %v12116_v13, %v5045_v23  ;;  %v5042_v58 = vmul.f32 0.03125, %v5003_v63  ;;  %v5185_v11 = vsel %vm267_vm0, %v5103_v24, 0.0  ;;  %v5108_v7 = vmul.f32 %v12373_v9, %v12373_v9 }
 0xd5f   :  { %5186 = vadd.xlane.f32.xlu0 %v5185_v11  ;;  %v5006_v57 = vpop.xlane.xlu0 %5005 }
 0xd60   :  { %v12385_v25 = vsub.f32 %v12113_v8, %v5042_v58  ;;  %v5043_v49 = vmul.f32 0.03125, %v5006_v57  ;;  %v5200_v59 = vsel %vm267_vm0, %v5108_v7, 0.0  ;;  %v5109_v60 = vmul.f32 %v12379_v28, %v12379_v28 }
 0xd61   :  { %5201 = vadd.xlane.f32.xlu1 %v5200_v59  ;;  %v12402_v7 = vpop.xlane.xlu1 %5671 }
 0xd62   :  { %v12391_v13 = vsub.f32 %v12124_v48, %v5043_v49  ;;  %v5203_v23 = vsel %vm267_vm0, %v5109_v60, 0.0  ;;  %v5106_v24 = vmul.f32 %v12385_v25, %v12385_v25  ;;  %13667 = vst [vmem:[#allocation100_spill] sm:$0xff] %v12402_v7 }
 0xd63   :  { %5204 = vadd.xlane.f32.xlu0 %v5203_v23  ;;  %v12400_v11 = vpop.xlane.xlu0 %5668 }
 0xd64   :  { %v5194_v63 = vsel %vm267_vm0, %v5106_v24, 0.0  ;;  %v5107_v8 = vmul.f32 %v12391_v13, %v12391_v13  ;;  %13666 = vst [vmem:[#allocation106_spill] sm:$0xff] %v12400_v11 }
 0xd65   :  { %5195 = vadd.xlane.f32.xlu1 %v5194_v63  ;;  %v12406_v57 = vpop.xlane.xlu1 %5677 }
 0xd66   :  { %v5197_v58 = vsel %vm267_vm0, %v5107_v8, 0.0  ;;  %13669 = vst [vmem:[#allocation75_spill] sm:$0xff] %v12406_v57 }
 0xd67   :  { %5198 = vadd.xlane.f32.xlu0 %v5197_v58  ;;  %v12404_v48 = vpop.xlane.xlu0 %5674 }
 0xd68   :  { %13668 = vst [vmem:[#allocation56_spill] sm:$0xff] %v12404_v48 }
 0xd6b   :  { %v12408_v49 = vpop.xlane.xlu0 %5680 }
 0xd6c   :  { %13670 = vst [vmem:[#allocation90_spill] sm:$0xff] %v12408_v49 }
 0xdb6   :  { %v5118_v59 = vpop.xlane.xlu1 %5117 }
 0xdb7   :  { %v5208_v60 = vmul.f32 0.03125, %v5118_v59 }
 0xdb8   :  { %v5121_v23 = vpop.xlane.xlu0 %5120 }
 0xdb9   :  { %v5240_v24 = vadd.f32 1e-05, %v5208_v60  ;;  %v5209_v52 = vmul.f32 0.03125, %v5121_v23 }
 0xdba   :  { %v5112_v55 = vpop.xlane.xlu1 %5111 }
 0xdbb   :  { %8193 = vrsqrt.f32 %v5240_v24  ;;  %v5241_v63 = vadd.f32 1e-05, %v5209_v52  ;;  %v5206_v8 = vmul.f32 0.03125, %v5112_v55 }
 0xdbc   :  { %v5115_v58 = vpop.xlane.xlu0 %5114 }
 0xdbd   :  { %8195 = vrsqrt.f32 %v5241_v63  ;;  %v5238_v11 = vadd.f32 1e-05, %v5206_v8  ;;  %v5207_v41 = vmul.f32 0.03125, %v5115_v58  ;;  %v12413_v63 = vld [vmem:[%s12872_s17] ss:$0 sm:$0xff] }
 0xdbe   :  { %v5130_v7 = vpop.xlane.xlu1 %5129 }
 0xdbf   :  { %8197 = vrsqrt.f32 %v5238_v11  ;;  %v5239_v48 = vadd.f32 1e-05, %v5207_v41  ;;  %v5212_v43 = vmul.f32 0.03125, %v5130_v7 }
 0xdc0   :  { %v5133_v57 = vpop.xlane.xlu0 %5132 }
 0xdc1   :  { %8199 = vrsqrt.f32 %v5239_v48  ;;  %v5244_v49 = vadd.f32 1e-05, %v5212_v43  ;;  %v5213_v20 = vmul.f32 0.03125, %v5133_v57 }
 0xdc2   :  { %v5124_v59 = vpop.xlane.xlu1 %5123 }
 0xdc3   :  { %8201 = vrsqrt.f32 %v5244_v49  ;;  %v5245_v60 = vadd.f32 1e-05, %v5213_v20  ;;  %v5210_v23 = vmul.f32 0.03125, %v5124_v59  ;;  %v12419_v20 = vld [vmem:[%s12873_s18] ss:$0 sm:$0xff]  ;;  %s8425_s18 = smov [#allocation3]  }
 0xdc4   :  { %v5127_v56 = vpop.xlane.xlu0 %5126 }
 0xdc5   :  { %v8194_v24 = vpop.eup %8193  ;;  %8203 = vrsqrt.f32 %v5245_v60  ;;  %v5242_v52 = vadd.f32 1e-05, %v5210_v23  ;;  %v5211_v55 = vmul.f32 0.03125, %v5127_v56 }
 0xdc6   :  { %v5142_v41 = vpop.xlane.xlu1 %5141  ;;  %v5304_v11 = vmul.f32 %v8194_v24, %v12209_v21  ;;  %v12426_v21 = vld [vmem:[%s12874_s19] ss:$0 sm:$0xff]  ;;  %s6430_s19 = sshll.u32 %s8425_s18, 4  ;;  %s6431_s19 = int_to_ptr.vmem [resolvable:$true] %s6430_s19 }
 0xdc7   :  { %v8196_v7 = vpop.eup %8195  ;;  %8205 = vrsqrt.f32 %v5242_v52  ;;  %v5243_v43 = vadd.f32 1e-05, %v5211_v55  ;;  %v5216_v48 = vmul.f32 0.03125, %v5142_v41  ;;  %s8395_s12 = scalar_lea.vmem %s6431_s19, 4096  ;;  %p8400_p1 = scmp.lt.s32.totalorder %s6431_s19, %s6431_s19 }
 0xdc8   :  { %v5145_v57 = vpop.xlane.xlu0 %5144  ;;  %v5343_v56 = vmul.f32 %v12413_v63, %v5304_v11  ;;  %v5305_v49 = vmul.f32 %v8196_v7, %v12212_v50  ;;  %p8396_p0 = scmp.ne.s32.totalorder %s6431_s19, %s8395_s12  ;;  %p8401_p2 = scmp.lt.s32.totalorder %s8395_s12, %s8395_s12 }
 0xdc9   :  { %v8198_v8 = vpop.eup %8197  ;;  %8207 = vrsqrt.f32 %v5243_v43  ;;  %v5248_v58 = vadd.f32 1e-05, %v5216_v48  ;;  %v5217_v59 = vmul.f32 0.03125, %v5145_v57 }
 0xdca   :  { %v5136_v60 = vpop.xlane.xlu1 %5135  ;;  %v12429_v23 = vadd.f32 %v12419_v20, %v5343_v56  ;;  %v5344_v24 = vmul.f32 %v12413_v63, %v5305_v49  ;;  %v5302_v52 = vmul.f32 %v8198_v8, %v12217_v10  ;;  %p8402_p3 = por %p8401_p2, %p8400_p1 }
 0xdcb   :  { %v8200_v55 = vpop.eup %8199  ;;  %8209 = vrsqrt.f32 %v5248_v58  ;;  %v5249_v50 = vadd.f32 1e-05, %v5217_v59  ;;  %v5214_v41 = vmul.f32 0.03125, %v5136_v60 }
 0xdcc   :  { %13671 = vst [vmem:[#allocation71_spill] sm:$0xff] %v12429_v23  ;;  %v5139_v11 = vpop.xlane.xlu0 %5138  ;;  %v5421_v7 = vmul.f32 %v12426_v21, %v12429_v23  ;;  %v12436_v43 = vadd.f32 %v12419_v20, %v5344_v24  ;;  %v5341_v48 = vmul.f32 %v12413_v63, %v5302_v52  ;;  %v5303_v57 = vmul.f32 %v8200_v55, %v12223_v6  ;;  %p8403_p4 = pnand %p8402_p3, %p8396_p0 }
 0xdcd   :  { %v8202_v56 = vpop.eup %8201  ;;  %8211 = vrsqrt.f32 %v5249_v50  ;;  %v5246_v49 = vadd.f32 1e-05, %v5214_v41  ;;  %v5215_v14 = vmul.f32 0.03125, %v5139_v11 }
 0xdce   :  { %v5154_v10 = vpop.xlane.xlu1 %5153  ;;  %v5457_v8 = vsel %vm267_vm0, %v5421_v7, 0.0  ;;  %v5422_v58 = vmul.f32 %v12426_v21, %v12436_v43  ;;  %v12444_v59 = vadd.f32 %v12419_v20, %v5341_v48  ;;  %v5342_v60 = vmul.f32 %v12413_v63, %v5303_v57 }
 0xdcf   :  { %v8204_v24 = vpop.eup %8203  ;;  %8213 = vrsqrt.f32 %v5246_v49  ;;  %v5247_v52 = vadd.f32 1e-05, %v5215_v14  ;;  %v5220_v23 = vmul.f32 0.03125, %v5154_v10  ;;  %5458 = vadd.xlane.f32.xlu1 %v5457_v8  ;;  %v5308_v6 = vmul.f32 %v8202_v56, %v12229_v44 }
 0xdd0   :  { %v5157_v55 = vpop.xlane.xlu0 %5156  ;;  %v5460_v50 = vsel %vm267_vm0, %v5422_v58, 0.0  ;;  %v5419_v41 = vmul.f32 %v12426_v21, %v12444_v59  ;;  %v12452_v11 = vadd.f32 %v12419_v20, %v5342_v60  ;;  %v5309_v7 = vmul.f32 %v8204_v24, %v12235_v19 }
 0xdd1   :  { %v8206_v48 = vpop.eup %8205  ;;  %8215 = vrsqrt.f32 %v5247_v52  ;;  %v5252_v57 = vadd.f32 1e-05, %v5220_v23  ;;  %v5221_v49 = vmul.f32 0.03125, %v5157_v55  ;;  %5461 = vadd.xlane.f32.xlu0 %v5460_v50  ;;  %v5347_v14 = vmul.f32 %v12413_v63, %v5308_v6 }
 0xdd2   :  { %v5148_v10 = vpop.xlane.xlu1 %5147  ;;  %v5451_v44 = vsel %vm267_vm0, %v5419_v41, 0.0  ;;  %v5420_v56 = vmul.f32 %v12426_v21, %v12452_v11  ;;  %v5348_v8 = vmul.f32 %v12413_v63, %v5309_v7  ;;  %v5306_v58 = vmul.f32 %v8206_v48, %v12241_v37 }
 0xdd3   :  { %v8208_v60 = vpop.eup %8207  ;;  %8217 = vrsqrt.f32 %v5252_v57  ;;  %v5253_v19 = vadd.f32 1e-05, %v5221_v49  ;;  %v5218_v24 = vmul.f32 0.03125, %v5148_v10  ;;  %5452 = vadd.xlane.f32.xlu1 %v5451_v44  ;;  %v12462_v23 = vadd.f32 %v12419_v20, %v5347_v14 }
 0xdd4   :  { %v5151_v52 = vpop.xlane.xlu0 %5150  ;;  %v5454_v6 = vsel %vm267_vm0, %v5420_v56, 0.0  ;;  %v12466_v55 = vadd.f32 %v12419_v20, %v5348_v8  ;;  %v5345_v50 = vmul.f32 %v12413_v63, %v5306_v58  ;;  %v5307_v41 = vmul.f32 %v8208_v60, %v12247_v46 }
 0xdd5   :  { %v8210_v7 = vpop.eup %8209  ;;  %8219 = vrsqrt.f32 %v5253_v19  ;;  %v5250_v37 = vadd.f32 1e-05, %v5218_v24  ;;  %v5219_v48 = vmul.f32 0.03125, %v5151_v52  ;;  %5455 = vadd.xlane.f32.xlu0 %v5454_v6  ;;  %v5425_v57 = vmul.f32 %v12426_v21, %v12462_v23 }
 0xdd6   :  { %v5166_v49 = vpop.xlane.xlu1 %5165  ;;  %v5426_v14 = vmul.f32 %v12426_v21, %v12466_v55  ;;  %v12475_v10 = vadd.f32 %v12419_v20, %v5345_v50  ;;  %v5346_v44 = vmul.f32 %v12413_v63, %v5307_v41  ;;  %v5312_v56 = vmul.f32 %v8210_v7, %v12253_v31 }
 0xdd7   :  { %v8212_v46 = vpop.eup %8211  ;;  %8221 = vrsqrt.f32 %v5250_v37  ;;  %v5251_v8 = vadd.f32 1e-05, %v5219_v48  ;;  %v5224_v58 = vmul.f32 0.03125, %v5166_v49  ;;  %v5469_v60 = vsel %vm267_vm0, %v5425_v57, 0.0 }
 0xdd8   :  { %5470 = vadd.xlane.f32.xlu1 %v5469_v60  ;;  %v5169_v19 = vpop.xlane.xlu0 %5168  ;;  %v5472_v24 = vsel %vm267_vm0, %v5426_v14, 0.0  ;;  %v5423_v52 = vmul.f32 %v12426_v21, %v12475_v10  ;;  %v12484_v6 = vadd.f32 %v12419_v20, %v5346_v44  ;;  %v5351_v50 = vmul.f32 %v12413_v63, %v5312_v56 }
 0xdd9   :  { %v8214_v41 = vpop.eup %8213  ;;  %8223 = vrsqrt.f32 %v5251_v8  ;;  %v5256_v31 = vadd.f32 1e-05, %v5224_v58  ;;  %v5225_v7 = vmul.f32 0.03125, %v5169_v19  ;;  %5473 = vadd.xlane.f32.xlu0 %v5472_v24  ;;  %v5313_v37 = vmul.f32 %v8212_v46, %v12259_v34 }
 0xdda   :  { %v5160_v48 = vpop.xlane.xlu1 %5159  ;;  %v5463_v57 = vsel %vm267_vm0, %v5423_v52, 0.0  ;;  %v5424_v49 = vmul.f32 %v12426_v21, %v12484_v6  ;;  %v12492_v14 = vadd.f32 %v12419_v20, %v5351_v50  ;;  %v5310_v44 = vmul.f32 %v8214_v41, %v12265_v26 }
 0xddb   :  { %v8216_v60 = vpop.eup %8215  ;;  %8225 = vrsqrt.f32 %v5256_v31  ;;  %v5257_v56 = vadd.f32 1e-05, %v5225_v7  ;;  %v5222_v8 = vmul.f32 0.03125, %v5160_v48  ;;  %v5352_v58 = vmul.f32 %v12413_v63, %v5313_v37 }
 0xddc   :  { %5464 = vadd.xlane.f32.xlu1 %v5463_v57  ;;  %v5163_v19 = vpop.xlane.xlu0 %5162  ;;  %v5466_v34 = vsel %vm267_vm0, %v5424_v49, 0.0  ;;  %v5429_v46 = vmul.f32 %v12426_v21, %v12492_v14  ;;  %v5349_v24 = vmul.f32 %v12413_v63, %v5310_v44  ;;  %v5311_v52 = vmul.f32 %v8216_v60, %v12271_v18 }
 0xddd   :  { %v8218_v50 = vpop.eup %8217  ;;  %8227 = vrsqrt.f32 %v5257_v56  ;;  %v5254_v26 = vadd.f32 1e-05, %v5222_v8  ;;  %v5223_v41 = vmul.f32 0.03125, %v5163_v19  ;;  %5467 = vadd.xlane.f32.xlu0 %v5466_v34  ;;  %v12502_v31 = vadd.f32 %v12419_v20, %v5352_v58 }
 0xdde   :  { %v5178_v7 = vpop.xlane.xlu1 %5177  ;;  %v5481_v37 = vsel %vm267_vm0, %v5429_v46, 0.0  ;;  %v12506_v48 = vadd.f32 %v12419_v20, %v5349_v24  ;;  %v5350_v57 = vmul.f32 %v12413_v63, %v5311_v52  ;;  %v5316_v49 = vmul.f32 %v8218_v50, %v12277_v17 }
 0xddf   :  { %v8220_v44 = vpop.eup %8219  ;;  %8229 = vrsqrt.f32 %v5254_v26  ;;  %v5255_v18 = vadd.f32 1e-05, %v5223_v41  ;;  %v5228_v60 = vmul.f32 0.03125, %v5178_v7  ;;  %v5430_v56 = vmul.f32 %v12426_v21, %v12502_v31 }
 0xde0   :  { %5482 = vadd.xlane.f32.xlu1 %v5481_v37  ;;  %v5181_v8 = vpop.xlane.xlu0 %5180  ;;  %v5427_v58 = vmul.f32 %v12426_v21, %v12506_v48  ;;  %v12515_v19 = vadd.f32 %v12419_v20, %v5350_v57  ;;  %v5355_v34 = vmul.f32 %v12413_v63, %v5316_v49  ;;  %v5317_v46 = vmul.f32 %v8220_v44, %v12283_v45 }
 0xde1   :  { %v8222_v17 = vpop.eup %8221  ;;  %8231 = vrsqrt.f32 %v5255_v18  ;;  %v5260_v24 = vadd.f32 1e-05, %v5228_v60  ;;  %v5229_v52 = vmul.f32 0.03125, %v5181_v8  ;;  %v5484_v50 = vsel %vm267_vm0, %v5430_v56, 0.0 }
 0xde2   :  { %5485 = vadd.xlane.f32.xlu0 %v5484_v50  ;;  %v5172_v26 = vpop.xlane.xlu1 %5171  ;;  %v5475_v41 = vsel %vm267_vm0, %v5427_v58, 0.0  ;;  %v5428_v7 = vmul.f32 %v12426_v21, %v12515_v19  ;;  %v12524_v37 = vadd.f32 %v12419_v20, %v5355_v34  ;;  %v5356_v57 = vmul.f32 %v12413_v63, %v5317_v46 }
 0xde3   :  { %v8224_v49 = vpop.eup %8223  ;;  %8233 = vrsqrt.f32 %v5260_v24  ;;  %v5261_v45 = vadd.f32 1e-05, %v5229_v52  ;;  %v5226_v44 = vmul.f32 0.03125, %v5172_v26  ;;  %v5314_v18 = vmul.f32 %v8222_v17, %v12289_v47 }
 0xde4   :  { %5476 = vadd.xlane.f32.xlu1 %v5475_v41  ;;  %v5175_v60 = vpop.xlane.xlu0 %5174  ;;  %v5478_v56 = vsel %vm267_vm0, %v5428_v7, 0.0  ;;  %v5433_v8 = vmul.f32 %v12426_v21, %v12524_v37  ;;  %v12532_v58 = vadd.f32 %v12419_v20, %v5356_v57  ;;  %v5315_v34 = vmul.f32 %v8224_v49, %v12295_v4 }
 0xde5   :  { %v8226_v50 = vpop.eup %8225  ;;  %8235 = vrsqrt.f32 %v5261_v45  ;;  %v5258_v46 = vadd.f32 1e-05, %v5226_v44  ;;  %v5227_v24 = vmul.f32 0.03125, %v5175_v60  ;;  %v5353_v52 = vmul.f32 %v12413_v63, %v5314_v18 }
 0xde6   :  { %5479 = vadd.xlane.f32.xlu0 %v5478_v56  ;;  %v5190_v47 = vpop.xlane.xlu1 %5189  ;;  %v5493_v17 = vsel %vm267_vm0, %v5433_v8, 0.0  ;;  %v5434_v26 = vmul.f32 %v12426_v21, %v12532_v58  ;;  %v5354_v41 = vmul.f32 %v12413_v63, %v5315_v34  ;;  %v5320_v7 = vmul.f32 %v8226_v50, %v12301_v35 }
 0xde7   :  { %v8228_v57 = vpop.eup %8227  ;;  %8237 = vrsqrt.f32 %v5258_v46  ;;  %v5259_v4 = vadd.f32 1e-05, %v5227_v24  ;;  %v5232_v49 = vmul.f32 0.03125, %v5190_v47  ;;  %v12542_v45 = vadd.f32 %v12419_v20, %v5353_v52 }
 0xde8   :  { %5494 = vadd.xlane.f32.xlu1 %v5493_v17  ;;  %v5193_v44 = vpop.xlane.xlu0 %5192  ;;  %v5496_v18 = vsel %vm267_vm0, %v5434_v26, 0.0  ;;  %v12546_v60 = vadd.f32 %v12419_v20, %v5354_v41  ;;  %v5359_v56 = vmul.f32 %v12413_v63, %v5320_v7  ;;  %v5321_v8 = vmul.f32 %v8228_v57, %v12307_v1 }
 0xde9   :  { %v8230_v34 = vpop.eup %8229  ;;  %8239 = vrsqrt.f32 %v5259_v4  ;;  %v5264_v35 = vadd.f32 1e-05, %v5232_v49  ;;  %v5233_v50 = vmul.f32 0.03125, %v5193_v44  ;;  %v5431_v46 = vmul.f32 %v12426_v21, %v12542_v45 }
 0xdea   :  { %5497 = vadd.xlane.f32.xlu0 %v5496_v18  ;;  %v5184_v24 = vpop.xlane.xlu1 %5183  ;;  %v5432_v52 = vmul.f32 %v12426_v21, %v12546_v60  ;;  %v12555_v47 = vadd.f32 %v12419_v20, %v5359_v56  ;;  %v5360_v17 = vmul.f32 %v12413_v63, %v5321_v8  ;;  %v5318_v26 = vmul.f32 %v8230_v34, %v12313_v40 }
 0xdeb   :  { %v8232_v1 = vpop.eup %8231  ;;  %8241 = vrsqrt.f32 %v5264_v35  ;;  %v5265_v41 = vadd.f32 1e-05, %v5233_v50  ;;  %v5230_v7 = vmul.f32 0.03125, %v5184_v24  ;;  %v5487_v57 = vsel %vm267_vm0, %v5431_v46, 0.0 }
 0xdec   :  { %5488 = vadd.xlane.f32.xlu1 %v5487_v57  ;;  %v5187_v4 = vpop.xlane.xlu0 %5186  ;;  %v5490_v49 = vsel %vm267_vm0, %v5432_v52, 0.0  ;;  %v5437_v44 = vmul.f32 %v12426_v21, %v12555_v47  ;;  %v12564_v18 = vadd.f32 %v12419_v20, %v5360_v17  ;;  %v5357_v56 = vmul.f32 %v12413_v63, %v5318_v26 }
 0xded   :  { %v8234_v8 = vpop.eup %8233  ;;  %8243 = vrsqrt.f32 %v5265_v41  ;;  %v5262_v40 = vadd.f32 1e-05, %v5230_v7  ;;  %v5231_v34 = vmul.f32 0.03125, %v5187_v4  ;;  %v5319_v35 = vmul.f32 %v8232_v1, %v12319_v33 }
 0xdee   :  { %5491 = vadd.xlane.f32.xlu0 %v5490_v49  ;;  %v5202_v50 = vpop.xlane.xlu1 %5201  ;;  %v5505_v46 = vsel %vm267_vm0, %v5437_v44, 0.0  ;;  %v5438_v24 = vmul.f32 %v12426_v21, %v12564_v18  ;;  %v12572_v52 = vadd.f32 %v12419_v20, %v5357_v56  ;;  %v5324_v17 = vmul.f32 %v8234_v8, %v12325_v0 }
 0xdef   :  { %v8236_v57 = vpop.eup %8235  ;;  %8245 = vrsqrt.f32 %v5262_v40  ;;  %v5263_v26 = vadd.f32 1e-05, %v5231_v34  ;;  %v5236_v41 = vmul.f32 0.03125, %v5202_v50  ;;  %v5358_v7 = vmul.f32 %v12413_v63, %v5319_v35 }
 0xdf0   :  { %5506 = vadd.xlane.f32.xlu1 %v5505_v46  ;;  %v5205_v33 = vpop.xlane.xlu0 %5204  ;;  %v5508_v1 = vsel %vm267_vm0, %v5438_v24, 0.0  ;;  %v5435_v4 = vmul.f32 %v12426_v21, %v12572_v52  ;;  %v5363_v49 = vmul.f32 %v12413_v63, %v5324_v17  ;;  %v5325_v44 = vmul.f32 %v8236_v57, %v12331_v2 }
 0xdf1   :  { %v8238_v56 = vpop.eup %8237  ;;  %8247 = vrsqrt.f32 %v5263_v26  ;;  %v5268_v0 = vadd.f32 1e-05, %v5236_v41  ;;  %v5237_v8 = vmul.f32 0.03125, %v5205_v33  ;;  %v12582_v40 = vadd.f32 %v12419_v20, %v5358_v7 }
 0xdf2   :  { %5509 = vadd.xlane.f32.xlu0 %v5508_v1  ;;  %v5196_v34 = vpop.xlane.xlu1 %5195  ;;  %v5499_v35 = vsel %vm267_vm0, %v5435_v4, 0.0  ;;  %v12586_v50 = vadd.f32 %v12419_v20, %v5363_v49  ;;  %v5364_v46 = vmul.f32 %v12413_v63, %v5325_v44  ;;  %v5322_v24 = vmul.f32 %v8238_v56, %v12337_v3 }
 0xdf3   :  { %v8240_v17 = vpop.eup %8239  ;;  %8249 = vrsqrt.f32 %v5268_v0  ;;  %v5269_v2 = vadd.f32 1e-05, %v5237_v8  ;;  %v5234_v57 = vmul.f32 0.03125, %v5196_v34  ;;  %v5436_v26 = vmul.f32 %v12426_v21, %v12582_v40 }
 0xdf4   :  { %5500 = vadd.xlane.f32.xlu1 %v5499_v35  ;;  %v5199_v41 = vpop.xlane.xlu0 %5198  ;;  %v5441_v7 = vmul.f32 %v12426_v21, %v12586_v50  ;;  %v12595_v33 = vadd.f32 %v12419_v20, %v5364_v46  ;;  %v5361_v1 = vmul.f32 %v12413_v63, %v5322_v24  ;;  %v5323_v4 = vmul.f32 %v8240_v17, %v12343_v39 }
 0xdf5   :  { %v8242_v3 = vpop.eup %8241  ;;  %8251 = vrsqrt.f32 %v5269_v2  ;;  %v5266_v49 = vadd.f32 1e-05, %v5234_v57  ;;  %v5235_v44 = vmul.f32 0.03125, %v5199_v41  ;;  %v5502_v56 = vsel %vm267_vm0, %v5436_v26, 0.0 }
 0xdf6   :  { %5503 = vadd.xlane.f32.xlu0 %v5502_v56  ;;  %v5517_v0 = vsel %vm267_vm0, %v5441_v7, 0.0  ;;  %v5442_v8 = vmul.f32 %v12426_v21, %v12595_v33  ;;  %v12604_v34 = vadd.f32 %v12419_v20, %v5361_v1  ;;  %v5362_v35 = vmul.f32 %v12413_v63, %v5323_v4 }
 0xdf7   :  { %v8244_v46 = vpop.eup %8243  ;;  %8253 = vrsqrt.f32 %v5266_v49  ;;  %v5267_v39 = vadd.f32 1e-05, %v5235_v44  ;;  %v5328_v24 = vmul.f32 %v8242_v3, %v12349_v5 }
 0xdf8   :  { %5518 = vadd.xlane.f32.xlu1 %v5517_v0  ;;  %v5520_v17 = vsel %vm267_vm0, %v5442_v8, 0.0  ;;  %v5439_v2 = vmul.f32 %v12426_v21, %v12604_v34  ;;  %v12612_v57 = vadd.f32 %v12419_v20, %v5362_v35  ;;  %v5329_v26 = vmul.f32 %v8244_v46, %v12355_v30 }
 0xdf9   :  { %v8246_v41 = vpop.eup %8245  ;;  %8255 = vrsqrt.f32 %v5267_v39  ;;  %v5367_v7 = vmul.f32 %v12413_v63, %v5328_v24 }
 0xdfa   :  { %5521 = vadd.xlane.f32.xlu0 %v5520_v17  ;;  %v5511_v1 = vsel %vm267_vm0, %v5439_v2, 0.0  ;;  %v5440_v5 = vmul.f32 %v12426_v21, %v12612_v57  ;;  %v5368_v4 = vmul.f32 %v12413_v63, %v5329_v26  ;;  %v5326_v3 = vmul.f32 %v8246_v41, %v12361_v22 }
 0xdfb   :  { %v8248_v49 = vpop.eup %8247  ;;  %v12622_v44 = vadd.f32 %v12419_v20, %v5367_v7 }
 0xdfc   :  { %5512 = vadd.xlane.f32.xlu1 %v5511_v1  ;;  %v5514_v30 = vsel %vm267_vm0, %v5440_v5, 0.0  ;;  %v12626_v56 = vadd.f32 %v12419_v20, %v5368_v4  ;;  %v5365_v0 = vmul.f32 %v12413_v63, %v5326_v3  ;;  %v5327_v8 = vmul.f32 %v8248_v49, %v12367_v32 }
 0xdfd   :  { %v8250_v35 = vpop.eup %8249  ;;  %v5445_v46 = vmul.f32 %v12426_v21, %v12622_v44  ;;  %v8424_v5 = vmov 0  }
 0xdfe   :  { %5515 = vadd.xlane.f32.xlu0 %v5514_v30  ;;  %v5446_v22 = vmul.f32 %v12426_v21, %v12626_v56  ;;  %v12635_v39 = vadd.f32 %v12419_v20, %v5365_v0  ;;  %v5366_v24 = vmul.f32 %v12413_v63, %v5327_v8  ;;  %v5332_v17 = vmul.f32 %v8250_v35, %v12373_v9 }
 0xdff   :  { %v8252_v2 = vpop.eup %8251  ;;  %v5529_v26 = vsel %vm267_vm0, %v5445_v46, 0.0  ;;  %7734 = vset.pattern.permute.xlu0 %v8424_v5  ;;  %7733 = vset.pattern.permute.xlu1 %v8424_v5 }
 0xe00   :  { %5530 = vadd.xlane.f32.xlu1 %v5529_v26  ;;  %v5532_v32 = vsel %vm267_vm0, %v5446_v22, 0.0  ;;  %v5443_v41 = vmul.f32 %v12426_v21, %v12635_v39  ;;  %v12644_v7 = vadd.f32 %v12419_v20, %v5366_v24  ;;  %v5371_v1 = vmul.f32 %v12413_v63, %v5332_v17 }
 0xe01   :  { %v8254_v4 = vpop.eup %8253  ;;  %v5333_v3 = vmul.f32 %v8252_v2, %v12379_v28 }
 0xe02   :  { %5533 = vadd.xlane.f32.xlu0 %v5532_v32  ;;  %v5523_v9 = vsel %vm267_vm0, %v5443_v41, 0.0  ;;  %v5444_v49 = vmul.f32 %v12426_v21, %v12644_v7  ;;  %v12652_v30 = vadd.f32 %v12419_v20, %v5371_v1  ;;  %v5330_v0 = vmul.f32 %v8254_v4, %v12385_v25 }
 0xe03   :  { %v8256_v8 = vpop.eup %8255  ;;  %v5372_v35 = vmul.f32 %v12413_v63, %v5333_v3  ;;  %v12681_v3 = vld [vmem:[#allocation2] ss:$0 sm:$0xff] }
 0xe04   :  { %5524 = vadd.xlane.f32.xlu1 %v5523_v9  ;;  %v5526_v46 = vsel %vm267_vm0, %v5444_v49, 0.0  ;;  %v5449_v28 = vmul.f32 %v12426_v21, %v12652_v30  ;;  %v5369_v22 = vmul.f32 %v12413_v63, %v5330_v0  ;;  %v5331_v24 = vmul.f32 %v8256_v8, %v12391_v13 }
 0xe05   :  { %v12662_v17 = vadd.f32 %v12419_v20, %v5372_v35 }
 0xe06   :  { %5527 = vadd.xlane.f32.xlu0 %v5526_v46  ;;  %v5541_v2 = vsel %vm267_vm0, %v5449_v28, 0.0  ;;  %v12666_v25 = vadd.f32 %v12419_v20, %v5369_v22  ;;  %v5370_v26 = vmul.f32 %v12413_v63, %v5331_v24 }
 0xe07   :  { %v5450_v32 = vmul.f32 %v12426_v21, %v12662_v17 }
 0xe08   :  { %5542 = vadd.xlane.f32.xlu1 %v5541_v2  ;;  %v5447_v41 = vmul.f32 %v12426_v21, %v12666_v25  ;;  %v12674_v13 = vadd.f32 %v12419_v20, %v5370_v26 }
 0xe09   :  { %v5544_v1 = vsel %vm267_vm0, %v5450_v32, 0.0 }
 0xe0a   :  { %5545 = vadd.xlane.f32.xlu0 %v5544_v1  ;;  %v5535_v5 = vsel %vm267_vm0, %v5447_v41, 0.0  ;;  %v5448_v4 = vmul.f32 %v12426_v21, %v12674_v13 }
 0xe0c   :  { %5536 = vadd.xlane.f32.xlu1 %v5535_v5  ;;  %v5538_v63 = vsel %vm267_vm0, %v5448_v4, 0.0 }
 0xe0e   :  { %5539 = vadd.xlane.f32.xlu0 %v5538_v63 }
 0xe5c   :  { %v5459_v9 = vpop.xlane.xlu1 %5458 }
 0xe5d   :  { %v5684_v49 = vadd.f32 %v12151_v62, %v5459_v9 }
 0xe5e   :  { %v5462_v0 = vpop.xlane.xlu0 %5461 }
 0xe5f   :  { %v5723_v20 = vadd.f32 %v12681_v3, %v5684_v49  ;;  %v5685_v8 = vadd.f32 %v12161_v53, %v5462_v0 }
 0xe60   :  { %v5453_v35 = vpop.xlane.xlu1 %5452 }
 0xe61   :  { %v6640_v46 = vmul.f32 -1.442695, %v5723_v20  ;;  %v5724_v28 = vadd.f32 %v12681_v3, %v5685_v8  ;;  %v5682_v21 = vadd.f32 %v12135_v51, %v5453_v35 }
 0xe62   :  { %v5456_v22 = vpop.xlane.xlu0 %5455 }
 0xe63   :  { %8257 = vpow2.f32 %v6640_v46  ;;  %v6641_v24 = vmul.f32 -1.442695, %v5724_v28  ;;  %v5721_v2 = vadd.f32 %v12681_v3, %v5682_v21  ;;  %v5683_v26 = vadd.f32 %v12154_v15, %v5456_v22 }
 0xe65   :  { %v6638_v32 = vmul.f32 -1.442695, %v5721_v2  ;;  %v5722_v62 = vadd.f32 %v12681_v3, %v5683_v26  ;;  %v5471_v41 = vpop.xlane.xlu1 %5470  ;;  %8259 = vpow2.f32 %v6641_v24 }
 0xe66   :  { %v5688_v53 = vadd.f32 %v12164_v54, %v5471_v41  ;;  %v5474_v63 = vpop.xlane.xlu0 %5473 }
 0xe67   :  { %8261 = vpow2.f32 %v6638_v32  ;;  %v6639_v1 = vmul.f32 -1.442695, %v5722_v62  ;;  %v5689_v0 = vadd.f32 %v12170_v36, %v5474_v63 }
 0xe68   :  { %v5727_v5 = vadd.f32 %v12681_v3, %v5688_v53 }
 0xe69   :  { %8263 = vpow2.f32 %v6639_v1  ;;  %v5465_v51 = vpop.xlane.xlu1 %5464  ;;  %v5728_v24 = vadd.f32 %v12681_v3, %v5689_v0 }
 0xe6a   :  { %v6644_v4 = vmul.f32 -1.442695, %v5727_v5  ;;  %v5686_v9 = vadd.f32 %v12159_v29, %v5465_v51  ;;  %v5468_v28 = vpop.xlane.xlu0 %5467 }
 0xe6b   :  { %v5687_v36 = vadd.f32 %v12166_v61, %v5468_v28  ;;  %v6645_v53 = vmul.f32 -1.442695, %v5728_v24 }
 0xe6c   :  { %8265 = vpow2.f32 %v6644_v4  ;;  %v5725_v15 = vadd.f32 %v12681_v3, %v5686_v9 }
 0xe6d   :  { %v8258_v49 = vpop.eup %8257  ;;  %v5483_v20 = vpop.xlane.xlu1 %5482  ;;  %v5726_v9 = vadd.f32 %v12681_v3, %v5687_v36 }
 0xe6e   :  { %v5851_v8 = vadd.f32 1.0, %v8258_v49  ;;  %v6642_v35 = vmul.f32 -1.442695, %v5725_v15  ;;  %v5692_v54 = vadd.f32 %v12172_v27, %v5483_v20 }
 0xe6f   :  { %v8260_v46 = vpop.eup %8259 }
 0xe70   :  { %8267 = vrcp.f32 %v5851_v8  ;;  %v5731_v21 = vadd.f32 %v12681_v3, %v5692_v54  ;;  %v5852_v41 = vadd.f32 1.0, %v8260_v46  ;;  %v6643_v8 = vmul.f32 -1.442695, %v5726_v9 }
 0xe71   :  { %v8262_v22 = vpop.eup %8261  ;;  %8269 = vpow2.f32 %v6642_v35  ;;  %v5477_v29 = vpop.xlane.xlu1 %5476 }
 0xe72   :  { %v5849_v2 = vadd.f32 1.0, %v8262_v22  ;;  %v6648_v26 = vmul.f32 -1.442695, %v5731_v21  ;;  %v5690_v62 = vadd.f32 %v12168_v42, %v5477_v29  ;;  %v5486_v21 = vpop.xlane.xlu0 %5485 }
 0xe73   :  { %v8264_v32 = vpop.eup %8263  ;;  %v5693_v36 = vadd.f32 %v12178_v38, %v5486_v21 }
 0xe74   :  { %8271 = vrcp.f32 %v5849_v2  ;;  %v5850_v27 = vadd.f32 1.0, %v8264_v32  ;;  %v5729_v1 = vadd.f32 %v12681_v3, %v5690_v62 }
 0xe75   :  { %8273 = vpow2.f32 %v6648_v26  ;;  %v5495_v5 = vpop.xlane.xlu1 %5494  ;;  %v5732_v9 = vadd.f32 %v12681_v3, %v5693_v36 }
 0xe76   :  { %v8266_v51 = vpop.eup %8265  ;;  %8275 = vrcp.f32 %v5850_v27  ;;  %v5696_v4 = vadd.f32 %v12180_v12, %v5495_v5  ;;  %v6646_v15 = vmul.f32 -1.442695, %v5729_v1  ;;  %v5480_v27 = vpop.xlane.xlu0 %5479  ;;  %v13672_v1 = vld [vmem:[#allocation63_spill] sm:$0xff] }
 0xe77   :  { %v5855_v63 = vadd.f32 1.0, %v8266_v51  ;;  %8277 = vrcp.f32 %v5852_v41 }
 0xe78   :  { %8279 = vpow2.f32 %v6645_v53  ;;  %v5735_v61 = vadd.f32 %v12681_v3, %v5696_v4 }
 0xe79   :  { %v5489_v42 = vpop.xlane.xlu1 %5488  ;;  %8281 = vrcp.f32 %v5855_v63 }
 0xe7a   :  { %v8268_v49 = vpop.eup %8267  ;;  %v5694_v0 = vadd.f32 %v12176_v16, %v5489_v42  ;;  %8283 = vpow2.f32 %v6646_v15  ;;  %v6652_v12 = vmul.f32 -1.442695, %v5735_v61  ;;  %v13673_v15 = vld [vmem:[#allocation86_spill] sm:$0xff] }
 0xe7b   :  { %v8270_v20 = vpop.eup %8269  ;;  %5957 = vperm.xlu1 %7733, %v8268_v49   ;;  %v6139_v35 = vsub.f32 1.0, %v8268_v49  ;;  %v5691_v61 = vadd.f32 %v13673_v15, %v5480_v27 }
 0xe7c   :  { %v5853_v54 = vadd.f32 1.0, %v8270_v20  ;;  %v5733_v46 = vadd.f32 %v12681_v3, %v5694_v0 }
 0xe7d   :  { %6181 = vperm.xlu0 %7734, %v6139_v35   ;;  %v5507_v29 = vpop.xlane.xlu1 %5506 }
 0xe7e   :  { %v8272_v28 = vpop.eup %8271  ;;  %8285 = vrcp.f32 %v5853_v54  ;;  %v6650_v16 = vmul.f32 -1.442695, %v5733_v46  ;;  %v5700_v5 = vadd.f32 %v13672_v1, %v5507_v29  ;;  %v6649_v46 = vmul.f32 -1.442695, %v5732_v9  ;;  %v13675_v1 = vld [vmem:[#allocation57_spill] sm:$0xff]  ;;  %v13676_v9 = vld [vmem:[#allocation144_spill] sm:$0xff] }
 0xe7f   :  { %v8274_v22 = vpop.eup %8273  ;;  %8287 = vpow2.f32 %v6643_v8  ;;  %5947 = vperm.xlu1 %7733, %v8272_v28   ;;  %v6137_v62 = vsub.f32 1.0, %v8272_v28  ;;  %v13674_v8 = vld [vmem:[#allocation65_spill] sm:$0xff]  ;;  %v5730_v28 = vadd.f32 %v12681_v3, %v5691_v61 }
 0xe80   :  { %v8276_v24 = vpop.eup %8275  ;;  %8289 = vpow2.f32 %v6652_v12  ;;  %v5859_v26 = vadd.f32 1.0, %v8274_v22  ;;  %v5739_v20 = vadd.f32 %v12681_v3, %v5700_v5 }
 0xe81   :  { %5952 = vperm.xlu0 %7734, %v8276_v24   ;;  %v8278_v2 = vpop.eup %8277  ;;  %8291 = vpow2.f32 %v6650_v16  ;;  %v5501_v63 = vpop.xlane.xlu1 %5500  ;;  %v6138_v54 = vsub.f32 1.0, %v8276_v24  ;;  %v6647_v36 = vmul.f32 -1.442695, %v5730_v28 }
 0xe82   :  { %v8280_v32 = vpop.eup %8279  ;;  %v6140_v51 = vsub.f32 1.0, %v8278_v2  ;;  %8293 = vrcp.f32 %v5859_v26  ;;  %v5698_v35 = vadd.f32 %v13674_v8, %v5501_v63  ;;  %v6656_v29 = vmul.f32 -1.442695, %v5739_v20  ;;  %v5498_v26 = vpop.xlane.xlu0 %5497 }
 0xe83   :  { %5962 = vperm.xlu1 %7733, %v8278_v2   ;;  %v8282_v41 = vpop.eup %8281  ;;  %v5856_v49 = vadd.f32 1.0, %v8280_v32  ;;  %v5697_v5 = vadd.f32 %v13675_v1, %v5498_v26 }
 0xe84   :  { %v8284_v53 = vpop.eup %8283  ;;  %v6143_v42 = vsub.f32 1.0, %v8282_v41  ;;  %v5737_v16 = vadd.f32 %v12681_v3, %v5698_v35 }
 0xe85   :  { %6171 = vperm.xlu0 %7734, %v6137_v62   ;;  %v5857_v4 = vadd.f32 1.0, %v8284_v53  ;;  %v5519_v62 = vpop.xlane.xlu1 %5518 }
 0xe86   :  { %v6654_v27 = vmul.f32 -1.442695, %v5737_v16  ;;  %v5492_v63 = vpop.xlane.xlu0 %5491  ;;  %v5704_v15 = vadd.f32 %v13676_v9, %v5519_v62 }
 0xe87   :  { %6186 = vperm.xlu1 %7733, %v6140_v51   ;;  %8295 = vrcp.f32 %v5857_v4 }
 0xe88   :  { %v8286_v38 = vpop.eup %8285  ;;  %8297 = vrcp.f32 %v5856_v49  ;;  %v13677_v49 = vld [vmem:[#allocation89_spill] sm:$0xff]  ;;  %v5743_v35 = vadd.f32 %v12681_v3, %v5704_v15  ;;  %v13679_v15 = vld [vmem:[#allocation62_spill] sm:$0xff] }
 0xe89   :  { %v8288_v0 = vpop.eup %8287  ;;  %6201 = vperm.xlu0 %7734, %v6143_v42   ;;  %v6141_v21 = vsub.f32 1.0, %v8286_v38  ;;  %8299 = vpow2.f32 %v6649_v46  ;;  %v5513_v61 = vpop.xlane.xlu1 %5512  ;;  %v5736_v42 = vadd.f32 %v12681_v3, %v5697_v5 }
 0xe8a   :  { %v8290_v12 = vpop.eup %8289  ;;  %v5854_v22 = vadd.f32 1.0, %v8288_v0  ;;  %v5695_v0 = vadd.f32 %v13677_v49, %v5492_v63  ;;  %v13680_v49 = vld [vmem:[#allocation53_spill] sm:$0xff] }
 0xe8b   :  { %6176 = vperm.xlu1 %7733, %v6138_v54   ;;  %v5863_v2 = vadd.f32 1.0, %v8290_v12  ;;  %v8292_v32 = vpop.eup %8291  ;;  %v6653_v28 = vmul.f32 -1.442695, %v5736_v42 }
 0xe8c   :  { %v8294_v24 = vpop.eup %8293  ;;  %8301 = vrcp.f32 %v5854_v22  ;;  %v5861_v53 = vadd.f32 1.0, %v8292_v32 }
 0xe8d   :  { %6191 = vperm.xlu0 %7734, %v6141_v21   ;;  %8303 = vpow2.f32 %v6656_v29  ;;  %v6147_v51 = vsub.f32 1.0, %v8294_v24  ;;  %v5734_v21 = vadd.f32 %v12681_v3, %v5695_v0  ;;  %v5531_v5 = vpop.xlane.xlu1 %5530 }
 0xe8e   :  { %8305 = vrcp.f32 %v5863_v2  ;;  %v6660_v2 = vmul.f32 -1.442695, %v5743_v35  ;;  %v5708_v0 = vadd.f32 %v13680_v49, %v5531_v5  ;;  %v13681_v35 = vld [vmem:[#allocation58_spill] sm:$0xff] }
 0xe8f   :  { %5977 = vperm.xlu1 %7733, %v8282_v41   ;;  %8307 = vpow2.f32 %v6647_v36 }
 0xe90   :  { %8309 = vpow2.f32 %v6654_v27  ;;  %v6651_v27 = vmul.f32 -1.442695, %v5734_v21 }
 0xe91   :  { %5997 = vperm.xlu0 %7734, %v8294_v24   ;;  %v8296_v4 = vpop.eup %8295  ;;  %8311 = vrcp.f32 %v5861_v53  ;;  %v5510_v24 = vpop.xlane.xlu0 %5509 }
 0xe92   :  { %v8298_v41 = vpop.eup %8297  ;;  %v6145_v20 = vsub.f32 1.0, %v8296_v4  ;;  %8313 = vpow2.f32 %v6653_v28  ;;  %v13682_v28 = vld [vmem:[#allocation94_spill] sm:$0xff] }
 0xe93   :  { %5967 = vperm.xlu1 %7733, %v8286_v38   ;;  %v8300_v8 = vpop.eup %8299  ;;  %v13678_v38 = vld [vmem:[#allocation68_spill] sm:$0xff]  ;;  %v6144_v32 = vsub.f32 1.0, %v8298_v41 }
 0xe94   :  { %v5702_v54 = vadd.f32 %v13678_v38, %v5513_v61  ;;  %v5860_v29 = vadd.f32 1.0, %v8300_v8  ;;  %v5701_v61 = vadd.f32 %v13679_v15, %v5510_v24 }
 0xe95   :  { %6221 = vperm.xlu0 %7734, %v6147_v51   ;;  %v5504_v42 = vpop.xlane.xlu0 %5503 }
 0xe96   :  { %v8302_v12 = vpop.eup %8301  ;;  %v5741_v26 = vadd.f32 %v12681_v3, %v5702_v54  ;;  %8315 = vrcp.f32 %v5860_v29  ;;  %v5740_v8 = vadd.f32 %v12681_v3, %v5701_v61  ;;  %v5699_v38 = vadd.f32 %v13681_v35, %v5504_v42  ;;  %v13683_v42 = vld [vmem:[#allocation143_spill] sm:$0xff] }
 0xe97   :  { %5982 = vperm.xlu1 %7733, %v8298_v41   ;;  %v8304_v46 = vpop.eup %8303  ;;  %8317 = vpow2.f32 %v6660_v2  ;;  %v6142_v63 = vsub.f32 1.0, %v8302_v12 }
 0xe98   :  { %v8306_v22 = vpop.eup %8305  ;;  %v5867_v36 = vadd.f32 1.0, %v8304_v46  ;;  %v6658_v51 = vmul.f32 -1.442695, %v5741_v26  ;;  %v5747_v46 = vadd.f32 %v12681_v3, %v5708_v0  ;;  %v5738_v2 = vadd.f32 %v12681_v3, %v5699_v38 }
 0xe99   :  { %6211 = vperm.xlu0 %7734, %v6145_v20   ;;  %v8308_v16 = vpop.eup %8307  ;;  %v6151_v41 = vsub.f32 1.0, %v8306_v22  ;;  %v5525_v20 = vpop.xlane.xlu1 %5524 }
 0xe9a   :  { %v8310_v62 = vpop.eup %8309  ;;  %v5858_v1 = vadd.f32 1.0, %v8308_v16  ;;  %8319 = vrcp.f32 %v5867_v36  ;;  %v5706_v21 = vadd.f32 %v13682_v28, %v5525_v20  ;;  %v6657_v16 = vmul.f32 -1.442695, %v5740_v8  ;;  %v13684_v8 = vld [vmem:[#allocation75_spill] sm:$0xff] }
 0xe9b   :  { %5972 = vperm.xlu1 %7733, %v8302_v12   ;;  %v8312_v53 = vpop.eup %8311  ;;  %v5865_v9 = vadd.f32 1.0, %v8310_v62  ;;  %8321 = vpow2.f32 %v6651_v27  ;;  %v6664_v24 = vmul.f32 -1.442695, %v5747_v46  ;;  %v6655_v5 = vmul.f32 -1.442695, %v5738_v2  ;;  %v13685_v46 = vld [vmem:[#allocation88_spill] sm:$0xff] }
 0xe9c   :  { %8323 = vrcp.f32 %v5858_v1  ;;  %v6149_v54 = vsub.f32 1.0, %v8312_v53  ;;  %v8314_v12 = vpop.eup %8313  ;;  %v5745_v62 = vadd.f32 %v12681_v3, %v5706_v21 }
 0xe9d   :  { %6017 = vperm.xlu0 %7734, %v8306_v22   ;;  %8325 = vpow2.f32 %v6658_v51 }
 0xe9e   :  { %8327 = vrcp.f32 %v5865_v9  ;;  %v5543_v9 = vpop.xlane.xlu1 %5542  ;;  %v6662_v15 = vmul.f32 -1.442695, %v5745_v62 }
 0xe9f   :  { %6206 = vperm.xlu1 %7733, %v6144_v32   ;;  %v5864_v32 = vadd.f32 1.0, %v8314_v12  ;;  %8329 = vpow2.f32 %v6657_v16  ;;  %v5712_v35 = vadd.f32 %v13684_v8, %v5543_v9  ;;  %v13686_v16 = vld [vmem:[#allocation100_spill] sm:$0xff] }
 0xea0   :  { %v8316_v22 = vpop.eup %8315 }
 0xea1   :  { %6007 = vperm.xlu0 %7734, %v8312_v53   ;;  %v8318_v29 = vpop.eup %8317  ;;  %v5522_v53 = vpop.xlane.xlu0 %5521  ;;  %8331 = vrcp.f32 %v5864_v32  ;;  %v6148_v61 = vsub.f32 1.0, %v8316_v22 }
 0xea2   :  { %v5871_v27 = vadd.f32 1.0, %v8318_v29  ;;  %8333 = vpow2.f32 %v6664_v24  ;;  %v5705_v49 = vadd.f32 %v13683_v42, %v5522_v53  ;;  %v5751_v29 = vadd.f32 %v12681_v3, %v5712_v35 }
 0xea3   :  { %6196 = vperm.xlu1 %7733, %v6142_v63  }
 0xea4   :  { %v8320_v26 = vpop.eup %8319  ;;  %8335 = vrcp.f32 %v5871_v27  ;;  %v5744_v12 = vadd.f32 %v12681_v3, %v5705_v49  ;;  %v6668_v53 = vmul.f32 -1.442695, %v5751_v29 }
 0xea5   :  { %6241 = vperm.xlu0 %7734, %v6151_v41   ;;  %v8322_v36 = vpop.eup %8321  ;;  %8337 = vpow2.f32 %v6655_v5  ;;  %v6155_v0 = vsub.f32 1.0, %v8320_v26  ;;  %v5516_v20 = vpop.xlane.xlu0 %5515 }
 0xea6   :  { %v5862_v63 = vadd.f32 1.0, %v8322_v36  ;;  %v5703_v28 = vadd.f32 %v13685_v46, %v5516_v20  ;;  %v6661_v36 = vmul.f32 -1.442695, %v5744_v12  ;;  %v13687_v20 = vld [vmem:[#allocation106_spill] sm:$0xff]  ;;  %v13688_v46 = vld [vmem:[#allocation77_spill] sm:$0xff] }
 0xea7   :  { %5987 = vperm.xlu1 %7733, %v8296_v4   ;;  %v8324_v4 = vpop.eup %8323 }
 0xea8   :  { %v8326_v1 = vpop.eup %8325  ;;  %8339 = vrcp.f32 %v5862_v63  ;;  %v6146_v38 = vsub.f32 1.0, %v8324_v4  ;;  %v5742_v24 = vadd.f32 %v12681_v3, %v5703_v28 }
 0xea9   :  { %6231 = vperm.xlu0 %7734, %v6149_v54   ;;  %v8328_v51 = vpop.eup %8327  ;;  %v5869_v41 = vadd.f32 1.0, %v8326_v1  ;;  %8341 = vpow2.f32 %v6662_v15  ;;  %v5537_v54 = vpop.xlane.xlu1 %5536 }
 0xeaa   :  { %v6153_v21 = vsub.f32 1.0, %v8328_v51  ;;  %v5710_v2 = vadd.f32 %v13686_v16, %v5537_v54  ;;  %v5534_v63 = vpop.xlane.xlu0 %5533  ;;  %v6659_v15 = vmul.f32 -1.442695, %v5742_v24 }
 0xeab   :  { %6002 = vperm.xlu1 %7733, %v8316_v22   ;;  %8343 = vrcp.f32 %v5869_v41  ;;  %v8330_v22 = vpop.eup %8329  ;;  %v5709_v8 = vadd.f32 %v13687_v20, %v5534_v63  ;;  %v13690_v20 = vld [vmem:[#allocation56_spill] sm:$0xff] }
 0xeac   :  { %v5749_v1 = vadd.f32 %v12681_v3, %v5710_v2  ;;  %8345 = vpow2.f32 %v6661_v36 }
 0xead   :  { %6037 = vperm.xlu0 %7734, %v8320_v26   ;;  %v8332_v26 = vpop.eup %8331  ;;  %v5748_v12 = vadd.f32 %v12681_v3, %v5709_v8 }
 0xeae   :  { %v8334_v32 = vpop.eup %8333  ;;  %v6666_v42 = vmul.f32 -1.442695, %v5749_v1  ;;  %v6152_v49 = vsub.f32 1.0, %v8332_v26 }
 0xeaf   :  { %5992 = vperm.xlu1 %7733, %v8324_v4   ;;  %v8336_v62 = vpop.eup %8335  ;;  %v5868_v4 = vadd.f32 1.0, %v8330_v22  ;;  %v6665_v2 = vmul.f32 -1.442695, %v5748_v12 }
 0xeb0   :  { %v8338_v27 = vpop.eup %8337  ;;  %v6159_v35 = vsub.f32 1.0, %v8336_v62 }
 0xeb1   :  { %6027 = vperm.xlu0 %7734, %v8328_v51   ;;  %v5875_v51 = vadd.f32 1.0, %v8334_v32  ;;  %8347 = vrcp.f32 %v5868_v4  ;;  %v5866_v41 = vadd.f32 1.0, %v8338_v27 }
 0xeb2   :  { %v8340_v5 = vpop.eup %8339  ;;  %8349 = vpow2.f32 %v6668_v53 }
 0xeb3   :  { %6226 = vperm.xlu1 %7733, %v6148_v61   ;;  %v8342_v9 = vpop.eup %8341  ;;  %8351 = vrcp.f32 %v5875_v51  ;;  %v6150_v54 = vsub.f32 1.0, %v8340_v5 }
 0xeb4   :  { %8353 = vpow2.f32 %v6659_v15  ;;  %v13689_v15 = vld [vmem:[#allocation90_spill] sm:$0xff] }
 0xeb5   :  { %6261 = vperm.xlu0 %7734, %v6155_v0   ;;  %v8344_v61 = vpop.eup %8343  ;;  %v5873_v0 = vadd.f32 1.0, %v8342_v9  ;;  %8355 = vrcp.f32 %v5866_v41 }
 0xeb6   :  { %8357 = vpow2.f32 %v6666_v42  ;;  %v8346_v22 = vpop.eup %8345 }
 0xeb7   :  { %6216 = vperm.xlu1 %7733, %v6146_v38   ;;  %v5528_v38 = vpop.xlane.xlu0 %5527  ;;  %8359 = vrcp.f32 %v5873_v0  ;;  %v5872_v36 = vadd.f32 1.0, %v8346_v22 }
 0xeb8   :  { %v5707_v28 = vadd.f32 %v13688_v46, %v5528_v38  ;;  %8361 = vpow2.f32 %v6665_v2 }
 0xeb9   :  { %6251 = vperm.xlu0 %7734, %v6153_v21   ;;  %v6157_v21 = vsub.f32 1.0, %v8344_v61  ;;  %8363 = vrcp.f32 %v5872_v36 }
 0xebb   :  { %6022 = vperm.xlu1 %7733, %v8332_v26   ;;  %v8348_v29 = vpop.eup %8347  ;;  %v5746_v26 = vadd.f32 %v12681_v3, %v5707_v28  ;;  %v5546_v27 = vpop.xlane.xlu0 %5545 }
 0xebc   :  { %v8350_v16 = vpop.eup %8349  ;;  %v6156_v63 = vsub.f32 1.0, %v8348_v29 }
 0xebd   :  { %6057 = vperm.xlu0 %7734, %v8336_v62   ;;  %v8352_v32 = vpop.eup %8351  ;;  %v5879_v4 = vadd.f32 1.0, %v8350_v16  ;;  %v6663_v1 = vmul.f32 -1.442695, %v5746_v26 }
 0xebe   :  { %v8354_v24 = vpop.eup %8353  ;;  %v6163_v41 = vsub.f32 1.0, %v8352_v32 }
 0xebf   :  { %6012 = vperm.xlu1 %7733, %v8340_v5   ;;  %v8356_v62 = vpop.eup %8355  ;;  %v5870_v51 = vadd.f32 1.0, %v8354_v24  ;;  %8365 = vrcp.f32 %v5879_v4  ;;  %v5540_v42 = vpop.xlane.xlu0 %5539 }
 0xec0   :  { %v8358_v53 = vpop.eup %8357  ;;  %8367 = vpow2.f32 %v6663_v1  ;;  %v5711_v8 = vadd.f32 %v13690_v20, %v5540_v42 }
 0xec1   :  { %6047 = vperm.xlu0 %7734, %v8344_v61   ;;  %v8360_v5 = vpop.eup %8359  ;;  %v5877_v9 = vadd.f32 1.0, %v8358_v53  ;;  %v5713_v61 = vadd.f32 %v13689_v15, %v5546_v27  ;;  %8369 = vrcp.f32 %v5870_v51 }
 0xec2   :  { %v8362_v38 = vpop.eup %8361  ;;  %v5750_v46 = vadd.f32 %v12681_v3, %v5711_v8 }
 0xec3   :  { %6246 = vperm.xlu1 %7733, %v6152_v49   ;;  %v6154_v49 = vsub.f32 1.0, %v8356_v62  ;;  %8371 = vrcp.f32 %v5877_v9  ;;  %v5752_v0 = vadd.f32 %v12681_v3, %v5713_v61 }
 0xec4   :  { %v6667_v16 = vmul.f32 -1.442695, %v5750_v46 }
 0xec5   :  { %6281 = vperm.xlu0 %7734, %v6159_v35   ;;  %v6161_v35 = vsub.f32 1.0, %v8360_v5  ;;  %v6669_v12 = vmul.f32 -1.442695, %v5752_v0 }
 0xec7   :  { %6236 = vperm.xlu1 %7733, %v6150_v54   ;;  %v8364_v54 = vpop.eup %8363  ;;  %8373 = vpow2.f32 %v6669_v12 }
 0xec9   :  { %6271 = vperm.xlu0 %7734, %v6157_v21   ;;  %v8366_v28 = vpop.eup %8365  ;;  %v5876_v21 = vadd.f32 1.0, %v8362_v38 }
 0xeca   :  { %v8368_v22 = vpop.eup %8367  ;;  %v6167_v24 = vsub.f32 1.0, %v8366_v28 }
 0xecb   :  { %6042 = vperm.xlu1 %7733, %v8348_v29   ;;  %v8370_v29 = vpop.eup %8369  ;;  %8375 = vrcp.f32 %v5876_v21  ;;  %v5874_v26 = vadd.f32 1.0, %v8368_v22  ;;  %v13693_v21 = vld [vmem:[#allocation46_spill] sm:$0xff] }
 0xecc   :  { %8377 = vpow2.f32 %v6667_v16  ;;  %v6158_v3 = vsub.f32 1.0, %v8370_v29 }
 0xecd   :  { %6077 = vperm.xlu0 %7734, %v8352_v32   ;;  %v8372_v2 = vpop.eup %8371  ;;  %v6160_v32 = vsub.f32 1.0, %v8364_v54  ;;  %8379 = vrcp.f32 %v5874_v26 }
 0xece   :  { %v6165_v36 = vsub.f32 1.0, %v8372_v2 }
 0xecf   :  { %6032 = vperm.xlu1 %7733, %v8356_v62  }
 0xed1   :  { %6067 = vperm.xlu0 %7734, %v8360_v5   ;;  %v8374_v62 = vpop.eup %8373 }
 0xed2   :  { %v5880_v27 = vadd.f32 1.0, %v8374_v62 }
 0xed3   :  { %6266 = vperm.xlu1 %7733, %v6156_v63  }
 0xed4   :  { %8381 = vrcp.f32 %v5880_v27 }
 0xed5   :  { %6301 = vperm.xlu0 %7734, %v6163_v41   ;;  %v8376_v4 = vpop.eup %8375  ;;  %v13691_v41 = vld [vmem:[#allocation71_spill] sm:$0xff] }
 0xed6   :  { %v8378_v53 = vpop.eup %8377  ;;  %v6164_v51 = vsub.f32 1.0, %v8376_v4 }
 0xed7   :  { %6256 = vperm.xlu1 %7733, %v6154_v49   ;;  %v8380_v1 = vpop.eup %8379  ;;  %v5878_v5 = vadd.f32 1.0, %v8378_v53  ;;  %v13692_v49 = vld [vmem:[#allocation120_spill] sm:$0xff] }
 0xed8   :  { %v6162_v63 = vsub.f32 1.0, %v8380_v1 }
 0xed9   :  { %6291 = vperm.xlu0 %7734, %v6161_v35   ;;  %8383 = vrcp.f32 %v5878_v5 }
 0xedb   :  { %6062 = vperm.xlu1 %7733, %v8364_v54  }
 0xedd   :  { %6097 = vperm.xlu0 %7734, %v8366_v28  }
 0xede   :  { %v8382_v9 = vpop.eup %8381 }
 0xedf   :  { %6052 = vperm.xlu1 %7733, %v8370_v29   ;;  %v6168_v29 = vsub.f32 1.0, %v8382_v9 }
 0xee1   :  { %6087 = vperm.xlu0 %7734, %v8372_v2  }
 0xee3   :  { %6286 = vperm.xlu1 %7733, %v6160_v32   ;;  %v8384_v20 = vpop.eup %8383  ;;  %v13694_v32 = vld [vmem:[#allocation127_spill] sm:$0xff] }
 0xee4   :  { %v6166_v54 = vsub.f32 1.0, %v8384_v20 }
 0xee5   :  { %6311 = vperm.xlu0 %7734, %v6165_v36  }
 0xee7   :  { %6276 = vperm.xlu1 %7733, %v6158_v3  }
 0xee9   :  { %6321 = vperm.xlu0 %7734, %v6167_v24  }
 0xeeb   :  { %6082 = vperm.xlu1 %7733, %v8376_v4  }
 0xeef   :  { %6072 = vperm.xlu1 %7733, %v8380_v1  }
 0xef3   :  { %6306 = vperm.xlu1 %7733, %v6164_v51   ;;  %v13696_v51 = vld [vmem:[#allocation128_spill] sm:$0xff] }
 0xef7   :  { %6296 = vperm.xlu1 %7733, %v6162_v63  }
 0xefa   :  { %v5958_v15 = vpop.permute.xlu1 %5957 }
 0xefb   :  { %6102 = vperm.xlu1 %7733, %v8382_v9   ;;  %v6107_v42 = vmul.f32 %v5958_v15, %v13691_v41  ;;  %v13697_v41 = vld [vmem:[#allocation123_spill] sm:$0xff] }
 0xefc   :  { %v6182_v61 = vpop.permute.xlu0 %6181 }
 0xefd   :  { %v6331_v0 = vmul.f32 %v6182_v61, %v13692_v49 }
 0xefe   :  { %v5948_v8 = vpop.permute.xlu1 %5947 }
 0xeff   :  { %v6363_v35 = vadd.f32 %v6331_v0, %v6107_v42  ;;  %6092 = vperm.xlu1 %7733, %v8384_v20   ;;  %v6105_v28 = vmul.f32 %v5948_v8, %v12444_v59  ;;  %v13695_v59 = vld [vmem:[#allocation124_spill] sm:$0xff]  ;;  %v13698_v8 = vld [vmem:[#allocation138_spill] sm:$0xff] }
 0xf00   :  { %v5953_v38 = vpop.permute.xlu0 %5952 }
 0xf01   :  { %6395 = vst.msk [vmem:[#allocation3 + $0x10] sm:$0xff] %vm267_vm0, %v6363_v35  ;;  %v6106_v4 = vmul.f32 %v5953_v38, %v12452_v11 }
 0xf02   :  { %v5963_v12 = vpop.permute.xlu1 %5962 }
 0xf03   :  { %6316 = vperm.xlu1 %7733, %v6166_v54   ;;  %v6108_v2 = vmul.f32 %v5963_v12, %v12436_v43 }
 0xf04   :  { %v6172_v46 = vpop.permute.xlu0 %6171 }
 0xf05   :  { %v6329_v22 = vmul.f32 %v6172_v46, %v13693_v21 }
 0xf06   :  { %v6187_v16 = vpop.permute.xlu1 %6186 }
 0xf07   :  { %v6361_v26 = vadd.f32 %v6329_v22, %v6105_v28  ;;  %v6332_v36 = vmul.f32 %v6187_v16, %v13694_v32  ;;  %6326 = vperm.xlu1 %7733, %v6168_v29   ;;  %v13699_v22 = vld [vmem:[#allocation135_spill] sm:$0xff] }
 0xf08   :  { %v6202_v3 = vpop.permute.xlu0 %6201 }
 0xf09   :  { %6393 = vst.msk [vmem:[#allocation3] sm:$0xff] %vm267_vm0, %v6361_v26  ;;  %v6364_v24 = vadd.f32 %v6332_v36, %v6108_v2  ;;  %v6335_v43 = vmul.f32 %v6202_v3, %v13696_v51  ;;  %v13700_v26 = vld [vmem:[#allocation136_spill] sm:$0xff] }
 0xf0a   :  { %v6177_v62 = vpop.permute.xlu1 %6176 }
 0xf0b   :  { %6396 = vst.msk [vmem:[#allocation3 + $0x18] sm:$0xff] %vm267_vm0, %v6364_v24  ;;  %v6330_v27 = vmul.f32 %v6177_v62, %v13695_v59  ;;  %v13701_v62 = vld [vmem:[#allocation139_spill] sm:$0xff] }
 0xf0c   :  { %v6192_v53 = vpop.permute.xlu0 %6191 }
 0xf0d   :  { %v6362_v1 = vadd.f32 %v6330_v27, %v6106_v4  ;;  %v6333_v42 = vmul.f32 %v6192_v53, %v13697_v41  ;;  %v13702_v27 = vld [vmem:[#allocation133_spill] sm:$0xff] }
 0xf0e   :  { %v5978_v5 = vpop.permute.xlu1 %5977 }
 0xf0f   :  { %6394 = vst.msk [vmem:[#allocation3 + $0x8] sm:$0xff] %vm267_vm0, %v6362_v1  ;;  %v6111_v63 = vmul.f32 %v5978_v5, %v12462_v23 }
 0xf10   :  { %v5998_v9 = vpop.permute.xlu0 %5997 }
 0xf11   :  { %v6367_v15 = vadd.f32 %v6335_v43, %v6111_v63  ;;  %v6115_v0 = vmul.f32 %v5998_v9, %v12492_v14  ;;  %v13703_v43 = vld [vmem:[#allocation137_spill] sm:$0xff] }
 0xf12   :  { %v5968_v61 = vpop.permute.xlu1 %5967 }
 0xf13   :  { %6399 = vst.msk [vmem:[#allocation3 + $0x30] sm:$0xff] %vm267_vm0, %v6367_v15  ;;  %v6109_v11 = vmul.f32 %v5968_v61, %v12475_v10 }
 0xf14   :  { %v6222_v49 = vpop.permute.xlu0 %6221 }
 0xf15   :  { %v6365_v20 = vadd.f32 %v6333_v42, %v6109_v11  ;;  %v6339_v35 = vmul.f32 %v6222_v49, %v13698_v8  ;;  %v13704_v11 = vld [vmem:[#allocation51_spill] sm:$0xff]  ;;  %v13705_v8 = vld [vmem:[#allocation141_spill] sm:$0xff] }
 0xf16   :  { %v5983_v38 = vpop.permute.xlu1 %5982 }
 0xf17   :  { %6397 = vst.msk [vmem:[#allocation3 + $0x20] sm:$0xff] %vm267_vm0, %v6365_v20  ;;  %v6371_v54 = vadd.f32 %v6339_v35, %v6115_v0  ;;  %v6112_v21 = vmul.f32 %v5983_v38, %v12466_v55 }
 0xf18   :  { %v6212_v23 = vpop.permute.xlu0 %6211 }
 0xf19   :  { %6403 = vst.msk [vmem:[#allocation3 + $0x50] sm:$0xff] %vm267_vm0, %v6371_v54  ;;  %v6337_v55 = vmul.f32 %v6212_v23, %v13702_v27 }
 0xf1a   :  { %v5973_v12 = vpop.permute.xlu1 %5972 }
 0xf1b   :  { %v6110_v2 = vmul.f32 %v5973_v12, %v12484_v6  ;;  %v13706_v12 = vld [vmem:[#allocation134_spill] sm:$0xff] }
 0xf1c   :  { %v6018_v46 = vpop.permute.xlu0 %6017 }
 0xf1d   :  { %v6119_v3 = vmul.f32 %v6018_v46, %v12524_v37 }
 0xf1e   :  { %v6207_v28 = vpop.permute.xlu1 %6206 }
 0xf1f   :  { %v6336_v10 = vmul.f32 %v6207_v28, %v13699_v22  ;;  %v13707_v22 = vld [vmem:[#allocation52_spill] sm:$0xff] }
 0xf20   :  { %v6008_v29 = vpop.permute.xlu0 %6007 }
 0xf21   :  { %v6368_v16 = vadd.f32 %v6336_v10, %v6112_v21  ;;  %v6117_v6 = vmul.f32 %v6008_v29, %v12542_v45 }
 0xf22   :  { %v6197_v14 = vpop.permute.xlu1 %6196 }
 0xf23   :  { %6400 = vst.msk [vmem:[#allocation3 + $0x38] sm:$0xff] %vm267_vm0, %v6368_v16  ;;  %v6334_v32 = vmul.f32 %v6197_v14, %v13700_v26 }
 0xf24   :  { %v6242_v36 = vpop.permute.xlu0 %6241 }
 0xf25   :  { %v6366_v24 = vadd.f32 %v6334_v32, %v6110_v2  ;;  %v6343_v4 = vmul.f32 %v6242_v36, %v13701_v62  ;;  %v13708_v32 = vld [vmem:[#allocation78_spill] sm:$0xff]  ;;  %v13709_v62 = vld [vmem:[#allocation67_spill] sm:$0xff] }
 0xf26   :  { %v5988_v59 = vpop.permute.xlu1 %5987 }
 0xf27   :  { %6398 = vst.msk [vmem:[#allocation3 + $0x28] sm:$0xff] %vm267_vm0, %v6366_v24  ;;  %v6375_v53 = vadd.f32 %v6343_v4, %v6119_v3  ;;  %v6113_v1 = vmul.f32 %v5988_v59, %v12506_v48 }
 0xf28   :  { %v6232_v5 = vpop.permute.xlu0 %6231 }
 0xf29   :  { %6407 = vst.msk [vmem:[#allocation3 + $0x70] sm:$0xff] %vm267_vm0, %v6375_v53  ;;  %v6369_v51 = vadd.f32 %v6337_v55, %v6113_v1  ;;  %v6341_v63 = vmul.f32 %v6232_v5, %v13703_v43  ;;  %v13710_v53 = vld [vmem:[#allocation140_spill] sm:$0xff] }
 0xf2a   :  { %v6003_v37 = vpop.permute.xlu1 %6002 }
 0xf2b   :  { %6401 = vst.msk [vmem:[#allocation3 + $0x40] sm:$0xff] %vm267_vm0, %v6369_v51  ;;  %v6373_v9 = vadd.f32 %v6341_v63, %v6117_v6  ;;  %v6116_v48 = vmul.f32 %v6003_v37, %v12502_v31  ;;  %v13711_v51 = vld [vmem:[#allocation55_spill] sm:$0xff] }
 0xf2c   :  { %v6038_v15 = vpop.permute.xlu0 %6037 }
 0xf2d   :  { %6405 = vst.msk [vmem:[#allocation3 + $0x60] sm:$0xff] %vm267_vm0, %v6373_v9  ;;  %v6123_v0 = vmul.f32 %v6038_v15, %v12555_v47 }
 0xf2e   :  { %v5993_v61 = vpop.permute.xlu1 %5992 }
 0xf2f   :  { %v6114_v54 = vmul.f32 %v5993_v61, %v12515_v19 }
 0xf30   :  { %v6028_v41 = vpop.permute.xlu0 %6027 }
 0xf31   :  { %v6121_v21 = vmul.f32 %v6028_v41, %v12572_v52  ;;  %v13712_v41 = vld [vmem:[#allocation54_spill] sm:$0xff] }
 0xf32   :  { %v6227_v42 = vpop.permute.xlu1 %6226 }
 0xf33   :  { %v6340_v49 = vmul.f32 %v6227_v42, %v13704_v11 }
 0xf34   :  { %v6262_v45 = vpop.permute.xlu0 %6261 }
 0xf35   :  { %v6372_v20 = vadd.f32 %v6340_v49, %v6116_v48  ;;  %v6347_v35 = vmul.f32 %v6262_v45, %v13705_v8  ;;  %v13713_v49 = vld [vmem:[#allocation73_spill] sm:$0xff] }
 0xf36   :  { %v6217_v38 = vpop.permute.xlu1 %6216 }
 0xf37   :  { %6404 = vst.msk [vmem:[#allocation3 + $0x58] sm:$0xff] %vm267_vm0, %v6372_v20  ;;  %v6379_v23 = vadd.f32 %v6347_v35, %v6123_v0  ;;  %v6338_v46 = vmul.f32 %v6217_v38, %v13706_v12  ;;  %v13714_v35 = vld [vmem:[#allocation142_spill] sm:$0xff]  ;;  %v13715_v12 = vld [vmem:[#allocation72_spill] sm:$0xff] }
 0xf38   :  { %v6252_v28 = vpop.permute.xlu0 %6251 }
 0xf39   :  { %6411 = vst.msk [vmem:[#allocation3 + $0x90] sm:$0xff] %vm267_vm0, %v6379_v23  ;;  %v6370_v31 = vadd.f32 %v6338_v46, %v6114_v54  ;;  %v6345_v10 = vmul.f32 %v6252_v28, %v13707_v22 }
 0xf3a   :  { %v6023_v47 = vpop.permute.xlu1 %6022 }
 0xf3b   :  { %6402 = vst.msk [vmem:[#allocation3 + $0x48] sm:$0xff] %vm267_vm0, %v6370_v31  ;;  %v6377_v29 = vadd.f32 %v6345_v10, %v6121_v21  ;;  %v6120_v26 = vmul.f32 %v6023_v47, %v12532_v58  ;;  %v13716_v47 = vld [vmem:[#allocation84_spill] sm:$0xff] }
 0xf3c   :  { %v6058_v16 = vpop.permute.xlu0 %6057 }
 0xf3d   :  { %6409 = vst.msk [vmem:[#allocation3 + $0x80] sm:$0xff] %vm267_vm0, %v6377_v29  ;;  %v6127_v3 = vmul.f32 %v6058_v16, %v12586_v50 }
 0xf3e   :  { %v6013_v19 = vpop.permute.xlu1 %6012 }
 0xf3f   :  { %v6118_v27 = vmul.f32 %v6013_v19, %v12546_v60 }
 0xf40   :  { %v6048_v14 = vpop.permute.xlu0 %6047 }
 0xf41   :  { %v6125_v6 = vmul.f32 %v6048_v14, %v12604_v34  ;;  %v13717_v14 = vld [vmem:[#allocation60_spill] sm:$0xff] }
 0xf42   :  { %v6247_v2 = vpop.permute.xlu1 %6246 }
 0xf43   :  { %v6344_v36 = vmul.f32 %v6247_v2, %v13708_v32 }
 0xf44   :  { %v6282_v52 = vpop.permute.xlu0 %6281 }
 0xf45   :  { %v6376_v24 = vadd.f32 %v6344_v36, %v6120_v26  ;;  %v6351_v4 = vmul.f32 %v6282_v52, %v13709_v62  ;;  %v13718_v52 = vld [vmem:[#allocation76_spill] sm:$0xff] }
 0xf46   :  { %v6237_v59 = vpop.permute.xlu1 %6236 }
 0xf47   :  { %6408 = vst.msk [vmem:[#allocation3 + $0x78] sm:$0xff] %vm267_vm0, %v6376_v24  ;;  %v6383_v55 = vadd.f32 %v6351_v4, %v6127_v3  ;;  %v6342_v1 = vmul.f32 %v6237_v59, %v13710_v53  ;;  %v13719_v4 = vld [vmem:[#allocation80_spill] sm:$0xff] }
 0xf48   :  { %v6272_v5 = vpop.permute.xlu0 %6271 }
 0xf49   :  { %6415 = vst.msk [vmem:[#allocation3 + $0xb0] sm:$0xff] %vm267_vm0, %v6383_v55  ;;  %v6374_v58 = vadd.f32 %v6342_v1, %v6118_v27  ;;  %v6349_v43 = vmul.f32 %v6272_v5, %v13711_v51  ;;  %v13720_v1 = vld [vmem:[#allocation91_spill] sm:$0xff] }
 0xf4a   :  { %v6043_v50 = vpop.permute.xlu1 %6042  ;;  %v13721_v51 = vld [vmem:[#allocation59_spill] sm:$0xff] }
 0xf4b   :  { %6406 = vst.msk [vmem:[#allocation3 + $0x68] sm:$0xff] %vm267_vm0, %v6374_v58  ;;  %v6381_v63 = vadd.f32 %v6349_v43, %v6125_v6  ;;  %v6124_v61 = vmul.f32 %v6043_v50, %v12564_v18 }
 0xf4c   :  { %v6078_v37 = vpop.permute.xlu0 %6077 }
 0xf4d   :  { %6413 = vst.msk [vmem:[#allocation3 + $0xa0] sm:$0xff] %vm267_vm0, %v6381_v63  ;;  %v6131_v48 = vmul.f32 %v6078_v37, %v12622_v44 }
 0xf4e   :  { %v6033_v60 = vpop.permute.xlu1 %6032 }
 0xf4f   :  { %v6122_v20 = vmul.f32 %v6033_v60, %v12582_v40 }
 0xf50   :  { %v6068_v9 = vpop.permute.xlu0 %6067 }
 0xf51   :  { %v6129_v23 = vmul.f32 %v6068_v9, %v12635_v39 }
 0xf52   :  { %v6267_v15 = vpop.permute.xlu1 %6266 }
 0xf53   :  { %v6348_v42 = vmul.f32 %v6267_v15, %v13712_v41  ;;  %v13722_v15 = vld [vmem:[#allocation81_spill] sm:$0xff] }
 0xf54   :  { %v6302_v34 = vpop.permute.xlu0 %6301 }
 0xf55   :  { %v6380_v11 = vadd.f32 %v6348_v42, %v6124_v61  ;;  %v6355_v45 = vmul.f32 %v6302_v34, %v13713_v49  ;;  %v13723_v42 = vld [vmem:[#allocation61_spill] sm:$0xff] }
 0xf56   :  { %v6257_v0 = vpop.permute.xlu1 %6256 }
 0xf57   :  { %6412 = vst.msk [vmem:[#allocation3 + $0x98] sm:$0xff] %vm267_vm0, %v6380_v11  ;;  %v6387_v8 = vadd.f32 %v6355_v45, %v6131_v48  ;;  %v6346_v38 = vmul.f32 %v6257_v0, %v13714_v35 }
 0xf58   :  { %v6292_v54 = vpop.permute.xlu0 %6291 }
 0xf59   :  { %6419 = vst.msk [vmem:[#allocation3 + $0xd0] sm:$0xff] %vm267_vm0, %v6387_v8  ;;  %v6378_v18 = vadd.f32 %v6346_v38, %v6122_v20  ;;  %v6353_v46 = vmul.f32 %v6292_v54, %v13715_v12 }
 0xf5a   :  { %v6063_v44 = vpop.permute.xlu1 %6062 }
 0xf5b   :  { %6410 = vst.msk [vmem:[#allocation3 + $0x88] sm:$0xff] %vm267_vm0, %v6378_v18  ;;  %v6385_v28 = vadd.f32 %v6353_v46, %v6129_v23  ;;  %v6128_v10 = vmul.f32 %v6063_v44, %v12595_v33 }
 0xf5c   :  { %v6098_v21 = vpop.permute.xlu0 %6097 }
 0xf5d   :  { %6417 = vst.msk [vmem:[#allocation3 + $0xc0] sm:$0xff] %vm267_vm0, %v6385_v28  ;;  %v6135_v62 = vmul.f32 %v6098_v21, %v12652_v30 }
 0xf5e   :  { %v6053_v40 = vpop.permute.xlu1 %6052 }
 0xf5f   :  { %v6126_v32 = vmul.f32 %v6053_v40, %v12612_v57 }
 0xf60   :  { %v6088_v31 = vpop.permute.xlu0 %6087 }
 0xf61   :  { %v6133_v16 = vmul.f32 %v6088_v31, %v12666_v25 }
 0xf62   :  { %v6287_v22 = vpop.permute.xlu1 %6286 }
 0xf63   :  { %v6352_v29 = vmul.f32 %v6287_v22, %v13716_v47 }
 0xf64   :  { %v6312_v39 = vpop.permute.xlu0 %6311 }
 0xf65   :  { %v6384_v19 = vadd.f32 %v6352_v29, %v6128_v10  ;;  %v6357_v2 = vmul.f32 %v6312_v39, %v13717_v14 }
 0xf66   :  { %v6277_v26 = vpop.permute.xlu1 %6276 }
 0xf67   :  { %6416 = vst.msk [vmem:[#allocation3 + $0xb8] sm:$0xff] %vm267_vm0, %v6384_v19  ;;  %v6389_v36 = vadd.f32 %v6357_v2, %v6133_v16  ;;  %v6350_v3 = vmul.f32 %v6277_v26, %v13718_v52 }
 0xf68   :  { %v6322_v24 = vpop.permute.xlu0 %6321 }
 0xf69   :  { %6421 = vst.msk [vmem:[#allocation3 + $0xe0] sm:$0xff] %vm267_vm0, %v6389_v36  ;;  %v6382_v33 = vadd.f32 %v6350_v3, %v6126_v32  ;;  %v6359_v59 = vmul.f32 %v6322_v24, %v13719_v4 }
 0xf6a   :  { %v6083_v25 = vpop.permute.xlu1 %6082 }
 0xf6b   :  { %6414 = vst.msk [vmem:[#allocation3 + $0xa8] sm:$0xff] %vm267_vm0, %v6382_v33  ;;  %v6391_v27 = vadd.f32 %v6359_v59, %v6135_v62  ;;  %v6132_v53 = vmul.f32 %v6083_v25, %v12626_v56 }
 0xf6d   :  { %6423 = vst.msk [vmem:[#allocation3 + $0xf0] sm:$0xff] %vm267_vm0, %v6391_v27 }
 0xf6e   :  { %v6073_v57 = vpop.permute.xlu1 %6072 }
 0xf6f   :  { %v6130_v30 = vmul.f32 %v6073_v57, %v12644_v7 }
 0xf72   :  { %v6307_v55 = vpop.permute.xlu1 %6306 }
 0xf73   :  { %v6356_v5 = vmul.f32 %v6307_v55, %v13720_v1 }
 0xf75   :  { %v6388_v6 = vadd.f32 %v6356_v5, %v6132_v53 }
 0xf76   :  { %v6297_v58 = vpop.permute.xlu1 %6296 }
 0xf77   :  { %6420 = vst.msk [vmem:[#allocation3 + $0xd8] sm:$0xff] %vm267_vm0, %v6388_v6  ;;  %v6354_v43 = vmul.f32 %v6297_v58, %v13721_v51 }
 0xf79   :  { %v6386_v50 = vadd.f32 %v6354_v43, %v6130_v30 }
 0xf7a   :  { %v6103_v63 = vpop.permute.xlu1 %6102 }
 0xf7b   :  { %6418 = vst.msk [vmem:[#allocation3 + $0xc8] sm:$0xff] %vm267_vm0, %v6386_v50  ;;  %v6136_v7 = vmul.f32 %v6103_v63, %v12662_v17 }
 0xf7e   :  { %v6093_v37 = vpop.permute.xlu1 %6092 }
 0xf7f   :  { %v6134_v9 = vmul.f32 %v6093_v37, %v12674_v13 }
 0xf82   :  { %v6317_v60 = vpop.permute.xlu1 %6316 }
 0xf83   :  { %v6358_v56 = vmul.f32 %v6317_v60, %v13722_v15 }
 0xf85   :  { %v6390_v61 = vadd.f32 %v6358_v56, %v6134_v9 }
 0xf86   :  { %v6327_v41 = vpop.permute.xlu1 %6326 }
 0xf87   :  { %6422 = vst.msk [vmem:[#allocation3 + $0xe8] sm:$0xff] %vm267_vm0, %v6390_v61  ;;  %v6360_v34 = vmul.f32 %v6327_v41, %v13723_v42 }
 0xf89   :  { %v6392_v48 = vadd.f32 %v6360_v34, %v6136_v7 }
 0xf8b   :  { %6424 = vst.msk [vmem:[#allocation3 + $0xf8] sm:$0xff] %vm267_vm0, %v6392_v48 }
 0xf8c   :  { %8406 = shalt.err (!%p8403_p4)
}
 0xf8d   :  { %s8407_s5 = scalar_lea.hbm %s12877_s22, 4096 }
 0xf8e   :  { %p8408_p5 = scmp.ne.s32.totalorder %s12877_s22, %s8407_s5  ;;  %p8411_p6 = scmp.lt.u32.totalorder %s8407_s5, %s12877_s22 }
 0xf90   :  { %p8413_p7 = pnand %p8411_p6, %p8408_p5 }
 0xf92   :  { %8416 = shalt.err (!%p8413_p7)
}
 0xf93   :  { %s8426_s1 = smov 128   ;;  %s8427_s26 = smov 8  }
 0xf94   :  { %6436 = dma.vmem_to_hbm [thread:$0]  %s6431_s19, 4096, %s12877_s22, [#allocation4], %s8426_s1, %s8426_s1, %s8427_s26  }
 0xf95   :  { %8417 = dma.done.wait [#allocation4], 4096  }
 0xf96   :  { %8418 = vsyncadd [#allocation4], 4294963200 }
 0xf97   :  { %6440 = vsyncpa [#allocation4], 1 }

</bundles_post_ra>
